<compile_context>
chip_gen: v6e
topology: v6e:2x2x1
jax: 0.10.0
libtpu: 0.0.40
codegen_flags: <defaults>
</compile_context>

<pallas_src>
import functools
import math

import numpy as np
import jax
import jax.numpy as jnp
from jax.experimental import pallas as pl
from jax.experimental.pallas import tpu as pltpu

KT, KH, KW = 3, 5, 5                 # Conv3d kernel; stride (1, 2, 2) everywhere
SPATIAL_PADS = [1, 2, 2, 2, 2, 2]    # conv1: padding=1 -> (1,1,1); conv2-6: (1,2,2)
LANE = 128


def _round_up(x, m):
    return (x + m - 1) // m * m


# ---------------------------------------------------------------------------
# Fused Pallas kernel: all 6 conv layers + bias + LeakyReLU / sigmoid.
# One grid step per batch element; activations stay in VMEM throughout.
# ---------------------------------------------------------------------------
def _fused_disc_kernel(cfg, use_sigmoid, *refs):
    n_layers = len(cfg)
    n_params = sum(2 if c["center"] else 3 for c in cfg)
    x_ref = refs[0]
    param_refs = refs[1:1 + n_params]
    o_ref = refs[1 + n_params]
    act_ref, ph_ref, col_ref = refs[2 + n_params:]

    T = cfg[0]["T"]
    pi = 0
    for l, c in enumerate(cfg):
        H_in, H_out, Hs = c["H_in"], c["H_out"], c["Hs"]
        WCI, WCO = c["WCI"], c["WCO"]
        last = (l == n_layers - 1)

        if c["center"]:
            # H_in == W_in == 1: only the spatial centre tap touches the input,
            # so the layer collapses to a tiny temporal conv -> one dense bf16
            # matmul; no ph/col machinery, no 15x K inflation (review item 11).
            w_ref, b_ref = param_refs[pi], param_refs[pi + 1]
            pi += 2
            zrow = jnp.zeros((1, act_ref.shape[1]), jnp.bfloat16)
            act_ref[0:1, :] = zrow                    # temporal zero padding
            act_ref[1 + T:2 + T, :] = zrow
            prv = act_ref[0:T, :WCI]                  # frame t-1
            cur = act_ref[1:1 + T, :WCI]              # frame t
            nxt = act_ref[2:2 + T, :WCI]              # frame t+1
            lhs = jnp.concatenate([prv, cur, nxt], axis=1)          # (T, 3*WCI)
            acc = jnp.dot(lhs, w_ref[...], preferred_element_type=jnp.float32)
        else:
            r_ref, w_ref, b_ref = (param_refs[pi], param_refs[pi + 1],
                                   param_refs[pi + 2])
            pi += 3

            # ---- layer input: bf16 (T*H_in, WCI), channels-last rows.
            if l == 0:
                act = x_ref[...].reshape(T * H_in, WCI)
            else:
                act = act_ref[1:1 + T * H_in, :WCI]

            # ---- zero padding (T & H) + stride-2 phase split along H for ALL
            #      frames with ONE bf16 selection matmul (exact 0/1 weights):
            #      replaces the T small f32 matmuls flagged in the review.
            phall = jnp.dot(r_ref[...], act,
                            preferred_element_type=jnp.float32).astype(jnp.bfloat16)
            zplane = jnp.zeros((2 * Hs, WCI), jnp.bfloat16)
            ph_ref[0, :2 * Hs, :WCI] = zplane                        # temporal pad
            ph_ref[T + 1, :2 * Hs, :WCI] = zplane
            for t in range(T):
                ph_ref[1 + t, :2 * Hs, :WCI] = phall[t * 2 * Hs:(t + 1) * 2 * Hs, :]

            # ---- im2col over the (dt, dh) taps: 15 contiguous, 128-lane-
            #      aligned, lane-dense bf16 block copies.  The stride-2 W axis
            #      is folded into the Toeplitz-expanded weight.
            for dt in range(KT):
                for dh in range(KH):
                    m = dt * KH + dh
                    r0 = (dh % 2) * Hs + dh // 2
                    col_ref[:, :H_out, m * WCI:(m + 1) * WCI] = (
                        ph_ref[dt:dt + T, r0:r0 + H_out, :WCI])

            # ---- one big-K bf16 matmul for the whole layer (frames batched
            #      into M), f32 accumulation.
            lhs = col_ref[:, :H_out, :KT * KH * WCI].reshape(
                T * H_out, KT * KH * WCI)
            acc = jnp.dot(lhs, w_ref[...], preferred_element_type=jnp.float32)

        acc = acc + b_ref[...]                                       # (M, WCO)

        if not last:
            acc = jnp.maximum(acc, 0.2 * acc)                        # LeakyReLU(0.2)
            # Park the layer output in VMEM (bf16) so vreg live ranges stay flat.
            act_ref[1:1 + T * H_out, :WCO] = acc.astype(jnp.bfloat16)
        else:
            if use_sigmoid:
                acc = jax.nn.sigmoid(acc)
            for t in range(T):
                o_ref[0, t] = acc[t * H_out:(t + 1) * H_out, :]


# ---------------------------------------------------------------------------
# Host-side parameter preparation.
# ---------------------------------------------------------------------------
def _spectral_normalize(w_oikhw, key):
    # TODO(synk): PyTorch SN keeps a persistent `u` and does 1 power iteration
    # per forward; here we run 20 iterations from a fixed random start instead.
    wm = w_oikhw.reshape(w_oikhw.shape[0], -1)
    u = jax.random.normal(key, (wm.shape[0],), jnp.float32)
    u = u / (jnp.linalg.norm(u) + 1e-12)
    v = jnp.ones((wm.shape[1],), jnp.float32)
    for _ in range(20):
        v = wm.T @ u
        v = v / (jnp.linalg.norm(v) + 1e-12)
        u = wm @ v
        u = u / (jnp.linalg.norm(u) + 1e-12)
    sigma = u @ (wm @ v)
    return w_oikhw / sigma


def _init_conv_params(key, c_in, c_out, apply_sn):
    k_w, k_b, k_u = jax.random.split(key, 3)
    fan_in = c_in * KT * KH * KW
    bound = 1.0 / math.sqrt(fan_in)
    w = jax.random.uniform(k_w, (c_out, c_in, KT, KH, KW), jnp.float32,
                           -bound, bound)
    b = jax.random.uniform(k_b, (c_out,), jnp.float32, -bound, bound)
    if apply_sn:
        w = _spectral_normalize(w, k_u)
    # kernel layout (kt, kh, kw, C_in, C_out)
    return jnp.transpose(w, (2, 3, 4, 1, 0)), b


def _build_phase_select(T, h_in, h_out, pad, hs):
    """Block-diagonal 0/1 matrix: phall = R_big @ act does zero-padding and the
    stride-2 phase split along H for all T frames in one bf16 matmul.
    Per frame, row p*hs + q selects input row 2*q + p - pad (zero if OOB)."""
    r = np.zeros((2 * hs, h_in), np.float32)
    for p in range(2):
        for q in range(hs):
            h = 2 * q + p - pad
            if 0 <= h < h_in:
                r[p * hs + q, h] = 1.0
    rbig = np.kron(np.eye(T, dtype=np.float32), r)      # (T*2*hs, T*h_in)
    return jnp.asarray(rbig, dtype=jnp.bfloat16)         # 0/1 exact in bf16


def _build_toeplitz_weight(w, w_in, w_out, pad, wci, wco):
    """Fold the stride-2 / zero-padded W axis into the weight and pad both the
    per-tap K block (-> wci, 128-multiple) and the output N (-> wco) with
    zeros so the kernel's tap copies and stores are lane-aligned & dense."""
    kt, kh, kw, c_in, c_out = w.shape
    sel = np.zeros((w_in, kw, w_out), np.float32)
    for wi in range(w_in):
        for wo in range(w_out):
            dw = wi + pad - 2 * wo
            if 0 <= dw < kw:
                sel[wi, dw, wo] = 1.0
    wexp = jnp.einsum("tudio,wdz->tuwizo", w, jnp.asarray(sel))
    wexp = wexp.reshape(kt, kh, w_in * c_in, w_out * c_out)
    wexp = jnp.pad(wexp, ((0, 0), (0, 0),
                          (0, wci - w_in * c_in), (0, wco - w_out * c_out)))
    return wexp.reshape(kt * kh * wci, wco).astype(jnp.bfloat16)


def _build_center_weight(w, c_in, c_out, pad, wci, wco):
    """For 1x1 spatial inputs only the centre spatial tap (dh=dw=pad) touches
    the input; the layer is a dense temporal matmul with this weight."""
    kt = w.shape[0]
    wc = jnp.zeros((kt, wci, wco), jnp.float32)
    wc = wc.at[:, :c_in, :c_out].set(w[:, pad, pad, :, :])
    return wc.reshape(kt * wci, wco).astype(jnp.bfloat16)


def build_discriminator_params(key, nc_in, nf, T, H, W):
    channels = [(nc_in, nf), (nf, 2 * nf), (2 * nf, 4 * nf),
                (4 * nf, 4 * nf), (4 * nf, 4 * nf), (4 * nf, 4 * nf)]
    keys = jax.random.split(key, len(channels))

    cfg, flat_params, raw_params = [], [], []
    h_in, w_in = H, W
    for l, ((c_in, c_out), pad) in enumerate(zip(channels, SPATIAL_PADS)):
        w, b = _init_conv_params(keys[l], c_in, c_out, apply_sn=(l < 5))
        raw_params.append((w, b))
        h_out = (h_in + 2 * pad - KH) // 2 + 1
        w_out = (w_in + 2 * pad - KW) // 2 + 1
        center = (h_in == 1 and w_in == 1 and pad == 2)
        hh = h_out + 2                       # phase rows actually read by taps
        hs = _round_up(hh, 4)                # 2*hs is a sublane (8) multiple
        wci = _round_up(w_in * c_in, LANE)   # lane-aligned per-tap K stride
        wco = _round_up(w_out * c_out, LANE)
        cfg.append(dict(T=T, H_in=h_in, W_in=w_in, C_in=c_in,
                        H_out=h_out, W_out=w_out, C_out=c_out,
                        Hs=hs, WCI=wci, WCO=wco, pad=pad, center=center))
        bias = jnp.zeros((1, wco), jnp.float32)
        bias = bias.at[0, :w_out * c_out].set(jnp.tile(b, (w_out,)))
        if center:
            flat_params += [_build_center_weight(w, c_in, c_out, pad, wci, wco),
                            bias]
        else:
            flat_params += [_build_phase_select(T, h_in, h_out, pad, hs),
                            _build_toeplitz_weight(w, w_in, w_out, pad, wci, wco),
                            bias]
        h_in, w_in = h_out, w_out

    assert not cfg[0]["center"], "first layer must take its input from x"
    return cfg, flat_params, raw_params


# ---------------------------------------------------------------------------
# Full discriminator forward (single fused pallas_call).
# ---------------------------------------------------------------------------
def sn_tpatchgan_disc_forward(xs, cfg, flat_params, use_sigmoid=True, mode=True):
    """xs: (B, T, C, H, W) if mode else (B, C, T, H, W). Returns (B, T, C', H', W')."""
    if not mode:
        xs = jnp.transpose(xs, (0, 2, 1, 3, 4))
    B, T, C, H, W = xs.shape
    c0, cL = cfg[0], cfg[-1]
    assert (T, H, W, C) == (c0["T"], c0["H_in"], c0["W_in"], c0["C_in"])
    HL, WL, CL = cL["H_out"], cL["W_out"], cL["C_out"]
    WCI0, WCOL = c0["WCI"], cL["WCO"]

    # channels-last, each frame flattened to (H, W*C) rows; bf16 + zero lane
    # padding up to a 128 multiple (halves the layer-0 HBM->VMEM DMA vs f32).
    x = jnp.transpose(xs, (0, 1, 3, 4, 2)).reshape(B, T, H, W * C)
    x = jnp.pad(x, ((0, 0), (0, 0), (0, 0), (0, WCI0 - W * C)))
    x = x.astype(jnp.bfloat16)

    in_specs = [pl.BlockSpec((1, T, H, WCI0), lambda b: (b, 0, 0, 0))]
    for p in flat_params:
        in_specs.append(pl.BlockSpec(p.shape, lambda b, _nd=p.ndim: (0,) * _nd))
    out_specs = pl.BlockSpec((1, T, HL, WCOL), lambda b: (b, 0, 0, 0))

    # Three max-size scratch buffers reused by every layer (peak = max layer,
    # not sum of layers).
    gen = [c for c in cfg if not c["center"]]
    hs_max = max(c["Hs"] for c in gen)
    hout_max = _round_up(max(c["H_out"] for c in gen), 8)
    wci_max = max(c["WCI"] for c in gen)
    act_rows = _round_up(max(T * c["H_out"] for c in cfg[:-1]) + 2, 8)
    act_lanes = max(c["WCO"] for c in cfg[:-1])
    scratch_shapes = [
        pltpu.VMEM((act_rows, act_lanes), jnp.bfloat16),            # activations
        pltpu.VMEM((T + 2, 2 * hs_max, wci_max), jnp.bfloat16),     # padded frames
        pltpu.VMEM((T, hout_max, KT * KH * wci_max), jnp.bfloat16), # im2col patches
    ]

    # NOTE: grid=(B,) "parallel" -> megacore/v7x splits batches across cores
    # when B >= 2 (B=2 in the test below keeps both TensorCores busy).
    out = pl.pallas_call(
        functools.partial(_fused_disc_kernel, tuple(cfg), use_sigmoid),
        out_shape=jax.ShapeDtypeStruct((B, T, HL, WCOL), jnp.float32),
        grid_spec=pltpu.PrefetchScalarGridSpec(
            num_scalar_prefetch=0,
            grid=(B,),
            in_specs=in_specs,
            out_specs=out_specs,
            scratch_shapes=scratch_shapes),
        compiler_params=pltpu.CompilerParams(
            dimension_semantics=("parallel",),
            vmem_limit_bytes=32 * 1024 * 1024),
    )(x, *flat_params)

    out = out[..., :WL * CL].reshape(B, T, HL, WL, CL)
    return jnp.transpose(out, (0, 1, 4, 2, 3))          # (B, T, C', H', W')


# ---------------------------------------------------------------------------
# Pure-JAX reference (f32) for a numerical cross-check.
# ---------------------------------------------------------------------------
def _reference_forward(xs, raw_params, use_sigmoid=True, mode=True):
    x = jnp.transpose(xs, (0, 2, 1, 3, 4)) if mode else xs   # (B, C, T, H, W)
    n = len(raw_params)
    for l, (w, b) in enumerate(raw_params):
        wt = jnp.transpose(w, (4, 3, 0, 1, 2))                # (Cout,Cin,kt,kh,kw)
        p = SPATIAL_PADS[l]
        x = jax.lax.conv_general_dilated(
            x, wt, window_strides=(1, 2, 2),
            padding=[(1, 1), (p, p), (p, p)],
            dimension_numbers=("NCDHW", "OIDHW", "NCDHW"))
        x = x + b.reshape(1, -1, 1, 1, 1)
        if l < n - 1:
            x = jnp.where(x >= 0, x, 0.2 * x)
    if use_sigmoid:
        x = jax.nn.sigmoid(x)
    return jnp.transpose(x, (0, 2, 1, 3, 4))                  # (B, T, C, H, W)


if __name__ == "__main__":
    key = jax.random.PRNGKey(0)
    nc_in, nf = 4, 8
    B, T, H, W = 2, 4, 16, 16

    k_param, k_x = jax.random.split(key)
    cfg, flat_params, raw_params = build_discriminator_params(
        k_param, nc_in, nf, T, H, W)

    xs = jax.random.normal(k_x, (B, T, nc_in, H, W), jnp.float32)

    fwd = jax.jit(lambda a: sn_tpatchgan_disc_forward(
        a, cfg, flat_params, use_sigmoid=True, mode=True))
    out = jax.block_until_ready(fwd(xs))

    assert out.shape == (B, T, 4 * nf, 1, 1), out.shape
    assert bool(jnp.all(jnp.isfinite(out)))

    # Cross-check against a plain-JAX conv3d reference (kernel matmuls are
    # bf16 with f32 accumulate -> loose tolerance on the sigmoid output).
    ref = jax.jit(lambda a: _reference_forward(a, raw_params, True, True))(xs)
    max_err = float(jnp.max(jnp.abs(out - ref)))
    assert max_err < 5e-2, f"max |kernel - reference| = {max_err}"

    # Pre-sigmoid cross-check as well (sigmoid compresses error).
    fwd_ns = jax.jit(lambda a: sn_tpatchgan_disc_forward(
        a, cfg, flat_params, use_sigmoid=False, mode=True))
    out_ns = jax.block_until_ready(fwd_ns(xs))
    ref_ns = jax.jit(lambda a: _reference_forward(a, raw_params, False, True))(xs)
    pre_err = float(jnp.max(jnp.abs(out_ns - ref_ns)))
    pre_tol = 5e-2 * (1.0 + float(jnp.max(jnp.abs(ref_ns))))
    assert pre_err < pre_tol, f"pre-sigmoid max err = {pre_err} (tol {pre_tol})"

    print("KERNEL_OK")
</pallas_src>

<mosaic_0001>
module attributes {stable_mosaic.version = 11 : i64} {
  func.func @_fused_disc_kernel(%arg0: i32, %arg1: memref<1x4x16x128xbf16, #tpu.memory_space<vmem>>, %arg2: memref<96x64xbf16, #tpu.memory_space<vmem>>, %arg3: memref<1920x128xbf16, #tpu.memory_space<vmem>>, %arg4: memref<1x128xf32, #tpu.memory_space<vmem>>, %arg5: memref<64x28xbf16, #tpu.memory_space<vmem>>, %arg6: memref<1920x128xbf16, #tpu.memory_space<vmem>>, %arg7: memref<1x128xf32, #tpu.memory_space<vmem>>, %arg8: memref<32x16xbf16, #tpu.memory_space<vmem>>, %arg9: memref<1920x128xbf16, #tpu.memory_space<vmem>>, %arg10: memref<1x128xf32, #tpu.memory_space<vmem>>, %arg11: memref<32x8xbf16, #tpu.memory_space<vmem>>, %arg12: memref<1920x128xbf16, #tpu.memory_space<vmem>>, %arg13: memref<1x128xf32, #tpu.memory_space<vmem>>, %arg14: memref<384x128xbf16, #tpu.memory_space<vmem>>, %arg15: memref<1x128xf32, #tpu.memory_space<vmem>>, %arg16: memref<384x128xbf16, #tpu.memory_space<vmem>>, %arg17: memref<1x128xf32, #tpu.memory_space<vmem>>, %arg18: memref<1x4x1x128xf32, #tpu.memory_space<vmem>>, %arg19: memref<32x128xbf16, #tpu.memory_space<vmem>>, %arg20: memref<6x24x128xbf16, #tpu.memory_space<vmem>>, %arg21: memref<4x8x1920xbf16, #tpu.memory_space<vmem>>) attributes {dimension_semantics = [#tpu.dimension_semantics<parallel>], iteration_bounds = array<i64: 2>, scalar_prefetch = 0 : i64, scratch_operands = 3 : i64, tpu.core_type = #tpu.core_type<tc>, window_params = [{transform_indices = @transform_0, window_bounds = array<i64: 1, 4, 16, 128>}, {pipeline_mode = #tpu.pipeline_mode<synchronous>, transform_indices = @transform_1, window_bounds = array<i64: 96, 64>}, {pipeline_mode = #tpu.pipeline_mode<synchronous>, transform_indices = @transform_2, window_bounds = array<i64: 1920, 128>}, {pipeline_mode = #tpu.pipeline_mode<synchronous>, transform_indices = @transform_3, window_bounds = array<i64: 1, 128>}, {pipeline_mode = #tpu.pipeline_mode<synchronous>, transform_indices = @transform_4, window_bounds = array<i64: 64, 28>}, {pipeline_mode = #tpu.pipeline_mode<synchronous>, transform_indices = @transform_5, window_bounds = array<i64: 1920, 128>}, {pipeline_mode = #tpu.pipeline_mode<synchronous>, transform_indices = @transform_6, window_bounds = array<i64: 1, 128>}, {pipeline_mode = #tpu.pipeline_mode<synchronous>, transform_indices = @transform_7, window_bounds = array<i64: 32, 16>}, {pipeline_mode = #tpu.pipeline_mode<synchronous>, transform_indices = @transform_8, window_bounds = array<i64: 1920, 128>}, {pipeline_mode = #tpu.pipeline_mode<synchronous>, transform_indices = @transform_9, window_bounds = array<i64: 1, 128>}, {pipeline_mode = #tpu.pipeline_mode<synchronous>, transform_indices = @transform_10, window_bounds = array<i64: 32, 8>}, {pipeline_mode = #tpu.pipeline_mode<synchronous>, transform_indices = @transform_11, window_bounds = array<i64: 1920, 128>}, {pipeline_mode = #tpu.pipeline_mode<synchronous>, transform_indices = @transform_12, window_bounds = array<i64: 1, 128>}, {pipeline_mode = #tpu.pipeline_mode<synchronous>, transform_indices = @transform_13, window_bounds = array<i64: 384, 128>}, {pipeline_mode = #tpu.pipeline_mode<synchronous>, transform_indices = @transform_14, window_bounds = array<i64: 1, 128>}, {pipeline_mode = #tpu.pipeline_mode<synchronous>, transform_indices = @transform_15, window_bounds = array<i64: 384, 128>}, {pipeline_mode = #tpu.pipeline_mode<synchronous>, transform_indices = @transform_16, window_bounds = array<i64: 1, 128>}, {transform_indices = @transform_17, window_bounds = array<i64: 1, 4, 1, 128>}]} {
    %c0 = arith.constant 0 : index
    %c0_0 = arith.constant 0 : index
    %c0_1 = arith.constant 0 : index
    %c0_2 = arith.constant 0 : index
    %0 = vector.load %arg1[%c0, %c0_0, %c0_1, %c0_2] : memref<1x4x16x128xbf16, #tpu.memory_space<vmem>>, vector<1x4x16x128xbf16>
    %1 = vector.shape_cast %0 : vector<1x4x16x128xbf16> to vector<64x128xbf16>
    %c0_3 = arith.constant 0 : index
    %c0_4 = arith.constant 0 : index
    %2 = vector.load %arg2[%c0_3, %c0_4] : memref<96x64xbf16, #tpu.memory_space<vmem>>, vector<96x64xbf16>
    %cst = arith.constant dense<0.000000e+00> : vector<96x128xf32>
    %3 = tpu.matmul %2, %1, %cst {dimension_numbers = #tpu.dot_dimension_numbers<[1], [0], [0], [1], [0, 0, 1, 1], [], []>} : vector<96x64xbf16>, vector<64x128xbf16>, vector<96x128xf32> -> vector<96x128xf32>
    %4 = arith.truncf %3 : vector<96x128xf32> to vector<96x128xbf16>
    %cst_5 = arith.constant 0.000000e+00 : bf16
    %5 = vector.broadcast %cst_5 : bf16 to vector<24x128xbf16>
    %c0_6 = arith.constant 0 : index
    %c0_7 = arith.constant 0 : index
    %c0_8 = arith.constant 0 : index
    %6 = vector.load %arg20[%c0_6, %c0_7, %c0_8] : memref<6x24x128xbf16, #tpu.memory_space<vmem>>, vector<1x24x128xbf16>
    %7 = vector.shape_cast %6 : vector<1x24x128xbf16> to vector<24x128xbf16>
    %8 = vector.shape_cast %5 : vector<24x128xbf16> to vector<1x24x128xbf16>
    tpu.vector_store %arg20[%c0_6, %c0_7, %c0_8], %8 {strides = array<i32>} : memref<6x24x128xbf16, #tpu.memory_space<vmem>>, vector<1x24x128xbf16>,
    %c5 = arith.constant 5 : index
    %c0_9 = arith.constant 0 : index
    %c0_10 = arith.constant 0 : index
    %9 = vector.load %arg20[%c5, %c0_9, %c0_10] : memref<6x24x128xbf16, #tpu.memory_space<vmem>>, vector<1x24x128xbf16>
    %10 = vector.shape_cast %9 : vector<1x24x128xbf16> to vector<24x128xbf16>
    %11 = vector.shape_cast %5 : vector<24x128xbf16> to vector<1x24x128xbf16>
    tpu.vector_store %arg20[%c5, %c0_9, %c0_10], %11 {strides = array<i32>} : memref<6x24x128xbf16, #tpu.memory_space<vmem>>, vector<1x24x128xbf16>,
    %12 = vector.extract_strided_slice %4 {offsets = [0, 0], sizes = [24, 128], strides = [1, 1]} : vector<96x128xbf16> to vector<24x128xbf16>
    %c1 = arith.constant 1 : index
    %c0_11 = arith.constant 0 : index
    %c0_12 = arith.constant 0 : index
    %13 = vector.load %arg20[%c1, %c0_11, %c0_12] : memref<6x24x128xbf16, #tpu.memory_space<vmem>>, vector<1x24x128xbf16>
    %14 = vector.shape_cast %13 : vector<1x24x128xbf16> to vector<24x128xbf16>
    %15 = vector.shape_cast %12 : vector<24x128xbf16> to vector<1x24x128xbf16>
    tpu.vector_store %arg20[%c1, %c0_11, %c0_12], %15 {strides = array<i32>} : memref<6x24x128xbf16, #tpu.memory_space<vmem>>, vector<1x24x128xbf16>,
    %16 = vector.extract_strided_slice %4 {offsets = [24, 0], sizes = [24, 128], strides = [1, 1]} : vector<96x128xbf16> to vector<24x128xbf16>
    %c2 = arith.constant 2 : index
    %c0_13 = arith.constant 0 : index
    %c0_14 = arith.constant 0 : index
    %17 = vector.load %arg20[%c2, %c0_13, %c0_14] : memref<6x24x128xbf16, #tpu.memory_space<vmem>>, vector<1x24x128xbf16>
    %18 = vector.shape_cast %17 : vector<1x24x128xbf16> to vector<24x128xbf16>
    %19 = vector.shape_cast %16 : vector<24x128xbf16> to vector<1x24x128xbf16>
    tpu.vector_store %arg20[%c2, %c0_13, %c0_14], %19 {strides = array<i32>} : memref<6x24x128xbf16, #tpu.memory_space<vmem>>, vector<1x24x128xbf16>,
    %20 = vector.extract_strided_slice %4 {offsets = [48, 0], sizes = [24, 128], strides = [1, 1]} : vector<96x128xbf16> to vector<24x128xbf16>
    %c3 = arith.constant 3 : index
    %c0_15 = arith.constant 0 : index
    %c0_16 = arith.constant 0 : index
    %21 = vector.load %arg20[%c3, %c0_15, %c0_16] : memref<6x24x128xbf16, #tpu.memory_space<vmem>>, vector<1x24x128xbf16>
    %22 = vector.shape_cast %21 : vector<1x24x128xbf16> to vector<24x128xbf16>
    %23 = vector.shape_cast %20 : vector<24x128xbf16> to vector<1x24x128xbf16>
    tpu.vector_store %arg20[%c3, %c0_15, %c0_16], %23 {strides = array<i32>} : memref<6x24x128xbf16, #tpu.memory_space<vmem>>, vector<1x24x128xbf16>,
    %24 = vector.extract_strided_slice %4 {offsets = [72, 0], sizes = [24, 128], strides = [1, 1]} : vector<96x128xbf16> to vector<24x128xbf16>
    %c4 = arith.constant 4 : index
    %c0_17 = arith.constant 0 : index
    %c0_18 = arith.constant 0 : index
    %25 = vector.load %arg20[%c4, %c0_17, %c0_18] : memref<6x24x128xbf16, #tpu.memory_space<vmem>>, vector<1x24x128xbf16>
    %26 = vector.shape_cast %25 : vector<1x24x128xbf16> to vector<24x128xbf16>
    %27 = vector.shape_cast %24 : vector<24x128xbf16> to vector<1x24x128xbf16>
    tpu.vector_store %arg20[%c4, %c0_17, %c0_18], %27 {strides = array<i32>} : memref<6x24x128xbf16, #tpu.memory_space<vmem>>, vector<1x24x128xbf16>,
    %c0_19 = arith.constant 0 : index
    %c0_20 = arith.constant 0 : index
    %c0_21 = arith.constant 0 : index
    %28 = vector.load %arg20[%c0_19, %c0_20, %c0_21] : memref<6x24x128xbf16, #tpu.memory_space<vmem>>, vector<4x7x128xbf16>
    %c0_22 = arith.constant 0 : index
    %c0_23 = arith.constant 0 : index
    %c0_24 = arith.constant 0 : index
    %29 = vector.load %arg21[%c0_22, %c0_23, %c0_24] : memref<4x8x1920xbf16, #tpu.memory_space<vmem>>, vector<4x7x128xbf16>
    tpu.vector_store %arg21[%c0_22, %c0_23, %c0_24], %28 {strides = array<i32>} : memref<4x8x1920xbf16, #tpu.memory_space<vmem>>, vector<4x7x128xbf16>,
    %c0_25 = arith.constant 0 : index
    %c12 = arith.constant 12 : index
    %c0_26 = arith.constant 0 : index
    %30 = vector.load %arg20[%c0_25, %c12, %c0_26] : memref<6x24x128xbf16, #tpu.memory_space<vmem>>, vector<4x7x128xbf16>
    %c0_27 = arith.constant 0 : index
    %c0_28 = arith.constant 0 : index
    %c128 = arith.constant 128 : index
    %31 = vector.load %arg21[%c0_27, %c0_28, %c128] : memref<4x8x1920xbf16, #tpu.memory_space<vmem>>, vector<4x7x128xbf16>
    tpu.vector_store %arg21[%c0_27, %c0_28, %c128], %30 {strides = array<i32>} : memref<4x8x1920xbf16, #tpu.memory_space<vmem>>, vector<4x7x128xbf16>,
    %c0_29 = arith.constant 0 : index
    %c1_30 = arith.constant 1 : index
    %c0_31 = arith.constant 0 : index
    %32 = vector.load %arg20[%c0_29, %c1_30, %c0_31] : memref<6x24x128xbf16, #tpu.memory_space<vmem>>, vector<4x7x128xbf16>
    %c0_32 = arith.constant 0 : index
    %c0_33 = arith.constant 0 : index
    %c256 = arith.constant 256 : index
    %33 = vector.load %arg21[%c0_32, %c0_33, %c256] : memref<4x8x1920xbf16, #tpu.memory_space<vmem>>, vector<4x7x128xbf16>
    tpu.vector_store %arg21[%c0_32, %c0_33, %c256], %32 {strides = array<i32>} : memref<4x8x1920xbf16, #tpu.memory_space<vmem>>, vector<4x7x128xbf16>,
    %c0_34 = arith.constant 0 : index
    %c13 = arith.constant 13 : index
    %c0_35 = arith.constant 0 : index
    %34 = vector.load %arg20[%c0_34, %c13, %c0_35] : memref<6x24x128xbf16, #tpu.memory_space<vmem>>, vector<4x7x128xbf16>
    %c0_36 = arith.constant 0 : index
    %c0_37 = arith.constant 0 : index
    %c384 = arith.constant 384 : index
    %35 = vector.load %arg21[%c0_36, %c0_37, %c384] : memref<4x8x1920xbf16, #tpu.memory_space<vmem>>, vector<4x7x128xbf16>
    tpu.vector_store %arg21[%c0_36, %c0_37, %c384], %34 {strides = array<i32>} : memref<4x8x1920xbf16, #tpu.memory_space<vmem>>, vector<4x7x128xbf16>,
    %c0_38 = arith.constant 0 : index
    %c2_39 = arith.constant 2 : index
    %c0_40 = arith.constant 0 : index
    %36 = vector.load %arg20[%c0_38, %c2_39, %c0_40] : memref<6x24x128xbf16, #tpu.memory_space<vmem>>, vector<4x7x128xbf16>
    %c0_41 = arith.constant 0 : index
    %c0_42 = arith.constant 0 : index
    %c512 = arith.constant 512 : index
    %37 = vector.load %arg21[%c0_41, %c0_42, %c512] : memref<4x8x1920xbf16, #tpu.memory_space<vmem>>, vector<4x7x128xbf16>
    tpu.vector_store %arg21[%c0_41, %c0_42, %c512], %36 {strides = array<i32>} : memref<4x8x1920xbf16, #tpu.memory_space<vmem>>, vector<4x7x128xbf16>,
    %c1_43 = arith.constant 1 : index
    %c0_44 = arith.constant 0 : index
    %c0_45 = arith.constant 0 : index
    %38 = vector.load %arg20[%c1_43, %c0_44, %c0_45] : memref<6x24x128xbf16, #tpu.memory_space<vmem>>, vector<4x7x128xbf16>
    %c0_46 = arith.constant 0 : index
    %c0_47 = arith.constant 0 : index
    %c640 = arith.constant 640 : index
    %39 = vector.load %arg21[%c0_46, %c0_47, %c640] : memref<4x8x1920xbf16, #tpu.memory_space<vmem>>, vector<4x7x128xbf16>
    tpu.vector_store %arg21[%c0_46, %c0_47, %c640], %38 {strides = array<i32>} : memref<4x8x1920xbf16, #tpu.memory_space<vmem>>, vector<4x7x128xbf16>,
    %c1_48 = arith.constant 1 : index
    %c12_49 = arith.constant 12 : index
    %c0_50 = arith.constant 0 : index
    %40 = vector.load %arg20[%c1_48, %c12_49, %c0_50] : memref<6x24x128xbf16, #tpu.memory_space<vmem>>, vector<4x7x128xbf16>
    %c0_51 = arith.constant 0 : index
    %c0_52 = arith.constant 0 : index
    %c768 = arith.constant 768 : index
    %41 = vector.load %arg21[%c0_51, %c0_52, %c768] : memref<4x8x1920xbf16, #tpu.memory_space<vmem>>, vector<4x7x128xbf16>
    tpu.vector_store %arg21[%c0_51, %c0_52, %c768], %40 {strides = array<i32>} : memref<4x8x1920xbf16, #tpu.memory_space<vmem>>, vector<4x7x128xbf16>,
    %c1_53 = arith.constant 1 : index
    %c1_54 = arith.constant 1 : index
    %c0_55 = arith.constant 0 : index
    %42 = vector.load %arg20[%c1_53, %c1_54, %c0_55] : memref<6x24x128xbf16, #tpu.memory_space<vmem>>, vector<4x7x128xbf16>
    %c0_56 = arith.constant 0 : index
    %c0_57 = arith.constant 0 : index
    %c896 = arith.constant 896 : index
    %43 = vector.load %arg21[%c0_56, %c0_57, %c896] : memref<4x8x1920xbf16, #tpu.memory_space<vmem>>, vector<4x7x128xbf16>
    tpu.vector_store %arg21[%c0_56, %c0_57, %c896], %42 {strides = array<i32>} : memref<4x8x1920xbf16, #tpu.memory_space<vmem>>, vector<4x7x128xbf16>,
    %c1_58 = arith.constant 1 : index
    %c13_59 = arith.constant 13 : index
    %c0_60 = arith.constant 0 : index
    %44 = vector.load %arg20[%c1_58, %c13_59, %c0_60] : memref<6x24x128xbf16, #tpu.memory_space<vmem>>, vector<4x7x128xbf16>
    %c0_61 = arith.constant 0 : index
    %c0_62 = arith.constant 0 : index
    %c1024 = arith.constant 1024 : index
    %45 = vector.load %arg21[%c0_61, %c0_62, %c1024] : memref<4x8x1920xbf16, #tpu.memory_space<vmem>>, vector<4x7x128xbf16>
    tpu.vector_store %arg21[%c0_61, %c0_62, %c1024], %44 {strides = array<i32>} : memref<4x8x1920xbf16, #tpu.memory_space<vmem>>, vector<4x7x128xbf16>,
    %c1_63 = arith.constant 1 : index
    %c2_64 = arith.constant 2 : index
    %c0_65 = arith.constant 0 : index
    %46 = vector.load %arg20[%c1_63, %c2_64, %c0_65] : memref<6x24x128xbf16, #tpu.memory_space<vmem>>, vector<4x7x128xbf16>
    %c0_66 = arith.constant 0 : index
    %c0_67 = arith.constant 0 : index
    %c1152 = arith.constant 1152 : index
    %47 = vector.load %arg21[%c0_66, %c0_67, %c1152] : memref<4x8x1920xbf16, #tpu.memory_space<vmem>>, vector<4x7x128xbf16>
    tpu.vector_store %arg21[%c0_66, %c0_67, %c1152], %46 {strides = array<i32>} : memref<4x8x1920xbf16, #tpu.memory_space<vmem>>, vector<4x7x128xbf16>,
    %c2_68 = arith.constant 2 : index
    %c0_69 = arith.constant 0 : index
    %c0_70 = arith.constant 0 : index
    %48 = vector.load %arg20[%c2_68, %c0_69, %c0_70] : memref<6x24x128xbf16, #tpu.memory_space<vmem>>, vector<4x7x128xbf16>
    %c0_71 = arith.constant 0 : index
    %c0_72 = arith.constant 0 : index
    %c1280 = arith.constant 1280 : index
    %49 = vector.load %arg21[%c0_71, %c0_72, %c1280] : memref<4x8x1920xbf16, #tpu.memory_space<vmem>>, vector<4x7x128xbf16>
    tpu.vector_store %arg21[%c0_71, %c0_72, %c1280], %48 {strides = array<i32>} : memref<4x8x1920xbf16, #tpu.memory_space<vmem>>, vector<4x7x128xbf16>,
    %c2_73 = arith.constant 2 : index
    %c12_74 = arith.constant 12 : index
    %c0_75 = arith.constant 0 : index
    %50 = vector.load %arg20[%c2_73, %c12_74, %c0_75] : memref<6x24x128xbf16, #tpu.memory_space<vmem>>, vector<4x7x128xbf16>
    %c0_76 = arith.constant 0 : index
    %c0_77 = arith.constant 0 : index
    %c1408 = arith.constant 1408 : index
    %51 = vector.load %arg21[%c0_76, %c0_77, %c1408] : memref<4x8x1920xbf16, #tpu.memory_space<vmem>>, vector<4x7x128xbf16>
    tpu.vector_store %arg21[%c0_76, %c0_77, %c1408], %50 {strides = array<i32>} : memref<4x8x1920xbf16, #tpu.memory_space<vmem>>, vector<4x7x128xbf16>,
    %c2_78 = arith.constant 2 : index
    %c1_79 = arith.constant 1 : index
    %c0_80 = arith.constant 0 : index
    %52 = vector.load %arg20[%c2_78, %c1_79, %c0_80] : memref<6x24x128xbf16, #tpu.memory_space<vmem>>, vector<4x7x128xbf16>
    %c0_81 = arith.constant 0 : index
    %c0_82 = arith.constant 0 : index
    %c1536 = arith.constant 1536 : index
    %53 = vector.load %arg21[%c0_81, %c0_82, %c1536] : memref<4x8x1920xbf16, #tpu.memory_space<vmem>>, vector<4x7x128xbf16>
    tpu.vector_store %arg21[%c0_81, %c0_82, %c1536], %52 {strides = array<i32>} : memref<4x8x1920xbf16, #tpu.memory_space<vmem>>, vector<4x7x128xbf16>,
    %c2_83 = arith.constant 2 : index
    %c13_84 = arith.constant 13 : index
    %c0_85 = arith.constant 0 : index
    %54 = vector.load %arg20[%c2_83, %c13_84, %c0_85] : memref<6x24x128xbf16, #tpu.memory_space<vmem>>, vector<4x7x128xbf16>
    %c0_86 = arith.constant 0 : index
    %c0_87 = arith.constant 0 : index
    %c1664 = arith.constant 1664 : index
    %55 = vector.load %arg21[%c0_86, %c0_87, %c1664] : memref<4x8x1920xbf16, #tpu.memory_space<vmem>>, vector<4x7x128xbf16>
    tpu.vector_store %arg21[%c0_86, %c0_87, %c1664], %54 {strides = array<i32>} : memref<4x8x1920xbf16, #tpu.memory_space<vmem>>, vector<4x7x128xbf16>,
    %c2_88 = arith.constant 2 : index
    %c2_89 = arith.constant 2 : index
    %c0_90 = arith.constant 0 : index
    %56 = vector.load %arg20[%c2_88, %c2_89, %c0_90] : memref<6x24x128xbf16, #tpu.memory_space<vmem>>, vector<4x7x128xbf16>
    %c0_91 = arith.constant 0 : index
    %c0_92 = arith.constant 0 : index
    %c1792 = arith.constant 1792 : index
    %57 = vector.load %arg21[%c0_91, %c0_92, %c1792] : memref<4x8x1920xbf16, #tpu.memory_space<vmem>>, vector<4x7x128xbf16>
    tpu.vector_store %arg21[%c0_91, %c0_92, %c1792], %56 {strides = array<i32>} : memref<4x8x1920xbf16, #tpu.memory_space<vmem>>, vector<4x7x128xbf16>,
    %c0_93 = arith.constant 0 : index
    %c0_94 = arith.constant 0 : index
    %c0_95 = arith.constant 0 : index
    %58 = vector.load %arg21[%c0_93, %c0_94, %c0_95] : memref<4x8x1920xbf16, #tpu.memory_space<vmem>>, vector<4x7x1920xbf16>
    %59 = vector.shape_cast %58 : vector<4x7x1920xbf16> to vector<28x1920xbf16>
    %c0_96 = arith.constant 0 : index
    %c0_97 = arith.constant 0 : index
    %60 = vector.load %arg3[%c0_96, %c0_97] : memref<1920x128xbf16, #tpu.memory_space<vmem>>, vector<1920x128xbf16>
    %cst_98 = arith.constant dense<0.000000e+00> : vector<28x128xf32>
    %61 = tpu.matmul %59, %60, %cst_98 {dimension_numbers = #tpu.dot_dimension_numbers<[1], [0], [0], [1], [0, 0, 1, 1], [], []>} : vector<28x1920xbf16>, vector<1920x128xbf16>, vector<28x128xf32> -> vector<28x128xf32>
    %c0_99 = arith.constant 0 : index
    %c0_100 = arith.constant 0 : index
    %62 = vector.load %arg4[%c0_99, %c0_100] : memref<1x128xf32, #tpu.memory_space<vmem>>, vector<1x128xf32>
    %63 = vector.broadcast %62 : vector<1x128xf32> to vector<28x128xf32>
    %64 = arith.addf %61, %63 : vector<28x128xf32>
    %cst_101 = arith.constant 2.000000e-01 : f32
    %65 = vector.broadcast %cst_101 : f32 to vector<28x128xf32>
    %66 = arith.mulf %65, %64 : vector<28x128xf32>
    %67 = arith.maximumf %64, %66 : vector<28x128xf32>
    %68 = arith.truncf %67 : vector<28x128xf32> to vector<28x128xbf16>
    %c1_102 = arith.constant 1 : index
    %c0_103 = arith.constant 0 : index
    %69 = vector.load %arg19[%c1_102, %c0_103] : memref<32x128xbf16, #tpu.memory_space<vmem>>, vector<28x128xbf16>
    tpu.vector_store %arg19[%c1_102, %c0_103], %68 {strides = array<i32>} : memref<32x128xbf16, #tpu.memory_space<vmem>>, vector<28x128xbf16>,
    %c1_104 = arith.constant 1 : index
    %c0_105 = arith.constant 0 : index
    %70 = vector.load %arg19[%c1_104, %c0_105] : memref<32x128xbf16, #tpu.memory_space<vmem>>, vector<28x128xbf16>
    %c0_106 = arith.constant 0 : index
    %c0_107 = arith.constant 0 : index
    %71 = vector.load %arg5[%c0_106, %c0_107] : memref<64x28xbf16, #tpu.memory_space<vmem>>, vector<64x28xbf16>
    %cst_108 = arith.constant dense<0.000000e+00> : vector<64x128xf32>
    %72 = tpu.matmul %71, %70, %cst_108 {dimension_numbers = #tpu.dot_dimension_numbers<[1], [0], [0], [1], [0, 0, 1, 1], [], []>} : vector<64x28xbf16>, vector<28x128xbf16>, vector<64x128xf32> -> vector<64x128xf32>
    %73 = arith.truncf %72 : vector<64x128xf32> to vector<64x128xbf16>
    %cst_109 = arith.constant 0.000000e+00 : bf16
    %74 = vector.broadcast %cst_109 : bf16 to vector<16x128xbf16>
    %c0_110 = arith.constant 0 : index
    %c0_111 = arith.constant 0 : index
    %c0_112 = arith.constant 0 : index
    %75 = vector.load %arg20[%c0_110, %c0_111, %c0_112] : memref<6x24x128xbf16, #tpu.memory_space<vmem>>, vector<1x16x128xbf16>
    %76 = vector.shape_cast %75 : vector<1x16x128xbf16> to vector<16x128xbf16>
    %77 = vector.shape_cast %74 : vector<16x128xbf16> to vector<1x16x128xbf16>
    tpu.vector_store %arg20[%c0_110, %c0_111, %c0_112], %77 {strides = array<i32>} : memref<6x24x128xbf16, #tpu.memory_space<vmem>>, vector<1x16x128xbf16>,
    %c5_113 = arith.constant 5 : index
    %c0_114 = arith.constant 0 : index
    %c0_115 = arith.constant 0 : index
    %78 = vector.load %arg20[%c5_113, %c0_114, %c0_115] : memref<6x24x128xbf16, #tpu.memory_space<vmem>>, vector<1x16x128xbf16>
    %79 = vector.shape_cast %78 : vector<1x16x128xbf16> to vector<16x128xbf16>
    %80 = vector.shape_cast %74 : vector<16x128xbf16> to vector<1x16x128xbf16>
    tpu.vector_store %arg20[%c5_113, %c0_114, %c0_115], %80 {strides = array<i32>} : memref<6x24x128xbf16, #tpu.memory_space<vmem>>, vector<1x16x128xbf16>,
    %81 = vector.extract_strided_slice %73 {offsets = [0, 0], sizes = [16, 128], strides = [1, 1]} : vector<64x128xbf16> to vector<16x128xbf16>
    %c1_116 = arith.constant 1 : index
    %c0_117 = arith.constant 0 : index
    %c0_118 = arith.constant 0 : index
    %82 = vector.load %arg20[%c1_116, %c0_117, %c0_118] : memref<6x24x128xbf16, #tpu.memory_space<vmem>>, vector<1x16x128xbf16>
    %83 = vector.shape_cast %82 : vector<1x16x128xbf16> to vector<16x128xbf16>
    %84 = vector.shape_cast %81 : vector<16x128xbf16> to vector<1x16x128xbf16>
    tpu.vector_store %arg20[%c1_116, %c0_117, %c0_118], %84 {strides = array<i32>} : memref<6x24x128xbf16, #tpu.memory_space<vmem>>, vector<1x16x128xbf16>,
    %85 = vector.extract_strided_slice %73 {offsets = [16, 0], sizes = [16, 128], strides = [1, 1]} : vector<64x128xbf16> to vector<16x128xbf16>
    %c2_119 = arith.constant 2 : index
    %c0_120 = arith.constant 0 : index
    %c0_121 = arith.constant 0 : index
    %86 = vector.load %arg20[%c2_119, %c0_120, %c0_121] : memref<6x24x128xbf16, #tpu.memory_space<vmem>>, vector<1x16x128xbf16>
    %87 = vector.shape_cast %86 : vector<1x16x128xbf16> to vector<16x128xbf16>
    %88 = vector.shape_cast %85 : vector<16x128xbf16> to vector<1x16x128xbf16>
    tpu.vector_store %arg20[%c2_119, %c0_120, %c0_121], %88 {strides = array<i32>} : memref<6x24x128xbf16, #tpu.memory_space<vmem>>, vector<1x16x128xbf16>,
    %89 = vector.extract_strided_slice %73 {offsets = [32, 0], sizes = [16, 128], strides = [1, 1]} : vector<64x128xbf16> to vector<16x128xbf16>
    %c3_122 = arith.constant 3 : index
    %c0_123 = arith.constant 0 : index
    %c0_124 = arith.constant 0 : index
    %90 = vector.load %arg20[%c3_122, %c0_123, %c0_124] : memref<6x24x128xbf16, #tpu.memory_space<vmem>>, vector<1x16x128xbf16>
    %91 = vector.shape_cast %90 : vector<1x16x128xbf16> to vector<16x128xbf16>
    %92 = vector.shape_cast %89 : vector<16x128xbf16> to vector<1x16x128xbf16>
    tpu.vector_store %arg20[%c3_122, %c0_123, %c0_124], %92 {strides = array<i32>} : memref<6x24x128xbf16, #tpu.memory_space<vmem>>, vector<1x16x128xbf16>,
    %93 = vector.extract_strided_slice %73 {offsets = [48, 0], sizes = [16, 128], strides = [1, 1]} : vector<64x128xbf16> to vector<16x128xbf16>
    %c4_125 = arith.constant 4 : index
    %c0_126 = arith.constant 0 : index
    %c0_127 = arith.constant 0 : index
    %94 = vector.load %arg20[%c4_125, %c0_126, %c0_127] : memref<6x24x128xbf16, #tpu.memory_space<vmem>>, vector<1x16x128xbf16>
    %95 = vector.shape_cast %94 : vector<1x16x128xbf16> to vector<16x128xbf16>
    %96 = vector.shape_cast %93 : vector<16x128xbf16> to vector<1x16x128xbf16>
    tpu.vector_store %arg20[%c4_125, %c0_126, %c0_127], %96 {strides = array<i32>} : memref<6x24x128xbf16, #tpu.memory_space<vmem>>, vector<1x16x128xbf16>,
    %c0_128 = arith.constant 0 : index
    %c0_129 = arith.constant 0 : index
    %c0_130 = arith.constant 0 : index
    %97 = vector.load %arg20[%c0_128, %c0_129, %c0_130] : memref<6x24x128xbf16, #tpu.memory_space<vmem>>, vector<4x4x128xbf16>
    %c0_131 = arith.constant 0 : index
    %c0_132 = arith.constant 0 : index
    %c0_133 = arith.constant 0 : index
    %98 = vector.load %arg21[%c0_131, %c0_132, %c0_133] : memref<4x8x1920xbf16, #tpu.memory_space<vmem>>, vector<4x4x128xbf16>
    tpu.vector_store %arg21[%c0_131, %c0_132, %c0_133], %97 {strides = array<i32>} : memref<4x8x1920xbf16, #tpu.memory_space<vmem>>, vector<4x4x128xbf16>,
    %c0_134 = arith.constant 0 : index
    %c8 = arith.constant 8 : index
    %c0_135 = arith.constant 0 : index
    %99 = vector.load %arg20[%c0_134, %c8, %c0_135] : memref<6x24x128xbf16, #tpu.memory_space<vmem>>, vector<4x4x128xbf16>
    %c0_136 = arith.constant 0 : index
    %c0_137 = arith.constant 0 : index
    %c128_138 = arith.constant 128 : index
    %100 = vector.load %arg21[%c0_136, %c0_137, %c128_138] : memref<4x8x1920xbf16, #tpu.memory_space<vmem>>, vector<4x4x128xbf16>
    tpu.vector_store %arg21[%c0_136, %c0_137, %c128_138], %99 {strides = array<i32>} : memref<4x8x1920xbf16, #tpu.memory_space<vmem>>, vector<4x4x128xbf16>,
    %c0_139 = arith.constant 0 : index
    %c1_140 = arith.constant 1 : index
    %c0_141 = arith.constant 0 : index
    %101 = vector.load %arg20[%c0_139, %c1_140, %c0_141] : memref<6x24x128xbf16, #tpu.memory_space<vmem>>, vector<4x4x128xbf16>
    %c0_142 = arith.constant 0 : index
    %c0_143 = arith.constant 0 : index
    %c256_144 = arith.constant 256 : index
    %102 = vector.load %arg21[%c0_142, %c0_143, %c256_144] : memref<4x8x1920xbf16, #tpu.memory_space<vmem>>, vector<4x4x128xbf16>
    tpu.vector_store %arg21[%c0_142, %c0_143, %c256_144], %101 {strides = array<i32>} : memref<4x8x1920xbf16, #tpu.memory_space<vmem>>, vector<4x4x128xbf16>,
    %c0_145 = arith.constant 0 : index
    %c9 = arith.constant 9 : index
    %c0_146 = arith.constant 0 : index
    %103 = vector.load %arg20[%c0_145, %c9, %c0_146] : memref<6x24x128xbf16, #tpu.memory_space<vmem>>, vector<4x4x128xbf16>
    %c0_147 = arith.constant 0 : index
    %c0_148 = arith.constant 0 : index
    %c384_149 = arith.constant 384 : index
    %104 = vector.load %arg21[%c0_147, %c0_148, %c384_149] : memref<4x8x1920xbf16, #tpu.memory_space<vmem>>, vector<4x4x128xbf16>
    tpu.vector_store %arg21[%c0_147, %c0_148, %c384_149], %103 {strides = array<i32>} : memref<4x8x1920xbf16, #tpu.memory_space<vmem>>, vector<4x4x128xbf16>,
    %c0_150 = arith.constant 0 : index
    %c2_151 = arith.constant 2 : index
    %c0_152 = arith.constant 0 : index
    %105 = vector.load %arg20[%c0_150, %c2_151, %c0_152] : memref<6x24x128xbf16, #tpu.memory_space<vmem>>, vector<4x4x128xbf16>
    %c0_153 = arith.constant 0 : index
    %c0_154 = arith.constant 0 : index
    %c512_155 = arith.constant 512 : index
    %106 = vector.load %arg21[%c0_153, %c0_154, %c512_155] : memref<4x8x1920xbf16, #tpu.memory_space<vmem>>, vector<4x4x128xbf16>
    tpu.vector_store %arg21[%c0_153, %c0_154, %c512_155], %105 {strides = array<i32>} : memref<4x8x1920xbf16, #tpu.memory_space<vmem>>, vector<4x4x128xbf16>,
    %c1_156 = arith.constant 1 : index
    %c0_157 = arith.constant 0 : index
    %c0_158 = arith.constant 0 : index
    %107 = vector.load %arg20[%c1_156, %c0_157, %c0_158] : memref<6x24x128xbf16, #tpu.memory_space<vmem>>, vector<4x4x128xbf16>
    %c0_159 = arith.constant 0 : index
    %c0_160 = arith.constant 0 : index
    %c640_161 = arith.constant 640 : index
    %108 = vector.load %arg21[%c0_159, %c0_160, %c640_161] : memref<4x8x1920xbf16, #tpu.memory_space<vmem>>, vector<4x4x128xbf16>
    tpu.vector_store %arg21[%c0_159, %c0_160, %c640_161], %107 {strides = array<i32>} : memref<4x8x1920xbf16, #tpu.memory_space<vmem>>, vector<4x4x128xbf16>,
    %c1_162 = arith.constant 1 : index
    %c8_163 = arith.constant 8 : index
    %c0_164 = arith.constant 0 : index
    %109 = vector.load %arg20[%c1_162, %c8_163, %c0_164] : memref<6x24x128xbf16, #tpu.memory_space<vmem>>, vector<4x4x128xbf16>
    %c0_165 = arith.constant 0 : index
    %c0_166 = arith.constant 0 : index
    %c768_167 = arith.constant 768 : index
    %110 = vector.load %arg21[%c0_165, %c0_166, %c768_167] : memref<4x8x1920xbf16, #tpu.memory_space<vmem>>, vector<4x4x128xbf16>
    tpu.vector_store %arg21[%c0_165, %c0_166, %c768_167], %109 {strides = array<i32>} : memref<4x8x1920xbf16, #tpu.memory_space<vmem>>, vector<4x4x128xbf16>,
    %c1_168 = arith.constant 1 : index
    %c1_169 = arith.constant 1 : index
    %c0_170 = arith.constant 0 : index
    %111 = vector.load %arg20[%c1_168, %c1_169, %c0_170] : memref<6x24x128xbf16, #tpu.memory_space<vmem>>, vector<4x4x128xbf16>
    %c0_171 = arith.constant 0 : index
    %c0_172 = arith.constant 0 : index
    %c896_173 = arith.constant 896 : index
    %112 = vector.load %arg21[%c0_171, %c0_172, %c896_173] : memref<4x8x1920xbf16, #tpu.memory_space<vmem>>, vector<4x4x128xbf16>
    tpu.vector_store %arg21[%c0_171, %c0_172, %c896_173], %111 {strides = array<i32>} : memref<4x8x1920xbf16, #tpu.memory_space<vmem>>, vector<4x4x128xbf16>,
    %c1_174 = arith.constant 1 : index
    %c9_175 = arith.constant 9 : index
    %c0_176 = arith.constant 0 : index
    %113 = vector.load %arg20[%c1_174, %c9_175, %c0_176] : memref<6x24x128xbf16, #tpu.memory_space<vmem>>, vector<4x4x128xbf16>
    %c0_177 = arith.constant 0 : index
    %c0_178 = arith.constant 0 : index
    %c1024_179 = arith.constant 1024 : index
    %114 = vector.load %arg21[%c0_177, %c0_178, %c1024_179] : memref<4x8x1920xbf16, #tpu.memory_space<vmem>>, vector<4x4x128xbf16>
    tpu.vector_store %arg21[%c0_177, %c0_178, %c1024_179], %113 {strides = array<i32>} : memref<4x8x1920xbf16, #tpu.memory_space<vmem>>, vector<4x4x128xbf16>,
    %c1_180 = arith.constant 1 : index
    %c2_181 = arith.constant 2 : index
    %c0_182 = arith.constant 0 : index
    %115 = vector.load %arg20[%c1_180, %c2_181, %c0_182] : memref<6x24x128xbf16, #tpu.memory_space<vmem>>, vector<4x4x128xbf16>
    %c0_183 = arith.constant 0 : index
    %c0_184 = arith.constant 0 : index
    %c1152_185 = arith.constant 1152 : index
    %116 = vector.load %arg21[%c0_183, %c0_184, %c1152_185] : memref<4x8x1920xbf16, #tpu.memory_space<vmem>>, vector<4x4x128xbf16>
    tpu.vector_store %arg21[%c0_183, %c0_184, %c1152_185], %115 {strides = array<i32>} : memref<4x8x1920xbf16, #tpu.memory_space<vmem>>, vector<4x4x128xbf16>,
    %c2_186 = arith.constant 2 : index
    %c0_187 = arith.constant 0 : index
    %c0_188 = arith.constant 0 : index
    %117 = vector.load %arg20[%c2_186, %c0_187, %c0_188] : memref<6x24x128xbf16, #tpu.memory_space<vmem>>, vector<4x4x128xbf16>
    %c0_189 = arith.constant 0 : index
    %c0_190 = arith.constant 0 : index
    %c1280_191 = arith.constant 1280 : index
    %118 = vector.load %arg21[%c0_189, %c0_190, %c1280_191] : memref<4x8x1920xbf16, #tpu.memory_space<vmem>>, vector<4x4x128xbf16>
    tpu.vector_store %arg21[%c0_189, %c0_190, %c1280_191], %117 {strides = array<i32>} : memref<4x8x1920xbf16, #tpu.memory_space<vmem>>, vector<4x4x128xbf16>,
    %c2_192 = arith.constant 2 : index
    %c8_193 = arith.constant 8 : index
    %c0_194 = arith.constant 0 : index
    %119 = vector.load %arg20[%c2_192, %c8_193, %c0_194] : memref<6x24x128xbf16, #tpu.memory_space<vmem>>, vector<4x4x128xbf16>
    %c0_195 = arith.constant 0 : index
    %c0_196 = arith.constant 0 : index
    %c1408_197 = arith.constant 1408 : index
    %120 = vector.load %arg21[%c0_195, %c0_196, %c1408_197] : memref<4x8x1920xbf16, #tpu.memory_space<vmem>>, vector<4x4x128xbf16>
    tpu.vector_store %arg21[%c0_195, %c0_196, %c1408_197], %119 {strides = array<i32>} : memref<4x8x1920xbf16, #tpu.memory_space<vmem>>, vector<4x4x128xbf16>,
    %c2_198 = arith.constant 2 : index
    %c1_199 = arith.constant 1 : index
    %c0_200 = arith.constant 0 : index
    %121 = vector.load %arg20[%c2_198, %c1_199, %c0_200] : memref<6x24x128xbf16, #tpu.memory_space<vmem>>, vector<4x4x128xbf16>
    %c0_201 = arith.constant 0 : index
    %c0_202 = arith.constant 0 : index
    %c1536_203 = arith.constant 1536 : index
    %122 = vector.load %arg21[%c0_201, %c0_202, %c1536_203] : memref<4x8x1920xbf16, #tpu.memory_space<vmem>>, vector<4x4x128xbf16>
    tpu.vector_store %arg21[%c0_201, %c0_202, %c1536_203], %121 {strides = array<i32>} : memref<4x8x1920xbf16, #tpu.memory_space<vmem>>, vector<4x4x128xbf16>,
    %c2_204 = arith.constant 2 : index
    %c9_205 = arith.constant 9 : index
    %c0_206 = arith.constant 0 : index
    %123 = vector.load %arg20[%c2_204, %c9_205, %c0_206] : memref<6x24x128xbf16, #tpu.memory_space<vmem>>, vector<4x4x128xbf16>
    %c0_207 = arith.constant 0 : index
    %c0_208 = arith.constant 0 : index
    %c1664_209 = arith.constant 1664 : index
    %124 = vector.load %arg21[%c0_207, %c0_208, %c1664_209] : memref<4x8x1920xbf16, #tpu.memory_space<vmem>>, vector<4x4x128xbf16>
    tpu.vector_store %arg21[%c0_207, %c0_208, %c1664_209], %123 {strides = array<i32>} : memref<4x8x1920xbf16, #tpu.memory_space<vmem>>, vector<4x4x128xbf16>,
    %c2_210 = arith.constant 2 : index
    %c2_211 = arith.constant 2 : index
    %c0_212 = arith.constant 0 : index
    %125 = vector.load %arg20[%c2_210, %c2_211, %c0_212] : memref<6x24x128xbf16, #tpu.memory_space<vmem>>, vector<4x4x128xbf16>
    %c0_213 = arith.constant 0 : index
    %c0_214 = arith.constant 0 : index
    %c1792_215 = arith.constant 1792 : index
    %126 = vector.load %arg21[%c0_213, %c0_214, %c1792_215] : memref<4x8x1920xbf16, #tpu.memory_space<vmem>>, vector<4x4x128xbf16>
    tpu.vector_store %arg21[%c0_213, %c0_214, %c1792_215], %125 {strides = array<i32>} : memref<4x8x1920xbf16, #tpu.memory_space<vmem>>, vector<4x4x128xbf16>,
    %c0_216 = arith.constant 0 : index
    %c0_217 = arith.constant 0 : index
    %c0_218 = arith.constant 0 : index
    %127 = vector.load %arg21[%c0_216, %c0_217, %c0_218] : memref<4x8x1920xbf16, #tpu.memory_space<vmem>>, vector<4x4x1920xbf16>
    %128 = vector.shape_cast %127 : vector<4x4x1920xbf16> to vector<16x1920xbf16>
    %c0_219 = arith.constant 0 : index
    %c0_220 = arith.constant 0 : index
    %129 = vector.load %arg6[%c0_219, %c0_220] : memref<1920x128xbf16, #tpu.memory_space<vmem>>, vector<1920x128xbf16>
    %cst_221 = arith.constant dense<0.000000e+00> : vector<16x128xf32>
    %130 = tpu.matmul %128, %129, %cst_221 {dimension_numbers = #tpu.dot_dimension_numbers<[1], [0], [0], [1], [0, 0, 1, 1], [], []>} : vector<16x1920xbf16>, vector<1920x128xbf16>, vector<16x128xf32> -> vector<16x128xf32>
    %c0_222 = arith.constant 0 : index
    %c0_223 = arith.constant 0 : index
    %131 = vector.load %arg7[%c0_222, %c0_223] : memref<1x128xf32, #tpu.memory_space<vmem>>, vector<1x128xf32>
    %132 = vector.broadcast %131 : vector<1x128xf32> to vector<16x128xf32>
    %133 = arith.addf %130, %132 : vector<16x128xf32>
    %cst_224 = arith.constant 2.000000e-01 : f32
    %134 = vector.broadcast %cst_224 : f32 to vector<16x128xf32>
    %135 = arith.mulf %134, %133 : vector<16x128xf32>
    %136 = arith.maximumf %133, %135 : vector<16x128xf32>
    %137 = arith.truncf %136 : vector<16x128xf32> to vector<16x128xbf16>
    %c1_225 = arith.constant 1 : index
    %c0_226 = arith.constant 0 : index
    %138 = vector.load %arg19[%c1_225, %c0_226] : memref<32x128xbf16, #tpu.memory_space<vmem>>, vector<16x128xbf16>
    tpu.vector_store %arg19[%c1_225, %c0_226], %137 {strides = array<i32>} : memref<32x128xbf16, #tpu.memory_space<vmem>>, vector<16x128xbf16>,
    %c1_227 = arith.constant 1 : index
    %c0_228 = arith.constant 0 : index
    %139 = vector.load %arg19[%c1_227, %c0_228] : memref<32x128xbf16, #tpu.memory_space<vmem>>, vector<16x128xbf16>
    %c0_229 = arith.constant 0 : index
    %c0_230 = arith.constant 0 : index
    %140 = vector.load %arg8[%c0_229, %c0_230] : memref<32x16xbf16, #tpu.memory_space<vmem>>, vector<32x16xbf16>
    %cst_231 = arith.constant dense<0.000000e+00> : vector<32x128xf32>
    %141 = tpu.matmul %140, %139, %cst_231 {dimension_numbers = #tpu.dot_dimension_numbers<[1], [0], [0], [1], [0, 0, 1, 1], [], []>} : vector<32x16xbf16>, vector<16x128xbf16>, vector<32x128xf32> -> vector<32x128xf32>
    %142 = arith.truncf %141 : vector<32x128xf32> to vector<32x128xbf16>
    %cst_232 = arith.constant 0.000000e+00 : bf16
    %143 = vector.broadcast %cst_232 : bf16 to vector<8x128xbf16>
    %c0_233 = arith.constant 0 : index
    %c0_234 = arith.constant 0 : index
    %c0_235 = arith.constant 0 : index
    %144 = vector.load %arg20[%c0_233, %c0_234, %c0_235] : memref<6x24x128xbf16, #tpu.memory_space<vmem>>, vector<1x8x128xbf16>
    %145 = vector.shape_cast %144 : vector<1x8x128xbf16> to vector<8x128xbf16>
    %146 = vector.shape_cast %143 : vector<8x128xbf16> to vector<1x8x128xbf16>
    tpu.vector_store %arg20[%c0_233, %c0_234, %c0_235], %146 {strides = array<i32>} : memref<6x24x128xbf16, #tpu.memory_space<vmem>>, vector<1x8x128xbf16>,
    %c5_236 = arith.constant 5 : index
    %c0_237 = arith.constant 0 : index
    %c0_238 = arith.constant 0 : index
    %147 = vector.load %arg20[%c5_236, %c0_237, %c0_238] : memref<6x24x128xbf16, #tpu.memory_space<vmem>>, vector<1x8x128xbf16>
    %148 = vector.shape_cast %147 : vector<1x8x128xbf16> to vector<8x128xbf16>
    %149 = vector.shape_cast %143 : vector<8x128xbf16> to vector<1x8x128xbf16>
    tpu.vector_store %arg20[%c5_236, %c0_237, %c0_238], %149 {strides = array<i32>} : memref<6x24x128xbf16, #tpu.memory_space<vmem>>, vector<1x8x128xbf16>,
    %150 = vector.extract_strided_slice %142 {offsets = [0, 0], sizes = [8, 128], strides = [1, 1]} : vector<32x128xbf16> to vector<8x128xbf16>
    %c1_239 = arith.constant 1 : index
    %c0_240 = arith.constant 0 : index
    %c0_241 = arith.constant 0 : index
    %151 = vector.load %arg20[%c1_239, %c0_240, %c0_241] : memref<6x24x128xbf16, #tpu.memory_space<vmem>>, vector<1x8x128xbf16>
    %152 = vector.shape_cast %151 : vector<1x8x128xbf16> to vector<8x128xbf16>
    %153 = vector.shape_cast %150 : vector<8x128xbf16> to vector<1x8x128xbf16>
    tpu.vector_store %arg20[%c1_239, %c0_240, %c0_241], %153 {strides = array<i32>} : memref<6x24x128xbf16, #tpu.memory_space<vmem>>, vector<1x8x128xbf16>,
    %154 = vector.extract_strided_slice %142 {offsets = [8, 0], sizes = [8, 128], strides = [1, 1]} : vector<32x128xbf16> to vector<8x128xbf16>
    %c2_242 = arith.constant 2 : index
    %c0_243 = arith.constant 0 : index
    %c0_244 = arith.constant 0 : index
    %155 = vector.load %arg20[%c2_242, %c0_243, %c0_244] : memref<6x24x128xbf16, #tpu.memory_space<vmem>>, vector<1x8x128xbf16>
    %156 = vector.shape_cast %155 : vector<1x8x128xbf16> to vector<8x128xbf16>
    %157 = vector.shape_cast %154 : vector<8x128xbf16> to vector<1x8x128xbf16>
    tpu.vector_store %arg20[%c2_242, %c0_243, %c0_244], %157 {strides = array<i32>} : memref<6x24x128xbf16, #tpu.memory_space<vmem>>, vector<1x8x128xbf16>,
    %158 = vector.extract_strided_slice %142 {offsets = [16, 0], sizes = [8, 128], strides = [1, 1]} : vector<32x128xbf16> to vector<8x128xbf16>
    %c3_245 = arith.constant 3 : index
    %c0_246 = arith.constant 0 : index
    %c0_247 = arith.constant 0 : index
    %159 = vector.load %arg20[%c3_245, %c0_246, %c0_247] : memref<6x24x128xbf16, #tpu.memory_space<vmem>>, vector<1x8x128xbf16>
    %160 = vector.shape_cast %159 : vector<1x8x128xbf16> to vector<8x128xbf16>
    %161 = vector.shape_cast %158 : vector<8x128xbf16> to vector<1x8x128xbf16>
    tpu.vector_store %arg20[%c3_245, %c0_246, %c0_247], %161 {strides = array<i32>} : memref<6x24x128xbf16, #tpu.memory_space<vmem>>, vector<1x8x128xbf16>,
    %162 = vector.extract_strided_slice %142 {offsets = [24, 0], sizes = [8, 128], strides = [1, 1]} : vector<32x128xbf16> to vector<8x128xbf16>
    %c4_248 = arith.constant 4 : index
    %c0_249 = arith.constant 0 : index
    %c0_250 = arith.constant 0 : index
    %163 = vector.load %arg20[%c4_248, %c0_249, %c0_250] : memref<6x24x128xbf16, #tpu.memory_space<vmem>>, vector<1x8x128xbf16>
    %164 = vector.shape_cast %163 : vector<1x8x128xbf16> to vector<8x128xbf16>
    %165 = vector.shape_cast %162 : vector<8x128xbf16> to vector<1x8x128xbf16>
    tpu.vector_store %arg20[%c4_248, %c0_249, %c0_250], %165 {strides = array<i32>} : memref<6x24x128xbf16, #tpu.memory_space<vmem>>, vector<1x8x128xbf16>,
    %c0_251 = arith.constant 0 : index
    %c0_252 = arith.constant 0 : index
    %c0_253 = arith.constant 0 : index
    %166 = vector.load %arg20[%c0_251, %c0_252, %c0_253] : memref<6x24x128xbf16, #tpu.memory_space<vmem>>, vector<4x2x128xbf16>
    %c0_254 = arith.constant 0 : index
    %c0_255 = arith.constant 0 : index
    %c0_256 = arith.constant 0 : index
    %167 = vector.load %arg21[%c0_254, %c0_255, %c0_256] : memref<4x8x1920xbf16, #tpu.memory_space<vmem>>, vector<4x2x128xbf16>
    tpu.vector_store %arg21[%c0_254, %c0_255, %c0_256], %166 {strides = array<i32>} : memref<4x8x1920xbf16, #tpu.memory_space<vmem>>, vector<4x2x128xbf16>,
    %c0_257 = arith.constant 0 : index
    %c4_258 = arith.constant 4 : index
    %c0_259 = arith.constant 0 : index
    %168 = vector.load %arg20[%c0_257, %c4_258, %c0_259] : memref<6x24x128xbf16, #tpu.memory_space<vmem>>, vector<4x2x128xbf16>
    %c0_260 = arith.constant 0 : index
    %c0_261 = arith.constant 0 : index
    %c128_262 = arith.constant 128 : index
    %169 = vector.load %arg21[%c0_260, %c0_261, %c128_262] : memref<4x8x1920xbf16, #tpu.memory_space<vmem>>, vector<4x2x128xbf16>
    tpu.vector_store %arg21[%c0_260, %c0_261, %c128_262], %168 {strides = array<i32>} : memref<4x8x1920xbf16, #tpu.memory_space<vmem>>, vector<4x2x128xbf16>,
    %c0_263 = arith.constant 0 : index
    %c1_264 = arith.constant 1 : index
    %c0_265 = arith.constant 0 : index
    %170 = vector.load %arg20[%c0_263, %c1_264, %c0_265] : memref<6x24x128xbf16, #tpu.memory_space<vmem>>, vector<4x2x128xbf16>
    %c0_266 = arith.constant 0 : index
    %c0_267 = arith.constant 0 : index
    %c256_268 = arith.constant 256 : index
    %171 = vector.load %arg21[%c0_266, %c0_267, %c256_268] : memref<4x8x1920xbf16, #tpu.memory_space<vmem>>, vector<4x2x128xbf16>
    tpu.vector_store %arg21[%c0_266, %c0_267, %c256_268], %170 {strides = array<i32>} : memref<4x8x1920xbf16, #tpu.memory_space<vmem>>, vector<4x2x128xbf16>,
    %c0_269 = arith.constant 0 : index
    %c5_270 = arith.constant 5 : index
    %c0_271 = arith.constant 0 : index
    %172 = vector.load %arg20[%c0_269, %c5_270, %c0_271] : memref<6x24x128xbf16, #tpu.memory_space<vmem>>, vector<4x2x128xbf16>
    %c0_272 = arith.constant 0 : index
    %c0_273 = arith.constant 0 : index
    %c384_274 = arith.constant 384 : index
    %173 = vector.load %arg21[%c0_272, %c0_273, %c384_274] : memref<4x8x1920xbf16, #tpu.memory_space<vmem>>, vector<4x2x128xbf16>
    tpu.vector_store %arg21[%c0_272, %c0_273, %c384_274], %172 {strides = array<i32>} : memref<4x8x1920xbf16, #tpu.memory_space<vmem>>, vector<4x2x128xbf16>,
    %c0_275 = arith.constant 0 : index
    %c2_276 = arith.constant 2 : index
    %c0_277 = arith.constant 0 : index
    %174 = vector.load %arg20[%c0_275, %c2_276, %c0_277] : memref<6x24x128xbf16, #tpu.memory_space<vmem>>, vector<4x2x128xbf16>
    %c0_278 = arith.constant 0 : index
    %c0_279 = arith.constant 0 : index
    %c512_280 = arith.constant 512 : index
    %175 = vector.load %arg21[%c0_278, %c0_279, %c512_280] : memref<4x8x1920xbf16, #tpu.memory_space<vmem>>, vector<4x2x128xbf16>
    tpu.vector_store %arg21[%c0_278, %c0_279, %c512_280], %174 {strides = array<i32>} : memref<4x8x1920xbf16, #tpu.memory_space<vmem>>, vector<4x2x128xbf16>,
    %c1_281 = arith.constant 1 : index
    %c0_282 = arith.constant 0 : index
    %c0_283 = arith.constant 0 : index
    %176 = vector.load %arg20[%c1_281, %c0_282, %c0_283] : memref<6x24x128xbf16, #tpu.memory_space<vmem>>, vector<4x2x128xbf16>
    %c0_284 = arith.constant 0 : index
    %c0_285 = arith.constant 0 : index
    %c640_286 = arith.constant 640 : index
    %177 = vector.load %arg21[%c0_284, %c0_285, %c640_286] : memref<4x8x1920xbf16, #tpu.memory_space<vmem>>, vector<4x2x128xbf16>
    tpu.vector_store %arg21[%c0_284, %c0_285, %c640_286], %176 {strides = array<i32>} : memref<4x8x1920xbf16, #tpu.memory_space<vmem>>, vector<4x2x128xbf16>,
    %c1_287 = arith.constant 1 : index
    %c4_288 = arith.constant 4 : index
    %c0_289 = arith.constant 0 : index
    %178 = vector.load %arg20[%c1_287, %c4_288, %c0_289] : memref<6x24x128xbf16, #tpu.memory_space<vmem>>, vector<4x2x128xbf16>
    %c0_290 = arith.constant 0 : index
    %c0_291 = arith.constant 0 : index
    %c768_292 = arith.constant 768 : index
    %179 = vector.load %arg21[%c0_290, %c0_291, %c768_292] : memref<4x8x1920xbf16, #tpu.memory_space<vmem>>, vector<4x2x128xbf16>
    tpu.vector_store %arg21[%c0_290, %c0_291, %c768_292], %178 {strides = array<i32>} : memref<4x8x1920xbf16, #tpu.memory_space<vmem>>, vector<4x2x128xbf16>,
    %c1_293 = arith.constant 1 : index
    %c1_294 = arith.constant 1 : index
    %c0_295 = arith.constant 0 : index
    %180 = vector.load %arg20[%c1_293, %c1_294, %c0_295] : memref<6x24x128xbf16, #tpu.memory_space<vmem>>, vector<4x2x128xbf16>
    %c0_296 = arith.constant 0 : index
    %c0_297 = arith.constant 0 : index
    %c896_298 = arith.constant 896 : index
    %181 = vector.load %arg21[%c0_296, %c0_297, %c896_298] : memref<4x8x1920xbf16, #tpu.memory_space<vmem>>, vector<4x2x128xbf16>
    tpu.vector_store %arg21[%c0_296, %c0_297, %c896_298], %180 {strides = array<i32>} : memref<4x8x1920xbf16, #tpu.memory_space<vmem>>, vector<4x2x128xbf16>,
    %c1_299 = arith.constant 1 : index
    %c5_300 = arith.constant 5 : index
    %c0_301 = arith.constant 0 : index
    %182 = vector.load %arg20[%c1_299, %c5_300, %c0_301] : memref<6x24x128xbf16, #tpu.memory_space<vmem>>, vector<4x2x128xbf16>
    %c0_302 = arith.constant 0 : index
    %c0_303 = arith.constant 0 : index
    %c1024_304 = arith.constant 1024 : index
    %183 = vector.load %arg21[%c0_302, %c0_303, %c1024_304] : memref<4x8x1920xbf16, #tpu.memory_space<vmem>>, vector<4x2x128xbf16>
    tpu.vector_store %arg21[%c0_302, %c0_303, %c1024_304], %182 {strides = array<i32>} : memref<4x8x1920xbf16, #tpu.memory_space<vmem>>, vector<4x2x128xbf16>,
    %c1_305 = arith.constant 1 : index
    %c2_306 = arith.constant 2 : index
    %c0_307 = arith.constant 0 : index
    %184 = vector.load %arg20[%c1_305, %c2_306, %c0_307] : memref<6x24x128xbf16, #tpu.memory_space<vmem>>, vector<4x2x128xbf16>
    %c0_308 = arith.constant 0 : index
    %c0_309 = arith.constant 0 : index
    %c1152_310 = arith.constant 1152 : index
    %185 = vector.load %arg21[%c0_308, %c0_309, %c1152_310] : memref<4x8x1920xbf16, #tpu.memory_space<vmem>>, vector<4x2x128xbf16>
    tpu.vector_store %arg21[%c0_308, %c0_309, %c1152_310], %184 {strides = array<i32>} : memref<4x8x1920xbf16, #tpu.memory_space<vmem>>, vector<4x2x128xbf16>,
    %c2_311 = arith.constant 2 : index
    %c0_312 = arith.constant 0 : index
    %c0_313 = arith.constant 0 : index
    %186 = vector.load %arg20[%c2_311, %c0_312, %c0_313] : memref<6x24x128xbf16, #tpu.memory_space<vmem>>, vector<4x2x128xbf16>
    %c0_314 = arith.constant 0 : index
    %c0_315 = arith.constant 0 : index
    %c1280_316 = arith.constant 1280 : index
    %187 = vector.load %arg21[%c0_314, %c0_315, %c1280_316] : memref<4x8x1920xbf16, #tpu.memory_space<vmem>>, vector<4x2x128xbf16>
    tpu.vector_store %arg21[%c0_314, %c0_315, %c1280_316], %186 {strides = array<i32>} : memref<4x8x1920xbf16, #tpu.memory_space<vmem>>, vector<4x2x128xbf16>,
    %c2_317 = arith.constant 2 : index
    %c4_318 = arith.constant 4 : index
    %c0_319 = arith.constant 0 : index
    %188 = vector.load %arg20[%c2_317, %c4_318, %c0_319] : memref<6x24x128xbf16, #tpu.memory_space<vmem>>, vector<4x2x128xbf16>
    %c0_320 = arith.constant 0 : index
    %c0_321 = arith.constant 0 : index
    %c1408_322 = arith.constant 1408 : index
    %189 = vector.load %arg21[%c0_320, %c0_321, %c1408_322] : memref<4x8x1920xbf16, #tpu.memory_space<vmem>>, vector<4x2x128xbf16>
    tpu.vector_store %arg21[%c0_320, %c0_321, %c1408_322], %188 {strides = array<i32>} : memref<4x8x1920xbf16, #tpu.memory_space<vmem>>, vector<4x2x128xbf16>,
    %c2_323 = arith.constant 2 : index
    %c1_324 = arith.constant 1 : index
    %c0_325 = arith.constant 0 : index
    %190 = vector.load %arg20[%c2_323, %c1_324, %c0_325] : memref<6x24x128xbf16, #tpu.memory_space<vmem>>, vector<4x2x128xbf16>
    %c0_326 = arith.constant 0 : index
    %c0_327 = arith.constant 0 : index
    %c1536_328 = arith.constant 1536 : index
    %191 = vector.load %arg21[%c0_326, %c0_327, %c1536_328] : memref<4x8x1920xbf16, #tpu.memory_space<vmem>>, vector<4x2x128xbf16>
    tpu.vector_store %arg21[%c0_326, %c0_327, %c1536_328], %190 {strides = array<i32>} : memref<4x8x1920xbf16, #tpu.memory_space<vmem>>, vector<4x2x128xbf16>,
    %c2_329 = arith.constant 2 : index
    %c5_330 = arith.constant 5 : index
    %c0_331 = arith.constant 0 : index
    %192 = vector.load %arg20[%c2_329, %c5_330, %c0_331] : memref<6x24x128xbf16, #tpu.memory_space<vmem>>, vector<4x2x128xbf16>
    %c0_332 = arith.constant 0 : index
    %c0_333 = arith.constant 0 : index
    %c1664_334 = arith.constant 1664 : index
    %193 = vector.load %arg21[%c0_332, %c0_333, %c1664_334] : memref<4x8x1920xbf16, #tpu.memory_space<vmem>>, vector<4x2x128xbf16>
    tpu.vector_store %arg21[%c0_332, %c0_333, %c1664_334], %192 {strides = array<i32>} : memref<4x8x1920xbf16, #tpu.memory_space<vmem>>, vector<4x2x128xbf16>,
    %c2_335 = arith.constant 2 : index
    %c2_336 = arith.constant 2 : index
    %c0_337 = arith.constant 0 : index
    %194 = vector.load %arg20[%c2_335, %c2_336, %c0_337] : memref<6x24x128xbf16, #tpu.memory_space<vmem>>, vector<4x2x128xbf16>
    %c0_338 = arith.constant 0 : index
    %c0_339 = arith.constant 0 : index
    %c1792_340 = arith.constant 1792 : index
    %195 = vector.load %arg21[%c0_338, %c0_339, %c1792_340] : memref<4x8x1920xbf16, #tpu.memory_space<vmem>>, vector<4x2x128xbf16>
    tpu.vector_store %arg21[%c0_338, %c0_339, %c1792_340], %194 {strides = array<i32>} : memref<4x8x1920xbf16, #tpu.memory_space<vmem>>, vector<4x2x128xbf16>,
    %c0_341 = arith.constant 0 : index
    %c0_342 = arith.constant 0 : index
    %c0_343 = arith.constant 0 : index
    %196 = vector.load %arg21[%c0_341, %c0_342, %c0_343] : memref<4x8x1920xbf16, #tpu.memory_space<vmem>>, vector<4x2x1920xbf16>
    %197 = vector.shape_cast %196 : vector<4x2x1920xbf16> to vector<8x1920xbf16>
    %c0_344 = arith.constant 0 : index
    %c0_345 = arith.constant 0 : index
    %198 = vector.load %arg9[%c0_344, %c0_345] : memref<1920x128xbf16, #tpu.memory_space<vmem>>, vector<1920x128xbf16>
    %cst_346 = arith.constant dense<0.000000e+00> : vector<8x128xf32>
    %199 = tpu.matmul %197, %198, %cst_346 {dimension_numbers = #tpu.dot_dimension_numbers<[1], [0], [0], [1], [0, 0, 1, 1], [], []>} : vector<8x1920xbf16>, vector<1920x128xbf16>, vector<8x128xf32> -> vector<8x128xf32>
    %c0_347 = arith.constant 0 : index
    %c0_348 = arith.constant 0 : index
    %200 = vector.load %arg10[%c0_347, %c0_348] : memref<1x128xf32, #tpu.memory_space<vmem>>, vector<1x128xf32>
    %201 = vector.broadcast %200 : vector<1x128xf32> to vector<8x128xf32>
    %202 = arith.addf %199, %201 : vector<8x128xf32>
    %cst_349 = arith.constant 2.000000e-01 : f32
    %203 = vector.broadcast %cst_349 : f32 to vector<8x128xf32>
    %204 = arith.mulf %203, %202 : vector<8x128xf32>
    %205 = arith.maximumf %202, %204 : vector<8x128xf32>
    %206 = arith.truncf %205 : vector<8x128xf32> to vector<8x128xbf16>
    %c1_350 = arith.constant 1 : index
    %c0_351 = arith.constant 0 : index
    %207 = vector.load %arg19[%c1_350, %c0_351] : memref<32x128xbf16, #tpu.memory_space<vmem>>, vector<8x128xbf16>
    tpu.vector_store %arg19[%c1_350, %c0_351], %206 {strides = array<i32>} : memref<32x128xbf16, #tpu.memory_space<vmem>>, vector<8x128xbf16>,
    %c1_352 = arith.constant 1 : index
    %c0_353 = arith.constant 0 : index
    %208 = vector.load %arg19[%c1_352, %c0_353] : memref<32x128xbf16, #tpu.memory_space<vmem>>, vector<8x128xbf16>
    %c0_354 = arith.constant 0 : index
    %c0_355 = arith.constant 0 : index
    %209 = vector.load %arg11[%c0_354, %c0_355] : memref<32x8xbf16, #tpu.memory_space<vmem>>, vector<32x8xbf16>
    %cst_356 = arith.constant dense<0.000000e+00> : vector<32x128xf32>
    %210 = tpu.matmul %209, %208, %cst_356 {dimension_numbers = #tpu.dot_dimension_numbers<[1], [0], [0], [1], [0, 0, 1, 1], [], []>} : vector<32x8xbf16>, vector<8x128xbf16>, vector<32x128xf32> -> vector<32x128xf32>
    %211 = arith.truncf %210 : vector<32x128xf32> to vector<32x128xbf16>
    %cst_357 = arith.constant 0.000000e+00 : bf16
    %212 = vector.broadcast %cst_357 : bf16 to vector<8x128xbf16>
    %c0_358 = arith.constant 0 : index
    %c0_359 = arith.constant 0 : index
    %c0_360 = arith.constant 0 : index
    %213 = vector.load %arg20[%c0_358, %c0_359, %c0_360] : memref<6x24x128xbf16, #tpu.memory_space<vmem>>, vector<1x8x128xbf16>
    %214 = vector.shape_cast %213 : vector<1x8x128xbf16> to vector<8x128xbf16>
    %215 = vector.shape_cast %212 : vector<8x128xbf16> to vector<1x8x128xbf16>
    tpu.vector_store %arg20[%c0_358, %c0_359, %c0_360], %215 {strides = array<i32>} : memref<6x24x128xbf16, #tpu.memory_space<vmem>>, vector<1x8x128xbf16>,
    %c5_361 = arith.constant 5 : index
    %c0_362 = arith.constant 0 : index
    %c0_363 = arith.constant 0 : index
    %216 = vector.load %arg20[%c5_361, %c0_362, %c0_363] : memref<6x24x128xbf16, #tpu.memory_space<vmem>>, vector<1x8x128xbf16>
    %217 = vector.shape_cast %216 : vector<1x8x128xbf16> to vector<8x128xbf16>
    %218 = vector.shape_cast %212 : vector<8x128xbf16> to vector<1x8x128xbf16>
    tpu.vector_store %arg20[%c5_361, %c0_362, %c0_363], %218 {strides = array<i32>} : memref<6x24x128xbf16, #tpu.memory_space<vmem>>, vector<1x8x128xbf16>,
    %219 = vector.extract_strided_slice %211 {offsets = [0, 0], sizes = [8, 128], strides = [1, 1]} : vector<32x128xbf16> to vector<8x128xbf16>
    %c1_364 = arith.constant 1 : index
    %c0_365 = arith.constant 0 : index
    %c0_366 = arith.constant 0 : index
    %220 = vector.load %arg20[%c1_364, %c0_365, %c0_366] : memref<6x24x128xbf16, #tpu.memory_space<vmem>>, vector<1x8x128xbf16>
    %221 = vector.shape_cast %220 : vector<1x8x128xbf16> to vector<8x128xbf16>
    %222 = vector.shape_cast %219 : vector<8x128xbf16> to vector<1x8x128xbf16>
    tpu.vector_store %arg20[%c1_364, %c0_365, %c0_366], %222 {strides = array<i32>} : memref<6x24x128xbf16, #tpu.memory_space<vmem>>, vector<1x8x128xbf16>,
    %223 = vector.extract_strided_slice %211 {offsets = [8, 0], sizes = [8, 128], strides = [1, 1]} : vector<32x128xbf16> to vector<8x128xbf16>
    %c2_367 = arith.constant 2 : index
    %c0_368 = arith.constant 0 : index
    %c0_369 = arith.constant 0 : index
    %224 = vector.load %arg20[%c2_367, %c0_368, %c0_369] : memref<6x24x128xbf16, #tpu.memory_space<vmem>>, vector<1x8x128xbf16>
    %225 = vector.shape_cast %224 : vector<1x8x128xbf16> to vector<8x128xbf16>
    %226 = vector.shape_cast %223 : vector<8x128xbf16> to vector<1x8x128xbf16>
    tpu.vector_store %arg20[%c2_367, %c0_368, %c0_369], %226 {strides = array<i32>} : memref<6x24x128xbf16, #tpu.memory_space<vmem>>, vector<1x8x128xbf16>,
    %227 = vector.extract_strided_slice %211 {offsets = [16, 0], sizes = [8, 128], strides = [1, 1]} : vector<32x128xbf16> to vector<8x128xbf16>
    %c3_370 = arith.constant 3 : index
    %c0_371 = arith.constant 0 : index
    %c0_372 = arith.constant 0 : index
    %228 = vector.load %arg20[%c3_370, %c0_371, %c0_372] : memref<6x24x128xbf16, #tpu.memory_space<vmem>>, vector<1x8x128xbf16>
    %229 = vector.shape_cast %228 : vector<1x8x128xbf16> to vector<8x128xbf16>
    %230 = vector.shape_cast %227 : vector<8x128xbf16> to vector<1x8x128xbf16>
    tpu.vector_store %arg20[%c3_370, %c0_371, %c0_372], %230 {strides = array<i32>} : memref<6x24x128xbf16, #tpu.memory_space<vmem>>, vector<1x8x128xbf16>,
    %231 = vector.extract_strided_slice %211 {offsets = [24, 0], sizes = [8, 128], strides = [1, 1]} : vector<32x128xbf16> to vector<8x128xbf16>
    %c4_373 = arith.constant 4 : index
    %c0_374 = arith.constant 0 : index
    %c0_375 = arith.constant 0 : index
    %232 = vector.load %arg20[%c4_373, %c0_374, %c0_375] : memref<6x24x128xbf16, #tpu.memory_space<vmem>>, vector<1x8x128xbf16>
    %233 = vector.shape_cast %232 : vector<1x8x128xbf16> to vector<8x128xbf16>
    %234 = vector.shape_cast %231 : vector<8x128xbf16> to vector<1x8x128xbf16>
    tpu.vector_store %arg20[%c4_373, %c0_374, %c0_375], %234 {strides = array<i32>} : memref<6x24x128xbf16, #tpu.memory_space<vmem>>, vector<1x8x128xbf16>,
    %c0_376 = arith.constant 0 : index
    %c0_377 = arith.constant 0 : index
    %c0_378 = arith.constant 0 : index
    %235 = vector.load %arg20[%c0_376, %c0_377, %c0_378] : memref<6x24x128xbf16, #tpu.memory_space<vmem>>, vector<4x1x128xbf16>
    %c0_379 = arith.constant 0 : index
    %c0_380 = arith.constant 0 : index
    %c0_381 = arith.constant 0 : index
    %236 = vector.load %arg21[%c0_379, %c0_380, %c0_381] : memref<4x8x1920xbf16, #tpu.memory_space<vmem>>, vector<4x1x128xbf16>
    tpu.vector_store %arg21[%c0_379, %c0_380, %c0_381], %235 {strides = array<i32>} : memref<4x8x1920xbf16, #tpu.memory_space<vmem>>, vector<4x1x128xbf16>,
    %c0_382 = arith.constant 0 : index
    %c4_383 = arith.constant 4 : index
    %c0_384 = arith.constant 0 : index
    %237 = vector.load %arg20[%c0_382, %c4_383, %c0_384] : memref<6x24x128xbf16, #tpu.memory_space<vmem>>, vector<4x1x128xbf16>
    %c0_385 = arith.constant 0 : index
    %c0_386 = arith.constant 0 : index
    %c128_387 = arith.constant 128 : index
    %238 = vector.load %arg21[%c0_385, %c0_386, %c128_387] : memref<4x8x1920xbf16, #tpu.memory_space<vmem>>, vector<4x1x128xbf16>
    tpu.vector_store %arg21[%c0_385, %c0_386, %c128_387], %237 {strides = array<i32>} : memref<4x8x1920xbf16, #tpu.memory_space<vmem>>, vector<4x1x128xbf16>,
    %c0_388 = arith.constant 0 : index
    %c1_389 = arith.constant 1 : index
    %c0_390 = arith.constant 0 : index
    %239 = vector.load %arg20[%c0_388, %c1_389, %c0_390] : memref<6x24x128xbf16, #tpu.memory_space<vmem>>, vector<4x1x128xbf16>
    %c0_391 = arith.constant 0 : index
    %c0_392 = arith.constant 0 : index
    %c256_393 = arith.constant 256 : index
    %240 = vector.load %arg21[%c0_391, %c0_392, %c256_393] : memref<4x8x1920xbf16, #tpu.memory_space<vmem>>, vector<4x1x128xbf16>
    tpu.vector_store %arg21[%c0_391, %c0_392, %c256_393], %239 {strides = array<i32>} : memref<4x8x1920xbf16, #tpu.memory_space<vmem>>, vector<4x1x128xbf16>,
    %c0_394 = arith.constant 0 : index
    %c5_395 = arith.constant 5 : index
    %c0_396 = arith.constant 0 : index
    %241 = vector.load %arg20[%c0_394, %c5_395, %c0_396] : memref<6x24x128xbf16, #tpu.memory_space<vmem>>, vector<4x1x128xbf16>
    %c0_397 = arith.constant 0 : index
    %c0_398 = arith.constant 0 : index
    %c384_399 = arith.constant 384 : index
    %242 = vector.load %arg21[%c0_397, %c0_398, %c384_399] : memref<4x8x1920xbf16, #tpu.memory_space<vmem>>, vector<4x1x128xbf16>
    tpu.vector_store %arg21[%c0_397, %c0_398, %c384_399], %241 {strides = array<i32>} : memref<4x8x1920xbf16, #tpu.memory_space<vmem>>, vector<4x1x128xbf16>,
    %c0_400 = arith.constant 0 : index
    %c2_401 = arith.constant 2 : index
    %c0_402 = arith.constant 0 : index
    %243 = vector.load %arg20[%c0_400, %c2_401, %c0_402] : memref<6x24x128xbf16, #tpu.memory_space<vmem>>, vector<4x1x128xbf16>
    %c0_403 = arith.constant 0 : index
    %c0_404 = arith.constant 0 : index
    %c512_405 = arith.constant 512 : index
    %244 = vector.load %arg21[%c0_403, %c0_404, %c512_405] : memref<4x8x1920xbf16, #tpu.memory_space<vmem>>, vector<4x1x128xbf16>
    tpu.vector_store %arg21[%c0_403, %c0_404, %c512_405], %243 {strides = array<i32>} : memref<4x8x1920xbf16, #tpu.memory_space<vmem>>, vector<4x1x128xbf16>,
    %c1_406 = arith.constant 1 : index
    %c0_407 = arith.constant 0 : index
    %c0_408 = arith.constant 0 : index
    %245 = vector.load %arg20[%c1_406, %c0_407, %c0_408] : memref<6x24x128xbf16, #tpu.memory_space<vmem>>, vector<4x1x128xbf16>
    %c0_409 = arith.constant 0 : index
    %c0_410 = arith.constant 0 : index
    %c640_411 = arith.constant 640 : index
    %246 = vector.load %arg21[%c0_409, %c0_410, %c640_411] : memref<4x8x1920xbf16, #tpu.memory_space<vmem>>, vector<4x1x128xbf16>
    tpu.vector_store %arg21[%c0_409, %c0_410, %c640_411], %245 {strides = array<i32>} : memref<4x8x1920xbf16, #tpu.memory_space<vmem>>, vector<4x1x128xbf16>,
    %c1_412 = arith.constant 1 : index
    %c4_413 = arith.constant 4 : index
    %c0_414 = arith.constant 0 : index
    %247 = vector.load %arg20[%c1_412, %c4_413, %c0_414] : memref<6x24x128xbf16, #tpu.memory_space<vmem>>, vector<4x1x128xbf16>
    %c0_415 = arith.constant 0 : index
    %c0_416 = arith.constant 0 : index
    %c768_417 = arith.constant 768 : index
    %248 = vector.load %arg21[%c0_415, %c0_416, %c768_417] : memref<4x8x1920xbf16, #tpu.memory_space<vmem>>, vector<4x1x128xbf16>
    tpu.vector_store %arg21[%c0_415, %c0_416, %c768_417], %247 {strides = array<i32>} : memref<4x8x1920xbf16, #tpu.memory_space<vmem>>, vector<4x1x128xbf16>,
    %c1_418 = arith.constant 1 : index
    %c1_419 = arith.constant 1 : index
    %c0_420 = arith.constant 0 : index
    %249 = vector.load %arg20[%c1_418, %c1_419, %c0_420] : memref<6x24x128xbf16, #tpu.memory_space<vmem>>, vector<4x1x128xbf16>
    %c0_421 = arith.constant 0 : index
    %c0_422 = arith.constant 0 : index
    %c896_423 = arith.constant 896 : index
    %250 = vector.load %arg21[%c0_421, %c0_422, %c896_423] : memref<4x8x1920xbf16, #tpu.memory_space<vmem>>, vector<4x1x128xbf16>
    tpu.vector_store %arg21[%c0_421, %c0_422, %c896_423], %249 {strides = array<i32>} : memref<4x8x1920xbf16, #tpu.memory_space<vmem>>, vector<4x1x128xbf16>,
    %c1_424 = arith.constant 1 : index
    %c5_425 = arith.constant 5 : index
    %c0_426 = arith.constant 0 : index
    %251 = vector.load %arg20[%c1_424, %c5_425, %c0_426] : memref<6x24x128xbf16, #tpu.memory_space<vmem>>, vector<4x1x128xbf16>
    %c0_427 = arith.constant 0 : index
    %c0_428 = arith.constant 0 : index
    %c1024_429 = arith.constant 1024 : index
    %252 = vector.load %arg21[%c0_427, %c0_428, %c1024_429] : memref<4x8x1920xbf16, #tpu.memory_space<vmem>>, vector<4x1x128xbf16>
    tpu.vector_store %arg21[%c0_427, %c0_428, %c1024_429], %251 {strides = array<i32>} : memref<4x8x1920xbf16, #tpu.memory_space<vmem>>, vector<4x1x128xbf16>,
    %c1_430 = arith.constant 1 : index
    %c2_431 = arith.constant 2 : index
    %c0_432 = arith.constant 0 : index
    %253 = vector.load %arg20[%c1_430, %c2_431, %c0_432] : memref<6x24x128xbf16, #tpu.memory_space<vmem>>, vector<4x1x128xbf16>
    %c0_433 = arith.constant 0 : index
    %c0_434 = arith.constant 0 : index
    %c1152_435 = arith.constant 1152 : index
    %254 = vector.load %arg21[%c0_433, %c0_434, %c1152_435] : memref<4x8x1920xbf16, #tpu.memory_space<vmem>>, vector<4x1x128xbf16>
    tpu.vector_store %arg21[%c0_433, %c0_434, %c1152_435], %253 {strides = array<i32>} : memref<4x8x1920xbf16, #tpu.memory_space<vmem>>, vector<4x1x128xbf16>,
    %c2_436 = arith.constant 2 : index
    %c0_437 = arith.constant 0 : index
    %c0_438 = arith.constant 0 : index
    %255 = vector.load %arg20[%c2_436, %c0_437, %c0_438] : memref<6x24x128xbf16, #tpu.memory_space<vmem>>, vector<4x1x128xbf16>
    %c0_439 = arith.constant 0 : index
    %c0_440 = arith.constant 0 : index
    %c1280_441 = arith.constant 1280 : index
    %256 = vector.load %arg21[%c0_439, %c0_440, %c1280_441] : memref<4x8x1920xbf16, #tpu.memory_space<vmem>>, vector<4x1x128xbf16>
    tpu.vector_store %arg21[%c0_439, %c0_440, %c1280_441], %255 {strides = array<i32>} : memref<4x8x1920xbf16, #tpu.memory_space<vmem>>, vector<4x1x128xbf16>,
    %c2_442 = arith.constant 2 : index
    %c4_443 = arith.constant 4 : index
    %c0_444 = arith.constant 0 : index
    %257 = vector.load %arg20[%c2_442, %c4_443, %c0_444] : memref<6x24x128xbf16, #tpu.memory_space<vmem>>, vector<4x1x128xbf16>
    %c0_445 = arith.constant 0 : index
    %c0_446 = arith.constant 0 : index
    %c1408_447 = arith.constant 1408 : index
    %258 = vector.load %arg21[%c0_445, %c0_446, %c1408_447] : memref<4x8x1920xbf16, #tpu.memory_space<vmem>>, vector<4x1x128xbf16>
    tpu.vector_store %arg21[%c0_445, %c0_446, %c1408_447], %257 {strides = array<i32>} : memref<4x8x1920xbf16, #tpu.memory_space<vmem>>, vector<4x1x128xbf16>,
    %c2_448 = arith.constant 2 : index
    %c1_449 = arith.constant 1 : index
    %c0_450 = arith.constant 0 : index
    %259 = vector.load %arg20[%c2_448, %c1_449, %c0_450] : memref<6x24x128xbf16, #tpu.memory_space<vmem>>, vector<4x1x128xbf16>
    %c0_451 = arith.constant 0 : index
    %c0_452 = arith.constant 0 : index
    %c1536_453 = arith.constant 1536 : index
    %260 = vector.load %arg21[%c0_451, %c0_452, %c1536_453] : memref<4x8x1920xbf16, #tpu.memory_space<vmem>>, vector<4x1x128xbf16>
    tpu.vector_store %arg21[%c0_451, %c0_452, %c1536_453], %259 {strides = array<i32>} : memref<4x8x1920xbf16, #tpu.memory_space<vmem>>, vector<4x1x128xbf16>,
    %c2_454 = arith.constant 2 : index
    %c5_455 = arith.constant 5 : index
    %c0_456 = arith.constant 0 : index
    %261 = vector.load %arg20[%c2_454, %c5_455, %c0_456] : memref<6x24x128xbf16, #tpu.memory_space<vmem>>, vector<4x1x128xbf16>
    %c0_457 = arith.constant 0 : index
    %c0_458 = arith.constant 0 : index
    %c1664_459 = arith.constant 1664 : index
    %262 = vector.load %arg21[%c0_457, %c0_458, %c1664_459] : memref<4x8x1920xbf16, #tpu.memory_space<vmem>>, vector<4x1x128xbf16>
    tpu.vector_store %arg21[%c0_457, %c0_458, %c1664_459], %261 {strides = array<i32>} : memref<4x8x1920xbf16, #tpu.memory_space<vmem>>, vector<4x1x128xbf16>,
    %c2_460 = arith.constant 2 : index
    %c2_461 = arith.constant 2 : index
    %c0_462 = arith.constant 0 : index
    %263 = vector.load %arg20[%c2_460, %c2_461, %c0_462] : memref<6x24x128xbf16, #tpu.memory_space<vmem>>, vector<4x1x128xbf16>
    %c0_463 = arith.constant 0 : index
    %c0_464 = arith.constant 0 : index
    %c1792_465 = arith.constant 1792 : index
    %264 = vector.load %arg21[%c0_463, %c0_464, %c1792_465] : memref<4x8x1920xbf16, #tpu.memory_space<vmem>>, vector<4x1x128xbf16>
    tpu.vector_store %arg21[%c0_463, %c0_464, %c1792_465], %263 {strides = array<i32>} : memref<4x8x1920xbf16, #tpu.memory_space<vmem>>, vector<4x1x128xbf16>,
    %c0_466 = arith.constant 0 : index
    %c0_467 = arith.constant 0 : index
    %c0_468 = arith.constant 0 : index
    %265 = vector.load %arg21[%c0_466, %c0_467, %c0_468] : memref<4x8x1920xbf16, #tpu.memory_space<vmem>>, vector<4x1x1920xbf16>
    %266 = vector.shape_cast %265 : vector<4x1x1920xbf16> to vector<4x1920xbf16>
    %c0_469 = arith.constant 0 : index
    %c0_470 = arith.constant 0 : index
    %267 = vector.load %arg12[%c0_469, %c0_470] : memref<1920x128xbf16, #tpu.memory_space<vmem>>, vector<1920x128xbf16>
    %cst_471 = arith.constant dense<0.000000e+00> : vector<4x128xf32>
    %268 = tpu.matmul %266, %267, %cst_471 {dimension_numbers = #tpu.dot_dimension_numbers<[1], [0], [0], [1], [0, 0, 1, 1], [], []>} : vector<4x1920xbf16>, vector<1920x128xbf16>, vector<4x128xf32> -> vector<4x128xf32>
    %c0_472 = arith.constant 0 : index
    %c0_473 = arith.constant 0 : index
    %269 = vector.load %arg13[%c0_472, %c0_473] : memref<1x128xf32, #tpu.memory_space<vmem>>, vector<1x128xf32>
    %270 = vector.broadcast %269 : vector<1x128xf32> to vector<4x128xf32>
    %271 = arith.addf %268, %270 : vector<4x128xf32>
    %cst_474 = arith.constant 2.000000e-01 : f32
    %272 = vector.broadcast %cst_474 : f32 to vector<4x128xf32>
    %273 = arith.mulf %272, %271 : vector<4x128xf32>
    %274 = arith.maximumf %271, %273 : vector<4x128xf32>
    %275 = arith.truncf %274 : vector<4x128xf32> to vector<4x128xbf16>
    %c1_475 = arith.constant 1 : index
    %c0_476 = arith.constant 0 : index
    %276 = vector.load %arg19[%c1_475, %c0_476] : memref<32x128xbf16, #tpu.memory_space<vmem>>, vector<4x128xbf16>
    tpu.vector_store %arg19[%c1_475, %c0_476], %275 {strides = array<i32>} : memref<32x128xbf16, #tpu.memory_space<vmem>>, vector<4x128xbf16>,
    %cst_477 = arith.constant 0.000000e+00 : bf16
    %277 = vector.broadcast %cst_477 : bf16 to vector<1x128xbf16>
    %c0_478 = arith.constant 0 : index
    %c0_479 = arith.constant 0 : index
    %278 = vector.load %arg19[%c0_478, %c0_479] : memref<32x128xbf16, #tpu.memory_space<vmem>>, vector<1x128xbf16>
    tpu.vector_store %arg19[%c0_478, %c0_479], %277 {strides = array<i32>} : memref<32x128xbf16, #tpu.memory_space<vmem>>, vector<1x128xbf16>,
    %c5_480 = arith.constant 5 : index
    %c0_481 = arith.constant 0 : index
    %279 = vector.load %arg19[%c5_480, %c0_481] : memref<32x128xbf16, #tpu.memory_space<vmem>>, vector<1x128xbf16>
    tpu.vector_store %arg19[%c5_480, %c0_481], %277 {strides = array<i32>} : memref<32x128xbf16, #tpu.memory_space<vmem>>, vector<1x128xbf16>,
    %c0_482 = arith.constant 0 : index
    %c0_483 = arith.constant 0 : index
    %280 = vector.load %arg19[%c0_482, %c0_483] : memref<32x128xbf16, #tpu.memory_space<vmem>>, vector<4x128xbf16>
    %c1_484 = arith.constant 1 : index
    %c0_485 = arith.constant 0 : index
    %281 = vector.load %arg19[%c1_484, %c0_485] : memref<32x128xbf16, #tpu.memory_space<vmem>>, vector<4x128xbf16>
    %c2_486 = arith.constant 2 : index
    %c0_487 = arith.constant 0 : index
    %282 = vector.load %arg19[%c2_486, %c0_487] : memref<32x128xbf16, #tpu.memory_space<vmem>>, vector<4x128xbf16>
    %283 = tpu.concatenate %280, %281, %282 in 1 : vector<4x128xbf16>, vector<4x128xbf16>, vector<4x128xbf16> -> vector<4x384xbf16>
    %c0_488 = arith.constant 0 : index
    %c0_489 = arith.constant 0 : index
    %284 = vector.load %arg14[%c0_488, %c0_489] : memref<384x128xbf16, #tpu.memory_space<vmem>>, vector<384x128xbf16>
    %cst_490 = arith.constant dense<0.000000e+00> : vector<4x128xf32>
    %285 = tpu.matmul %283, %284, %cst_490 {dimension_numbers = #tpu.dot_dimension_numbers<[1], [0], [0], [1], [0, 0, 1, 1], [], []>} : vector<4x384xbf16>, vector<384x128xbf16>, vector<4x128xf32> -> vector<4x128xf32>
    %c0_491 = arith.constant 0 : index
    %c0_492 = arith.constant 0 : index
    %286 = vector.load %arg15[%c0_491, %c0_492] : memref<1x128xf32, #tpu.memory_space<vmem>>, vector<1x128xf32>
    %287 = vector.broadcast %286 : vector<1x128xf32> to vector<4x128xf32>
    %288 = arith.addf %285, %287 : vector<4x128xf32>
    %cst_493 = arith.constant 2.000000e-01 : f32
    %289 = vector.broadcast %cst_493 : f32 to vector<4x128xf32>
    %290 = arith.mulf %289, %288 : vector<4x128xf32>
    %291 = arith.maximumf %288, %290 : vector<4x128xf32>
    %292 = arith.truncf %291 : vector<4x128xf32> to vector<4x128xbf16>
    %c1_494 = arith.constant 1 : index
    %c0_495 = arith.constant 0 : index
    %293 = vector.load %arg19[%c1_494, %c0_495] : memref<32x128xbf16, #tpu.memory_space<vmem>>, vector<4x128xbf16>
    tpu.vector_store %arg19[%c1_494, %c0_495], %292 {strides = array<i32>} : memref<32x128xbf16, #tpu.memory_space<vmem>>, vector<4x128xbf16>,
    %cst_496 = arith.constant 0.000000e+00 : bf16
    %294 = vector.broadcast %cst_496 : bf16 to vector<1x128xbf16>
    %c0_497 = arith.constant 0 : index
    %c0_498 = arith.constant 0 : index
    %295 = vector.load %arg19[%c0_497, %c0_498] : memref<32x128xbf16, #tpu.memory_space<vmem>>, vector<1x128xbf16>
    tpu.vector_store %arg19[%c0_497, %c0_498], %294 {strides = array<i32>} : memref<32x128xbf16, #tpu.memory_space<vmem>>, vector<1x128xbf16>,
    %c5_499 = arith.constant 5 : index
    %c0_500 = arith.constant 0 : index
    %296 = vector.load %arg19[%c5_499, %c0_500] : memref<32x128xbf16, #tpu.memory_space<vmem>>, vector<1x128xbf16>
    tpu.vector_store %arg19[%c5_499, %c0_500], %294 {strides = array<i32>} : memref<32x128xbf16, #tpu.memory_space<vmem>>, vector<1x128xbf16>,
    %c0_501 = arith.constant 0 : index
    %c0_502 = arith.constant 0 : index
    %297 = vector.load %arg19[%c0_501, %c0_502] : memref<32x128xbf16, #tpu.memory_space<vmem>>, vector<4x128xbf16>
    %c1_503 = arith.constant 1 : index
    %c0_504 = arith.constant 0 : index
    %298 = vector.load %arg19[%c1_503, %c0_504] : memref<32x128xbf16, #tpu.memory_space<vmem>>, vector<4x128xbf16>
    %c2_505 = arith.constant 2 : index
    %c0_506 = arith.constant 0 : index
    %299 = vector.load %arg19[%c2_505, %c0_506] : memref<32x128xbf16, #tpu.memory_space<vmem>>, vector<4x128xbf16>
    %300 = tpu.concatenate %297, %298, %299 in 1 : vector<4x128xbf16>, vector<4x128xbf16>, vector<4x128xbf16> -> vector<4x384xbf16>
    %c0_507 = arith.constant 0 : index
    %c0_508 = arith.constant 0 : index
    %301 = vector.load %arg16[%c0_507, %c0_508] : memref<384x128xbf16, #tpu.memory_space<vmem>>, vector<384x128xbf16>
    %cst_509 = arith.constant dense<0.000000e+00> : vector<4x128xf32>
    %302 = tpu.matmul %300, %301, %cst_509 {dimension_numbers = #tpu.dot_dimension_numbers<[1], [0], [0], [1], [0, 0, 1, 1], [], []>} : vector<4x384xbf16>, vector<384x128xbf16>, vector<4x128xf32> -> vector<4x128xf32>
    %c0_510 = arith.constant 0 : index
    %c0_511 = arith.constant 0 : index
    %303 = vector.load %arg17[%c0_510, %c0_511] : memref<1x128xf32, #tpu.memory_space<vmem>>, vector<1x128xf32>
    %304 = vector.broadcast %303 : vector<1x128xf32> to vector<4x128xf32>
    %305 = arith.addf %302, %304 : vector<4x128xf32>
    %306 = arith.negf %305 : vector<4x128xf32>
    %307 = math.exp %306 : vector<4x128xf32>
    %cst_512 = arith.constant 1.000000e+00 : f32
    %308 = vector.broadcast %cst_512 : f32 to vector<4x128xf32>
    %309 = arith.addf %308, %307 : vector<4x128xf32>
    %310 = arith.divf %308, %309 : vector<4x128xf32>
    %311 = vector.extract_strided_slice %310 {offsets = [0, 0], sizes = [1, 128], strides = [1, 1]} : vector<4x128xf32> to vector<1x128xf32>
    %c0_513 = arith.constant 0 : index
    %c0_514 = arith.constant 0 : index
    %c0_515 = arith.constant 0 : index
    %c0_516 = arith.constant 0 : index
    %312 = vector.load %arg18[%c0_513, %c0_514, %c0_515, %c0_516] : memref<1x4x1x128xf32, #tpu.memory_space<vmem>>, vector<1x1x1x128xf32>
    %313 = vector.shape_cast %312 : vector<1x1x1x128xf32> to vector<1x128xf32>
    %314 = vector.shape_cast %311 : vector<1x128xf32> to vector<1x1x1x128xf32>
    tpu.vector_store %arg18[%c0_513, %c0_514, %c0_515, %c0_516], %314 {strides = array<i32>} : memref<1x4x1x128xf32, #tpu.memory_space<vmem>>, vector<1x1x1x128xf32>,
    %315 = vector.extract_strided_slice %310 {offsets = [1, 0], sizes = [1, 128], strides = [1, 1]} : vector<4x128xf32> to vector<1x128xf32>
    %c0_517 = arith.constant 0 : index
    %c1_518 = arith.constant 1 : index
    %c0_519 = arith.constant 0 : index
    %c0_520 = arith.constant 0 : index
    %316 = vector.load %arg18[%c0_517, %c1_518, %c0_519, %c0_520] : memref<1x4x1x128xf32, #tpu.memory_space<vmem>>, vector<1x1x1x128xf32>
    %317 = vector.shape_cast %316 : vector<1x1x1x128xf32> to vector<1x128xf32>
    %318 = vector.shape_cast %315 : vector<1x128xf32> to vector<1x1x1x128xf32>
    tpu.vector_store %arg18[%c0_517, %c1_518, %c0_519, %c0_520], %318 {strides = array<i32>} : memref<1x4x1x128xf32, #tpu.memory_space<vmem>>, vector<1x1x1x128xf32>,
    %319 = vector.extract_strided_slice %310 {offsets = [2, 0], sizes = [1, 128], strides = [1, 1]} : vector<4x128xf32> to vector<1x128xf32>
    %c0_521 = arith.constant 0 : index
    %c2_522 = arith.constant 2 : index
    %c0_523 = arith.constant 0 : index
    %c0_524 = arith.constant 0 : index
    %320 = vector.load %arg18[%c0_521, %c2_522, %c0_523, %c0_524] : memref<1x4x1x128xf32, #tpu.memory_space<vmem>>, vector<1x1x1x128xf32>
    %321 = vector.shape_cast %320 : vector<1x1x1x128xf32> to vector<1x128xf32>
    %322 = vector.shape_cast %319 : vector<1x128xf32> to vector<1x1x1x128xf32>
    tpu.vector_store %arg18[%c0_521, %c2_522, %c0_523, %c0_524], %322 {strides = array<i32>} : memref<1x4x1x128xf32, #tpu.memory_space<vmem>>, vector<1x1x1x128xf32>,
    %323 = vector.extract_strided_slice %310 {offsets = [3, 0], sizes = [1, 128], strides = [1, 1]} : vector<4x128xf32> to vector<1x128xf32>
    %c0_525 = arith.constant 0 : index
    %c3_526 = arith.constant 3 : index
    %c0_527 = arith.constant 0 : index
    %c0_528 = arith.constant 0 : index
    %324 = vector.load %arg18[%c0_525, %c3_526, %c0_527, %c0_528] : memref<1x4x1x128xf32, #tpu.memory_space<vmem>>, vector<1x1x1x128xf32>
    %325 = vector.shape_cast %324 : vector<1x1x1x128xf32> to vector<1x128xf32>
    %326 = vector.shape_cast %323 : vector<1x128xf32> to vector<1x1x1x128xf32>
    tpu.vector_store %arg18[%c0_525, %c3_526, %c0_527, %c0_528], %326 {strides = array<i32>} : memref<1x4x1x128xf32, #tpu.memory_space<vmem>>, vector<1x1x1x128xf32>,
    return
  }
  func.func @transform_0(%arg0: i32) -> (i32, i32, i32, i32) {
    %c0_i32 = arith.constant 0 : i32
    %c0_i32_0 = arith.constant 0 : i32
    %c0_i32_1 = arith.constant 0 : i32
    %c0_i32_2 = arith.constant 0 : i32
    return %arg0, %c0_i32, %c0_i32_0, %c0_i32_1 : i32, i32, i32, i32
  }
  func.func @transform_1(%arg0: i32) -> (i32, i32) {
    %c0_i32 = arith.constant 0 : i32
    %c0_i32_0 = arith.constant 0 : i32
    %c0_i32_1 = arith.constant 0 : i32
    return %c0_i32, %c0_i32_0 : i32, i32
  }
  func.func @transform_2(%arg0: i32) -> (i32, i32) {
    %c0_i32 = arith.constant 0 : i32
    %c0_i32_0 = arith.constant 0 : i32
    %c0_i32_1 = arith.constant 0 : i32
    return %c0_i32, %c0_i32_0 : i32, i32
  }
  func.func @transform_3(%arg0: i32) -> (i32, i32) {
    %c0_i32 = arith.constant 0 : i32
    %c0_i32_0 = arith.constant 0 : i32
    %c0_i32_1 = arith.constant 0 : i32
    return %c0_i32, %c0_i32_0 : i32, i32
  }
  func.func @transform_4(%arg0: i32) -> (i32, i32) {
    %c0_i32 = arith.constant 0 : i32
    %c0_i32_0 = arith.constant 0 : i32
    %c0_i32_1 = arith.constant 0 : i32
    return %c0_i32, %c0_i32_0 : i32, i32
  }
  func.func @transform_5(%arg0: i32) -> (i32, i32) {
    %c0_i32 = arith.constant 0 : i32
    %c0_i32_0 = arith.constant 0 : i32
    %c0_i32_1 = arith.constant 0 : i32
    return %c0_i32, %c0_i32_0 : i32, i32
  }
  func.func @transform_6(%arg0: i32) -> (i32, i32) {
    %c0_i32 = arith.constant 0 : i32
    %c0_i32_0 = arith.constant 0 : i32
    %c0_i32_1 = arith.constant 0 : i32
    return %c0_i32, %c0_i32_0 : i32, i32
  }
  func.func @transform_7(%arg0: i32) -> (i32, i32) {
    %c0_i32 = arith.constant 0 : i32
    %c0_i32_0 = arith.constant 0 : i32
    %c0_i32_1 = arith.constant 0 : i32
    return %c0_i32, %c0_i32_0 : i32, i32
  }
  func.func @transform_8(%arg0: i32) -> (i32, i32) {
    %c0_i32 = arith.constant 0 : i32
    %c0_i32_0 = arith.constant 0 : i32
    %c0_i32_1 = arith.constant 0 : i32
    return %c0_i32, %c0_i32_0 : i32, i32
  }
  func.func @transform_9(%arg0: i32) -> (i32, i32) {
    %c0_i32 = arith.constant 0 : i32
    %c0_i32_0 = arith.constant 0 : i32
    %c0_i32_1 = arith.constant 0 : i32
    return %c0_i32, %c0_i32_0 : i32, i32
  }
  func.func @transform_10(%arg0: i32) -> (i32, i32) {
    %c0_i32 = arith.constant 0 : i32
    %c0_i32_0 = arith.constant 0 : i32
    %c0_i32_1 = arith.constant 0 : i32
    return %c0_i32, %c0_i32_0 : i32, i32
  }
  func.func @transform_11(%arg0: i32) -> (i32, i32) {
    %c0_i32 = arith.constant 0 : i32
    %c0_i32_0 = arith.constant 0 : i32
    %c0_i32_1 = arith.constant 0 : i32
    return %c0_i32, %c0_i32_0 : i32, i32
  }
  func.func @transform_12(%arg0: i32) -> (i32, i32) {
    %c0_i32 = arith.constant 0 : i32
    %c0_i32_0 = arith.constant 0 : i32
    %c0_i32_1 = arith.constant 0 : i32
    return %c0_i32, %c0_i32_0 : i32, i32
  }
  func.func @transform_13(%arg0: i32) -> (i32, i32) {
    %c0_i32 = arith.constant 0 : i32
    %c0_i32_0 = arith.constant 0 : i32
    %c0_i32_1 = arith.constant 0 : i32
    return %c0_i32, %c0_i32_0 : i32, i32
  }
  func.func @transform_14(%arg0: i32) -> (i32, i32) {
    %c0_i32 = arith.constant 0 : i32
    %c0_i32_0 = arith.constant 0 : i32
    %c0_i32_1 = arith.constant 0 : i32
    return %c0_i32, %c0_i32_0 : i32, i32
  }
  func.func @transform_15(%arg0: i32) -> (i32, i32) {
    %c0_i32 = arith.constant 0 : i32
    %c0_i32_0 = arith.constant 0 : i32
    %c0_i32_1 = arith.constant 0 : i32
    return %c0_i32, %c0_i32_0 : i32, i32
  }
  func.func @transform_16(%arg0: i32) -> (i32, i32) {
    %c0_i32 = arith.constant 0 : i32
    %c0_i32_0 = arith.constant 0 : i32
    %c0_i32_1 = arith.constant 0 : i32
    return %c0_i32, %c0_i32_0 : i32, i32
  }
  func.func @transform_17(%arg0: i32) -> (i32, i32, i32, i32) {
    %c0_i32 = arith.constant 0 : i32
    %c0_i32_0 = arith.constant 0 : i32
    %c0_i32_1 = arith.constant 0 : i32
    %c0_i32_2 = arith.constant 0 : i32
    return %arg0, %c0_i32, %c0_i32_0, %c0_i32_1 : i32, i32, i32, i32
  }
}

</mosaic_0001>

<bundles_post_ra>
// kernel: _lambda_.1
= control target key start
LH: loop header
LB: loop body
LE: loop exit
PB: predicated region body
PF: predicated region fallthrough
CT: control target
= control target key end

     0   :  { %s16819_s0 = inlined_call_operand.vmem [shape: bf16[2,4,16,128], index: 0, kind: input, shape index: {}]   ;;  %s16820_s1 = inlined_call_operand.vmem [shape: bf16[96,64], index: 1, kind: input, shape index: {}]   ;;  %s16821_s2 = inlined_call_operand.hbm [shape: bf16[1920,128], index: 2, kind: input, shape index: {}]   ;;  %s16822_s3 = inlined_call_operand.vmem [shape: f32[1,128], index: 3, kind: input, shape index: {}]   ;;  %s16823_s4 = inlined_call_operand.vmem [shape: bf16[64,28], index: 4, kind: input, shape index: {}]   ;;  %s16824_s5 = inlined_call_operand.hbm [shape: bf16[1920,128], index: 5, kind: input, shape index: {}]   ;;  %s16825_s6 = inlined_call_operand.vmem [shape: f32[1,128], index: 6, kind: input, shape index: {}]   ;;  %s16826_s7 = inlined_call_operand.vmem [shape: bf16[32,16], index: 7, kind: input, shape index: {}]   ;;  %s16827_s8 = inlined_call_operand.hbm [shape: bf16[1920,128], index: 8, kind: input, shape index: {}]   ;;  %s16828_s9 = inlined_call_operand.vmem [shape: f32[1,128], index: 9, kind: input, shape index: {}]   ;;  %s16829_s10 = inlined_call_operand.vmem [shape: bf16[32,8], index: 10, kind: input, shape index: {}]   ;;  %s16830_s11 = inlined_call_operand.vmem [shape: bf16[1920,128], index: 11, kind: input, shape index: {}]   ;;  %s16831_s12 = inlined_call_operand.vmem [shape: f32[1,128], index: 12, kind: input, shape index: {}]   ;;  %s16832_s13 = inlined_call_operand.vmem [shape: bf16[384,128], index: 13, kind: input, shape index: {}]   ;;  %s16833_s14 = inlined_call_operand.vmem [shape: f32[1,128], index: 14, kind: input, shape index: {}]   ;;  %s16834_s15 = inlined_call_operand.vmem [shape: bf16[384,128], index: 15, kind: input, shape index: {}]   ;;  %s16835_s16 = inlined_call_operand.vmem [shape: f32[1,128], index: 16, kind: input, shape index: {}]   ;;  %s16836_s17 = inlined_call_operand.vmem [shape: f32[2,4,1,128], index: 17, kind: output, shape index: {}]  }
   0x1   :  { %16840 = sst [smem:[#allocation12_spill]] %s16819_s0 }
   0x2   :  { %16841 = sst [smem:[#allocation13_spill]] %s16820_s1 }
   0x3   :  { %22 = vsyncpa [#allocation6], 0 }
   0x4   :  { %23 = vsyncpa [#allocation8], 0  ;;  %s14908_s24 = smov 0  }
   0x5 LB: > { %s14914_s25 = sadd.s32 4294967295, %s14806_s24   ;;  %p12090_p0 = scmp.ge.s32.totalorder %s14806_s24, 1  ;;  %s14806_s24 = sphi %s14908_s24, %s29_s24  }
   0x6   : > { %p422_p1 = scmp.lt.s32.totalorder %s14806_s24, 3  ;;  %p14071_p2 = scmp.eq.s32.totalorder %s14914_s25, 0 }
   0x7   : > { %s14808_s27 = smov [#allocation7]   ;;  %s14809_s29 = smov [#allocation5]  }
   0x8   : > { %p14919_p3 = pnand %p12090_p0, %p422_p1  ;;  %s456_s28 = sshll.u32 %s14808_s27, 4  ;;  %s457_s28 = int_to_ptr.vmem [resolvable:$true] %s456_s28 }
   0x9   : > { %s437_s0 = sshll.u32 %s14809_s29, 4  ;;  %s14810_s18 = smov [#allocation9]   ;;  %s438_s0 = int_to_ptr.vmem [resolvable:$true] %s437_s0 }
   0xa   : > { %p14061_p4 = pneg %p14919_p3  ;;  %s475_s19 = sshll.u32 %s14810_s18, 4  ;;  %s14931_s19 = int_to_ptr.vmem [resolvable:$true] %s475_s19 }
   0xb   : > { %s14725_s1 = scalar_lea.vmem %s457_s28, 15360  ;;  %p14733_p10 = scmp.lt.s32.totalorder %s457_s28, %s457_s28 }
   0xc   : > { %p14927_p5 = pnand %p14071_p2, %p14061_p4  ;;  %p14726_p7 = scmp.ne.s32.totalorder %s457_s28, %s14725_s1 }
   0xd   : > { %p14734_p11 = scmp.lt.s32.totalorder %s14725_s1, %s14725_s1 }
   0xe   : > { %p14716_p6 = pneg %p14927_p5 }
   0xf   : > { %p14735_p12 = por %p14734_p11, %p14733_p10 }
  0x10   : > { %p14728_p8 = pnand %p14726_p7, %p14716_p6 }
  0x12   : > { %p14729_p9 = pneg %p14728_p8 }
  0x14   : > { %p14736_p13 = pnand %p14735_p12, %p14729_p9 }
  0x16   : > { %14739 = shalt.err (!%p14736_p13)
}
  0x17   : > { %s14811_s20 = smov 64   ;;  %s14812_s21 = smov 4  }
  0x18   : > { %14067 = dma.hbm_to_vmem [thread:$0]  (!%p14927_p5), %s16824_s5, 15360, %s457_s28, [#allocation8], %s14811_s20, %s14811_s20, %s14812_s21  }
  0x19   : > { %s14751_s27 = scalar_lea.vmem %s438_s0, 15360  ;;  %p14759_p7 = scmp.lt.s32.totalorder %s438_s0, %s438_s0 }
  0x1a   : > { %p14752_p0 = scmp.ne.s32.totalorder %s438_s0, %s14751_s27  ;;  %p14760_p8 = scmp.lt.s32.totalorder %s14751_s27, %s14751_s27 }
  0x1c   : > { %p14754_p1 = pnand %p14752_p0, %p14716_p6  ;;  %p14761_p10 = por %p14760_p8, %p14759_p7 }
  0x1e   : > { %p14755_p4 = pneg %p14754_p1 }
  0x20   : > { %p14762_p9 = pnand %p14761_p10, %p14755_p4 }
  0x22   : > { %14765 = shalt.err (!%p14762_p9)
}
  0x23   : > { %14064 = dma.hbm_to_vmem [thread:$0]  (!%p14927_p5), %s16821_s2, 15360, %s438_s0, [#allocation6], %s14811_s20, %s14811_s20, %s14812_s21  }
  0x24   : > { %s14777_s28 = scalar_lea.vmem %s14931_s19, 15360  ;;  %p14785_p0 = scmp.lt.s32.totalorder %s14931_s19, %s14931_s19 }
  0x25   : > { %p14778_p11 = scmp.ne.s32.totalorder %s14931_s19, %s14777_s28  ;;  %p14786_p1 = scmp.lt.s32.totalorder %s14777_s28, %s14777_s28 }
  0x27   : > { %p14780_p12 = pnand %p14778_p11, %p14716_p6  ;;  %p14787_p4 = por %p14786_p1, %p14785_p0 }
  0x29   : > { %p14781_p13 = pneg %p14780_p12 }
  0x2b   : > { %p14788_p7 = pnand %p14787_p4, %p14781_p13 }
  0x2d   : > { %14791 = shalt.err (!%p14788_p7)
}
  0x2e   : > { %14070 = dma.hbm_to_vmem [thread:$0]  (!%p14927_p5), %s16827_s8, 15360, %s14931_s19, [#allocation8], %s14811_s20, %s14811_s20, %s14812_s21  }
  0x2f   : > { %523 = sbr.rel (%p14919_p3) target bundleno = 2960 (0xb90), region = 88 }
  0x34   : > { %14797 = dma.done.wait (%p14071_p2), [#allocation6], 15360  }
  0x35   : > { %14799 = vsyncadd (%p14071_p2), [#allocation6], 4294951936 }
  0x36   : > { %14801 = dma.done.wait (%p14071_p2), [#allocation8], 30720  }
  0x37   : > { %14803 = vsyncadd (%p14071_p2), [#allocation8], 4294936576  ;;  %p582_p6 = scmp.lt.s32.totalorder %s14914_s25, 1  ;;  %s16844_s19 = sld [smem:[#allocation12_spill]]  ;;  %vm666_vm0 = vcmask 523264   ;;  %vm1078_vm1 = vcmask 1042432  }
  0x38   : > { %s16845_s27 = sld [smem:[#allocation13_spill]]  ;;  %vm1079_vm2 = vcmask 1046532   ;;  %vm841_vm3 = vcmask 1043456   ;;  %vm842_vm4 = vsmask.f32 3328  ;;  %v16838_v11 = vmov 0  }
  0x39   : > { %s16866_s25 = smov (!%p582_p6, %s14914_s25), 1  ;;  %vm15007_vm5 = vmor %vm1078_vm1, %vm1079_vm2  ;;  %772 = vst [vmem:[#allocation3] sm:$0xf] %v16838_v11  ;;  %vm872_vm6 = vcmask 1041408   ;;  %vm873_vm7 = vcmask 1045508   ;;  %v14105_v57 = vld [vmem:[#allocation5 + $0x78] sm:$0xff]  }
  0x3a   : > { %s13032_s26 = sshll.u32 %s16866_s25, 5  ;;  %773 = vst [vmem:[#allocation3 + $0x4] sm:$0xf] %v16838_v11  ;;  %774 = vst [vmem:[#allocation3 + $0x8] sm:$0xf] %v16838_v11  ;;  %v14106_v58 = vld [vmem:[#allocation5 + $0xf8] sm:$0xff]   ;;  %13114 = vmatprep.subr.bf16.mxu1 %v14105_v57 }
  0x3b   : > { %776 = vst [vmem:[#allocation3 + $0x3c] sm:$0xf] %v16838_v11  ;;  %777 = vst [vmem:[#allocation3 + $0x40] sm:$0xf] %v16838_v11  ;;  %vm971_vm9 = vsmask.f32 1280 }
  0x3c   : > { %778 = vst [vmem:[#allocation3 + $0x44] sm:$0xf] %v16838_v11  ;;  %vm15018_vm8 = vmand %vm841_vm3, %vm842_vm4  ;;  %v1101_v22 = vld [vmem:[#allocation4 + $0x10] sm:$0xf]  ;;  %vm972_vm10 = vsmask.f32 5392 }
  0x3d   : > { %s586_s20 = scalar_lea.vmem %s16844_s19, %s13032_s26  ;;  %vm15028_vm11 = vmor %vm872_vm6, %vm873_vm7  ;;  %v844_v47 = vld [vmem:[#allocation4] sm:$0xf]  ;;  %v895_v49 = vld [vmem:[#allocation4 + $0x4] sm:$0xf]  ;;  %vm4328_vm13 = vcmask 228352   ;;  %vm4341_vm7 = vcmask 1045504  }
  0x3e   : > { %v14095_v0 = vld [vmem:[%s586_s20 + $0x18] sm:$0xff]   ;;  %v14096_v1 = vld [vmem:[%s586_s20 + $0x10] sm:$0xff]   ;;  %v14097_v2 = vld [vmem:[%s586_s20 + $0x8] sm:$0xff]   ;;  %vm4257_vm14 = vsmask.f32 7938  ;;  %s12101_s28 = sshll.u32 %s16866_s25, 2 }
  0x3f   : > { %13883 = vmatprep.subr.bf16.mxu0 %v14095_v0  ;;  %v14099_v3 = vld [vmem:[%s16845_s27] sm:$0xff]   ;;  %v14100_v5 = vld [vmem:[%s16845_s27 + $0x8] sm:$0xff]   ;;  %v14101_v6 = vld [vmem:[%s16845_s27 + $0x10] sm:$0xff]   ;;  %vm4217_vm2 = vsmask.f32 4368  ;;  %s590_s26 = scalar_lea.vmem %s16836_s17, %s12101_s28 }
  0x40   : > { %13884 = vmatpush3.bf16.msra.mxu0 %v14095_v0  ;;  %13891 = vmatprep.mubr.msk.bf16.mxu0 %vm666_vm0, %v14099_v3  ;;  %v14098_v4 = vld [vmem:[%s586_s20] sm:$0xff]   ;;  %v14102_v7 = vld [vmem:[%s16845_s27 + $0x18] sm:$0xff]   ;;  %v14104_v9 = vld [vmem:[%s16845_s27 + $0x28] sm:$0xff]  }
  0x41   : > { %13885 = vmatprep.subr.bf16.mxu0 %v14096_v1  ;;  %v14103_v8 = vld [vmem:[%s16845_s27 + $0x20] sm:$0xff]   ;;  %v1062_v12 = vld [vmem:[#allocation3] sm:$0xe]  ;;  %v1063_v13 = vld [vmem:[#allocation3 + $0x4] sm:$0x1] }
  0x42   : > { %v12134_v15 = vrot.slane %v1062_v12, 9  ;;  %v1083_v16 = vrot.slane %v1063_v13, 5  ;;  %v963_v17 = vld [vmem:[#allocation3 + $0x4] sm:$0xc]  ;;  %v907_v18 = vld [vmem:[#allocation3] sm:$0xf]  ;;  %vm15034_vm12 = vmor %vm971_vm9, %vm972_vm10 }
  0x43   : > { %v975_v19 = vshrl.u32 %v963_v17, 16  ;;  %v978_v20 = vshll.u32 %v963_v17, 16  ;;  %v912_v23 = vshrl.u32 %v907_v18, 16  ;;  %v915_v24 = vshll.u32 %v907_v18, 16  ;;  %v964_v25 = vld [vmem:[#allocation3 + $0x8] sm:$0x3]  ;;  %vm15684_vm15 = vmand %vm841_vm3, %vm4257_vm14 }
  0x44   : > { %13886 = vmatpush3.bf16.msra.mxu0 %v14096_v1  ;;  %v1084_v21 = vsel %vm15007_vm5, %v12134_v15, %v1083_v16  ;;  %v984_v29 = vshrl.u32 %v964_v25, 16  ;;  %v987_v30 = vshll.u32 %v964_v25, 16  ;;  %v856_v38 = vld [vmem:[#allocation3 + $0x4] sm:$0xc]  ;;  %v857_v39 = vld [vmem:[#allocation3 + $0x8] sm:$0x3] }
  0x45   : > { %13887 = vmatprep.subr.bf16.mxu0 %v14097_v2  ;;  %v1102_v26 = vsel %vm15018_vm8, %v1084_v21, %v1101_v22  ;;  %v977_v27 = vrot.slane %v975_v19, 6  ;;  %v980_v28 = vrot.slane %v978_v20, 7  ;;  %v914_v31 = vrot.slane %v912_v23, 4  ;;  %4415 = vst [vmem:[#allocation3 + $0x4] sm:$0xf] %v16838_v11  ;;  %v14107_v59 = vld [vmem:[#allocation5 + $0x38] sm:$0xff]  }
  0x46   : > { %1103 = vst [vmem:[#allocation4 + $0x10] sm:$0xf] %v1102_v26  ;;  %v917_v32 = vrot.slane %v915_v24, 5  ;;  %v986_v35 = vrot.slane %v984_v29, 6  ;;  %v989_v36 = vrot.slane %v987_v30, 7  ;;  %v12130_v41 = vrot.slane %v856_v38, 10  ;;  %13115 = vmatpush3.bf16.msra.mxu1 %v14107_v59 }
  0x47   : > { %v981_v34 = vor.u32 %v980_v28, %v977_v27  ;;  %v877_v42 = vrot.slane %v857_v39, 6  ;;  %v837_v46 = vld [vmem:[#allocation3] sm:$0xf]  ;;  %v951_v53 = vld [vmem:[#allocation4 + $0x8] sm:$0xf]  ;;  %v14109_v61 = vld [vmem:[#allocation5 + $0x70] sm:$0xff]  }
  0x48   : > { %13888 = vmatpush3.bf16.msra.mxu0 %v14097_v2  ;;  %v918_v40 = vor.u32 %v917_v32, %v914_v31  ;;  %v990_v44 = vor.u32 %v989_v36, %v986_v35  ;;  %v845_v51 = vsel %vm15018_vm8, %v837_v46, %v844_v47  ;;  %v1050_v54 = vld [vmem:[#allocation4 + $0xc] sm:$0xf]  ;;  %4414 = vst [vmem:[#allocation3] sm:$0xf] %v16838_v11  ;;  %v14110_v62 = vld [vmem:[#allocation5 + $0xf0] sm:$0xff]   ;;  %v14113_v1 = vld [vmem:[#allocation5 + $0x68] sm:$0xff]  }
  0x49   : > { %13889 = vmatprep.subr.bf16.mxu0 %v14098_v4  ;;  %v982_v43 = vrot.slane %v981_v34, 4  ;;  %v878_v48 = vsel %vm15028_vm11, %v12130_v41, %v877_v42  ;;  %846 = vst [vmem:[#allocation4] sm:$0xf] %v845_v51  ;;  %v14108_v60 = vld [vmem:[#allocation5 + $0xb8] sm:$0xff]   ;;  %v14111_v63 = vld [vmem:[#allocation5 + $0x30] sm:$0xff]   ;;  %13116 = vmatprep.subr.bf16.mxu1 %v14109_v61  ;;  %v14114_v2 = vld [vmem:[#allocation5 + $0xe8] sm:$0xff]  }
  0x4a   : > { %v919_v45 = vrot.slane %v918_v40, 4  ;;  %v896_v52 = vsel %vm15018_vm8, %v878_v48, %v895_v49  ;;  %v14112_v0 = vld [vmem:[#allocation5 + $0xb0] sm:$0xff]   ;;  %13117 = vmatpush3.bf16.msra.mxu1 %v14111_v63  ;;  %v14115_v3 = vld [vmem:[#allocation5 + $0x28] sm:$0xff]   ;;  %v14122_v12 = vld [vmem:[#allocation5 + $0xd8] sm:$0xff]   ;;  %vm14817_vm9 = vmmov 0   ;;  %vm6696_vm10 = vcmask 130048  }
  0x4b   : > { %v991_v50 = vsel %vm15034_vm12, %v982_v43, %v990_v44  ;;  %897 = vst [vmem:[#allocation4 + $0x4] sm:$0xf] %v896_v52  ;;  %13118 = vmatprep.subr.bf16.mxu1 %v14113_v1  ;;  %v14123_v13 = vld [vmem:[#allocation5 + $0x18] sm:$0xff]   ;;  %v14125_v16 = vld [vmem:[#allocation5 + $0x50] sm:$0xff]   ;;  %v14129_v20 = vld [vmem:[#allocation5 + $0x48] sm:$0xff]   ;;  %vm10186_vm14 = vcmask 1042434  }
  0x4c   : > { %13890 = vmatpush3.bf16.msra.mxu0 %v14098_v4  ;;  %v952_v55 = vsel %vm15018_vm8, %v919_v45, %v951_v53  ;;  %v1051_v56 = vsel %vm15018_vm8, %v991_v50, %v1050_v54  ;;  %v14116_v4 = vld [vmem:[#allocation5 + $0xa8] sm:$0xff]   ;;  %v14124_v15 = vld [vmem:[#allocation5 + $0x98] sm:$0xff]   ;;  %v14126_v17 = vld [vmem:[#allocation5 + $0xd0] sm:$0xff]  }
  0x4d   : > { %953 = vst [vmem:[#allocation4 + $0x8] sm:$0xf] %v952_v55  ;;  %1052 = vst [vmem:[#allocation4 + $0xc] sm:$0xf] %v1051_v56  ;;  %13142 = vmatprep.subr.bf16.mxu0 %v14106_v58  ;;  %v14127_v18 = vld [vmem:[#allocation5 + $0x10] sm:$0xff]   ;;  %v14130_v21 = vld [vmem:[#allocation5 + $0xc8] sm:$0xff]  }
  0x4e   : > { %13119 = vmatpush3.bf16.msra.mxu1 %v14115_v3  ;;  %v14128_v19 = vld [vmem:[#allocation5 + $0x90] sm:$0xff]   ;;  %v14131_v22 = vld [vmem:[#allocation5 + $0x8] sm:$0xff]   ;;  %v14133_v24 = vld [vmem:[#allocation5 + $0x40] sm:$0xff]  }
  0x4f   : > { %13892 = vmatmul.mubr.msk.bf16.vlgmr.msra.gmra.mxu0 %vm666_vm0, %v14100_v5  ;;  %v14117_v5 = vld [vmem:[#allocation5 + $0x60] sm:$0xff]   ;;  %v14132_v23 = vld [vmem:[#allocation5 + $0x88] sm:$0xff]   ;;  %v14137_v28 = vld [vmem:[#allocation5 + $0x178] sm:$0xff]  }
  0x50   : > { %13895 = vmatprep.mubr.msk.bf16.mxu0 %vm666_vm0, %v14101_v6  ;;  %13143 = vmatpush3.bf16.msra.mxu0 %v14108_v60  ;;  %v14118_v6 = vld [vmem:[#allocation5 + $0xe0] sm:$0xff]   ;;  %v14138_v29 = vld [vmem:[#allocation5 + $0x1f8] sm:$0xff]   ;;  %v1503_v30 = vld [vmem:[#allocation3 + $0x40] sm:$0xc] }
  0x51   : > { %13144 = vmatprep.subr.bf16.mxu0 %v14110_v62  ;;  %13120 = vmatprep.subr.bf16.mxu1 %v14117_v5  ;;  %v14134_v25 = vld [vmem:[#allocation5 + $0xc0] sm:$0xff]   ;;  %v1560_v32 = vshrl.u32 %v1503_v30, 16  ;;  %v1563_v34 = vshll.u32 %v1503_v30, 16  ;;  %v1504_v38 = vld [vmem:[#allocation3 + $0x44] sm:$0x3] }
  0x52   : > { %v14135_v26 = vld [vmem:[#allocation5] sm:$0xff]   ;;  %v1569_v41 = vshrl.u32 %v1504_v38, 16  ;;  %v1572_v42 = vshll.u32 %v1504_v38, 16  ;;  %v1399_v48 = vld [vmem:[#allocation3 + $0x40] sm:$0xc] }
  0x53   : > { %v14136_v27 = vld [vmem:[#allocation5 + $0x80] sm:$0xff]   ;;  %v1562_v39 = vrot.slane %v1560_v32, 6  ;;  %v1565_v40 = vrot.slane %v1563_v34, 7  ;;  %v1400_v50 = vld [vmem:[#allocation3 + $0x44] sm:$0x3]  ;;  %v12149_v51 = vrot.slane %v1399_v48, 10 }
  0x54   : > { %13145 = vmatpush3.bf16.msra.mxu0 %v14112_v0  ;;  %v1444_v31 = vld [vmem:[#allocation3 + $0x3c] sm:$0xf]  ;;  %v1571_v46 = vrot.slane %v1569_v41, 6  ;;  %v1574_v47 = vrot.slane %v1572_v42, 7  ;;  %v1423_v54 = vrot.slane %v1400_v50, 6 }
  0x55   : > { %13146 = vmatprep.subr.bf16.mxu0 %v14114_v2  ;;  %v1473_v35 = vshrl.u32 %v1444_v31, 16  ;;  %v1476_v36 = vshll.u32 %v1444_v31, 16  ;;  %v1566_v45 = vor.u32 %v1565_v40, %v1562_v39  ;;  %v1599_v56 = vld [vmem:[#allocation3 + $0x3c] sm:$0xe]  ;;  %v1600_v57 = vld [vmem:[#allocation3 + $0x40] sm:$0x1] }
  0x56   : > { %v1575_v53 = vor.u32 %v1574_v47, %v1571_v46  ;;  %v1380_v59 = vld [vmem:[#allocation3 + $0x3c] sm:$0xf]  ;;  %v1390_v60 = vld [vmem:[#allocation4 + $0xdc] sm:$0xf]  ;;  %v1438_v61 = vld [vmem:[#allocation4 + $0xe0] sm:$0xf]  ;;  %v1424_v0 = vsel %vm15028_vm11, %v12149_v51, %v1423_v54 }
  0x57   : > { %13896 = vmatmul.mubr.msk.bf16.gmra.mxu0 %vm666_vm0, %v14102_v7  ;;  %v14119_v7 = vld [vmem:[#allocation5 + $0x20] sm:$0xff]   ;;  %v1475_v43 = vrot.slane %v1473_v35, 4  ;;  %v1478_v44 = vrot.slane %v1476_v36, 5  ;;  %v1567_v52 = vrot.slane %v1566_v45, 4  ;;  %4417 = vst [vmem:[#allocation3 + $0x40] sm:$0xf] %v16838_v11  ;;  %v1391_v63 = vsel %vm15018_vm8, %v1380_v59, %v1390_v60 }
  0x58   : > { %13899 = vmatprep.mubr.msk.bf16.mxu0 %vm666_vm0, %v14103_v8  ;;  %13147 = vmatpush3.bf16.msra.mxu0 %v14116_v4  ;;  %v14120_v8 = vld [vmem:[#allocation5 + $0xa0] sm:$0xff]   ;;  %v1494_v1 = vld [vmem:[#allocation4 + $0xe4] sm:$0xf]  ;;  %v12153_v2 = vrot.slane %v1599_v56, 9  ;;  %v1623_v3 = vrot.slane %v1600_v57, 5  ;;  %v1439_v5 = vsel %vm15018_vm8, %v1424_v0, %v1438_v61 }
  0x59   : > { %13148 = vmatprep.subr.bf16.mxu0 %v14118_v6  ;;  %13121 = vmatpush3.bf16.msra.mxu1 %v14119_v7  ;;  %v1479_v49 = vor.u32 %v1478_v44, %v1475_v43  ;;  %v1576_v62 = vsel %vm15034_vm12, %v1567_v52, %v1575_v53  ;;  %4416 = vst [vmem:[#allocation3 + $0x3c] sm:$0xf] %v16838_v11  ;;  %1392 = vst [vmem:[#allocation4 + $0xdc] sm:$0xf] %v1391_v63  ;;  %v1590_v7 = vld [vmem:[#allocation4 + $0xe8] sm:$0xf] }
  0x5a   : > { %1440 = vst [vmem:[#allocation4 + $0xe0] sm:$0xf] %v1439_v5  ;;  %v15074_v30 = vld.sshfl [vmem:[#allocation4 + $0x8] sm:$0xff pattern:$0x75316420] }
  0x5b   : > { %v1480_v55 = vrot.slane %v1479_v49, 4  ;;  %v954_v50 = vld [vmem:[#allocation4 + $0x44] sm:$0xf]  ;;  %v898_v54 = vld [vmem:[#allocation4 + $0x40] sm:$0xf] }
  0x5c   : > { %13149 = vmatpush3.bf16.msra.mxu0 %v14120_v8  ;;  %v1221_v63 = vld [vmem:[#allocation4 + $0x1c] sm:$0xf]  ;;  %v1104_v5 = vld [vmem:[#allocation4 + $0x4c] sm:$0xf] }
  0x5d   : > { %13150 = vmatprep.subr.bf16.mxu0 %v14122_v12  ;;  %v1495_v6 = vsel %vm15018_vm8, %v1480_v55, %v1494_v1  ;;  %v1624_v12 = vsel %vm15007_vm5, %v12153_v2, %v1623_v3 }
  0x5e   : > { %1496 = vst [vmem:[#allocation4 + $0xe4] sm:$0xf] %v1495_v6 }
  0x5f   : > { %13900 = vmatmul.mubr.msk.bf16.gmra.mxu0 %vm666_vm0, %v14104_v9  ;;  %v14121_v9 = vld [vmem:[#allocation5 + $0x58] sm:$0xff]   ;;  %vm4216_vm0 = vsmask.f32 256 }
  0x60   : > { %13122 = vmatprep.subr.bf16.mxu1 %v14121_v9  ;;  %13151 = vmatpush3.bf16.msra.mxu0 %v14124_v15  ;;  %v1591_v9 = vsel %vm15018_vm8, %v1576_v62, %v1590_v7  ;;  %vm15691_vm4 = vmor %vm4216_vm0, %vm4217_vm2 }
  0x61   : > { %13123 = vmatpush3.bf16.msra.mxu1 %v14123_v13  ;;  %13152 = vmatprep.subr.bf16.mxu0 %v14126_v17  ;;  %v1638_v13 = vld [vmem:[#allocation4 + $0xec] sm:$0xf]  ;;  %1592 = vst [vmem:[#allocation4 + $0xe8] sm:$0xf] %v1591_v9 }
  0x62   : > { %13124 = vmatprep.subr.bf16.mxu1 %v14125_v16  ;;  %v1639_v16 = vsel %vm15018_vm8, %v1624_v12, %v1638_v13 }
  0x63   : > { %1640 = vst [vmem:[#allocation4 + $0xec] sm:$0xf] %v1639_v16 }
  0x64   : > { %13153 = vmatpush3.bf16.msra.mxu0 %v14128_v19 }
  0x65   : > { %13125 = vmatpush3.bf16.msra.mxu1 %v14127_v18  ;;  %13154 = vmatprep.subr.bf16.mxu0 %v14130_v21  ;;  %v14814_v18 = vmov 1966171168  }
  0x66   : > { %13126 = vmatprep.subr.bf16.mxu1 %v14129_v20  ;;  %v1738_v19 = vunpack.c.l.s4 %v14814_v18  ;;  %v1740_v20 = vlaneseq }
  0x68   : > { %13155 = vmatpush3.bf16.msra.mxu0 %v14132_v23  ;;  %v847_v23 = vld [vmem:[#allocation4 + $0x3c] sm:$0xf] }
  0x69   : > { %13127 = vmatpush3.bf16.msra.mxu1 %v14131_v22  ;;  %13156 = vmatprep.subr.bf16.mxu0 %v14134_v25 }
  0x6a   : > { %13128 = vmatprep.subr.bf16.mxu1 %v14133_v24  ;;  %v1117_v24 = vld [vmem:[#allocation4 + $0x14] sm:$0xf] }
  0x6c   : > { %13157 = vmatpush3.bf16.msra.mxu0 %v14136_v27  ;;  %v15070_v27 = vshrl.u32 %v1740_v20, 7 }
  0x6d   : > { %13129 = vmatpush3.bf16.msra.mxu1 %v14135_v26  ;;  %13198 = vmatprep.subr.bf16.mxu0 %v14138_v29  ;;  %v1739_v26 = vunpack.c.0.s8 %v1738_v19  ;;  %v15072_v29 = vld.sshfl [vmem:[#allocation4] sm:$0xff pattern:$0x75316420] }
  0x6e   : > { %13170 = vmatprep.subr.bf16.mxu1 %v14137_v28  ;;  %v1733_v56 = vcombine.low %v15072_v29, %v15074_v30  ;;  %v1734_v57 = vcombine.high %v15072_v29, %v15074_v30  ;;  %v1368_v30 = vld [vmem:[#allocation4 + $0x60] sm:$0xf] }
  0x6f   : > { %v15083_v44 = vsub.s32 %v1739_v26, %v15070_v27 }
 0x10f   : > { %v13893_v58 = vpop.f32.mrf.mxu0 }
 0x111   : > { %v719_v4 = vpop.f32.mrf.mxu0 }
 0x112   : > { %v13033_v8 = vpack.c.bf16 %v719_v4, %v719_v4 }
 0x113   : > { %v13894_v15 = vpop.f32.mrf.mxu0 }
 0x114   : > { %791 = vst [vmem:[#allocation3 + $0xc] sm:$0xf] %v13033_v8 }
 0x115   : > { %v722_v17 = vpop.f32.mrf.mxu0 }
 0x116   : > { %v13069_v21 = vpack.c.bf16 %v13893_v58, %v722_v17 }
 0x117   : > { %v13897_v22 = vpop.f32.mrf.mxu0 }
 0x118   : > { %13101 = vst [vmem:[#allocation3 + $0x10] sm:$0xff] %v13069_v21  }
 0x119   : > { %v735_v25 = vpop.f32.mrf.mxu0 }
 0x11a   : > { %v13074_v28 = vpack.c.bf16 %v735_v25, %v13894_v15 }
 0x11b   : > { %v838_v31 = vld [vmem:[#allocation3 + $0xc] sm:$0xf]  ;;  %v15076_v34 = vpop.f32.mrf.mxu0 }
 0x11c   : > { %v908_v32 = vld [vmem:[#allocation3 + $0xc] sm:$0xf]  ;;  %v848_v35 = vsel %vm15018_vm8, %v838_v31, %v847_v23  ;;  %13075 = vst [vmem:[#allocation3 + $0x18] sm:$0xff] %v13074_v28   ;;  %v1053_v31 = vld [vmem:[#allocation4 + $0x48] sm:$0xf] }
 0x11d   : > { %v921_v36 = vshrl.u32 %v908_v32, 16  ;;  %v924_v38 = vshll.u32 %v908_v32, 16  ;;  %v1064_v39 = vld [vmem:[#allocation3 + $0xc] sm:$0xe]  ;;  %849 = vst [vmem:[#allocation4 + $0x3c] sm:$0xf] %v848_v35  ;;  %v738_v43 = vpop.f32.mrf.mxu0 }
 0x11e   : > { %v1113_v40 = vld [vmem:[#allocation3 + $0xc] sm:$0xf]  ;;  %v12135_v51 = vrot.slane %v1064_v39, 9  ;;  %v13079_v55 = vpack.c.bf16 %v13897_v22, %v738_v43 }
 0x11f   : > { %v1118_v41 = vsel %vm15018_vm8, %v1113_v40, %v1117_v24  ;;  %v1177_v42 = vld [vmem:[#allocation3 + $0xc] sm:$0xf]  ;;  %v923_v45 = vrot.slane %v921_v36, 4  ;;  %v926_v46 = vrot.slane %v924_v38, 5  ;;  %v858_v52 = vld [vmem:[#allocation3 + $0x10] sm:$0xc] }
 0x120   : > { %1119 = vst [vmem:[#allocation4 + $0x14] sm:$0xf] %v1118_v41  ;;  %v1182_v47 = vshrl.u32 %v1177_v42, 16  ;;  %v1185_v48 = vshll.u32 %v1177_v42, 16  ;;  %v15085_v49 = vld [vmem:[#allocation3 + $0xc] sm:$0xe] }
 0x121   : > { %v859_v53 = vld [vmem:[#allocation3 + $0x14] sm:$0x3]  ;;  %v927_v58 = vor.u32 %v926_v46, %v923_v45  ;;  %v12131_v61 = vrot.slane %v858_v52, 10  ;;  %v965_v62 = vld [vmem:[#allocation3 + $0x10] sm:$0xc]  ;;  %v12142_v0 = vrot.slane %v15085_v49, 9 }
 0x122   : > { %v1184_v59 = vrot.slane %v1182_v47, 4  ;;  %v1187_v60 = vrot.slane %v1185_v48, 5  ;;  %v881_v1 = vrot.slane %v859_v53, 6  ;;  %v966_v2 = vld [vmem:[#allocation3 + $0x14] sm:$0x3]  ;;  %v993_v3 = vshrl.u32 %v965_v62, 16 }
 0x123   : > { %v996_v4 = vshll.u32 %v965_v62, 16  ;;  %13102 = vst [vmem:[#allocation3 + $0x20] sm:$0xff] %v13079_v55   ;;  %v928_v6 = vrot.slane %v927_v58, 4  ;;  %v1002_v8 = vshrl.u32 %v966_v2, 16  ;;  %v1005_v9 = vshll.u32 %v966_v2, 16 }
 0x124   : > { %v1188_v7 = vor.u32 %v1187_v60, %v1184_v59  ;;  %v1065_v12 = vld [vmem:[#allocation3 + $0x10] sm:$0x1]  ;;  %v882_v13 = vsel %vm15028_vm11, %v12131_v61, %v881_v1  ;;  %v995_v15 = vrot.slane %v993_v3, 6  ;;  %v1129_v18 = vld [vmem:[#allocation3 + $0x10] sm:$0xc] }
 0x125   : > { %v998_v16 = vrot.slane %v996_v4, 7  ;;  %v1087_v17 = vrot.slane %v1065_v12, 5  ;;  %v955_v19 = vsel %vm15018_vm8, %v928_v6, %v954_v50  ;;  %v899_v21 = vsel %vm15018_vm8, %v882_v13, %v898_v54  ;;  %v1130_v23 = vld [vmem:[#allocation3 + $0x14] sm:$0x3]  ;;  %v1165_v24 = vld [vmem:[#allocation4 + $0x18] sm:$0xf] }
 0x126   : > { %v1189_v20 = vrot.slane %v1188_v7, 4  ;;  %v1004_v22 = vrot.slane %v1002_v8, 6  ;;  %v1233_v25 = vld [vmem:[#allocation3 + $0x10] sm:$0xc]  ;;  %956 = vst [vmem:[#allocation4 + $0x44] sm:$0xf] %v955_v19 }
 0x127   : > { %900 = vst [vmem:[#allocation4 + $0x40] sm:$0xf] %v899_v21  ;;  %v999_v26 = vor.u32 %v998_v16, %v995_v15  ;;  %v1007_v28 = vrot.slane %v1005_v9, 7  ;;  %v1088_v32 = vsel %vm15007_vm5, %v12135_v51, %v1087_v17  ;;  %v12138_v35 = vrot.slane %v1129_v18, 10  ;;  %v1234_v36 = vld [vmem:[#allocation3 + $0x14] sm:$0x3] }
 0x128   : > { %v1330_v38 = vld [vmem:[#allocation3 + $0x10] sm:$0x1]  ;;  %v1222_v39 = vsel %vm15018_vm8, %v1189_v20, %v1221_v63  ;;  %v1105_v40 = vsel %vm15018_vm8, %v1088_v32, %v1104_v5  ;;  %v1147_v41 = vrot.slane %v1130_v23, 6  ;;  %v1242_v42 = vshrl.u32 %v1233_v25, 16  ;;  %v1365_v43 = vld [vmem:[#allocation4 + $0x24] sm:$0xf] }
 0x129   : > { %v850_v45 = vld [vmem:[#allocation4 + $0x78] sm:$0xf]  ;;  %1223 = vst [vmem:[#allocation4 + $0x1c] sm:$0xf] %v1222_v39  ;;  %v1000_v46 = vrot.slane %v999_v26, 4  ;;  %v1008_v47 = vor.u32 %v1007_v28, %v1004_v22  ;;  %v1245_v48 = vshll.u32 %v1233_v25, 16  ;;  %v15122_v15 = vrot.slane %v1733_v56, %v15083_v44 }
 0x12a   : > { %1106 = vst [vmem:[#allocation4 + $0x4c] sm:$0xf] %v1105_v40  ;;  %v1251_v49 = vshrl.u32 %v1234_v36, 16  ;;  %v839_v50 = vld [vmem:[#allocation3 + $0x18] sm:$0xf]  ;;  %v1148_v51 = vsel %vm15028_vm11, %v12138_v35, %v1147_v41  ;;  %v1244_v52 = vrot.slane %v1242_v42, 6  ;;  %v15132_v35 = vrot.slane %v1734_v57, %v15083_v44 }
 0x12b   : > { %v1254_v53 = vshll.u32 %v1234_v36, 16  ;;  %v1347_v54 = vrot.slane %v1330_v38, 5  ;;  %v909_v55 = vld [vmem:[#allocation3 + $0x18] sm:$0xf]  ;;  %v1009_v58 = vsel %vm15034_vm12, %v1000_v46, %v1008_v47  ;;  %v1166_v59 = vsel %vm15018_vm8, %v1148_v51, %v1165_v24  ;;  %v967_v62 = vld [vmem:[#allocation3 + $0x1c] sm:$0xc] }
 0x12c   : > { %v1247_v60 = vrot.slane %v1245_v48, 7  ;;  %v1253_v61 = vrot.slane %v1251_v49, 6  ;;  %v1120_v63 = vld [vmem:[#allocation4 + $0x50] sm:$0xf]  ;;  %v1054_v1 = vsel %vm15018_vm8, %v1009_v58, %v1053_v31  ;;  %1167 = vst [vmem:[#allocation4 + $0x18] sm:$0xf] %v1166_v59  ;;  %v851_v4 = vsel %vm15018_vm8, %v839_v50, %v850_v45 }
 0x12d   : > { %v1256_v2 = vrot.slane %v1254_v53, 7  ;;  %v1348_v3 = vsel %vm15007_vm5, %v12142_v0, %v1347_v54  ;;  %v1066_v5 = vld [vmem:[#allocation3 + $0x18] sm:$0xe]  ;;  %v1067_v6 = vld [vmem:[#allocation3 + $0x1c] sm:$0x1]  ;;  %v930_v12 = vshrl.u32 %v909_v55, 16  ;;  %v12203_v47 = vcombine.low %v15122_v15, %v15132_v35 }
 0x12e   : > { %1055 = vst [vmem:[#allocation4 + $0x48] sm:$0xf] %v1054_v1  ;;  %v1248_v7 = vor.u32 %v1247_v60, %v1244_v52  ;;  %v1317_v8 = vld [vmem:[#allocation4 + $0x20] sm:$0xf]  ;;  %v1366_v9 = vsel %vm15018_vm8, %v1348_v3, %v1365_v43  ;;  %852 = vst [vmem:[#allocation4 + $0x78] sm:$0xf] %v851_v4 }
 0x12f   : > { %v1114_v13 = vld [vmem:[#allocation3 + $0x18] sm:$0xf]  ;;  %v1257_v0 = vor.u32 %v1256_v2, %v1253_v61  ;;  %1367 = vst [vmem:[#allocation4 + $0x24] sm:$0xf] %v1366_v9  ;;  %v933_v16 = vshll.u32 %v909_v55, 16  ;;  %v1011_v17 = vshrl.u32 %v967_v62, 16 }
 0x130   : > { %v1014_v18 = vshll.u32 %v967_v62, 16  ;;  %v1178_v19 = vld [vmem:[#allocation3 + $0x18] sm:$0xf]  ;;  %v1249_v20 = vrot.slane %v1248_v7, 4  ;;  %v932_v21 = vrot.slane %v930_v12, 4  ;;  %v12136_v22 = vrot.slane %v1066_v5, 9 }
 0x131   : > { %v1091_v23 = vrot.slane %v1067_v6, 5  ;;  %v1107_v24 = vld [vmem:[#allocation4 + $0x88] sm:$0xf]  ;;  %v15124_v25 = vld [vmem:[#allocation3 + $0x1c] sm:$0xc]  ;;  %v935_v26 = vrot.slane %v933_v16, 5  ;;  %v1121_v31 = vsel %vm15018_vm8, %v1114_v13, %v1120_v63 }
 0x132   : > { %v1013_v28 = vrot.slane %v1011_v17, 6  ;;  %v1235_v56 = vld [vmem:[#allocation3 + $0x1c] sm:$0xc]  ;;  %v1381_v32 = vld [vmem:[#allocation4 + $0x28] sm:$0xf]  ;;  %v1258_v36 = vsel %vm15034_vm12, %v1249_v20, %v1257_v0  ;;  %v1016_v38 = vrot.slane %v1014_v18, 7 }
 0x133   : > { %v1092_v39 = vsel %vm15007_vm5, %v12136_v22, %v1091_v23  ;;  %1122 = vst [vmem:[#allocation4 + $0x50] sm:$0xf] %v1121_v31  ;;  %v1191_v40 = vshrl.u32 %v1178_v19, 16  ;;  %v1331_v41 = vld [vmem:[#allocation3 + $0x18] sm:$0xe]  ;;  %v1318_v43 = vsel %vm15018_vm8, %v1258_v36, %v1317_v8  ;;  %v936_v45 = vor.u32 %v935_v26, %v932_v21 }
 0x134   : > { %v1332_v42 = vld [vmem:[#allocation3 + $0x1c] sm:$0x1]  ;;  %v957_v46 = vld [vmem:[#allocation4 + $0x80] sm:$0xf]  ;;  %v1108_v29 = vsel %vm15018_vm8, %v1092_v39, %v1107_v24  ;;  %v1377_v57 = vld [vmem:[#allocation3 + $0x18] sm:$0xf]  ;;  %v1017_v60 = vor.u32 %v1016_v38, %v1013_v28 }
 0x135   : > { %1319 = vst [vmem:[#allocation4 + $0x20] sm:$0xf] %v1318_v43  ;;  %1109 = vst [vmem:[#allocation4 + $0x88] sm:$0xf] %v1108_v29  ;;  %v1193_v48 = vrot.slane %v1191_v40, 4  ;;  %v1194_v49 = vshll.u32 %v1178_v19, 16  ;;  %v1382_v63 = vsel %vm15018_vm8, %v1377_v57, %v1381_v32  ;;  %v15168_v57 = vpop.f32.mrf.mxu0 }
 0x136   : > { %v1260_v50 = vshrl.u32 %v1235_v56, 16  ;;  %v1263_v51 = vshll.u32 %v1235_v56, 16  ;;  %v1441_v52 = vld [vmem:[#allocation3 + $0x18] sm:$0xf]  ;;  %v12132_v53 = vrot.slane %v15124_v25, 10  ;;  %v937_v54 = vrot.slane %v936_v45, 4 }
 0x137   : > { %v15145_v55 = vld [vmem:[#allocation3 + $0x1c] sm:$0xc]  ;;  %v12143_v58 = vrot.slane %v1331_v41, 9  ;;  %v1351_v59 = vrot.slane %v1332_v42, 5  ;;  %v1196_v61 = vrot.slane %v1194_v49, 5  ;;  %v1446_v7 = vshrl.u32 %v1441_v52, 16 }
 0x138   : > { %v1262_v62 = vrot.slane %v1260_v50, 6  ;;  %v1497_v1 = vld [vmem:[#allocation3 + $0x1c] sm:$0xc]  ;;  %v1593_v2 = vld [vmem:[#allocation3 + $0x18] sm:$0xe]  ;;  %v958_v3 = vsel %vm15018_vm8, %v937_v54, %v957_v46  ;;  %v1265_v5 = vrot.slane %v1263_v51, 7 }
 0x139   : > { %v1224_v4 = vld [vmem:[#allocation4 + $0x58] sm:$0xf]  ;;  %v1352_v6 = vsel %vm15007_vm5, %v12143_v58, %v1351_v59  ;;  %1383 = vst [vmem:[#allocation4 + $0x28] sm:$0xf] %v1382_v63  ;;  %v1594_v8 = vld [vmem:[#allocation3 + $0x1c] sm:$0x1]  ;;  %v1197_v13 = vor.u32 %v1196_v61, %v1193_v48 }
 0x13a   : > { %v853_v9 = vld [vmem:[#allocation4 + $0xb4] sm:$0xf]  ;;  %959 = vst [vmem:[#allocation4 + $0x80] sm:$0xf] %v958_v3  ;;  %v12139_v12 = vrot.slane %v15145_v55, 10  ;;  %v1369_v0 = vsel %vm15018_vm8, %v1352_v6, %v1368_v30  ;;  %v1449_v16 = vshll.u32 %v1441_v52, 16  ;;  %v1266_v56 = vor.u32 %v1265_v5, %v1262_v62 }
 0x13b   : > { %v840_v17 = vld [vmem:[#allocation3 + $0x24] sm:$0xf]  ;;  %v861_v18 = vld [vmem:[#allocation3 + $0x20] sm:$0x3]  ;;  %1370 = vst [vmem:[#allocation4 + $0x60] sm:$0xf] %v1369_v0  ;;  %v15183_v0 = vpop.f32.mrf.mxu0 }
 0x13c   : > { %v1448_v19 = vrot.slane %v1446_v7, 4  ;;  %v1506_v20 = vshrl.u32 %v1497_v1, 16  ;;  %v1509_v21 = vshll.u32 %v1497_v1, 16  ;;  %v12150_v22 = vrot.slane %v1593_v2, 9  ;;  %v910_v23 = vld [vmem:[#allocation3 + $0x24] sm:$0xf] }
 0x13d   : > { %v15156_v24 = vrot.slane %v1017_v60, 4  ;;  %v1198_v25 = vrot.slane %v1197_v13, 4  ;;  %v1451_v26 = vrot.slane %v1449_v16, 5  ;;  %v1611_v28 = vrot.slane %v1594_v8, 5  ;;  %v1629_v31 = vld [vmem:[#allocation4 + $0x38] sm:$0xf] }
 0x13e   : > { %v1485_v32 = vld [vmem:[#allocation4 + $0x30] sm:$0xf]  ;;  %v15158_v36 = vrot.slane %v1506_v20, 6  ;;  %v854_v38 = vsel %vm15018_vm8, %v840_v17, %v853_v9  ;;  %v885_v39 = vrot.slane %v861_v18, 6  ;;  %v901_v40 = vld [vmem:[#allocation4 + $0x7c] sm:$0xf] }
 0x13f   : > { %v968_v41 = vld [vmem:[#allocation3 + $0x20] sm:$0x3]  ;;  %v1225_v42 = vsel %vm15018_vm8, %v1198_v25, %v1224_v4  ;;  %v15164_v43 = vld [vmem:[#allocation3 + $0x1c] sm:$0xc]  ;;  %v1452_v45 = vor.u32 %v1451_v26, %v1448_v19  ;;  %v1612_v46 = vsel %vm15007_vm5, %v12150_v22, %v1611_v28  ;;  %855 = vst [vmem:[#allocation4 + $0xb4] sm:$0xf] %v854_v38 }
 0x140   : > { %v939_v29 = vshrl.u32 %v910_v23, 16  ;;  %v1123_v30 = vld [vmem:[#allocation4 + $0x8c] sm:$0xf]  ;;  %1226 = vst [vmem:[#allocation4 + $0x58] sm:$0xf] %v1225_v42  ;;  %v15170_v48 = vrot.slane %v1509_v21, 7  ;;  %v1630_v49 = vsel %vm15018_vm8, %v1612_v46, %v1629_v31  ;;  %v886_v50 = vsel %vm15028_vm11, %v12132_v53, %v885_v39 }
 0x141   : > { %v942_v51 = vshll.u32 %v910_v23, 16  ;;  %v1115_v52 = vld [vmem:[#allocation3 + $0x24] sm:$0xf]  ;;  %v1132_v54 = vld [vmem:[#allocation3 + $0x20] sm:$0x3]  ;;  %v1453_v58 = vrot.slane %v1452_v45, 4  ;;  %v902_v59 = vsel %vm15018_vm8, %v886_v50, %v901_v40 }
 0x142   : > { %1631 = vst [vmem:[#allocation4 + $0x38] sm:$0xf] %v1630_v49  ;;  %v941_v60 = vrot.slane %v939_v29, 4  ;;  %v1020_v61 = vshrl.u32 %v968_v41, 16  ;;  %v1179_v62 = vld [vmem:[#allocation3 + $0x24] sm:$0xf]  ;;  %v1124_v8 = vsel %vm15018_vm8, %v1115_v52, %v1123_v30  ;;  %v1512_v21 = vor.u32 %v15170_v48, %v15158_v36 }
 0x143   : > { %v1267_v63 = vrot.slane %v1266_v56, 4  ;;  %v12146_v1 = vrot.slane %v15164_v43, 10  ;;  %903 = vst [vmem:[#allocation4 + $0x7c] sm:$0xf] %v902_v59  ;;  %v944_v2 = vrot.slane %v942_v51, 5  ;;  %v1023_v3 = vshll.u32 %v968_v41, 16 }
 0x144   : > { %v1236_v4 = vld [vmem:[#allocation3 + $0x20] sm:$0x3]  ;;  %v1384_v5 = vld [vmem:[#allocation4 + $0x64] sm:$0xf]  ;;  %v1486_v53 = vsel %vm15018_vm8, %v1453_v58, %v1485_v32  ;;  %v960_v6 = vld [vmem:[#allocation4 + $0xbc] sm:$0xf] }
 0x145   : > { %v1022_v7 = vrot.slane %v1020_v61, 6  ;;  %v1151_v9 = vrot.slane %v1132_v54, 6  ;;  %v1168_v13 = vld [vmem:[#allocation4 + $0x54] sm:$0xf]  ;;  %1487 = vst [vmem:[#allocation4 + $0x30] sm:$0xf] %v1486_v53  ;;  %v945_v16 = vor.u32 %v944_v2, %v941_v60 }
 0x146   : > { %v1025_v17 = vrot.slane %v1023_v3, 7  ;;  %1125 = vst [vmem:[#allocation4 + $0x8c] sm:$0xf] %v1124_v8  ;;  %v1200_v18 = vshrl.u32 %v1179_v62, 16  ;;  %v1203_v19 = vshll.u32 %v1179_v62, 16  ;;  %v1269_v23 = vshrl.u32 %v1236_v4, 16 }
 0x147   : > { %v1378_v20 = vld [vmem:[#allocation3 + $0x24] sm:$0xf]  ;;  %v1152_v22 = vsel %vm15028_vm11, %v12139_v12, %v1151_v9  ;;  %v1272_v25 = vshll.u32 %v1236_v4, 16  ;;  %v1394_v26 = vld [vmem:[#allocation3 + $0x20] sm:$0x3]  ;;  %v946_v31 = vrot.slane %v945_v16, 4  ;;  %v13902_v12 = vpop.f32.mrf.mxu0 }
 0x148   : > { %v1442_v28 = vld [vmem:[#allocation3 + $0x24] sm:$0xf]  ;;  %v1026_v56 = vor.u32 %v1025_v17, %v1022_v7  ;;  %v1056_v32 = vld [vmem:[#allocation4 + $0x84] sm:$0xf]  ;;  %v1169_v38 = vsel %vm15018_vm8, %v1152_v22, %v1168_v13  ;;  %v1202_v39 = vrot.slane %v1200_v18, 4  ;;  %v1205_v40 = vrot.slane %v1203_v19, 5 }
 0x149   : > { %1170 = vst [vmem:[#allocation4 + $0x54] sm:$0xf] %v1169_v38  ;;  %v1271_v41 = vrot.slane %v1269_v23, 6  ;;  %v1274_v36 = vrot.slane %v1272_v25, 7  ;;  %v1385_v55 = vsel %vm15018_vm8, %v1378_v20, %v1384_v5  ;;  %v1498_v42 = vld [vmem:[#allocation3 + $0x20] sm:$0x3]  ;;  %v961_v43 = vsel %vm15018_vm8, %v946_v31, %v960_v6  ;;  %v754_v4 = vpop.f32.mrf.mxu0 }
 0x14a   : > { %v1027_v45 = vsel %vm15034_vm12, %v15156_v24, %v1026_v56  ;;  %1386 = vst [vmem:[#allocation4 + $0x64] sm:$0xf] %v1385_v55  ;;  %v1411_v46 = vrot.slane %v1394_v26, 6  ;;  %v1429_v29 = vld [vmem:[#allocation4 + $0x2c] sm:$0xf]  ;;  %v1455_v30 = vshrl.u32 %v1442_v28, 16  ;;  %v1206_v49 = vor.u32 %v1205_v40, %v1202_v39 }
 0x14b   : > { %962 = vst [vmem:[#allocation4 + $0xbc] sm:$0xf] %v961_v43  ;;  %v1057_v48 = vsel %vm15018_vm8, %v1027_v45, %v1056_v32  ;;  %v1275_v50 = vor.u32 %v1274_v36, %v1271_v41  ;;  %v1320_v51 = vld [vmem:[#allocation4 + $0x5c] sm:$0xf]  ;;  %v1458_v52 = vshll.u32 %v1442_v28, 16  ;;  %v1515_v60 = vshrl.u32 %v1498_v42, 16 }
 0x14c   : > { %1058 = vst [vmem:[#allocation4 + $0x84] sm:$0xf] %v1057_v48  ;;  %v1227_v54 = vld [vmem:[#allocation4 + $0x94] sm:$0xf]  ;;  %v1412_v58 = vsel %vm15028_vm11, %v12146_v1, %v1411_v46  ;;  %v1457_v59 = vrot.slane %v1455_v30, 4  ;;  %v1518_v24 = vshll.u32 %v1498_v42, 16  ;;  %v13084_v17 = vpack.c.bf16 %v15183_v0, %v15076_v34 }
 0x14d   : > { %v1207_v61 = vrot.slane %v1206_v49, 4  ;;  %v1276_v62 = vsel %vm15034_vm12, %v1267_v63, %v1275_v50  ;;  %v1430_v2 = vsel %vm15018_vm8, %v1412_v58, %v1429_v29  ;;  %v1460_v3 = vrot.slane %v1458_v52, 5  ;;  %v12157_v5 = vld.sshfl [vmem:[#allocation4 + $0x18] sm:$0xff pattern:$0x75316420] }
 0x14e   : > { %v1513_v53 = vrot.slane %v1512_v21, 4  ;;  %v1321_v6 = vsel %vm15018_vm8, %v1276_v62, %v1320_v51  ;;  %1431 = vst [vmem:[#allocation4 + $0x2c] sm:$0xf] %v1430_v2  ;;  %v1488_v7 = vld [vmem:[#allocation4 + $0x6c] sm:$0xf]  ;;  %v1517_v1 = vrot.slane %v1515_v60, 6  ;;  %v13044_v18 = vpack.c.bf16 %v13902_v12, %v13902_v12 }
 0x14f   : > { %v1520_v8 = vrot.slane %v1518_v24, 7  ;;  %v1581_v9 = vld [vmem:[#allocation4 + $0x34] sm:$0xf]  ;;  %v12163_v13 = vld.sshfl [vmem:[#allocation4 + $0x44] sm:$0xff pattern:$0x75316420]  ;;  %v1228_v16 = vsel %vm15018_vm8, %v1207_v61, %v1227_v54  ;;  %v1461_v63 = vor.u32 %v1460_v3, %v1457_v59  ;;  %v13089_v22 = vpack.c.bf16 %v15168_v57, %v754_v4 }
 0x150   : > { %1322 = vst [vmem:[#allocation4 + $0x5c] sm:$0xf] %v1321_v6  ;;  %v12156_v19 = vld.sshfl [vmem:[#allocation4 + $0x10] sm:$0xff pattern:$0x75316420]  ;;  %13103 = vst [vmem:[#allocation3 + $0x28] sm:$0xff] %v13084_v17   ;;  %v15253_v51 = vrot.slane %v12203_v47, %v15083_v44 }
 0x151   : > { %v12162_v20 = vld.sshfl [vmem:[#allocation4 + $0x3c] sm:$0xff pattern:$0x75316420]  ;;  %1229 = vst [vmem:[#allocation4 + $0x94] sm:$0xf] %v1228_v16  ;;  %v1521_v21 = vor.u32 %v1520_v8, %v1517_v1  ;;  %v1735_v26 = vcombine.low %v12156_v19, %v12157_v5  ;;  %v1736_v28 = vcombine.high %v12156_v19, %v12157_v5  ;;  %v1462_v31 = vrot.slane %v1461_v63, 4 }
 0x152   : > { %v12164_v23 = vld.sshfl [vmem:[#allocation4 + $0x4c] sm:$0xff pattern:$0x75316420]  ;;  %v12165_v25 = vld.sshfl [vmem:[#allocation4 + $0x54] sm:$0xff pattern:$0x75316420]  ;;  %v1861_v56 = vcombine.low %v12162_v20, %v12163_v13  ;;  %v1862_v32 = vcombine.high %v12162_v20, %v12163_v13 }
 0x153   : > { %836 = vst [vmem:[#allocation3 + $0x38] sm:$0xf] %v13044_v18  ;;  %v1863_v38 = vcombine.low %v12164_v23, %v12165_v25  ;;  %v15215_v39 = vld [vmem:[#allocation3 + $0x24] sm:$0xe]  ;;  %v1522_v0 = vsel %vm15034_vm12, %v1513_v53, %v1521_v21  ;;  %13090 = vst [vmem:[#allocation3 + $0x30] sm:$0xff] %v13089_v22   ;;  %v15222_v57 = vrot.slane %v1736_v28, %v15083_v44 }
 0x154   : > { %v15217_v34 = vld [vmem:[#allocation3 + $0x24] sm:$0xe]  ;;  %v1864_v40 = vcombine.high %v12164_v23, %v12165_v25  ;;  %v1489_v41 = vsel %vm15018_vm8, %v1462_v31, %v1488_v7  ;;  %v1582_v36 = vsel %vm15018_vm8, %v1522_v0, %v1581_v9  ;;  %v15228_v55 = vld.sshfl [vmem:[#allocation4 + $0x80] sm:$0xff pattern:$0x75316420]  ;;  %v15231_v42 = vrot.slane %v1735_v26, %v15083_v44 }
 0x155   : > { %1490 = vst [vmem:[#allocation4 + $0x6c] sm:$0xf] %v1489_v41  ;;  %1583 = vst [vmem:[#allocation4 + $0x34] sm:$0xf] %v1582_v36  ;;  %v15233_v12 = vld [vmem:[#allocation3 + $0x24] sm:$0xe]  ;;  %v1871_v45 = vrot.slane %v1861_v56, %v15083_v44  ;;  %v15239_v46 = vrot.slane %v1862_v32, %v15083_v44  ;;  %v1885_v29 = vrot.slane %v1863_v38, %v15083_v44 }
 0x156   : > { %v15235_v43 = vld.sshfl [vmem:[#allocation4 + $0x78] sm:$0xff pattern:$0x75316420]  ;;  %v15243_v30 = vrot.slane %v1864_v40, %v15083_v44  ;;  %v12137_v48 = vrot.slane %v15215_v39, 9  ;;  %v12144_v49 = vrot.slane %v15217_v34, 9  ;;  %v1768_v52 = vcombine.high %v15132_v35, %v15222_v57 }
 0x157   : > { %v1989_v50 = vcombine.low %v15235_v43, %v15228_v55  ;;  %v1893_v54 = vcombine.low %v1871_v45, %v1885_v29  ;;  %v15257_v58 = vcombine.high %v1871_v45, %v1885_v29  ;;  %v12151_v60 = vrot.slane %v15233_v12, 9  ;;  %v904_v24 = vld [vmem:[#allocation4 + $0xb8] sm:$0xf]  ;;  %v862_v2 = vld [vmem:[#allocation3 + $0x28] sm:$0xc] }
 0x158   : > { %v1895_v59 = vcombine.low %v15239_v46, %v15243_v30  ;;  %v1766_v61 = vcombine.high %v15122_v15, %v15231_v42  ;;  %v1896_v62 = vcombine.high %v15239_v46, %v15243_v30  ;;  %v863_v35 = vld [vmem:[#allocation3 + $0x2c] sm:$0x3]  ;;  %v969_v3 = vld [vmem:[#allocation3 + $0x28] sm:$0xc]  ;;  %v12133_v7 = vrot.slane %v862_v2, 10 }
 0x159   : > { %v15267_v47 = vrot.slane %v1989_v50, %v15083_v44  ;;  %v2233_v4 = vunpack.i.h.s16 %v1893_v54  ;;  %v2241_v53 = vunpack.i.h.s16 %v15257_v58  ;;  %v15270_v6 = vpack.i.b16 %v1893_v54, %v1768_v52  ;;  %v970_v8 = vld [vmem:[#allocation3 + $0x2c] sm:$0x3]  ;;  %v1069_v18 = vld [vmem:[#allocation3 + $0x28] sm:$0x1]  ;;  %v1133_v19 = vld [vmem:[#allocation3 + $0x28] sm:$0xc] }
 0x15a   : > { %v2237_v5 = vunpack.i.h.s16 %v1895_v59  ;;  %v889_v1 = vrot.slane %v863_v35, 6  ;;  %v1029_v9 = vshrl.u32 %v969_v3, 16  ;;  %v1032_v13 = vshll.u32 %v969_v3, 16  ;;  %v1110_v16 = vld [vmem:[#allocation4 + $0xc4] sm:$0xf] }
 0x15b   : > { %v1038_v63 = vshrl.u32 %v970_v8, 16  ;;  %v1041_v17 = vshll.u32 %v970_v8, 16  ;;  %v15272_v20 = vpack.i.b16 %v1895_v59, %v2233_v4  ;;  %v1095_v26 = vrot.slane %v1069_v18, 5  ;;  %v1134_v28 = vld [vmem:[#allocation3 + $0x2c] sm:$0x3] }
 0x15c   : > { %v15275_v21 = vpack.i.b16 %v15257_v58, %v2237_v5  ;;  %v890_v22 = vsel %vm15028_vm11, %v12133_v7, %v889_v1  ;;  %v1031_v23 = vrot.slane %v1029_v9, 6  ;;  %v1034_v25 = vrot.slane %v1032_v13, 7  ;;  %v1171_v31 = vld [vmem:[#allocation4 + $0x90] sm:$0xf]  ;;  %v1237_v0 = vld [vmem:[#allocation3 + $0x28] sm:$0xc] }
 0x15d   : > { %v905_v56 = vsel %vm15018_vm8, %v890_v22, %v904_v24  ;;  %v1040_v32 = vrot.slane %v1038_v63, 6  ;;  %v1043_v38 = vrot.slane %v1041_v17, 7  ;;  %v12140_v39 = vrot.slane %v1133_v19, 10  ;;  %v1059_v41 = vld [vmem:[#allocation4 + $0xc0] sm:$0xf] }
 0x15e   : > { %906 = vst [vmem:[#allocation4 + $0xb8] sm:$0xf] %v905_v56  ;;  %v1035_v40 = vor.u32 %v1034_v25, %v1031_v23  ;;  %v1096_v36 = vsel %vm15007_vm5, %v12137_v48, %v1095_v26  ;;  %v1155_v45 = vrot.slane %v1134_v28, 6  ;;  %v1238_v29 = vld [vmem:[#allocation3 + $0x2c] sm:$0x3]  ;;  %v1278_v50 = vshrl.u32 %v1237_v0, 16 }
 0x15f   : > { %v1334_v52 = vld [vmem:[#allocation3 + $0x28] sm:$0x1]  ;;  %v1044_v54 = vor.u32 %v1043_v38, %v1040_v32  ;;  %v1111_v59 = vsel %vm15018_vm8, %v1096_v36, %v1110_v16  ;;  %v1281_v2 = vshll.u32 %v1237_v0, 16  ;;  %v1287_v24 = vshrl.u32 %v1238_v29, 16  ;;  %v1371_v35 = vld [vmem:[#allocation4 + $0x9c] sm:$0xf] }
 0x160   : > { %v1395_v3 = vld [vmem:[#allocation3 + $0x28] sm:$0xc]  ;;  %v1396_v4 = vld [vmem:[#allocation3 + $0x2c] sm:$0x3]  ;;  %v1036_v5 = vrot.slane %v1035_v40, 4  ;;  %v1156_v7 = vsel %vm15028_vm11, %v12140_v39, %v1155_v45  ;;  %v1280_v1 = vrot.slane %v1278_v50, 6  ;;  %v2552_v58 = vcombine.low %v15272_v20, %v15275_v21 }
 0x161   : > { %1112 = vst [vmem:[#allocation4 + $0xc4] sm:$0xf] %v1111_v59  ;;  %v1290_v48 = vshll.u32 %v1238_v29, 16  ;;  %v1499_v8 = vld [vmem:[#allocation3 + $0x28] sm:$0xc]  ;;  %v1172_v9 = vsel %vm15018_vm8, %v1156_v7, %v1171_v31  ;;  %v1283_v13 = vrot.slane %v1281_v2, 7 }
 0x162   : > { %v1289_v63 = vrot.slane %v1287_v24, 6  ;;  %v1355_v17 = vrot.slane %v1334_v52, 5  ;;  %v1432_v16 = vld [vmem:[#allocation4 + $0x68] sm:$0xf]  ;;  %v1045_v18 = vsel %vm15034_vm12, %v1036_v5, %v1044_v54  ;;  %1173 = vst [vmem:[#allocation4 + $0x90] sm:$0xf] %v1172_v9 }
 0x163   : > { %v1292_v19 = vrot.slane %v1290_v48, 7  ;;  %v12147_v22 = vrot.slane %v1395_v3, 10  ;;  %v1415_v23 = vrot.slane %v1396_v4, 6  ;;  %v1500_v25 = vld [vmem:[#allocation3 + $0x2c] sm:$0x3]  ;;  %v1060_v26 = vsel %vm15018_vm8, %v1045_v18, %v1059_v41 }
 0x164   : > { %v1284_v28 = vor.u32 %v1283_v13, %v1280_v1  ;;  %v1323_v56 = vld [vmem:[#allocation4 + $0x98] sm:$0xf]  ;;  %v1356_v31 = vsel %vm15007_vm5, %v12144_v49, %v1355_v17  ;;  %v1524_v32 = vshrl.u32 %v1499_v8, 16  ;;  %v1596_v38 = vld [vmem:[#allocation3 + $0x28] sm:$0x1]  ;;  %v1527_v45 = vshll.u32 %v1499_v8, 16 }
 0x165   : > { %v1136_v39 = vld [vmem:[#allocation3 + $0x38] sm:$0x3]  ;;  %1061 = vst [vmem:[#allocation4 + $0xc0] sm:$0xf] %v1060_v26  ;;  %v1293_v0 = vor.u32 %v1292_v19, %v1289_v63  ;;  %v1372_v40 = vsel %vm15018_vm8, %v1356_v31, %v1371_v35  ;;  %v1416_v36 = vsel %vm15028_vm11, %v12147_v22, %v1415_v23  ;;  %v1632_v41 = vld [vmem:[#allocation4 + $0x74] sm:$0xf] }
 0x166   : > { %v1240_v29 = vld [vmem:[#allocation3 + $0x38] sm:$0x3]  ;;  %v1285_v50 = vrot.slane %v1284_v28, 4  ;;  %1373 = vst [vmem:[#allocation4 + $0x9c] sm:$0xf] %v1372_v40  ;;  %v1433_v34 = vsel %vm15018_vm8, %v1416_v36, %v1432_v16  ;;  %v1526_v49 = vrot.slane %v1524_v32, 6 }
 0x167   : > { %v1533_v52 = vshrl.u32 %v1500_v25, 16  ;;  %v15303_v54 = vld [vmem:[#allocation3 + $0x38] sm:$0x3]  ;;  %1434 = vst [vmem:[#allocation4 + $0x68] sm:$0xf] %v1433_v34  ;;  %v1529_v59 = vrot.slane %v1527_v45, 7 }
 0x168   : > { %v1536_v2 = vshll.u32 %v1500_v25, 16  ;;  %v1615_v24 = vrot.slane %v1596_v38, 5  ;;  %v1159_v35 = vrot.slane %v1136_v39, 6  ;;  %v1502_v3 = vld [vmem:[#allocation3 + $0x38] sm:$0x3]  ;;  %v1294_v5 = vsel %vm15034_vm12, %v1285_v50, %v1293_v0 }
 0x169   : > { %v1126_v4 = vld [vmem:[#allocation4 + $0xc8] sm:$0xf]  ;;  %v1535_v7 = vrot.slane %v1533_v52, 6  ;;  %v1305_v1 = vshrl.u32 %v1240_v29, 16  ;;  %v1308_v48 = vshll.u32 %v1240_v29, 16  ;;  %v1324_v9 = vsel %vm15018_vm8, %v1294_v5, %v1323_v56 }
 0x16a   : > { %v1116_v8 = vld [vmem:[#allocation3 + $0x30] sm:$0xf]  ;;  %v1530_v13 = vor.u32 %v1529_v59, %v1526_v49  ;;  %v1538_v63 = vrot.slane %v1536_v2, 7  ;;  %v1584_v17 = vld [vmem:[#allocation4 + $0x70] sm:$0xf]  ;;  %v1616_v16 = vsel %vm15007_vm5, %v12151_v60, %v1615_v24  ;;  %v1419_v26 = vrot.slane %v15303_v54, 6 }
 0x16b   : > { %v1135_v18 = vld [vmem:[#allocation3 + $0x34] sm:$0xc]  ;;  %v1180_v19 = vld [vmem:[#allocation3 + $0x30] sm:$0xf]  ;;  %1325 = vst [vmem:[#allocation4 + $0x98] sm:$0xf] %v1324_v9  ;;  %v1633_v22 = vsel %vm15018_vm8, %v1616_v16, %v1632_v41  ;;  %v1127_v0 = vsel %vm15018_vm8, %v1116_v8, %v1126_v4 }
 0x16c   : > { %v15315_v23 = vrot.slane %v1305_v1, 6  ;;  %v15317_v25 = vrot.slane %v1308_v48, 7  ;;  %v1174_v28 = vld [vmem:[#allocation4 + $0xcc] sm:$0xf]  ;;  %v1531_v56 = vrot.slane %v1530_v13, 4  ;;  %v1539_v31 = vor.u32 %v1538_v63, %v1535_v7 }
 0x16d   : > { %1634 = vst [vmem:[#allocation4 + $0x74] sm:$0xf] %v1633_v22  ;;  %v1551_v12 = vshrl.u32 %v1502_v3, 16  ;;  %v1554_v32 = vshll.u32 %v1502_v3, 16  ;;  %v1239_v38 = vld [vmem:[#allocation3 + $0x34] sm:$0xc] }
 0x16e   : > { %v1387_v60 = vld [vmem:[#allocation4 + $0xa0] sm:$0xf]  ;;  %v1311_v39 = vor.u32 %v15317_v25, %v15315_v23  ;;  %v12141_v40 = vrot.slane %v1135_v18, 10  ;;  %v1209_v36 = vshrl.u32 %v1180_v19, 16  ;;  %v1335_v45 = vld [vmem:[#allocation3 + $0x30] sm:$0xe]  ;;  %v1540_v29 = vsel %vm15034_vm12, %v1531_v56, %v1539_v31 }
 0x16f   : > { %v1336_v41 = vld [vmem:[#allocation3 + $0x34] sm:$0x1]  ;;  %v15326_v50 = vrot.slane %v1551_v12, 6  ;;  %v15328_v34 = vrot.slane %v1554_v32, 7  ;;  %1128 = vst [vmem:[#allocation4 + $0xc8] sm:$0xf] %v1127_v0  ;;  %v1585_v54 = vsel %vm15018_vm8, %v1540_v29, %v1584_v17 }
 0x170   : > { %v1212_v49 = vshll.u32 %v1180_v19, 16  ;;  %v1379_v52 = vld [vmem:[#allocation3 + $0x30] sm:$0xf]  ;;  %v1160_v59 = vsel %vm15028_vm11, %v12141_v40, %v1159_v35  ;;  %v1211_v2 = vrot.slane %v1209_v36, 4  ;;  %v1296_v24 = vshrl.u32 %v1239_v38, 16 }
 0x171   : > { %v1397_v3 = vld [vmem:[#allocation3 + $0x34] sm:$0xc]  ;;  %v1443_v4 = vld [vmem:[#allocation3 + $0x30] sm:$0xf]  ;;  %1586 = vst [vmem:[#allocation4 + $0x70] sm:$0xf] %v1585_v54  ;;  %v1557_v5 = vor.u32 %v15328_v34, %v15326_v50  ;;  %v1175_v7 = vsel %vm15018_vm8, %v1160_v59, %v1174_v28  ;;  %v1388_v16 = vsel %vm15018_vm8, %v1379_v52, %v1387_v60 }
 0x172   : > { %v1214_v1 = vrot.slane %v1212_v49, 5  ;;  %v1299_v48 = vshll.u32 %v1239_v38, 16  ;;  %v1501_v8 = vld [vmem:[#allocation3 + $0x34] sm:$0xc]  ;;  %1176 = vst [vmem:[#allocation4 + $0xcc] sm:$0xf] %v1175_v7 }
 0x173   : > { %v1230_v9 = vld [vmem:[#allocation4 + $0xd0] sm:$0xf]  ;;  %v1298_v13 = vrot.slane %v1296_v24, 6  ;;  %v12145_v63 = vrot.slane %v1335_v45, 9  ;;  %v1359_v17 = vrot.slane %v1336_v41, 5  ;;  %v12148_v22 = vrot.slane %v1397_v3, 10 }
 0x174   : > { %v1374_v35 = vld [vmem:[#allocation4 + $0xd8] sm:$0xf]  ;;  %v1215_v18 = vor.u32 %v1214_v1, %v1211_v2  ;;  %v1301_v19 = vrot.slane %v1299_v48, 7  ;;  %1389 = vst [vmem:[#allocation4 + $0xa0] sm:$0xf] %v1388_v16  ;;  %v1464_v31 = vshrl.u32 %v1443_v4, 16 }
 0x175   : > { %v1435_v56 = vld [vmem:[#allocation4 + $0xa4] sm:$0xf]  ;;  %v1360_v28 = vsel %vm15007_vm5, %v12145_v63, %v1359_v17  ;;  %v1467_v12 = vshll.u32 %v1443_v4, 16  ;;  %v1542_v32 = vshrl.u32 %v1501_v8, 16  ;;  %v1545_v38 = vshll.u32 %v1501_v8, 16 }
 0x176   : > { %v1597_v0 = vld [vmem:[#allocation3 + $0x30] sm:$0xe]  ;;  %v1216_v40 = vrot.slane %v1215_v18, 4  ;;  %v1302_v36 = vor.u32 %v1301_v19, %v1298_v13  ;;  %v1326_v45 = vld [vmem:[#allocation4 + $0xd4] sm:$0xf]  ;;  %v1375_v41 = vsel %vm15018_vm8, %v1360_v28, %v1374_v35  ;;  %v1420_v60 = vsel %vm15028_vm11, %v12148_v22, %v1419_v26 }
 0x177   : > { %v1598_v29 = vld [vmem:[#allocation3 + $0x34] sm:$0x1]  ;;  %1376 = vst [vmem:[#allocation4 + $0xd8] sm:$0xf] %v1375_v41  ;;  %v1436_v49 = vsel %vm15018_vm8, %v1420_v60, %v1435_v56  ;;  %v1466_v52 = vrot.slane %v1464_v31, 4  ;;  %v1469_v54 = vrot.slane %v1467_v12, 5  ;;  %v15355_v8 = vpack.i.b16 %v1896_v62, %v2241_v53 }
 0x178   : > { %v1544_v59 = vrot.slane %v1542_v32, 6  ;;  %v12173_v2 = vld.sshfl [vmem:[#allocation4 + $0x90] sm:$0xff pattern:$0x75316420]  ;;  %v1231_v24 = vsel %vm15018_vm8, %v1216_v40, %v1230_v9  ;;  %v1303_v3 = vrot.slane %v1302_v36, 4  ;;  %v1547_v7 = vrot.slane %v1545_v38, 7 }
 0x179   : > { %1437 = vst [vmem:[#allocation4 + $0xa4] sm:$0xf] %v1436_v49  ;;  %v1491_v4 = vld [vmem:[#allocation4 + $0xa8] sm:$0xf]  ;;  %v12152_v1 = vrot.slane %v1597_v0, 9  ;;  %v1470_v33 = vor.u32 %v1469_v54, %v1466_v52  ;;  %v1619_v26 = vrot.slane %v1598_v29, 5  ;;  %v2550_v9 = vcombine.low %v1766_v61, %v15270_v6 }
 0x17a   : > { %v1635_v48 = vld [vmem:[#allocation4 + $0xb0] sm:$0xf]  ;;  %1232 = vst [vmem:[#allocation4 + $0xd0] sm:$0xf] %v1231_v24  ;;  %v1312_v63 = vsel %vm15034_vm12, %v1303_v3, %v1311_v39  ;;  %v1548_v17 = vor.u32 %v1547_v7, %v1544_v59  ;;  %v1587_v35 = vld [vmem:[#allocation4 + $0xac] sm:$0xf]  ;;  %v12206_v61 = vcombine.low %v15355_v8, %v15267_v47  ;;  %v2590_v18 = vrot.slane %v2552_v58, %v15083_v44 }
 0x17b   : > { %v12172_v13 = vld.sshfl [vmem:[#allocation4 + $0x88] sm:$0xff pattern:$0x75316420]  ;;  %v12179_v46 = vld.sshfl [vmem:[#allocation4 + $0xbc] sm:$0xff pattern:$0x75316420]  ;;  %v1327_v62 = vsel %vm15018_vm8, %v1312_v63, %v1326_v45  ;;  %v1620_v15 = vsel %vm15007_vm5, %v12152_v1, %v1619_v26  ;;  %v2576_v16 = vrot.slane %v2550_v9, %v15083_v44  ;;  %v1990_v22 = vcombine.high %v15235_v43, %v15228_v55 }
 0x17c   : > { %v1991_v30 = vcombine.low %v12172_v13, %v12173_v2  ;;  %v1471_v53 = vrot.slane %v1470_v33, 4  ;;  %v12178_v23 = vld.sshfl [vmem:[#allocation4 + $0xb4] sm:$0xff pattern:$0x75316420]  ;;  %1328 = vst [vmem:[#allocation4 + $0xd4] sm:$0xf] %v1327_v62  ;;  %v1636_v39 = vsel %vm15018_vm8, %v1620_v15, %v1635_v48  ;;  %v2604_v10 = vrot.slane %v12206_v61, %v15083_v44 }
 0x17d   : > { %v1549_v25 = vrot.slane %v1548_v17, 4  ;;  %1637 = vst [vmem:[#allocation4 + $0xb0] sm:$0xf] %v1636_v39  ;;  %v1992_v56 = vcombine.high %v12172_v13, %v12173_v2  ;;  %v2613_v28 = vcombine.high %v15253_v51, %v2576_v16  ;;  %v2612_v12 = vcombine.low %v15253_v51, %v2576_v16  ;;  %v12180_v36 = vld.sshfl [vmem:[#allocation4 + $0xc4] sm:$0xff pattern:$0x75316420] }
 0x17e   : > { %v1492_v19 = vsel %vm15018_vm8, %v1471_v53, %v1491_v4  ;;  %v2117_v32 = vcombine.low %v12178_v23, %v12179_v46  ;;  %v2617_v0 = vcombine.high %v2590_v18, %v2604_v10  ;;  %v2616_v40 = vcombine.low %v2590_v18, %v2604_v10  ;;  %v14139_v2 = vld [vmem:[#allocation5 + $0x138] sm:$0xff]   ;;  %v14141_v3 = vld [vmem:[#allocation5 + $0x170] sm:$0xff]  }
 0x17f   : > { %1493 = vst [vmem:[#allocation4 + $0xa8] sm:$0xf] %v1492_v19  ;;  %v1558_v31 = vsel %vm15034_vm12, %v1549_v25, %v1557_v5  ;;  %v2640_v55 = vrot.slane %v2613_v28, %v15083_v44  ;;  %v15394_v50 = vrot.slane %v1991_v30, %v15083_v44  ;;  %v2118_v37 = vcombine.high %v12178_v23, %v12179_v46  ;;  %v14140_v24 = vld [vmem:[#allocation5 + $0x1b8] sm:$0xff]   ;;  %v14142_v4 = vld [vmem:[#allocation5 + $0x1f0] sm:$0xff]   ;;  %v14145_v46 = vld [vmem:[#allocation5 + $0x168] sm:$0xff]  }
 0x180   : > { %v1588_v38 = vsel %vm15018_vm8, %v1558_v31, %v1587_v35  ;;  %v2668_v34 = vrot.slane %v2617_v0, %v15083_v44  ;;  %v2626_v5 = vrot.slane %v2612_v12, %v15083_v44  ;;  %v2654_v51 = vrot.slane %v2616_v40, %v15083_v44  ;;  %v14143_v26 = vld [vmem:[#allocation5 + $0x130] sm:$0xff]   ;;  %v14146_v30 = vld [vmem:[#allocation5 + $0x1e8] sm:$0xff]   ;;  %v14150_v31 = vld [vmem:[#allocation5 + $0x1e0] sm:$0xff]  }
 0x181   : > { %1589 = vst [vmem:[#allocation4 + $0xac] sm:$0xf] %v1588_v38  ;;  %v12181_v43 = vld.sshfl [vmem:[#allocation4 + $0xcc] sm:$0xff pattern:$0x75316420]  ;;  %v15400_v14 = vrot.slane %v1990_v22, %v15083_v44  ;;  %v15403_v41 = vrot.slane %v1992_v56, %v15083_v44  ;;  %v2127_v29 = vrot.slane %v2117_v32, %v15083_v44  ;;  %v2134_v7 = vrot.slane %v2118_v37, %v15083_v44  ;;  %v14144_v9 = vld [vmem:[#allocation5 + $0x1b0] sm:$0xff]  }
 0x182   : > { %v2119_v45 = vcombine.low %v12180_v36, %v12181_v43  ;;  %v2120_v60 = vcombine.high %v12180_v36, %v12181_v43  ;;  %v2680_v49 = vcombine.low %v2640_v55, %v2668_v34  ;;  %v2681_v52 = vcombine.high %v2640_v55, %v2668_v34  ;;  %v14147_v23 = vld [vmem:[#allocation5 + $0x128] sm:$0xff]   ;;  %v14149_v56 = vld [vmem:[#allocation5 + $0x160] sm:$0xff]   ;;  %v14153_v43 = vld [vmem:[#allocation5 + $0x158] sm:$0xff]  }
 0x183   : > { %v2676_v54 = vcombine.low %v2626_v5, %v2654_v51  ;;  %v2677_v59 = vcombine.high %v2626_v5, %v2654_v51  ;;  %v2021_v33 = vcombine.low %v15267_v47, %v15394_v50  ;;  %v2022_v13 = vcombine.high %v15267_v47, %v15394_v50  ;;  %v14148_v25 = vld [vmem:[#allocation5 + $0x1a8] sm:$0xff]   ;;  %v14151_v12 = vld [vmem:[#allocation5 + $0x120] sm:$0xff]   ;;  %v14154_v34 = vld [vmem:[#allocation5 + $0x1d8] sm:$0xff]  }
 0x184   : > { %v2141_v1 = vrot.slane %v2119_v45, %v15083_v44  ;;  %v2148_v48 = vrot.slane %v2120_v60, %v15083_v44  ;;  %3836 = vmatprep.mubr.bf16.mxu1 %v2680_v49  ;;  %3885 = vmatprep.mubr.bf16.mxu0 %v2681_v52  ;;  %v2553_v63 = vcombine.high %v15272_v20, %v15275_v21  ;;  %v14152_v32 = vld [vmem:[#allocation5 + $0x1a0] sm:$0xff]   ;;  %vm4264_vm5 = vsmask.f32 2304 }
 0x185   : > { %3837 = vmatmul.mubr.bf16.vlgmr.msra.gmra.mxu1 %v2676_v54  ;;  %3886 = vmatmul.mubr.bf16.vlgmr.msra.gmra.mxu0 %v2677_v59  ;;  %v2024_v62 = vcombine.high %v15400_v14, %v15403_v41  ;;  %v12205_v53 = vcombine.high %v15231_v42, %v15270_v6  ;;  %v2555_v47 = vcombine.high %v15355_v8, %v2021_v33  ;;  %v12160_v52 = vld.sshfl [vmem:[#allocation4 + $0x30] sm:$0xff pattern:$0x75316420]  ;;  %vm4265_vm6 = vmand %vm1078_vm1, %vm4264_vm5  ;;  %vm4311_vm8 = vsmask.f32 7424 }
 0x186   : > { %v2149_v17 = vcombine.low %v2127_v29, %v2141_v1  ;;  %v2150_v35 = vcombine.high %v2127_v29, %v2141_v1  ;;  %v2151_v58 = vcombine.low %v2134_v7, %v2148_v48  ;;  %13171 = vmatpush3.bf16.msra.mxu1 %v14139_v2  ;;  %13199 = vmatpush3.bf16.msra.mxu0 %v14140_v24  ;;  %v15456_v29 = vld.sshfl [vmem:[#allocation4 + $0x28] sm:$0xff pattern:$0x75316420]  ;;  %vm6653_vm11 = vcmask 1040384  }
 0x187   : > { %13172 = vmatprep.subr.bf16.mxu1 %v14141_v3  ;;  %13200 = vmatprep.subr.bf16.mxu0 %v14142_v4  ;;  %v2152_v20 = vcombine.high %v2134_v7, %v2148_v48  ;;  %v12211_v39 = vcombine.low %v15400_v14, %v2022_v13  ;;  %v12204_v16 = vcombine.low %v15231_v42, %v15222_v57  ;;  %v15463_v3 = vld.sshfl [vmem:[#allocation4 + $0x20] sm:$0xff pattern:$0x75316420]  ;;  %v14156_v4 = vld [vmem:[#allocation5 + $0x198] sm:$0xff]   ;;  %vm15826_vm12 = vmand %vm6653_vm11, %vm4216_vm0  ;;  %vm11359_vm0 = vsmask.f32 2306 }
 0x188   : > { %v2261_v21 = vunpack.i.h.s16 %v2149_v17  ;;  %v2265_v15 = vunpack.i.h.s16 %v2151_v58  ;;  %v2269_v61 = vunpack.i.h.s16 %v2150_v35  ;;  %v15424_v18 = vrot.slane %v2553_v63, %v15083_v44  ;;  %v12161_v48 = vld.sshfl [vmem:[#allocation4 + $0x38] sm:$0x33 pattern:$0x75316420]  ;;  %v14157_v63 = vld [vmem:[#allocation5 + $0x150] sm:$0xff]   ;;  %vm16699_vm2 = vmand %vm1078_vm1, %vm11359_vm0 }
 0x189   : > { %v15427_v6 = vrot.slane %v2555_v47, %v15083_v44  ;;  %v15429_v8 = vpack.i.b16 %v2149_v17, %v2024_v62  ;;  %v15438_v57 = vrot.slane %v12205_v53, %v15083_v44  ;;  %v15445_v38 = vrot.slane %v12204_v16, %v15083_v44  ;;  %v14158_v17 = vld [vmem:[#allocation5 + $0x1d0] sm:$0xff]   ;;  %v12169_v47 = vld.sshfl [vmem:[#allocation4 + $0x74] sm:$0x33 pattern:$0x75316420] }
 0x18a   : > { %v15431_v19 = vpack.i.b16 %v2151_v58, %v2261_v21  ;;  %v15433_v10 = vpack.i.b16 %v2150_v35, %v2265_v15  ;;  %v15435_v22 = vpack.i.b16 %v2152_v20, %v2269_v61  ;;  %13173 = vmatpush3.bf16.msra.mxu1 %v14143_v26  ;;  %13201 = vmatpush3.bf16.msra.mxu0 %v14144_v9  ;;  %v12166_v35 = vld.sshfl [vmem:[#allocation4 + $0x5c] sm:$0xff pattern:$0x75316420]  ;;  %v12167_v58 = vld.sshfl [vmem:[#allocation4 + $0x64] sm:$0xff pattern:$0x75316420] }
 0x18b   : > { %13174 = vmatprep.subr.bf16.mxu1 %v14145_v46  ;;  %13202 = vmatprep.subr.bf16.mxu0 %v14146_v30  ;;  %v2619_v0 = vcombine.high %v15424_v18, %v15427_v6  ;;  %v2831_v40 = vrot.slane %v12211_v39, %v15083_v44  ;;  %v2615_v37 = vcombine.high %v15445_v38, %v15438_v57  ;;  %v12168_v46 = vld.sshfl [vmem:[#allocation4 + $0x6c] sm:$0xff pattern:$0x75316420]  ;;  %v14159_v61 = vld [vmem:[#allocation5 + $0x110] sm:$0xff]  }
 0x18c   : > { %v2821_v42 = vcombine.low %v15429_v8, %v15431_v19  ;;  %v2823_v28 = vcombine.low %v15433_v10, %v15435_v22  ;;  %v2023_v5 = vcombine.low %v15400_v14, %v15403_v41  ;;  %v14155_v41 = vld [vmem:[#allocation5 + $0x118] sm:$0xff]   ;;  %v2822_v1 = vcombine.high %v15429_v8, %v15431_v19  ;;  %v15478_v39 = vld.sshfl [vmem:[#allocation4 + $0x98] sm:$0xff pattern:$0x75316420] }
 0x18d   : > { %v2675_v49 = vrot.slane %v2619_v0, %v15083_v44  ;;  %v2647_v14 = vrot.slane %v2615_v37, %v15083_v44  ;;  %v2824_v62 = vcombine.high %v15433_v10, %v15435_v22  ;;  %v1799_v20 = vcombine.low %v12160_v52, %v12161_v48  ;;  %v15480_v16 = vld.sshfl [vmem:[#allocation4 + $0xa0] sm:$0xff pattern:$0x75316420]  ;;  %v14161_v10 = vld [vmem:[#allocation5 + $0x148] sm:$0xff]   ;;  %v14166_v37 = vld [vmem:[#allocation5 + $0x1c0] sm:$0xff]  }
 0x18e   : > { %v2845_v36 = vrot.slane %v2821_v42, %v15083_v44  ;;  %v2859_v55 = vrot.slane %v2823_v28, %v15083_v44  ;;  %13175 = vmatpush3.bf16.msra.mxu1 %v14147_v23  ;;  %13203 = vmatpush3.bf16.msra.mxu0 %v14148_v25  ;;  %v12212_v7 = vcombine.high %v2023_v5, %v15394_v50  ;;  %v14160_v23 = vld [vmem:[#allocation5 + $0x190] sm:$0xff]   ;;  %v14162_v22 = vld [vmem:[#allocation5 + $0x1c8] sm:$0xff]  }
 0x18f   : > { %13176 = vmatprep.subr.bf16.mxu1 %v14149_v56  ;;  %13204 = vmatprep.subr.bf16.mxu0 %v14150_v31  ;;  %v2682_v30 = vcombine.low %v2647_v14, %v2675_v49  ;;  %v1797_v50 = vcombine.low %v15463_v3, %v15456_v29  ;;  %v2683_v53 = vcombine.high %v2647_v14, %v2675_v49  ;;  %v14168_v14 = vld [vmem:[#allocation5 + $0x180] sm:$0xff]  }
 0x190   : > { %v2868_v51 = vcombine.high %v2831_v40, %v2845_v36  ;;  %v2871_v45 = vcombine.high %v2859_v55, %v2859_v55  ;;  %v2867_v60 = vcombine.low %v2831_v40, %v2845_v36  ;;  %v2907_v24 = vrot.slane %v2859_v55, %v15083_v44 }
 0x191   : > { %v1800_v21 = vcombine.high %v12160_v52, %v12161_v48  ;;  %v2614_v15 = vcombine.low %v15445_v38, %v15438_v57  ;;  %v15476_v25 = vrot.slane %v2822_v1, %v15083_v44  ;;  %v1798_v8 = vcombine.high %v15463_v3, %v15456_v29  ;;  %v14164_v38 = vld [vmem:[#allocation5 + $0x188] sm:$0xff]   ;;  %v14167_v3 = vld [vmem:[#allocation5 + $0x100] sm:$0xff]   ;;  %v12184_v48 = vld.sshfl [vmem:[#allocation4 + $0xe4] sm:$0xff pattern:$0x75316420] }
 0x192   : > { %v2893_v54 = vrot.slane %v2868_v51, %v15083_v44  ;;  %v2921_v59 = vrot.slane %v2871_v45, %v15083_v44  ;;  %v2879_v2 = vrot.slane %v2867_v60, %v15083_v44  ;;  %13177 = vmatpush3.bf16.msra.mxu1 %v14151_v12  ;;  %13205 = vmatpush3.bf16.msra.mxu0 %v14152_v32  ;;  %v14163_v32 = vld [vmem:[#allocation5 + $0x108] sm:$0xff]  }
 0x193   : > { %13178 = vmatprep.subr.bf16.mxu1 %v14153_v43  ;;  %13206 = vmatprep.subr.bf16.mxu0 %v14154_v34  ;;  %v2618_v19 = vcombine.low %v15424_v18, %v15427_v6  ;;  %v15487_v56 = vrot.slane %v12212_v7, %v15083_v44  ;;  %v15490_v31 = vrot.slane %v1800_v21, %v15083_v44  ;;  %v14165_v43 = vld [vmem:[#allocation5 + $0x140] sm:$0xff]  }
 0x194   : > { %v2933_v33 = vcombine.low %v2893_v54, %v2921_v59  ;;  %v2934_v26 = vcombine.high %v2893_v54, %v2921_v59  ;;  %v2929_v9 = vcombine.low %v2879_v2, %v2907_v24  ;;  %v2930_v13 = vcombine.high %v2879_v2, %v2907_v24  ;;  %v12182_v2 = vld.sshfl [vmem:[#allocation4 + $0xd4] sm:$0xff pattern:$0x75316420]  ;;  %v12183_v24 = vld.sshfl [vmem:[#allocation4 + $0xdc] sm:$0xff pattern:$0x75316420] }
 0x195   : > { %v1925_v57 = vcombine.low %v12166_v35, %v12167_v58  ;;  %v1926_v42 = vcombine.high %v12166_v35, %v12167_v58  ;;  %v1927_v28 = vcombine.low %v12168_v46, %v12169_v47  ;;  %v15493_v12 = vrot.slane %v2824_v62, %v15083_v44 }
 0x196   : > { %3844 = vmatprep.mubr.bf16.mxu1 %v2933_v33  ;;  %3893 = vmatprep.mubr.bf16.mxu0 %v2934_v26  ;;  %v15496_v18 = vrot.slane %v1799_v20, %v15083_v44  ;;  %v1928_v6 = vcombine.high %v12168_v46, %v12169_v47  ;;  %v2870_v0 = vcombine.high %v15487_v56, %v15476_v25  ;;  %v12185_v33 = vld.sshfl [vmem:[#allocation4 + $0xec] sm:$0x33 pattern:$0x75316420] }
 0x197   : > { %3845 = vmatmul.mubr.bf16.gmra.mxu1 %v2929_v9  ;;  %3894 = vmatmul.mubr.bf16.gmra.mxu0 %v2930_v13  ;;  %v15501_v40 = vrot.slane %v1798_v8, %v15083_v44  ;;  %v1935_v36 = vrot.slane %v1925_v57, %v15083_v44  ;;  %v1949_v55 = vrot.slane %v1927_v28, %v15083_v44  ;;  %v14169_v13 = vld [vmem:[#allocation5 + $0x278] sm:$0xff]   ;;  %v14173_v57 = vld [vmem:[#allocation5 + $0x270] sm:$0xff]  }
 0x198   : > { %3934 = vmatprep.mubr.bf16.mxu1 %v2682_v30  ;;  %3983 = vmatprep.mubr.bf16.mxu0 %v2683_v53  ;;  %v15506_v34 = vrot.slane %v1797_v50, %v15083_v44  ;;  %v1942_v5 = vrot.slane %v1926_v42, %v15083_v44  ;;  %v1956_v51 = vrot.slane %v1928_v6, %v15083_v44  ;;  %v14172_v8 = vld [vmem:[#allocation5 + $0x2b8] sm:$0xff]   ;;  %v14174_v42 = vld [vmem:[#allocation5 + $0x2f0] sm:$0xff]  }
 0x199   : > { %13179 = vmatpush3.bf16.msra.mxu1 %v14155_v41  ;;  %13207 = vmatpush3.bf16.msra.mxu0 %v14156_v4  ;;  %v2053_v45 = vcombine.low %v15478_v39, %v15480_v16  ;;  %v1832_v60 = vcombine.high %v15501_v40, %v15490_v31  ;;  %v1957_v29 = vcombine.low %v1935_v36, %v1949_v55 }
 0x19a   : > { %13180 = vmatprep.subr.bf16.mxu1 %v14157_v63  ;;  %13208 = vmatprep.subr.bf16.mxu0 %v14158_v17  ;;  %v1958_v49 = vcombine.high %v1935_v36, %v1949_v55  ;;  %v2872_v52 = vcombine.high %v15493_v12, %v15493_v12  ;;  %v1830_v54 = vcombine.high %v15506_v34, %v15496_v18  ;;  %v14170_v63 = vld [vmem:[#allocation5 + $0x2f8] sm:$0xff]  }
 0x19b   : > { %v1959_v59 = vcombine.low %v1942_v5, %v1956_v51  ;;  %v1960_v41 = vcombine.high %v1942_v5, %v1956_v51  ;;  %v2234_v4 = vunpack.i.h.s16 %v1957_v29  ;;  %v15518_v1 = vpack.i.b16 %v1957_v29, %v1832_v60  ;;  %v14176_v5 = vld [vmem:[#allocation5 + $0x2b0] sm:$0xff]  }
 0x19c   : > { %v2242_v7 = vunpack.i.h.s16 %v1958_v49  ;;  %v2633_v26 = vrot.slane %v2614_v15, %v15083_v44  ;;  %v2661_v9 = vrot.slane %v2618_v19, %v15083_v44  ;;  %v15523_v17 = vrot.slane %v2053_v45, %v15083_v44 }
 0x19d   : > { %13181 = vmatpush3.bf16.msra.mxu1 %v14159_v61  ;;  %13209 = vmatpush3.bf16.msra.mxu0 %v14160_v23  ;;  %v2238_v35 = vunpack.i.h.s16 %v1959_v59  ;;  %v15525_v58 = vpack.i.b16 %v1959_v59, %v2234_v4  ;;  %v2686_v30 = vcombine.low %v1830_v54, %v15518_v1  ;;  %v2900_v62 = vrot.slane %v2870_v0, %v15083_v44  ;;  %v14171_v23 = vld [vmem:[#allocation5 + $0x238] sm:$0xff]   ;;  %v15550_v0 = vld.sshfl [vmem:[#allocation4 + $0xb0] sm:$0x33 pattern:$0x75316420] }
 0x19e   : > { %13182 = vmatprep.subr.bf16.mxu1 %v14161_v10  ;;  %13210 = vmatprep.subr.bf16.mxu0 %v14162_v22  ;;  %v15527_v46 = vpack.i.b16 %v1960_v41, %v2242_v7  ;;  %v2928_v50 = vrot.slane %v2872_v52, %v15083_v44  ;;  %v12207_v47 = vcombine.low %v15506_v34, %v15501_v40  ;;  %v14175_v34 = vld [vmem:[#allocation5 + $0x230] sm:$0xff]   ;;  %v14178_v52 = vld [vmem:[#allocation5 + $0x2e8] sm:$0xff]  }
 0x19f   : > { %v15532_v53 = vpack.i.b16 %v1958_v49, %v2238_v35  ;;  %v2181_v21 = vcombine.low %v12182_v2, %v12183_v24  ;;  %v2182_v15 = vcombine.high %v12182_v2, %v12183_v24  ;;  %v2678_v61 = vcombine.low %v2633_v26, %v2661_v9  ;;  %v14177_v49 = vld [vmem:[#allocation5 + $0x268] sm:$0xff]  }
 0x1a0   : > { %v12210_v20 = vcombine.low %v15527_v46, %v15523_v17  ;;  %v2183_v10 = vcombine.low %v12184_v48, %v12185_v33  ;;  %v2184_v22 = vcombine.high %v12184_v48, %v12185_v33  ;;  %v2869_v28 = vcombine.low %v15487_v56, %v15476_v25 }
 0x1a1   : > { %13183 = vmatpush3.bf16.msra.mxu1 %v14163_v32  ;;  %13211 = vmatpush3.bf16.msra.mxu0 %v14164_v38  ;;  %v2688_v19 = vcombine.low %v15525_v58, %v15532_v53  ;;  %v15543_v6 = vrot.slane %v2686_v30, %v15083_v44  ;;  %v15548_v38 = vld.sshfl [vmem:[#allocation4 + $0xa8] sm:$0xff pattern:$0x75316420]  ;;  %v2679_v40 = vcombine.high %v2633_v26, %v2661_v9  ;;  %v14181_v9 = vld [vmem:[#allocation5 + $0x260] sm:$0xff]  }
 0x1a2   : > { %13184 = vmatprep.subr.bf16.mxu1 %v14165_v43  ;;  %13212 = vmatprep.subr.bf16.mxu0 %v14166_v37  ;;  %v15546_v32 = vrot.slane %v12210_v20, %v15083_v44  ;;  %v2935_v36 = vcombine.low %v2900_v62, %v2928_v50  ;;  %v2936_v43 = vcombine.high %v2900_v62, %v2928_v50  ;;  %v14183_v30 = vld [vmem:[#allocation5 + $0x220] sm:$0xff]  }
 0x1a3   : > { %v15553_v55 = vrot.slane %v2688_v19, %v15083_v44  ;;  %v15556_v25 = vrot.slane %v12207_v47, %v15083_v44  ;;  %v2191_v56 = vrot.slane %v2181_v21, %v15083_v44  ;;  %v15560_v37 = vrot.slane %v2182_v15, %v15083_v44  ;;  %v14184_v62 = vld [vmem:[#allocation5 + $0x2a0] sm:$0xff]   ;;  %v14185_v15 = vld [vmem:[#allocation5 + $0x258] sm:$0xff]  }
 0x1a4   : > { %v2205_v45 = vrot.slane %v2183_v10, %v15083_v44  ;;  %v2212_v60 = vrot.slane %v2184_v22, %v15083_v44  ;;  %v2886_v29 = vrot.slane %v2869_v28, %v15083_v44  ;;  %v2056_v59 = vcombine.high %v15548_v38, %v15550_v0  ;;  %v14187_v10 = vld [vmem:[#allocation5 + $0x218] sm:$0xff]  }
 0x1a5   : > { %13185 = vmatpush3.bf16.msra.mxu1 %v14167_v3  ;;  %13213 = vmatpush3.bf16.msra.mxu0 %v14168_v14  ;;  %v2753_v51 = vcombine.high %v15553_v55, %v15546_v32  ;;  %v2749_v54 = vcombine.high %v15556_v25, %v15543_v6  ;;  %v2914_v2 = vrot.slane %v15493_v12, %v15083_v44  ;;  %v14179_v3 = vld [vmem:[#allocation5 + $0x228] sm:$0xff]   ;;  %v14188_v22 = vld [vmem:[#allocation5 + $0x298] sm:$0xff]  }
 0x1a6   : > { %13226 = vmatprep.subr.bf16.mxu1 %v14169_v13  ;;  %13254 = vmatprep.subr.bf16.mxu0 %v14170_v63  ;;  %v14180_v14 = vld [vmem:[#allocation5 + $0x2a8] sm:$0xff]   ;;  %v2054_v41 = vcombine.high %v15478_v39, %v15480_v16  ;;  %v2213_v4 = vcombine.low %v2191_v56, %v2205_v45  ;;  %v2214_v7 = vcombine.high %v2191_v56, %v2205_v45  ;;  %v14182_v13 = vld [vmem:[#allocation5 + $0x2e0] sm:$0xff]   ;;  %v14192_v56 = vld [vmem:[#allocation5 + $0x290] sm:$0xff]  }
 0x1a7   : > { %v2804_v24 = vrot.slane %v2753_v51, %v15083_v44  ;;  %v2215_v48 = vcombine.low %v15560_v37, %v2212_v60  ;;  %v2931_v33 = vcombine.low %v2886_v29, %v2914_v2  ;;  %v2776_v26 = vrot.slane %v2749_v54, %v15083_v44  ;;  %v14194_v51 = vld [vmem:[#allocation5 + $0x2c8] sm:$0xff]  }
 0x1a8   : > { %3935 = vmatmul.mubr.bf16.vlgmr.msra.gmra.mxu1 %v2678_v61  ;;  %3984 = vmatmul.mubr.bf16.vlgmr.msra.gmra.mxu0 %v2679_v40  ;;  %v2932_v63 = vcombine.high %v2886_v29, %v2914_v2  ;;  %v2055_v12 = vcombine.low %v15548_v38, %v15550_v0  ;;  %v15581_v35 = vrot.slane %v2056_v59, %v15083_v44  ;;  %v2262_v47 = vunpack.i.h.s16 %v2213_v4  ;;  %v14186_v61 = vld [vmem:[#allocation5 + $0x2d8] sm:$0xff]   ;;  %v14189_v38 = vld [vmem:[#allocation5 + $0x250] sm:$0xff]   ;;  %v14196_v29 = vld [vmem:[#allocation5 + $0x288] sm:$0xff]  }
 0x1a9   : > { %3942 = vmatprep.mubr.bf16.mxu1 %v2935_v36  ;;  %3991 = vmatprep.mubr.bf16.mxu0 %v2936_v43  ;;  %v2816_v39 = vcombine.low %v2776_v26, %v2804_v24  ;;  %v2817_v16 = vcombine.high %v2776_v26, %v2804_v24  ;;  %v15584_v50 = vrot.slane %v2054_v41, %v15083_v44  ;;  %v2266_v20 = vunpack.i.h.s16 %v2215_v48  ;;  %v14190_v0 = vld [vmem:[#allocation5 + $0x2d0] sm:$0xff]   ;;  %v14197_v59 = vld [vmem:[#allocation5 + $0x240] sm:$0xff]  }
 0x1aa   : > { %13227 = vmatpush3.bf16.msra.mxu1 %v14171_v23  ;;  %13255 = vmatpush3.bf16.msra.mxu0 %v14172_v8  ;;  %v2270_v21 = vunpack.i.h.s16 %v2214_v7  ;;  %v15587_v23 = vrot.slane %v2055_v12, %v15083_v44  ;;  %v2216_v19 = vcombine.high %v15560_v37, %v2212_v60  ;;  %v14191_v43 = vld [vmem:[#allocation5 + $0x210] sm:$0xff]   ;;  %v14195_v60 = vld [vmem:[#allocation5 + $0x208] sm:$0xff]   ;;  %v14198_v2 = vld [vmem:[#allocation5 + $0x2c0] sm:$0xff]   ;;  %v2752_v24 = vcombine.low %v15553_v55, %v15546_v32 }
 0x1ab   : > { %13228 = vmatprep.subr.bf16.mxu1 %v14173_v57  ;;  %13256 = vmatprep.subr.bf16.mxu0 %v14174_v42  ;;  %v2088_v8 = vcombine.high %v15584_v50, %v15581_v35  ;;  %v15592_v57 = vpack.i.b16 %v2215_v48, %v2262_v47  ;;  %v15594_v42 = vpack.i.b16 %v2214_v7, %v2266_v20  ;;  %v14199_v41 = vld [vmem:[#allocation5 + $0x200] sm:$0xff]   ;;  %v14201_v55 = vld [vmem:[#allocation5 + $0x378] sm:$0xff]  }
 0x1ac   : > { %v15596_v28 = vpack.i.b16 %v2216_v19, %v2270_v21  ;;  %v2086_v40 = vcombine.high %v15523_v17, %v15587_v23  ;;  %v2085_v54 = vcombine.low %v15523_v17, %v15587_v23  ;;  %v2689_v48 = vcombine.high %v15525_v58, %v15532_v53 }
 0x1ad   : > { %v15600_v36 = vpack.i.b16 %v2213_v4, %v2088_v8  ;;  %v14200_v4 = vld [vmem:[#allocation5 + $0x280] sm:$0xff]   ;;  %v2790_v26 = vrot.slane %v2752_v24, %v15083_v44  ;;  %v14208_v8 = vld [vmem:[#allocation5 + $0x3a8] sm:$0xff]   ;;  %v14216_v24 = vld [vmem:[#allocation5 + $0x350] sm:$0xff]  }
 0x1ae   : > { %13229 = vmatpush3.bf16.msra.mxu1 %v14175_v34  ;;  %13257 = vmatpush3.bf16.msra.mxu0 %v14176_v5  ;;  %v2941_v34 = vcombine.low %v15594_v42, %v15596_v28  ;;  %v14193_v5 = vld [vmem:[#allocation5 + $0x248] sm:$0xff]   ;;  %v12213_v45 = vcombine.low %v15584_v50, %v2086_v40  ;;  %v2691_v32 = vcombine.high %v15527_v46, %v2085_v54  ;;  %v14214_v54 = vld [vmem:[#allocation5 + $0x398] sm:$0xff]  }
 0x1af   : > { %13230 = vmatprep.subr.bf16.mxu1 %v14177_v49  ;;  %13258 = vmatprep.subr.bf16.mxu0 %v14178_v52  ;;  %v2939_v37 = vcombine.low %v15600_v36, %v15592_v57  ;;  %v2733_v53 = vrot.slane %v2689_v48, %v15083_v44 }
 0x1b0   : > { %3943 = vmatmul.mubr.bf16.gmra.mxu1 %v2931_v33  ;;  %3992 = vmatmul.mubr.bf16.gmra.mxu0 %v2932_v63  ;;  %v15609_v52 = vrot.slane %v2941_v34, %v15083_v44  ;;  %v14202_v33 = vld [vmem:[#allocation5 + $0x3b8] sm:$0xff]   ;;  %v14210_v34 = vld [vmem:[#allocation5 + $0x360] sm:$0xff]  }
 0x1b1   : > { %4032 = vmatprep.mubr.bf16.mxu1 %v2816_v39  ;;  %4081 = vmatprep.mubr.bf16.mxu0 %v2817_v16  ;;  %v2963_v49 = vrot.slane %v2939_v37, %v15083_v44  ;;  %v14203_v63 = vld [vmem:[#allocation5 + $0x338] sm:$0xff]   ;;  %v14205_v39 = vld [vmem:[#allocation5 + $0x3b0] sm:$0xff]  }
 0x1b2   : > { %13231 = vmatpush3.bf16.msra.mxu1 %v14179_v3  ;;  %13259 = vmatpush3.bf16.msra.mxu0 %v14180_v14  ;;  %v2949_v3 = vrot.slane %v12213_v45, %v15083_v44  ;;  %v2748_v14 = vcombine.low %v15556_v25, %v15543_v6  ;;  %v2989_v17 = vcombine.high %v15609_v52, %v15609_v52 }
 0x1b3   : > { %13232 = vmatprep.subr.bf16.mxu1 %v14181_v9  ;;  %13260 = vmatprep.subr.bf16.mxu0 %v14182_v13  ;;  %v12209_v6 = vcombine.high %v15496_v18, %v15518_v1  ;;  %v12208_v9 = vcombine.low %v15496_v18, %v15490_v31  ;;  %v2747_v13 = vrot.slane %v2691_v32, %v15083_v44  ;;  %v14204_v1 = vld [vmem:[#allocation5 + $0x370] sm:$0xff]  }
 0x1b4   : > { %v2986_v7 = vcombine.high %v2949_v3, %v2963_v49  ;;  %v2762_v25 = vrot.slane %v2748_v14, %v15083_v44  ;;  %v3039_v46 = vrot.slane %v2989_v17, %v15083_v44  ;;  %v2985_v31 = vcombine.low %v2949_v3, %v2963_v49  ;;  %v14212_v49 = vld [vmem:[#allocation5 + $0x320] sm:$0xff]   ;;  %v14217_v3 = vld [vmem:[#allocation5 + $0x390] sm:$0xff]   ;;  %v14220_v17 = vld [vmem:[#allocation5 + $0x388] sm:$0xff]  }
 0x1b5   : > { %v2719_v16 = vrot.slane %v12209_v6, %v15083_v44  ;;  %v2705_v18 = vrot.slane %v12208_v9, %v15083_v44  ;;  %v2755_v20 = vcombine.high %v2733_v53, %v2747_v13  ;;  %v2754_v21 = vcombine.low %v2733_v53, %v2747_v13 }
 0x1b6   : > { %13233 = vmatpush3.bf16.msra.mxu1 %v14183_v30  ;;  %13261 = vmatpush3.bf16.msra.mxu0 %v14184_v62  ;;  %v3011_v58 = vrot.slane %v2986_v7, %v15083_v44  ;;  %v2812_v12 = vcombine.low %v2762_v25, %v2790_v26  ;;  %v2813_v30 = vcombine.high %v2762_v25, %v2790_v26  ;;  %v14219_v7 = vld [vmem:[#allocation5 + $0x348] sm:$0xff]  }
 0x1b7   : > { %13234 = vmatprep.subr.bf16.mxu1 %v14185_v15  ;;  %13262 = vmatprep.subr.bf16.mxu0 %v14186_v61  ;;  %v14206_v15 = vld [vmem:[#allocation5 + $0x330] sm:$0xff]   ;;  %v14207_v61 = vld [vmem:[#allocation5 + $0x368] sm:$0xff]   ;;  %v2751_v19 = vcombine.high %v2705_v18, %v2719_v16  ;;  %v3025_v40 = vrot.slane %v15609_v52, %v15083_v44  ;;  %v14213_v52 = vld [vmem:[#allocation5 + $0x358] sm:$0xff]   ;;  %v2940_v14 = vcombine.high %v15600_v36, %v15592_v57 }
 0x1b8   : > { %v3051_v62 = vcombine.low %v3011_v58, %v3039_v46  ;;  %v3052_v47 = vcombine.high %v3011_v58, %v3039_v46  ;;  %v14222_v57 = vld [vmem:[#allocation5 + $0x340] sm:$0xff]  }
 0x1b9   : > { %v14223_v36 = vld [vmem:[#allocation5 + $0x380] sm:$0xff]  }
 0x1ba   : > { %13235 = vmatpush3.bf16.msra.mxu1 %v14187_v10  ;;  %13263 = vmatpush3.bf16.msra.mxu0 %v14188_v22  ;;  %v2750_v10 = vcombine.low %v2705_v18, %v2719_v16  ;;  %v2997_v22 = vrot.slane %v2985_v31, %v15083_v44 }
 0x1bb   : > { %13236 = vmatprep.subr.bf16.mxu1 %v14189_v38  ;;  %13264 = vmatprep.subr.bf16.mxu0 %v14190_v0  ;;  %v2811_v38 = vrot.slane %v2755_v20, %v15083_v44  ;;  %v15638_v0 = vrot.slane %v2754_v21, %v15083_v44  ;;  %v14227_v20 = vld [vmem:[%s16823_s4] sm:$0xff]  }
 0x1bc   : > { %v15644_v37 = vrot.slane %v2750_v10, %v15083_v44  ;;  %v3048_v45 = vcombine.high %v2997_v22, %v3025_v40 }
 0x1be   : > { %13237 = vmatpush3.bf16.msra.mxu1 %v14191_v43  ;;  %13265 = vmatpush3.bf16.msra.mxu0 %v14192_v56  ;;  %v14209_v43 = vld [vmem:[#allocation5 + $0x328] sm:$0xff]   ;;  %v2783_v56 = vrot.slane %v2751_v19, %v15083_v44  ;;  %v2814_v58 = vcombine.low %v15644_v37, %v15638_v0 }
 0x1bf   : > { %13238 = vmatprep.subr.bf16.mxu1 %v14193_v5  ;;  %13266 = vmatprep.subr.bf16.mxu0 %v14194_v51  ;;  %v14211_v5 = vld [vmem:[#allocation5 + $0x3a0] sm:$0xff]   ;;  %v3047_v51 = vcombine.low %v2997_v22, %v3025_v40 }
 0x1c2   : > { %13239 = vmatpush3.bf16.msra.mxu1 %v14195_v60  ;;  %13267 = vmatpush3.bf16.msra.mxu0 %v14196_v29  ;;  %v2818_v60 = vcombine.low %v2783_v56, %v2811_v38  ;;  %v2815_v29 = vcombine.high %v15644_v37, %v15638_v0 }
 0x1c3   : > { %13240 = vmatprep.subr.bf16.mxu1 %v14197_v59  ;;  %13268 = vmatprep.subr.bf16.mxu0 %v14198_v2  ;;  %v14215_v59 = vld [vmem:[#allocation5 + $0x318] sm:$0xff]   ;;  %v2087_v2 = vcombine.low %v15584_v50, %v15581_v35  ;;  %v2970_v35 = vrot.slane %v2940_v14, %v15083_v44  ;;  %v14221_v50 = vld [vmem:[#allocation5 + $0x308] sm:$0xff]  }
 0x1c5   : > { %v12214_v48 = vcombine.high %v2087_v2, %v15587_v23 }
 0x1c6   : > { %13241 = vmatpush3.bf16.msra.mxu1 %v14199_v41  ;;  %13269 = vmatpush3.bf16.msra.mxu0 %v14200_v4  ;;  %v2942_v41 = vcombine.high %v15594_v42, %v15596_v28  ;;  %v14218_v4 = vld [vmem:[#allocation5 + $0x310] sm:$0xff]   ;;  %v14224_v28 = vld [vmem:[#allocation5 + $0x300] sm:$0xff]  }
 0x1c7   : > { %13282 = vmatprep.subr.bf16.mxu1 %v14201_v55  ;;  %13903 = vmatprep.subr.bf16.mxu0 %v14202_v33  ;;  %v2956_v55 = vrot.slane %v12214_v48, %v15083_v44  ;;  %v12186_v48 = vld [vmem:[%s16822_s3] ss:$0 sm:$0xff] }
 0x1c8   : > { %v2984_v32 = vrot.slane %v2942_v41, %v15083_v44 }
 0x1c9   : > { %4033 = vmatmul.mubr.bf16.vlgmr.msra.gmra.mxu1 %v2812_v12  ;;  %4082 = vmatmul.mubr.bf16.vlgmr.msra.gmra.mxu0 %v2813_v30  ;;  %v2987_v42 = vcombine.low %v2956_v55, %v2970_v35  ;;  %v2988_v23 = vcombine.high %v2956_v55, %v2970_v35 }
 0x1ca   : > { %4040 = vmatprep.mubr.bf16.mxu1 %v3051_v62  ;;  %4089 = vmatprep.mubr.bf16.mxu0 %v3052_v47  ;;  %v3032_v9 = vrot.slane %v2984_v32, %v15083_v44 }
 0x1cb   : > { %13283 = vmatpush3.bf16.msra.mxu1 %v14203_v63  ;;  %13904 = vmatpush3.bf16.msra.mxu0 %v14202_v33  ;;  %v2990_v33 = vcombine.high %v2984_v32, %v2984_v32  ;;  %v3004_v26 = vrot.slane %v2987_v42, %v15083_v44  ;;  %v3018_v6 = vrot.slane %v2988_v23, %v15083_v44 }
 0x1cc   : > { %13284 = vmatprep.subr.bf16.mxu1 %v14204_v1  ;;  %13905 = vmatprep.subr.bf16.mxu0 %v14205_v39 }
 0x1cd   : > { %v3046_v25 = vrot.slane %v2990_v33, %v15083_v44  ;;  %v3050_v46 = vcombine.high %v3004_v26, %v3032_v9  ;;  %v3049_v13 = vcombine.low %v3004_v26, %v3032_v9 }
 0x1cf   : > { %13285 = vmatpush3.bf16.msra.mxu1 %v14206_v15  ;;  %13906 = vmatpush3.bf16.msra.mxu0 %v14205_v39  ;;  %v3053_v53 = vcombine.low %v3018_v6, %v3046_v25 }
 0x1d0   : > { %13286 = vmatprep.subr.bf16.mxu1 %v14207_v61  ;;  %13907 = vmatprep.subr.bf16.mxu0 %v14208_v8 }
 0x1d1   : > { %4041 = vmatmul.mubr.bf16.gmra.mxu1 %v3047_v51  ;;  %4090 = vmatmul.mubr.bf16.gmra.mxu0 %v3048_v45 }
 0x1d2   : > { %4130 = vmatprep.mubr.bf16.mxu1 %v2818_v60  ;;  %13919 = vmatprep.mubr.bf16.mxu0 %v2815_v29 }
 0x1d3   : > { %13287 = vmatpush3.bf16.msra.mxu1 %v14209_v43  ;;  %13908 = vmatpush3.bf16.msra.mxu0 %v14208_v8 }
 0x1d4   : > { %13288 = vmatprep.subr.bf16.mxu1 %v14210_v34  ;;  %13909 = vmatprep.subr.bf16.mxu0 %v14211_v5 }
 0x1d7   : > { %13289 = vmatpush3.bf16.msra.mxu1 %v14212_v49  ;;  %13910 = vmatpush3.bf16.msra.mxu0 %v14211_v5 }
 0x1d8   : > { %13290 = vmatprep.subr.bf16.mxu1 %v14213_v52  ;;  %13911 = vmatprep.subr.bf16.mxu0 %v14214_v54 }
 0x1db   : > { %13291 = vmatpush3.bf16.msra.mxu1 %v14215_v59  ;;  %13912 = vmatpush3.bf16.msra.mxu0 %v14214_v54 }
 0x1dc   : > { %13292 = vmatprep.subr.bf16.mxu1 %v14216_v24  ;;  %13913 = vmatprep.subr.bf16.mxu0 %v14217_v3 }
 0x1df   : > { %13293 = vmatpush3.bf16.msra.mxu1 %v14218_v4  ;;  %13914 = vmatpush3.bf16.msra.mxu0 %v14217_v3 }
 0x1e0   : > { %13294 = vmatprep.subr.bf16.mxu1 %v14219_v7  ;;  %13915 = vmatprep.subr.bf16.mxu0 %v14220_v17 }
 0x1e3   : > { %13295 = vmatpush3.bf16.msra.mxu1 %v14221_v50  ;;  %13916 = vmatpush3.bf16.msra.mxu0 %v14220_v17 }
 0x1e4   : > { %13296 = vmatprep.subr.bf16.mxu1 %v14222_v57  ;;  %13917 = vmatprep.subr.bf16.mxu0 %v14223_v36 }
 0x1e7   : > { %13297 = vmatpush3.bf16.msra.mxu1 %v14224_v28  ;;  %13918 = vmatpush3.bf16.msra.mxu0 %v14223_v36 }
 0x1ea   : > { %4131 = vmatmul.mubr.bf16.vlgmr.msra.gmra.mxu1 %v2814_v58  ;;  %13920 = vmatmul.mubr.bf16.vlgmr.msra.gmra.mxu0 %v3050_v46 }
 0x1eb   : > { %4138 = vmatprep.mubr.bf16.mxu1 %v3053_v53 }
 0x1f2   : > { %4139 = vmatmul.mubr.bf16.gmra.mxu1 %v3049_v13 }
 0x1f3   : > { %13927 = vmatprep.mubr.msk.bf16.mxu1 %vm4328_vm13, %v14227_v20 }
 0x245   : > { %v13130_v63 = vpop.f32.mrf.mxu1  ;;  %v13158_v12 = vpop.f32.mrf.mxu0 }
 0x247   : > { %v13131_v1 = vpop.f32.mrf.mxu1  ;;  %v13159_v39 = vpop.f32.mrf.mxu0 }
 0x248   : > { %v13132_v17 = vadd.f32 %v13131_v1, %v13130_v63  ;;  %v13160_v36 = vadd.f32 %v13159_v39, %v13158_v12 }
 0x249   : > { %v13133_v16 = vpop.f32.mrf.mxu1  ;;  %v13161_v30 = vpop.f32.mrf.mxu0 }
 0x24a   : > { %v3839_v32 = vadd.f32 %v13132_v17, %v12186_v48 }
 0x24b   : > { %v13134_v31 = vpop.f32.mrf.mxu1  ;;  %v13162_v18 = vpop.f32.mrf.mxu0 }
 0x24c   : > { %v13135_v57 = vadd.f32 %v13134_v31, %v13133_v16  ;;  %v3888_v23 = vadd.f32 %v13160_v36, %v3839_v32  ;;  %v13163_v6 = vadd.f32 %v13162_v18, %v13161_v30 }
 0x24e   : > { %v3842_v33 = vadd.f32 %v13135_v57, %v12186_v48 }
 0x250   : > { %v3891_v53 = vadd.f32 %v13163_v6, %v3842_v33 }
 0x257   : > { %v13136_v62 = vpop.f32.mrf.mxu1  ;;  %v13164_v47 = vpop.f32.mrf.mxu0 }
 0x259   : > { %v13137_v21 = vpop.f32.mrf.mxu1  ;;  %v13165_v15 = vpop.f32.mrf.mxu0 }
 0x25a   : > { %v13138_v26 = vadd.f32 %v13137_v21, %v13136_v62  ;;  %v13166_v11 = vadd.f32 %v13165_v15, %v13164_v47 }
 0x25b   : > { %v13139_v61 = vpop.f32.mrf.mxu1  ;;  %v15668_v8 = vpop.f32.mrf.mxu0 }
 0x25c   : > { %v3847_v13 = vadd.f32 %v13138_v26, %v12186_v48 }
 0x25d   : > { %v13140_v19 = vpop.f32.mrf.mxu1  ;;  %v15670_v10 = vpop.f32.mrf.mxu0 }
 0x25e   : > { %v13141_v20 = vadd.f32 %v13140_v19, %v13139_v61 }
 0x260   : > { %v3850_v30 = vadd.f32 %v13141_v20, %v12186_v48 }
 0x268   : > { %v13186_v22 = vpop.f32.mrf.mxu1  ;;  %v13214_v38 = vpop.f32.mrf.mxu0 }
 0x26a   : > { %v13187_v0 = vpop.f32.mrf.mxu1  ;;  %v13215_v40 = vpop.f32.mrf.mxu0 }
 0x26b   : > { %v13188_v55 = vadd.f32 %v13187_v0, %v13186_v22  ;;  %v13216_v63 = vadd.f32 %v13215_v40, %v13214_v38  ;;  %v3896_v22 = vadd.f32 %v13166_v11, %v3847_v13  ;;  %v13169_v38 = vadd.f32 %v15670_v10, %v15668_v8 }
 0x26c   : > { %v13189_v43 = vpop.f32.mrf.mxu1  ;;  %v13217_v56 = vpop.f32.mrf.mxu0 }
 0x26d   : > { %v3937_v25 = vadd.f32 %v13188_v55, %v3888_v23 }
 0x26e   : > { %v13190_v37 = vpop.f32.mrf.mxu1  ;;  %v13218_v34 = vpop.f32.mrf.mxu0 }
 0x26f   : > { %v13191_v9 = vadd.f32 %v13190_v37, %v13189_v43  ;;  %v3986_v17 = vadd.f32 %v13216_v63, %v3937_v25  ;;  %v13219_v0 = vadd.f32 %v13218_v34, %v13217_v56  ;;  %v3899_v56 = vadd.f32 %v13169_v38, %v3850_v30 }
 0x270   : > { %v13192_v5 = vpop.f32.mrf.mxu1  ;;  %v13220_v51 = vpop.f32.mrf.mxu0 }
 0x271   : > { %v3940_v16 = vadd.f32 %v13191_v9, %v3891_v53 }
 0x272   : > { %v13193_v45 = vpop.f32.mrf.mxu1  ;;  %v13221_v60 = vpop.f32.mrf.mxu0 }
 0x273   : > { %v13194_v12 = vadd.f32 %v13193_v45, %v13192_v5  ;;  %v3989_v43 = vadd.f32 %v13219_v0, %v3940_v16  ;;  %v13222_v61 = vadd.f32 %v13221_v60, %v13220_v51  ;;  %v4259_v0 = vld [vmem:[#allocation2] sm:$0xf] }
 0x274   : > { %v13195_v29 = vpop.f32.mrf.mxu1  ;;  %v15672_v49 = vpop.f32.mrf.mxu0 }
 0x275   : > { %v3945_v37 = vadd.f32 %v13194_v12, %v3896_v22  ;;  %v14478_v22 = vld [vmem:[%s16830_s11 + $0x78] sm:$0xff]  }
 0x276   : > { %v13196_v52 = vpop.f32.mrf.mxu1  ;;  %v15674_v54 = vpop.f32.mrf.mxu0 }
 0x277   : > { %v13197_v47 = vadd.f32 %v13196_v52, %v13195_v29  ;;  %v13225_v10 = vadd.f32 %v15674_v54, %v15672_v49 }
 0x289   : > { %v13242_v59 = vpop.f32.mrf.mxu1  ;;  %v13270_v2 = vpop.f32.mrf.mxu0 }
 0x28b   : > { %v13243_v24 = vpop.f32.mrf.mxu1  ;;  %v13271_v3 = vpop.f32.mrf.mxu0 }
 0x28c   : > { %v13244_v1 = vadd.f32 %v13243_v24, %v13242_v59  ;;  %v13272_v57 = vadd.f32 %v13271_v3, %v13270_v2  ;;  %v3994_v59 = vadd.f32 %v13222_v61, %v3945_v37  ;;  %v14354_v37 = vld [vmem:[%s16826_s7 + $0x8] sm:$0xff]  }
 0x28d   : > { %v13245_v14 = vpop.f32.mrf.mxu1  ;;  %v13273_v41 = vpop.f32.mrf.mxu0 }
 0x28e   : > { %v4035_v32 = vadd.f32 %v13244_v1, %v3986_v17 }
 0x28f   : > { %v13246_v4 = vpop.f32.mrf.mxu1  ;;  %v13274_v7 = vpop.f32.mrf.mxu0 }
 0x290   : > { %v13247_v62 = vadd.f32 %v13246_v4, %v13245_v14  ;;  %v4084_v40 = vadd.f32 %v13272_v57, %v4035_v32  ;;  %v13275_v24 = vadd.f32 %v13274_v7, %v13273_v41  ;;  %v3948_v4 = vadd.f32 %v13197_v47, %v3899_v56 }
 0x291   : > { %v13248_v35 = vpop.f32.mrf.mxu1  ;;  %v13276_v50 = vpop.f32.mrf.mxu0 }
 0x292   : > { %v4038_v5 = vadd.f32 %v13247_v62, %v3989_v43 }
 0x293   : > { %v13249_v42 = vpop.f32.mrf.mxu1  ;;  %v13277_v28 = vpop.f32.mrf.mxu0 }
 0x294   : > { %v13250_v45 = vadd.f32 %v13249_v42, %v13248_v35  ;;  %v4087_v2 = vadd.f32 %v13275_v24, %v4038_v5  ;;  %v13278_v29 = vadd.f32 %v13277_v28, %v13276_v50  ;;  %v3997_v42 = vadd.f32 %v13225_v10, %v3948_v4 }
 0x295   : > { %v13251_v58 = vpop.f32.mrf.mxu1  ;;  %v13279_v46 = vpop.f32.mrf.mxu0 }
 0x296   : > { %v4043_v3 = vadd.f32 %v13250_v45, %v3994_v59 }
 0x297   : > { %v13252_v39 = vpop.f32.mrf.mxu1  ;;  %v13280_v31 = vpop.f32.mrf.mxu0 }
 0x298   : > { %v13253_v51 = vadd.f32 %v13252_v39, %v13251_v58  ;;  %v4092_v41 = vadd.f32 %v13278_v29, %v4043_v3  ;;  %v13281_v1 = vadd.f32 %v13280_v31, %v13279_v46 }
 0x29a   : > { %v4046_v25 = vadd.f32 %v13253_v51, %v3997_v42 }
 0x29c   : > { %v4095_v28 = vadd.f32 %v13281_v1, %v4046_v25  ;;  %v14230_v25 = vld [vmem:[%s16823_s4 + $0x18] sm:$0xff]   ;;  %v14235_v1 = vld [vmem:[#allocation7 + $0x68] sm:$0xff]  }
 0x2aa   : > { %v13298_v18 = vpop.f32.mrf.mxu1  ;;  %v13921_v21 = vpop.f32.mrf.mxu0 }
 0x2ac   : > { %v13299_v15 = vpop.f32.mrf.mxu1  ;;  %v4181_v19 = vpop.f32.mrf.mxu0 }
 0x2ad   : > { %v13300_v11 = vadd.f32 %v13299_v15, %v13298_v18 }
 0x2ae   : > { %v13301_v34 = vpop.f32.mrf.mxu1  ;;  %v13922_v48 = vpop.f32.mrf.mxu0 }
 0x2af   : > { %v4133_v14 = vadd.f32 %v13300_v11, %v4084_v40 }
 0x2b0   : > { %v13302_v36 = vpop.f32.mrf.mxu1  ;;  %v4184_v23 = vpop.f32.mrf.mxu0 }
 0x2b1   : > { %v4182_v55 = vadd.f32 %v4181_v19, %v4133_v14  ;;  %v13303_v8 = vadd.f32 %v13302_v36, %v13301_v34 }
 0x2b2   : > { %v13304_v60 = vpop.f32.mrf.mxu1 }
 0x2b3   : > { %v4196_v52 = vmul.f32 0.2, %v4182_v55  ;;  %v4136_v35 = vadd.f32 %v13303_v8, %v4087_v2  ;;  %v4266_v2 = vld [vmem:[#allocation2 + $0xc] sm:$0x7] }
 0x2b4   : > { %v13305_v33 = vpop.f32.mrf.mxu1 }
 0x2b5   : > { %v4200_v7 = vmax.f32 %v4182_v55, %v4196_v52  ;;  %v4185_v26 = vadd.f32 %v4184_v23, %v4136_v35  ;;  %v13306_v6 = vadd.f32 %v13305_v33, %v13304_v60 }
 0x2b6   : > { %v13307_v9 = vpop.f32.mrf.mxu1 }
 0x2b7   : > { %v13045_v53 = vpack.c.bf16 %v4200_v7, %v4200_v7  ;;  %v4197_v13 = vmul.f32 0.2, %v4185_v26  ;;  %v4141_v63 = vadd.f32 %v13306_v6, %v4092_v41  ;;  %v14229_v6 = vld [vmem:[%s16823_s4 + $0x10] sm:$0xff]  }
 0x2b8   : > { %v13308_v20 = vpop.f32.mrf.mxu1 }
 0x2b9   : > { %v4220_v49 = vshrl.u32 %v13045_v53, 16  ;;  %v4201_v54 = vmax.f32 %v4185_v26, %v4197_v13  ;;  %v4190_v50 = vadd.f32 %v13921_v21, %v4141_v63  ;;  %v13309_v58 = vadd.f32 %v13308_v20, %v13307_v9  ;;  %v14228_v26 = vld [vmem:[%s16823_s4 + $0x8] sm:$0xff]   ;;  %v14231_v9 = vld [vmem:[#allocation7 + $0x78] sm:$0xff]   ;;  %v14233_v13 = vld [vmem:[#allocation7 + $0x70] sm:$0xff]  }
 0x2ba   : > { %v4223_v16 = vshll.u32 %v13045_v53, 16  ;;  %v14232_v53 = vld [vmem:[#allocation7 + $0x38] sm:$0xff]   ;;  %13326 = vmatprep.subr.bf16.mxu0 %v14231_v9  ;;  %v14234_v63 = vld [vmem:[#allocation7 + $0x30] sm:$0xff]  }
 0x2bb   : > { %v4222_v17 = vrot.slane %v4220_v49, 7  ;;  %v13046_v12 = vpack.c.bf16 %v4201_v54, %v4201_v54  ;;  %v4198_v39 = vmul.f32 0.2, %v4190_v50  ;;  %v4144_v32 = vadd.f32 %v13309_v58, %v4095_v28  ;;  %13327 = vmatpush3.bf16.msra.mxu0 %v14232_v53  ;;  %v14236_v20 = vld [vmem:[#allocation7 + $0xf8] sm:$0xff]   ;;  %v14237_v49 = vld [vmem:[#allocation7 + $0x28] sm:$0xff]   ;;  %v14240_v28 = vld [vmem:[#allocation7 + $0xf0] sm:$0xff]  }
 0x2bc   : > { %13328 = vmatprep.subr.bf16.mxu0 %v14233_v13  ;;  %v14238_v54 = vld [vmem:[#allocation7 + $0xb8] sm:$0xff]   ;;  %v14242_v58 = vld [vmem:[#allocation7 + $0xb0] sm:$0xff]  }
 0x2bd   : > { %v4225_v62 = vor.u32 %v4223_v16, %v4222_v17  ;;  %v4228_v46 = vshrl.u32 %v13046_v12, 16  ;;  %v4202_v31 = vmax.f32 %v4190_v50, %v4198_v39  ;;  %v4193_v30 = vadd.f32 %v13922_v48, %v4144_v32  ;;  %v14239_v50 = vld [vmem:[#allocation7 + $0x60] sm:$0xff]   ;;  %v14244_v16 = vld [vmem:[#allocation7 + $0xe8] sm:$0xff]   ;;  %v14245_v39 = vld [vmem:[#allocation7 + $0x18] sm:$0xff]  }
 0x2be   : > { %v4231_v43 = vshll.u32 %v13046_v12, 16  ;;  %v4226_v61 = vrot.slane %v4222_v17, 4  ;;  %v14241_v17 = vld [vmem:[#allocation7 + $0x20] sm:$0xff]   ;;  %v14243_v12 = vld [vmem:[#allocation7 + $0x58] sm:$0xff]  }
 0x2bf   : > { %v4260_v18 = vsel %vm15684_vm15, %v4225_v62, %v4259_v0  ;;  %v4230_v21 = vrot.slane %v4228_v46, 7  ;;  %v13047_v57 = vpack.c.bf16 %v4202_v31, %v4202_v31  ;;  %v4199_v38 = vmul.f32 0.2, %v4193_v30  ;;  %13329 = vmatpush3.bf16.msra.mxu0 %v14234_v63  ;;  %v14246_v0 = vld [vmem:[#allocation7 + $0xa8] sm:$0xff]   ;;  %v14248_v32 = vld [vmem:[#allocation7 + $0xe0] sm:$0xff]   ;;  %v14247_v31 = vld [vmem:[#allocation7 + $0x50] sm:$0xff]  }
 0x2c0   : > { %4261 = vst [vmem:[#allocation2] sm:$0xf] %v4260_v18  ;;  %13330 = vmatprep.subr.bf16.mxu0 %v14235_v1  ;;  %v4454_v62 = vld [vmem:[#allocation3] sm:$0x3]  ;;  %v4462_v46 = vld [vmem:[#allocation3 + $0x4] sm:$0x3] }
 0x2c1   : > { %v4233_v47 = vor.u32 %v4231_v43, %v4230_v21  ;;  %v4237_v15 = vshrl.u32 %v13047_v57, 16  ;;  %v4203_v19 = vmax.f32 %v4193_v30, %v4199_v38  ;;  %v4240_v45 = vshll.u32 %v13047_v57, 16  ;;  %4458 = vst [vmem:[#allocation4] sm:$0x3] %v4454_v62  ;;  %4466 = vst [vmem:[#allocation4 + $0x4] sm:$0x3] %v4462_v46 }
 0x2c2   : > { %v4235_v56 = vrot.slane %v4230_v21, 4  ;;  %v4470_v30 = vld [vmem:[#allocation3] sm:$0x7]  ;;  %v16858_v21 = vmov 0   ;;  %v14250_v43 = vld [vmem:[#allocation7 + $0xa0] sm:$0xff]   ;;  %v14249_v57 = vld [vmem:[#allocation7 + $0x10] sm:$0xff]  }
 0x2c3   : > { %v4234_v40 = vsel %vm15691_vm4, %v4226_v61, %v4233_v47  ;;  %v4239_v5 = vrot.slane %v4237_v15, 7  ;;  %v13048_v11 = vpack.c.bf16 %v4203_v19, %v4203_v19  ;;  %13331 = vmatpush3.bf16.msra.mxu0 %v14237_v49  ;;  %v4566_v18 = vld [vmem:[#allocation3] sm:$0x6]  ;;  %v14252_v38 = vld [vmem:[#allocation7 + $0xd8] sm:$0xff]   ;;  %v14256_v19 = vld [vmem:[#allocation7 + $0xd0] sm:$0xff]  }
 0x2c4   : > { %4262 = vst [vmem:[#allocation2 + $0x4] sm:$0xf] %v4234_v40  ;;  %13332 = vmatprep.subr.bf16.mxu0 %v14239_v50  ;;  %6754 = vst [vmem:[#allocation3] sm:$0xf] %v16858_v21  ;;  %v14251_v61 = vld [vmem:[#allocation7 + $0x48] sm:$0xff]   ;;  %v14254_v47 = vld [vmem:[#allocation7 + $0x98] sm:$0xff]  }
 0x2c5   : > { %v4242_v34 = vor.u32 %v4240_v45, %v4239_v5  ;;  %v4246_v59 = vshrl.u32 %v13048_v11, 16  ;;  %v4249_v4 = vshll.u32 %v13048_v11, 16  ;;  %v4244_v48 = vrot.slane %v4239_v5, 4  ;;  %v14253_v15 = vld [vmem:[#allocation7 + $0x8] sm:$0xff]   ;;  %v14255_v40 = vld [vmem:[#allocation7 + $0x40] sm:$0xff]   ;;  %v14258_v5 = vld [vmem:[#allocation7 + $0x90] sm:$0xff]  }
 0x2c6   : > { %v14257_v45 = vld [vmem:[#allocation7] sm:$0xff]   ;;  %v14268_v53 = vld [vmem:[#allocation7 + $0x1f8] sm:$0xff]   ;;  %v4793_v62 = vld [vmem:[#allocation3 + $0x40] sm:$0x7] }
 0x2c7   : > { %v4243_v24 = vsel %vm15691_vm4, %v4235_v56, %v4242_v34  ;;  %v4248_v14 = vrot.slane %v4246_v59, 7  ;;  %13333 = vmatpush3.bf16.msra.mxu0 %v14241_v17  ;;  %v14259_v59 = vld [vmem:[#allocation7 + $0xc8] sm:$0xff]  }
 0x2c8   : > { %4263 = vst [vmem:[#allocation2 + $0x8] sm:$0xf] %v4243_v24  ;;  %13334 = vmatprep.subr.bf16.mxu0 %v14243_v12  ;;  %v15716_v11 = vld.sshfl [vmem:[#allocation4] sm:$0xf pattern:$0x76325410] }
 0x2c9   : > { %v4251_v36 = vor.u32 %v4249_v4, %v4248_v14  ;;  %v14260_v14 = vld [vmem:[#allocation7 + $0x178] sm:$0xff]   ;;  %v14261_v4 = vld [vmem:[#allocation7 + $0x88] sm:$0xff]   ;;  %v4729_v12 = vld [vmem:[#allocation3 + $0x3c] sm:$0x3] }
 0x2ca   : > { %4733 = vst [vmem:[#allocation4 + $0xdc] sm:$0x3] %v4729_v12 }
 0x2cb   : > { %v4252_v3 = vsel %vm15691_vm4, %v4244_v48, %v4251_v36  ;;  %v14226_v8 = vld [vmem:[#allocation2] sm:$0xff]   ;;  %13335 = vmatpush3.bf16.msra.mxu0 %v14245_v39  ;;  %v6768_v56 = vld [vmem:[#allocation3] sm:$0x1]  ;;  %v6776_v34 = vld [vmem:[#allocation3] sm:$0x4]  ;;  %v12357_v48 = vrot.slane %v4566_v18, 9 }
 0x2cc   : > { %v4267_v55 = vsel %vm4265_vm6, %v4252_v3, %v4266_v2  ;;  %v4315_v10 = vshll.u32 %v14226_v8, 16  ;;  %v4313_v42 = vshrl.u32 %v14226_v8, 16  ;;  %13336 = vmatprep.subr.bf16.mxu0 %v14247_v31  ;;  %6772 = vst [vmem:[#allocation4] sm:$0x1] %v6768_v56  ;;  %v12548_v24 = vrot.slane %v6776_v34, 10  ;;  %v14263_v36 = vld [vmem:[#allocation7 + $0xc0] sm:$0xff]  }
 0x2cd   : > { %4268 = vst [vmem:[#allocation2 + $0xc] sm:$0x7] %v4267_v55  ;;  %4586 = vst [vmem:[#allocation4 + $0x10] sm:$0x3] %v12357_v48  ;;  %v14265_v2 = vld [vmem:[#allocation7 + $0x80] sm:$0xff]   ;;  %v4475_v3 = vshrl.u32 %v4470_v30, 16 }
 0x2ce   : > { %v4317_v29 = vrot.slane %v4315_v10, 1  ;;  %6796 = vst [vmem:[#allocation4 + $0x4] sm:$0x1] %v12548_v24  ;;  %v4478_v55 = vshll.u32 %v4470_v30, 16  ;;  %v4518_v8 = vld [vmem:[#allocation3 + $0x4] sm:$0x7] }
 0x2cf   : > { %13337 = vmatpush3.bf16.msra.mxu0 %v14249_v57  ;;  %v4523_v10 = vshrl.u32 %v4518_v8, 16  ;;  %v4737_v39 = vld [vmem:[#allocation3 + $0x40] sm:$0x3]  ;;  %v4822_v30 = vshrl.u32 %v4793_v62, 16  ;;  %v4825_v18 = vshll.u32 %v4793_v62, 16 }
 0x2d0   : > { %v4318_v33 = vor.u32 %v4317_v29, %v4313_v42  ;;  %13338 = vmatprep.subr.bf16.mxu0 %v14251_v61  ;;  %v4480_v29 = vrot.slane %v4478_v55, 5  ;;  %4741 = vst [vmem:[#allocation4 + $0xe0] sm:$0x3] %v4737_v39 }
 0x2d1   : > { %v4824_v61 = vrot.slane %v4822_v30, 4 }
 0x2d3   : > { %13339 = vmatpush3.bf16.msra.mxu0 %v14253_v15 }
 0x2d4   : > { %v14225_v51 = vld [vmem:[#allocation2 + $0x8] sm:$0x7f]   ;;  %13340 = vmatprep.subr.bf16.mxu0 %v14255_v40 }
 0x2d5   : > { %v4320_v60 = vshll.u32 %v14225_v51, 16  ;;  %v4324_v35 = vshrl.u32 %v14225_v51, 16  ;;  %v4526_v51 = vshll.u32 %v4518_v8, 16 }
 0x2d7   : > { %v4322_v52 = vrot.slane %v4320_v60, 1  ;;  %13341 = vmatpush3.bf16.msra.mxu0 %v14257_v45  ;;  %v4477_v60 = vrot.slane %v4475_v3, 4  ;;  %v15724_v45 = vld.sshfl [vmem:[#allocation4 + $0xdc] sm:$0xf pattern:$0x76325410] }
 0x2d8   : > { %13370 = vmatprep.subr.bf16.mxu0 %v14260_v14 }
 0x2d9   : > { %v4326_v23 = vor.u32 %v4324_v35, %v4322_v52  ;;  %v4323_v7 = vsel %vm4311_vm8, %v4318_v33, %v4322_v52  ;;  %v4525_v52 = vrot.slane %v4523_v10, 4  ;;  %v4528_v35 = vrot.slane %v4526_v51, 5 }
 0x2da   : > { %v4481_v42 = vor.u32 %v4480_v29, %v4477_v60 }
 0x2db   : > { %14047 = vmatprep.subr.msk.bf16.mxu1 %vm4341_vm7, %v4326_v23  ;;  %v4343_v41 = vsel %vm4341_vm7, %v4326_v23, 0  ;;  %v15718_v23 = vld [vmem:[#allocation3] sm:$0x2]  ;;  %v4529_v33 = vor.u32 %v4528_v35, %v4525_v52 }
 0x2dc   : > { %13924 = vmatpush3.bf16.msra.mxu1 %v4343_v41  ;;  %v6800_v41 = vld [vmem:[#allocation3] sm:$0x3] }
 0x2dd   : > { %13925 = vmatprep.subr.bf16.mxu1 %v4323_v7  ;;  %v4530_v13 = vrot.slane %v4529_v33, 4 }
 0x2df   : > { %4562 = vst [vmem:[#allocation4 + $0xc] sm:$0x3] %v4530_v13 }
 0x2e0   : > { %13926 = vmatpush3.bf16.msra.mxu1 %v4323_v7  ;;  %v6848_v7 = vld [vmem:[#allocation3] sm:$0xc] }
 0x2e1   : > { %13348 = vmatprep.subr.bf16.mxu1 %v14236_v20  ;;  %v6853_v9 = vshrl.u32 %v6848_v7, 16  ;;  %9197 = vst [vmem:[#allocation3] sm:$0xf] %v16858_v21  ;;  %v6856_v63 = vshll.u32 %v6848_v7, 16 }
 0x2e3   : > { %13928 = vmatmul.mubr.msk.bf16.vlgmr.msra.gmra.mxu1 %vm4328_vm13, %v14228_v26  ;;  %v4482_v26 = vrot.slane %v4481_v42, 4  ;;  %v6855_v49 = vrot.slane %v6853_v9, 6 }
 0x2e4   : > { %13931 = vmatprep.mubr.msk.bf16.mxu1 %vm4328_vm13, %v14229_v6  ;;  %13349 = vmatpush3.bf16.msra.mxu1 %v14238_v54  ;;  %v6805_v6 = vshrl.u32 %v6800_v41, 16  ;;  %v6858_v54 = vrot.slane %v6856_v63, 7 }
 0x2e5   : > { %13350 = vmatprep.subr.bf16.mxu1 %v14240_v28  ;;  %4514 = vst [vmem:[#allocation4 + $0x8] sm:$0x3] %v4482_v26 }
 0x2e6   : > { %v6807_v1 = vrot.slane %v6805_v6, 4  ;;  %v6859_v28 = vor.u32 %v6858_v54, %v6855_v49 }
 0x2e8   : > { %13351 = vmatpush3.bf16.msra.mxu1 %v14242_v58  ;;  %v6860_v17 = vrot.slane %v6859_v28, 4 }
 0x2e9   : > { %13352 = vmatprep.subr.bf16.mxu1 %v14244_v16 }
 0x2eb   : > { %13932 = vmatmul.mubr.msk.bf16.gmra.mxu1 %vm4328_vm13, %v14230_v25  ;;  %v6808_v25 = vshll.u32 %v6800_v41, 16  ;;  %vm9135_vm13 = vcmask 64512  }
 0x2ec   : > { %13353 = vmatpush3.bf16.msra.mxu1 %v14246_v0  ;;  %v15721_v16 = vld.sshfl [vmem:[#allocation4 + $0x8] sm:$0xf pattern:$0x76325410]  ;;  %v4745_v0 = vld [vmem:[#allocation3 + $0x3c] sm:$0x7] }
 0x2ed   : > { %13354 = vmatprep.subr.bf16.mxu1 %v14248_v32  ;;  %v6810_v20 = vrot.slane %v6808_v25, 5  ;;  %6892 = vst [vmem:[#allocation4 + $0xc] sm:$0x1] %v6860_v17  ;;  %v4841_v32 = vld [vmem:[#allocation3 + $0x3c] sm:$0x6]  ;;  %v4774_v46 = vshrl.u32 %v4745_v0, 16 }
 0x2ee   : > { %6755 = vst [vmem:[#allocation3 + $0x3c] sm:$0xf] %v16858_v21  ;;  %v4777_v31 = vshll.u32 %v4745_v0, 16 }
 0x2ef   : > { %v6811_v50 = vor.u32 %v6810_v20, %v6807_v1  ;;  %v4776_v57 = vrot.slane %v4774_v46, 4 }
 0x2f0   : > { %13355 = vmatpush3.bf16.msra.mxu1 %v14250_v43  ;;  %v12368_v43 = vrot.slane %v4841_v32, 9 }
 0x2f1   : > { %13356 = vmatprep.subr.bf16.mxu1 %v14252_v38  ;;  %v6812_v58 = vrot.slane %v6811_v50, 4  ;;  %v4779_v38 = vrot.slane %v4777_v31, 5 }
 0x2f2   : > { %4861 = vst [vmem:[#allocation4 + $0xec] sm:$0x3] %v12368_v43 }
 0x2f3   : > { %6844 = vst [vmem:[#allocation4 + $0x8] sm:$0x1] %v6812_v58  ;;  %v4780_v15 = vor.u32 %v4779_v38, %v4776_v57 }
 0x2f4   : > { %13357 = vmatpush3.bf16.msra.mxu1 %v14254_v47  ;;  %v4827_v47 = vrot.slane %v4825_v18, 5 }
 0x2f5   : > { %13358 = vmatprep.subr.bf16.mxu1 %v14256_v19  ;;  %v4781_v40 = vrot.slane %v4780_v15, 4  ;;  %v7075_v56 = vld [vmem:[#allocation3 + $0x3c] sm:$0x1]  ;;  %v7083_v34 = vld [vmem:[#allocation3 + $0x3c] sm:$0x4] }
 0x2f6   : > { %v4828_v19 = vor.u32 %v4827_v47, %v4824_v61  ;;  %7079 = vst [vmem:[#allocation4 + $0xdc] sm:$0x1] %v7075_v56  ;;  %v7107_v24 = vld [vmem:[#allocation3 + $0x3c] sm:$0x3]  ;;  %v7155_v14 = vld [vmem:[#allocation3 + $0x3c] sm:$0xc] }
 0x2f7   : > { %4789 = vst [vmem:[#allocation4 + $0xe4] sm:$0x3] %v4781_v40  ;;  %v7139_v48 = vshll.u32 %v7107_v24, 16  ;;  %v12552_v47 = vrot.slane %v15718_v23, 9 }
 0x2f8   : > { %13359 = vmatpush3.bf16.msra.mxu1 %v14258_v5  ;;  %v4829_v5 = vrot.slane %v4828_v19, 4 }
 0x2f9   : > { %13360 = vmatprep.subr.bf16.mxu1 %v14259_v59  ;;  %v12567_v59 = vrot.slane %v7083_v34, 10  ;;  %v7141_v55 = vrot.slane %v7139_v48, 5 }
 0x2fa   : > { %4837 = vst [vmem:[#allocation4 + $0xe8] sm:$0x3] %v4829_v5 }
 0x2fb   : > { %7103 = vst [vmem:[#allocation4 + $0xe0] sm:$0x1] %v12567_v59 }
 0x2fc   : > { %13361 = vmatpush3.bf16.msra.mxu1 %v14261_v4  ;;  %v7136_v4 = vshrl.u32 %v7107_v24, 16 }
 0x2fd   : > { %13362 = vmatprep.subr.bf16.mxu1 %v14263_v36  ;;  %v7184_v36 = vshrl.u32 %v7155_v14, 16 }
 0x2fe   : > { %v7138_v3 = vrot.slane %v7136_v4, 4 }
 0x2ff   : > { %v7186_v8 = vrot.slane %v7184_v36, 6 }
 0x300   : > { %13363 = vmatpush3.bf16.msra.mxu1 %v14265_v2  ;;  %v7187_v2 = vshll.u32 %v7155_v14, 16  ;;  %v7142_v51 = vor.u32 %v7141_v55, %v7138_v3  ;;  %v14815_v55 = vmov 1983009808  }
 0x301   : > { %13392 = vmatprep.subr.bf16.mxu1 %v14268_v53  ;;  %v15726_v35 = vld.sshfl [vmem:[#allocation4 + $0xe4] sm:$0xf pattern:$0x76325410] }
 0x302   : > { %v7189_v10 = vrot.slane %v7187_v2, 7  ;;  %v7143_v29 = vrot.slane %v7142_v51, 4 }
 0x304   : > { %v7190_v60 = vor.u32 %v7189_v10, %v7186_v8  ;;  %7151 = vst [vmem:[#allocation4 + $0xe4] sm:$0x1] %v7143_v29  ;;  %v5418_v8 = vunpack.c.l.s4 %v14815_v55 }
 0x306   : > { %v7191_v52 = vrot.slane %v7190_v60, 4 }
 0x308   : > { %7199 = vst [vmem:[#allocation4 + $0xe8] sm:$0x1] %v7191_v52 }
 0x3a3   : > { %v13929_v42 = vpop.f32.mrf.mxu1 }
 0x3a5   : > { %v4379_v33 = vpop.f32.mrf.mxu1 }
 0x3a6   : > { %v13049_v41 = vpack.c.bf16 %v4379_v33, %v4379_v33 }
 0x3a7   : > { %v13930_v7 = vpop.f32.mrf.mxu1 }
 0x3a8   : > { %4425 = vst [vmem:[#allocation3 + $0xc] sm:$0xf] %v13049_v41  ;;  %v13094_v26 = vpack.c.bf16 %v13930_v7, %v13929_v42 }
 0x3a9   : > { %v4382_v6 = vpop.f32.mrf.mxu1 }
 0x3aa   : > { %13095 = vst [vmem:[#allocation3 + $0x18] sm:$0xff] %v13094_v26   ;;  %v13050_v25 = vpack.c.bf16 %v4382_v6, %v4382_v6 }
 0x3ab   : > { %v13933_v9 = vpop.f32.mrf.mxu1 }
 0x3ac   : > { %4426 = vst [vmem:[#allocation3 + $0x10] sm:$0xf] %v13050_v25 }
 0x3ad   : > { %v4395_v53 = vpop.f32.mrf.mxu1 }
 0x3ae   : > { %v13053_v13 = vpack.c.bf16 %v4395_v53, %v4395_v53 }
 0x3af   : > { %v13934_v63 = vpop.f32.mrf.mxu1  ;;  %v4455_v1 = vld [vmem:[#allocation3 + $0xc] sm:$0x3] }
 0x3b0   : > { %v4567_v20 = vld [vmem:[#allocation3 + $0xc] sm:$0x6]  ;;  %4443 = vst [vmem:[#allocation3 + $0x24] sm:$0xf] %v13053_v13  ;;  %v13099_v54 = vpack.c.bf16 %v13934_v63, %v13933_v9  ;;  %4459 = vst [vmem:[#allocation4 + $0x3c] sm:$0x3] %v4455_v1  ;;  %v5419_v13 = vunpack.c.0.s8 %v5418_v8 }
 0x3b1   : > { %v4590_v49 = vld [vmem:[#allocation3 + $0xc] sm:$0x3]  ;;  %v12358_v50 = vrot.slane %v4567_v20, 9  ;;  %v4398_v58 = vpop.f32.mrf.mxu1  ;;  %v4456_v17 = vld [vmem:[#allocation3 + $0x18] sm:$0x3] }
 0x3b2   : > { %4594 = vst [vmem:[#allocation4 + $0x14] sm:$0x3] %v4590_v49  ;;  %v4471_v28 = vld [vmem:[#allocation3 + $0xc] sm:$0x7]  ;;  %v4464_v12 = vld [vmem:[#allocation3 + $0x1c] sm:$0x3]  ;;  %v13054_v0 = vpack.c.bf16 %v4398_v58, %v4398_v58 }
 0x3b3   : > { %v4568_v39 = vld [vmem:[#allocation3 + $0x18] sm:$0x6]  ;;  %13100 = vst [vmem:[#allocation3 + $0x30] sm:$0xff] %v13099_v54   ;;  %4460 = vst [vmem:[#allocation4 + $0x78] sm:$0x3] %v4456_v17  ;;  %v4484_v31 = vshrl.u32 %v4471_v28, 16 }
 0x3b4   : > { %4468 = vst [vmem:[#allocation4 + $0x7c] sm:$0x3] %v4464_v12  ;;  %v12359_v32 = vrot.slane %v4568_v39, 9  ;;  %4587 = vst [vmem:[#allocation4 + $0x4c] sm:$0x3] %v12358_v50  ;;  %v4487_v18 = vshll.u32 %v4471_v28, 16 }
 0x3b5   : > { %v4591_v62 = vld [vmem:[#allocation3 + $0x18] sm:$0x3]  ;;  %v4463_v30 = vld [vmem:[#allocation3 + $0x10] sm:$0x3]  ;;  %4444 = vst [vmem:[#allocation3 + $0x28] sm:$0xf] %v13054_v0 }
 0x3b6   : > { %v4472_v46 = vld [vmem:[#allocation3 + $0x18] sm:$0x7]  ;;  %4595 = vst [vmem:[#allocation4 + $0x50] sm:$0x3] %v4591_v62  ;;  %4467 = vst [vmem:[#allocation4 + $0x40] sm:$0x3] %v4463_v30 }
 0x3b7   : > { %v4493_v43 = vshrl.u32 %v4472_v46, 16  ;;  %v4496_v57 = vshll.u32 %v4472_v46, 16  ;;  %4588 = vst [vmem:[#allocation4 + $0x88] sm:$0x3] %v12359_v32  ;;  %v4486_v38 = vrot.slane %v4484_v31, 4  ;;  %v4489_v15 = vrot.slane %v4487_v18, 5 }
 0x3b8   : > { %v4519_v61 = vld [vmem:[#allocation3 + $0x10] sm:$0x7]  ;;  %v4606_v56 = vld [vmem:[#allocation3 + $0xc] sm:$0x7]  ;;  %v4520_v34 = vld [vmem:[#allocation3 + $0x1c] sm:$0x7] }
 0x3b9   : > { %v4495_v19 = vrot.slane %v4493_v43, 4  ;;  %v4498_v40 = vrot.slane %v4496_v57, 5  ;;  %v4598_v5 = vld [vmem:[#allocation3 + $0x10] sm:$0x3]  ;;  %v4532_v59 = vshrl.u32 %v4519_v61, 16  ;;  %v4490_v3 = vor.u32 %v4489_v15, %v4486_v38 }
 0x3ba   : > { %v4599_v24 = vld [vmem:[#allocation3 + $0x1c] sm:$0x3]  ;;  %4602 = vst [vmem:[#allocation4 + $0x18] sm:$0x3] %v4598_v5  ;;  %v4457_v14 = vld [vmem:[#allocation3 + $0x24] sm:$0x3]  ;;  %v15733_v38 = vsub.s32 %v5419_v13, %v15070_v27 }
 0x3bb   : > { %v4569_v4 = vld [vmem:[#allocation3 + $0x24] sm:$0x6]  ;;  %4603 = vst [vmem:[#allocation4 + $0x54] sm:$0x3] %v4599_v24  ;;  %4461 = vst [vmem:[#allocation4 + $0xb4] sm:$0x3] %v4457_v14  ;;  %v4499_v23 = vor.u32 %v4498_v40, %v4495_v19 }
 0x3bc   : > { %v4592_v48 = vld [vmem:[#allocation3 + $0x24] sm:$0x3]  ;;  %v12360_v36 = vrot.slane %v4569_v4, 9  ;;  %v4593_v10 = vld [vmem:[#allocation3 + $0x30] sm:$0x3]  ;;  %v4535_v51 = vshll.u32 %v4519_v61, 16 }
 0x3bd   : > { %4596 = vst [vmem:[#allocation4 + $0x8c] sm:$0x3] %v4592_v48  ;;  %v15729_v2 = vld.sshfl [vmem:[#allocation4 + $0x10] sm:$0xf pattern:$0x76325410] }
 0x3be   : > { %6916 = vst [vmem:[#allocation4 + $0x10] sm:$0x1] %v12552_v47  ;;  %v4541_v60 = vshrl.u32 %v4520_v34, 16  ;;  %4589 = vst [vmem:[#allocation4 + $0xc4] sm:$0x3] %v12360_v36  ;;  %v4534_v52 = vrot.slane %v4532_v59, 4 }
 0x3bf   : > { %4597 = vst [vmem:[#allocation4 + $0xc8] sm:$0x3] %v4593_v10  ;;  %v4473_v29 = vld [vmem:[#allocation3 + $0x24] sm:$0x7]  ;;  %v4544_v42 = vshll.u32 %v4520_v34, 16  ;;  %v4611_v33 = vshrl.u32 %v4606_v56, 16 }
 0x3c0   : > { %v4465_v41 = vld [vmem:[#allocation3 + $0x28] sm:$0x3]  ;;  %v4491_v26 = vrot.slane %v4490_v3, 4  ;;  %v4500_v6 = vrot.slane %v4499_v23, 4  ;;  %v4502_v25 = vshrl.u32 %v4473_v29, 16  ;;  %v4614_v53 = vshll.u32 %v4606_v56, 16 }
 0x3c1   : > { %v12377_v7 = vld.sshfl [vmem:[#allocation4 + $0x3c] sm:$0xf pattern:$0x76325410]  ;;  %4469 = vst [vmem:[#allocation4 + $0xb8] sm:$0x3] %v4465_v41 }
 0x3c2   : > { %v4521_v9 = vld [vmem:[#allocation3 + $0x28] sm:$0x7]  ;;  %v4505_v63 = vshll.u32 %v4473_v29, 16  ;;  %v4537_v1 = vrot.slane %v4535_v51, 5  ;;  %v4543_v20 = vrot.slane %v4541_v60, 4  ;;  %v4504_v50 = vrot.slane %v4502_v25, 4 }
 0x3c3   : > { %v4600_v49 = vld [vmem:[#allocation3 + $0x28] sm:$0x3]  ;;  %v12379_v54 = vld.sshfl [vmem:[#allocation4 + $0x4c] sm:$0xf pattern:$0x76325410]  ;;  %v12402_v46 = vcombine.low %v15716_v11, %v12377_v7 }
 0x3c4   : > { %4515 = vst [vmem:[#allocation4 + $0x44] sm:$0x3] %v4491_v26  ;;  %4516 = vst [vmem:[#allocation4 + $0x80] sm:$0x3] %v4500_v6  ;;  %v4546_v28 = vrot.slane %v4544_v42, 5  ;;  %v4550_v58 = vshrl.u32 %v4521_v9, 16  ;;  %v4538_v32 = vor.u32 %v4537_v1, %v4534_v52  ;;  %v12406_v11 = vcombine.low %v15729_v2, %v12379_v54 }
 0x3c5   : > { %v4601_v17 = vld [vmem:[#allocation3 + $0x34] sm:$0x3]  ;;  %4604 = vst [vmem:[#allocation4 + $0x90] sm:$0x3] %v4600_v49  ;;  %v4613_v12 = vrot.slane %v4611_v33, 4  ;;  %v4507_v0 = vrot.slane %v4505_v63, 5  ;;  %v5423_v27 = vrot.slane %v12402_v46, %v15733_v38 }
 0x3c6   : > { %v12387_v39 = vld.sshfl [vmem:[#allocation4 + $0x88] sm:$0xf pattern:$0x76325410]  ;;  %v4553_v62 = vshll.u32 %v4521_v9, 16  ;;  %v4547_v31 = vor.u32 %v4546_v28, %v4543_v20  ;;  %v4552_v30 = vrot.slane %v4550_v58, 4  ;;  %v15742_v7 = vrot.slane %v12406_v11, %v15733_v38 }
 0x3c7   : > { %4605 = vst [vmem:[#allocation4 + $0xcc] sm:$0x3] %v4601_v17  ;;  %v4607_v18 = vld [vmem:[#allocation3 + $0x18] sm:$0x7]  ;;  %v4616_v43 = vrot.slane %v4614_v53, 5  ;;  %v4508_v47 = vor.u32 %v4507_v0, %v4504_v50  ;;  %v4539_v15 = vrot.slane %v4538_v32, 4 }
 0x3c8   : > { %v12385_v57 = vld.sshfl [vmem:[#allocation4 + $0x78] sm:$0xf pattern:$0x76325410]  ;;  %v4555_v19 = vrot.slane %v4553_v62, 5  ;;  %v4548_v5 = vrot.slane %v4547_v31, 4 }
 0x3c9   : > { %v12395_v61 = vld.sshfl [vmem:[#allocation4 + $0xc4] sm:$0xf pattern:$0x76325410]  ;;  %v4608_v56 = vld [vmem:[#allocation3 + $0x24] sm:$0x7]  ;;  %v4617_v59 = vor.u32 %v4616_v43, %v4613_v12 }
 0x3ca   : > { %v12408_v40 = vcombine.low %v12387_v39, %v12395_v61  ;;  %v4609_v34 = vld [vmem:[#allocation3 + $0x30] sm:$0x7]  ;;  %v4620_v24 = vshrl.u32 %v4607_v18, 16  ;;  %v4509_v4 = vrot.slane %v4508_v47, 4  ;;  %v4556_v48 = vor.u32 %v4555_v19, %v4552_v30  ;;  %4563 = vst [vmem:[#allocation4 + $0x48] sm:$0x3] %v4539_v15 }
 0x3cb   : > { %v12393_v14 = vld.sshfl [vmem:[#allocation4 + $0xb4] sm:$0xf pattern:$0x76325410]  ;;  %v4623_v36 = vshll.u32 %v4607_v18, 16  ;;  %v4618_v23 = vrot.slane %v4617_v59, 4 }
 0x3cc   : > { %v12404_v3 = vcombine.low %v12385_v57, %v12393_v14  ;;  %4564 = vst [vmem:[#allocation4 + $0x84] sm:$0x3] %v4548_v5  ;;  %v4622_v55 = vrot.slane %v4620_v24, 4  ;;  %4517 = vst [vmem:[#allocation4 + $0xbc] sm:$0x3] %v4509_v4  ;;  %v4557_v8 = vrot.slane %v4556_v48, 4  ;;  %v15739_v52 = vrot.slane %v12408_v40, %v15733_v38 }
 0x3cd   : > { %v4625_v10 = vrot.slane %v4623_v36, 5  ;;  %v4629_v51 = vshrl.u32 %v4608_v56, 16  ;;  %v4632_v60 = vshll.u32 %v4608_v56, 16  ;;  %v4638_v2 = vshrl.u32 %v4609_v34, 16  ;;  %4650 = vst [vmem:[#allocation4 + $0x1c] sm:$0x3] %v4618_v23 }
 0x3ce   : > { %v5437_v29 = vrot.slane %v12404_v3, %v15733_v38  ;;  %v4641_v42 = vshll.u32 %v4609_v34, 16  ;;  %v4654_v33 = vld [vmem:[#allocation3 + $0x10] sm:$0x7]  ;;  %4565 = vst [vmem:[#allocation4 + $0xc0] sm:$0x3] %v4557_v8  ;;  %v14264_v50 = vld [vmem:[#allocation7 + $0x170] sm:$0xff]   ;;  %v5482_v0 = vcombine.high %v15742_v7, %v15739_v52 }
 0x3cf   : > { %v14262_v41 = vld [vmem:[#allocation7 + $0x138] sm:$0xff]   ;;  %v4626_v26 = vor.u32 %v4625_v10, %v4622_v55  ;;  %v4631_v6 = vrot.slane %v4629_v51, 4  ;;  %v4634_v25 = vrot.slane %v4632_v60, 5  ;;  %v4655_v9 = vld [vmem:[#allocation3 + $0x1c] sm:$0x7]  ;;  %v4640_v63 = vrot.slane %v4638_v2, 4 }
 0x3d0   : > { %v5446_v53 = vcombine.high %v5423_v27, %v5437_v29  ;;  %v5445_v13 = vcombine.low %v5423_v27, %v5437_v29  ;;  %v4643_v1 = vrot.slane %v4641_v42, 5  ;;  %v4656_v20 = vld [vmem:[#allocation3 + $0x28] sm:$0x7]  ;;  %v4726_v49 = vld [vmem:[#allocation3 + $0x18] sm:$0x3]  ;;  %v4659_v17 = vshrl.u32 %v4654_v33, 16 }
 0x3d1   : > { %v4727_v54 = vld [vmem:[#allocation3 + $0x24] sm:$0x3]  ;;  %v4627_v28 = vrot.slane %v4626_v26, 4  ;;  %v4635_v58 = vor.u32 %v4634_v25, %v4631_v6  ;;  %v4662_v12 = vshll.u32 %v4654_v33, 16  ;;  %v4728_v39 = vld [vmem:[#allocation3 + $0x30] sm:$0x3] }
 0x3d2   : > { %4730 = vst [vmem:[#allocation4 + $0x28] sm:$0x3] %v4726_v49  ;;  %4731 = vst [vmem:[#allocation4 + $0x64] sm:$0x3] %v4727_v54  ;;  %6323 = vmatprep.mubr.bf16.mxu0 %v5446_v53  ;;  %v14266_v32 = vld [vmem:[#allocation7 + $0x130] sm:$0xff]   ;;  %v4644_v46 = vor.u32 %v4643_v1, %v4640_v63  ;;  %v4668_v31 = vshrl.u32 %v4655_v9, 16 }
 0x3d3   : > { %v12378_v62 = vld.sshfl [vmem:[#allocation4 + $0x44] sm:$0xf pattern:$0x76325410]  ;;  %v4671_v30 = vshll.u32 %v4655_v9, 16  ;;  %6324 = vmatmul.mubr.bf16.vlgmr.msra.gmra.mxu0 %v5445_v13  ;;  %v14267_v43 = vld [vmem:[#allocation7 + $0x168] sm:$0xff]  }
 0x3d4   : > { %4732 = vst [vmem:[#allocation4 + $0xa0] sm:$0x3] %v4728_v39  ;;  %v12403_v18 = vcombine.low %v15721_v16, %v12378_v62  ;;  %v4636_v57 = vrot.slane %v4635_v58, 4  ;;  %4651 = vst [vmem:[#allocation4 + $0x58] sm:$0x3] %v4627_v28  ;;  %v4661_v47 = vrot.slane %v4659_v17, 4  ;;  %13371 = vmatpush3.bf16.msra.mxu0 %v14262_v41  ;;  %6405 = vmatprep.mubr.bf16.mxu0 %v5482_v0 }
 0x3d5   : > { %v4657_v61 = vld [vmem:[#allocation3 + $0x34] sm:$0x7]  ;;  %v4702_v15 = vld [vmem:[#allocation3 + $0xc] sm:$0x6]  ;;  %v4645_v19 = vrot.slane %v4644_v46, 4  ;;  %v4664_v40 = vrot.slane %v4662_v12, 5  ;;  %13372 = vmatprep.subr.bf16.mxu0 %v14264_v50 }
 0x3d6   : > { %v4670_v5 = vrot.slane %v4668_v31, 4  ;;  %v4673_v56 = vrot.slane %v4671_v30, 5  ;;  %v4703_v34 = vld [vmem:[#allocation3 + $0x18] sm:$0x6]  ;;  %v4704_v59 = vld [vmem:[#allocation3 + $0x24] sm:$0x6]  ;;  %v15748_v11 = vrot.slane %v12403_v18, %v15733_v38 }
 0x3d7   : > { %v4734_v24 = vld [vmem:[#allocation3 + $0x1c] sm:$0x3]  ;;  %v12386_v14 = vld.sshfl [vmem:[#allocation4 + $0x80] sm:$0xf pattern:$0x76325410]  ;;  %v4665_v27 = vor.u32 %v4664_v40, %v4661_v47 }
 0x3d8   : > { %4652 = vst [vmem:[#allocation4 + $0x94] sm:$0x3] %v4636_v57  ;;  %v4677_v16 = vshrl.u32 %v4656_v20, 16  ;;  %v4680_v4 = vshll.u32 %v4656_v20, 16  ;;  %v4705_v48 = vld [vmem:[#allocation3 + $0x30] sm:$0x6]  ;;  %v4674_v23 = vor.u32 %v4673_v56, %v4670_v5  ;;  %13373 = vmatpush3.bf16.msra.mxu0 %v14266_v32 }
 0x3d9   : > { %4738 = vst [vmem:[#allocation4 + $0x2c] sm:$0x3] %v4734_v24  ;;  %v12394_v36 = vld.sshfl [vmem:[#allocation4 + $0xbc] sm:$0xf pattern:$0x76325410]  ;;  %13374 = vmatprep.subr.bf16.mxu0 %v14267_v43 }
 0x3da   : > { %v14269_v3 = vld [vmem:[#allocation7 + $0x128] sm:$0xff]   ;;  %4653 = vst [vmem:[#allocation4 + $0xd0] sm:$0x3] %v4645_v19  ;;  %v4686_v55 = vshrl.u32 %v4657_v61, 16  ;;  %v4689_v8 = vshll.u32 %v4657_v61, 16  ;;  %v12405_v10 = vcombine.low %v12386_v14, %v12394_v36  ;;  %v14271_v51 = vld [vmem:[#allocation7 + $0x160] sm:$0xff]  }
 0x3db   : > { %v4679_v60 = vrot.slane %v4677_v16, 4  ;;  %v4682_v29 = vrot.slane %v4680_v4, 5  ;;  %v12361_v2 = vrot.slane %v4702_v15, 9  ;;  %v4735_v42 = vld [vmem:[#allocation3 + $0x28] sm:$0x3]  ;;  %v4666_v33 = vrot.slane %v4665_v27, 4 }
 0x3dc   : > { %v4675_v41 = vrot.slane %v4674_v23, 4  ;;  %v4688_v26 = vrot.slane %v4686_v55, 4  ;;  %v4691_v6 = vrot.slane %v4689_v8, 5  ;;  %v4736_v25 = vld [vmem:[#allocation3 + $0x34] sm:$0x3]  ;;  %v5444_v9 = vrot.slane %v12405_v10, %v15733_v38  ;;  %v14272_v28 = vld [vmem:[#allocation7 + $0x1f0] sm:$0xff]   ;;  %13375 = vmatpush3.bf16.msra.mxu0 %v14269_v3 }
 0x3dd   : > { %4739 = vst [vmem:[#allocation4 + $0x68] sm:$0x3] %v4735_v42  ;;  %v14270_v53 = vld [vmem:[#allocation7 + $0x1b8] sm:$0xff]   ;;  %v4683_v63 = vor.u32 %v4682_v29, %v4679_v60  ;;  %v12362_v1 = vrot.slane %v4703_v34, 9  ;;  %v12363_v20 = vrot.slane %v4704_v59, 9  ;;  %v12364_v17 = vrot.slane %v4705_v48, 9  ;;  %13376 = vmatprep.subr.bf16.mxu0 %v14271_v51 }
 0x3de   : > { %v12372_v13 = vld.sshfl [vmem:[#allocation4 + $0x18] sm:$0xf pattern:$0x76325410]  ;;  %4722 = vst [vmem:[#allocation4 + $0x24] sm:$0x3] %v12361_v2  ;;  %v4692_v58 = vor.u32 %v4691_v6, %v4688_v26  ;;  %v5447_v39 = vcombine.low %v15748_v11, %v5444_v9  ;;  %v5448_v0 = vcombine.high %v15748_v11, %v5444_v9 }
 0x3df   : > { %4740 = vst [vmem:[#allocation4 + $0xa4] sm:$0x3] %v4736_v25  ;;  %v4742_v49 = vld [vmem:[#allocation3 + $0x18] sm:$0x7]  ;;  %v4743_v54 = vld [vmem:[#allocation3 + $0x24] sm:$0x7] }
 0x3e0   : > { %v12380_v50 = vld.sshfl [vmem:[#allocation4 + $0x54] sm:$0xf pattern:$0x76325410]  ;;  %4698 = vst [vmem:[#allocation4 + $0x20] sm:$0x3] %v4666_v33  ;;  %6364 = vmatprep.mubr.bf16.mxu1 %v5448_v0 }
 0x3e1   : > { %4699 = vst [vmem:[#allocation4 + $0x5c] sm:$0x3] %v4675_v41  ;;  %v4747_v12 = vshrl.u32 %v4742_v49, 16  ;;  %v14273_v32 = vld [vmem:[#allocation7 + $0x120] sm:$0xff]   ;;  %v14275_v62 = vld [vmem:[#allocation7 + $0x158] sm:$0xff]   ;;  %v4684_v46 = vrot.slane %v4683_v63, 4  ;;  %v12407_v18 = vcombine.low %v12372_v13, %v12380_v50  ;;  %6365 = vmatmul.mubr.bf16.vlgmr.msra.gmra.mxu1 %v5447_v39 }
 0x3e2   : > { %4723 = vst [vmem:[#allocation4 + $0x60] sm:$0x3] %v12362_v1  ;;  %4724 = vst [vmem:[#allocation4 + $0x9c] sm:$0x3] %v12363_v20  ;;  %v4744_v31 = vld [vmem:[#allocation3 + $0x30] sm:$0x7]  ;;  %13393 = vmatpush3.bf16.msra.mxu1 %v14270_v53  ;;  %13377 = vmatpush3.bf16.msra.mxu0 %v14273_v32 }
 0x3e3   : > { %v12388_v30 = vld.sshfl [vmem:[#allocation4 + $0x90] sm:$0xf pattern:$0x76325410]  ;;  %v4693_v43 = vrot.slane %v4692_v58, 4  ;;  %v4749_v57 = vrot.slane %v4747_v12, 4  ;;  %v15754_v14 = vrot.slane %v12407_v18, %v15733_v38  ;;  %13394 = vmatprep.subr.bf16.mxu1 %v14272_v28  ;;  %13378 = vmatprep.subr.bf16.mxu0 %v14275_v62 }
 0x3e4   : > { %4725 = vst [vmem:[#allocation4 + $0xd8] sm:$0x3] %v12364_v17  ;;  %v12396_v61 = vld.sshfl [vmem:[#allocation4 + $0xcc] sm:$0xf pattern:$0x76325410] }
 0x3e5   : > { %4700 = vst [vmem:[#allocation4 + $0x98] sm:$0x3] %v4684_v46  ;;  %v4750_v47 = vshll.u32 %v4742_v49, 16  ;;  %v4756_v15 = vshrl.u32 %v4743_v54, 16  ;;  %v12409_v19 = vcombine.low %v12388_v30, %v12396_v61  ;;  %4701 = vst [vmem:[#allocation4 + $0xd4] sm:$0x3] %v4693_v43 }
 0x3e6   : > { %v4759_v40 = vshll.u32 %v4743_v54, 16  ;;  %v4765_v5 = vshrl.u32 %v4744_v31, 16  ;;  %v4790_v56 = vld [vmem:[#allocation3 + $0x1c] sm:$0x7]  ;;  %v14274_v34 = vld [vmem:[#allocation7 + $0x1b0] sm:$0xff]   ;;  %v14276_v16 = vld [vmem:[#allocation7 + $0x1e8] sm:$0xff]  }
 0x3e7   : > { %v4752_v59 = vrot.slane %v4750_v47, 5  ;;  %v4758_v24 = vrot.slane %v4756_v15, 4  ;;  %v15757_v11 = vrot.slane %v12409_v19, %v15733_v38  ;;  %v14277_v48 = vld [vmem:[#allocation7 + $0x118] sm:$0xff]   ;;  %v4768_v27 = vshll.u32 %v4744_v31, 16  ;;  %v14278_v8 = vld [vmem:[#allocation7 + $0x1a8] sm:$0xff]   ;;  %v14279_v10 = vld [vmem:[#allocation7 + $0x150] sm:$0xff]   ;;  %13395 = vmatpush3.bf16.msra.mxu1 %v14274_v34 }
 0x3e8   : > { %v4761_v4 = vrot.slane %v4759_v40, 5  ;;  %v4767_v3 = vrot.slane %v4765_v5, 4  ;;  %v4795_v23 = vshrl.u32 %v4790_v56, 16  ;;  %v4791_v2 = vld [vmem:[#allocation3 + $0x28] sm:$0x7]  ;;  %13396 = vmatprep.subr.bf16.mxu1 %v14276_v16  ;;  %v14280_v33 = vld [vmem:[#allocation7 + $0x1e0] sm:$0xff]   ;;  %13379 = vmatpush3.bf16.msra.mxu0 %v14277_v48 }
 0x3e9   : > { %v4753_v36 = vor.u32 %v4752_v59, %v4749_v57  ;;  %v5484_v55 = vcombine.high %v15754_v14, %v15757_v11  ;;  %v4770_v29 = vrot.slane %v4768_v27, 5  ;;  %v4792_v42 = vld [vmem:[#allocation3 + $0x34] sm:$0x7]  ;;  %v14281_v41 = vld [vmem:[#allocation7 + $0x110] sm:$0xff]   ;;  %v4838_v6 = vld [vmem:[#allocation3 + $0x18] sm:$0x6]  ;;  %13380 = vmatprep.subr.bf16.mxu0 %v14279_v10 }
 0x3ea   : > { %v4762_v51 = vor.u32 %v4761_v4, %v4758_v24  ;;  %v14282_v25 = vld [vmem:[#allocation7 + $0x1a0] sm:$0xff]   ;;  %v4797_v13 = vrot.slane %v4795_v23, 4  ;;  %v4798_v63 = vshll.u32 %v4790_v56, 16  ;;  %v14283_v1 = vld [vmem:[#allocation7 + $0x148] sm:$0xff]   ;;  %v4804_v20 = vshrl.u32 %v4791_v2, 16  ;;  %v14284_v28 = vld [vmem:[#allocation7 + $0x1d8] sm:$0xff]  }
 0x3eb   : > { %v4754_v60 = vrot.slane %v4753_v36, 4  ;;  %6446 = vmatprep.mubr.bf16.mxu1 %v5484_v55  ;;  %v4771_v53 = vor.u32 %v4770_v29, %v4767_v3  ;;  %v4807_v49 = vshll.u32 %v4791_v2, 16  ;;  %v4813_v54 = vshrl.u32 %v4792_v42, 16  ;;  %v4839_v50 = vld [vmem:[#allocation3 + $0x24] sm:$0x6]  ;;  %13397 = vmatpush3.bf16.msra.mxu1 %v14278_v8  ;;  %v14287_v61 = vld [vmem:[#allocation7 + $0x140] sm:$0xff]  }
 0x3ec   : > { %v4763_v26 = vrot.slane %v4762_v51, 4  ;;  %v15761_v9 = vld.sshfl [vmem:[#allocation4 + $0x98] sm:$0xf pattern:$0x76325410]  ;;  %v4800_v17 = vrot.slane %v4798_v63, 5  ;;  %13398 = vmatprep.subr.bf16.mxu1 %v14280_v33  ;;  %13381 = vmatpush3.bf16.msra.mxu0 %v14281_v41  ;;  %v5481_v29 = vcombine.low %v15742_v7, %v15739_v52 }
 0x3ed   : > { %4786 = vst [vmem:[#allocation4 + $0x30] sm:$0x3] %v4754_v60  ;;  %v4772_v58 = vrot.slane %v4771_v53, 4  ;;  %v4816_v12 = vshll.u32 %v4792_v42, 16  ;;  %v4840_v39 = vld [vmem:[#allocation3 + $0x30] sm:$0x6]  ;;  %13382 = vmatprep.subr.bf16.mxu0 %v14283_v1 }
 0x3ee   : > { %4787 = vst [vmem:[#allocation4 + $0x6c] sm:$0x3] %v4763_v26  ;;  %v14285_v0 = vld [vmem:[#allocation7 + $0x108] sm:$0xff]   ;;  %v4806_v32 = vrot.slane %v4804_v20, 4  ;;  %v4809_v62 = vrot.slane %v4807_v49, 5  ;;  %v4815_v46 = vrot.slane %v4813_v54, 4  ;;  %v4801_v18 = vor.u32 %v4800_v17, %v4797_v13 }
 0x3ef   : > { %v7203_v31 = vld [vmem:[#allocation3 + $0x3c] sm:$0x2]  ;;  %4788 = vst [vmem:[#allocation4 + $0xa8] sm:$0x3] %v4772_v58  ;;  %v4818_v43 = vrot.slane %v4816_v12, 5  ;;  %v12365_v57 = vrot.slane %v4838_v6, 9  ;;  %13399 = vmatpush3.bf16.msra.mxu1 %v14282_v25 }
 0x3f0   : > { %v12397_v30 = vld.sshfl [vmem:[#allocation4 + $0xd4] sm:$0xf pattern:$0x76325410]  ;;  %9198 = vst [vmem:[#allocation3 + $0x3c] sm:$0xf] %v16858_v21  ;;  %v4810_v19 = vor.u32 %v4809_v62, %v4806_v32  ;;  %13400 = vmatprep.subr.bf16.mxu1 %v14284_v28  ;;  %13383 = vmatpush3.bf16.msra.mxu0 %v14285_v0  ;;  %v5483_v28 = vcombine.low %v15754_v14, %v15757_v11 }
 0x3f1   : > { %v12373_v47 = vld.sshfl [vmem:[#allocation4 + $0x20] sm:$0xf pattern:$0x76325410]  ;;  %v12412_v15 = vcombine.low %v15761_v9, %v12397_v30  ;;  %v12366_v40 = vrot.slane %v4839_v50, 9  ;;  %v14286_v56 = vld [vmem:[#allocation7 + $0x198] sm:$0xff]   ;;  %v4819_v59 = vor.u32 %v4818_v43, %v4815_v46  ;;  %13384 = vmatprep.subr.bf16.mxu0 %v14287_v61 }
 0x3f2   : > { %v15765_v5 = vld.sshfl [vmem:[#allocation4 + $0xec] sm:$0x3 pattern:$0x76325410]  ;;  %v4802_v34 = vrot.slane %v4801_v18, 4  ;;  %v12367_v24 = vrot.slane %v4840_v39, 9 }
 0x3f3   : > { %4858 = vst [vmem:[#allocation4 + $0x38] sm:$0x3] %v12365_v57  ;;  %v12571_v16 = vrot.slane %v7203_v31, 9  ;;  %v14288_v4 = vld [vmem:[#allocation7 + $0x1d0] sm:$0xff]   ;;  %v4811_v21 = vrot.slane %v4810_v19, 4  ;;  %v14289_v36 = vld [vmem:[#allocation7 + $0x100] sm:$0xff]   ;;  %13401 = vmatpush3.bf16.msra.mxu1 %v14286_v56  ;;  %v15768_v8 = vrot.slane %v12412_v15, %v15733_v38 }
 0x3f4   : > { %v12381_v48 = vld.sshfl [vmem:[#allocation4 + $0x5c] sm:$0xf pattern:$0x76325410]  ;;  %4859 = vst [vmem:[#allocation4 + $0x74] sm:$0x3] %v12366_v40  ;;  %13402 = vmatprep.subr.bf16.mxu1 %v14288_v4  ;;  %13385 = vmatpush3.bf16.msra.mxu0 %v14289_v36 }
 0x3f5   : > { %v12410_v3 = vcombine.low %v12373_v47, %v12381_v48  ;;  %v4820_v27 = vrot.slane %v4819_v59, 4  ;;  %4834 = vst [vmem:[#allocation4 + $0x34] sm:$0x3] %v4802_v34  ;;  %4860 = vst [vmem:[#allocation4 + $0xb0] sm:$0x3] %v12367_v24  ;;  %v14292_v23 = vld [vmem:[#allocation7 + $0x278] sm:$0xff]  }
 0x3f6   : > { %7223 = vst [vmem:[#allocation4 + $0xec] sm:$0x1] %v12571_v16  ;;  %4835 = vst [vmem:[#allocation4 + $0x70] sm:$0x3] %v4811_v21  ;;  %v14290_v55 = vld [vmem:[#allocation7 + $0x190] sm:$0xff]   ;;  %v14291_v10 = vld [vmem:[#allocation7 + $0x1c8] sm:$0xff]   ;;  %13414 = vmatprep.subr.bf16.mxu0 %v14292_v23 }
 0x3f7   : > { %4836 = vst [vmem:[#allocation4 + $0xac] sm:$0x3] %v4820_v27  ;;  %v14294_v51 = vld [vmem:[#allocation7 + $0x238] sm:$0xff]   ;;  %v15771_v60 = vrot.slane %v12410_v3, %v15733_v38  ;;  %v14296_v2 = vld [vmem:[#allocation7 + $0x270] sm:$0xff]   ;;  %13403 = vmatpush3.bf16.msra.mxu1 %v14290_v55  ;;  %v14293_v33 = vld [vmem:[#allocation7 + $0x188] sm:$0xff]   ;;  %6406 = vmatmul.mubr.bf16.vlgmr.msra.gmra.mxu0 %v5481_v29 }
 0x3f8   : > { %v12382_v42 = vld.sshfl [vmem:[#allocation4 + $0x64] sm:$0xf pattern:$0x76325410]  ;;  %13404 = vmatprep.subr.bf16.mxu1 %v14291_v10  ;;  %v14295_v6 = vld [vmem:[#allocation7 + $0x1c0] sm:$0xff]   ;;  %13415 = vmatpush3.bf16.msra.mxu0 %v14294_v51  ;;  %v14299_v13 = vld [vmem:[#allocation7 + $0x268] sm:$0xff]  }
 0x3f9   : > { %v5518_v41 = vcombine.high %v15771_v60, %v15768_v8  ;;  %v12374_v26 = vld.sshfl [vmem:[#allocation4 + $0x28] sm:$0xf pattern:$0x76325410]  ;;  %v14298_v9 = vld [vmem:[#allocation7 + $0x230] sm:$0xff]   ;;  %13416 = vmatprep.subr.bf16.mxu0 %v14296_v2  ;;  %v14297_v52 = vld [vmem:[#allocation7 + $0x180] sm:$0xff]   ;;  %v5517_v3 = vcombine.low %v15771_v60, %v15768_v8 }
 0x3fa   : > { %v12390_v25 = vld.sshfl [vmem:[#allocation4 + $0xa0] sm:$0xf pattern:$0x76325410]  ;;  %v12411_v53 = vcombine.low %v12374_v26, %v12382_v42  ;;  %v14300_v63 = vld [vmem:[#allocation7 + $0x2f8] sm:$0xff]   ;;  %v14301_v1 = vld [vmem:[#allocation7 + $0x228] sm:$0xff]  }
 0x3fb   : > { %6487 = vmatprep.mubr.bf16.mxu0 %v5518_v41  ;;  %13405 = vmatpush3.bf16.msra.mxu1 %v14293_v33  ;;  %v12413_v7 = vcombine.low %v12390_v25, %v15724_v45  ;;  %v14303_v49 = vld [vmem:[#allocation7 + $0x260] sm:$0xff]   ;;  %v14302_v54 = vld [vmem:[#allocation7 + $0x2b8] sm:$0xff]   ;;  %v14304_v58 = vld [vmem:[#allocation7 + $0x2f0] sm:$0xff]   ;;  %v14816_v33 = vmov 0.0  }
 0x3fc   : > { %13406 = vmatprep.subr.bf16.mxu1 %v14295_v6  ;;  %13417 = vmatpush3.bf16.msra.mxu0 %v14298_v9  ;;  %v15779_v20 = vrot.slane %v12411_v53, %v15733_v38  ;;  %v14305_v17 = vld [vmem:[#allocation7 + $0x220] sm:$0xff]   ;;  %v14307_v12 = vld [vmem:[#allocation7 + $0x258] sm:$0xff]   ;;  %v14306_v39 = vld [vmem:[#allocation7 + $0x2b0] sm:$0xff]  }
 0x3fd   : > { %13418 = vmatprep.subr.bf16.mxu0 %v14299_v13  ;;  %v15782_v50 = vrot.slane %v12413_v7, %v15733_v38  ;;  %v14308_v0 = vld [vmem:[#allocation7 + $0x2e8] sm:$0xff]   ;;  %v14309_v32 = vld [vmem:[#allocation7 + $0x218] sm:$0xff]   ;;  %v14311_v62 = vld [vmem:[#allocation7 + $0x250] sm:$0xff]  }
 0x3fe   : > { %v14310_v14 = vld [vmem:[#allocation7 + $0x2a8] sm:$0xff]   ;;  %v14312_v11 = vld [vmem:[#allocation7 + $0x2e0] sm:$0xff]   ;;  %v14313_v46 = vld [vmem:[#allocation7 + $0x210] sm:$0xff]  }
 0x3ff   : > { %13407 = vmatpush3.bf16.msra.mxu1 %v14297_v52  ;;  %v5520_v45 = vcombine.high %v15779_v20, %v15782_v50  ;;  %v14315_v31 = vld [vmem:[#allocation7 + $0x248] sm:$0xff]   ;;  %v14314_v30 = vld [vmem:[#allocation7 + $0x2a0] sm:$0xff]   ;;  %v14316_v18 = vld [vmem:[#allocation7 + $0x2d8] sm:$0xff]   ;;  %v5519_v42 = vcombine.low %v15779_v20, %v15782_v50 }
 0x400   : > { %13436 = vmatprep.subr.bf16.mxu1 %v14300_v63  ;;  %13419 = vmatpush3.bf16.msra.mxu0 %v14301_v1  ;;  %v12383_v43 = vld.sshfl [vmem:[#allocation4 + $0x6c] sm:$0xf pattern:$0x76325410]  ;;  %v14317_v57 = vld [vmem:[#allocation7 + $0x208] sm:$0xff]   ;;  %v14320_v56 = vld [vmem:[#allocation7 + $0x2d0] sm:$0xff]  }
 0x401   : > { %13420 = vmatprep.subr.bf16.mxu0 %v14303_v49  ;;  %v12375_v61 = vld.sshfl [vmem:[#allocation4 + $0x30] sm:$0xf pattern:$0x76325410]  ;;  %v14318_v19 = vld [vmem:[#allocation7 + $0x298] sm:$0xff]   ;;  %v14322_v16 = vld [vmem:[#allocation7 + $0x290] sm:$0xff]  }
 0x402   : > { %6447 = vmatmul.mubr.bf16.vlgmr.msra.gmra.mxu1 %v5483_v28  ;;  %v14319_v47 = vld [vmem:[#allocation7 + $0x240] sm:$0xff]   ;;  %v12391_v15 = vld.sshfl [vmem:[#allocation4 + $0xa8] sm:$0xf pattern:$0x76325410]  ;;  %v12414_v40 = vcombine.low %v12375_v61, %v12383_v43  ;;  %v14323_v48 = vld [vmem:[#allocation7 + $0x2c8] sm:$0xff]  }
 0x403   : > { %13437 = vmatpush3.bf16.msra.mxu1 %v14302_v54  ;;  %6528 = vmatprep.mubr.bf16.mxu1 %v5520_v45  ;;  %v14321_v34 = vld [vmem:[#allocation7 + $0x200] sm:$0xff]   ;;  %v12416_v59 = vcombine.low %v12391_v15, %v15726_v35  ;;  %v14324_v24 = vld [vmem:[#allocation7 + $0x378] sm:$0xff]   ;;  %v14328_v27 = vld [vmem:[#allocation7 + $0x370] sm:$0xff]  }
 0x404   : > { %13438 = vmatprep.subr.bf16.mxu1 %v14304_v58  ;;  %13421 = vmatpush3.bf16.msra.mxu0 %v14305_v17  ;;  %v15790_v4 = vrot.slane %v12414_v40, %v15733_v38  ;;  %v14326_v21 = vld [vmem:[#allocation7 + $0x338] sm:$0xff]   ;;  %v14325_v35 = vld [vmem:[#allocation7 + $0x288] sm:$0xff]   ;;  %v14327_v55 = vld [vmem:[#allocation7 + $0x2c0] sm:$0xff]  }
 0x405   : > { %13422 = vmatprep.subr.bf16.mxu0 %v14307_v12  ;;  %v15793_v36 = vrot.slane %v12416_v59, %v15733_v38  ;;  %v14330_v10 = vld [vmem:[#allocation7 + $0x330] sm:$0xff]   ;;  %v14331_v51 = vld [vmem:[#allocation7 + $0x368] sm:$0xff]   ;;  %v14329_v29 = vld [vmem:[#allocation7 + $0x280] sm:$0xff]  }
 0x406   : > { %v14332_v8 = vld [vmem:[#allocation7 + $0x328] sm:$0xff]   ;;  %v14334_v60 = vld [vmem:[#allocation7 + $0x360] sm:$0xff]   ;;  %v14333_v2 = vld [vmem:[#allocation7 + $0x3b8] sm:$0xff]  }
 0x407   : > { %13439 = vmatpush3.bf16.msra.mxu1 %v14306_v39  ;;  %v5554_v23 = vcombine.high %v15790_v4, %v15793_v36  ;;  %v14335_v41 = vld [vmem:[#allocation7 + $0x320] sm:$0xff]   ;;  %v14337_v26 = vld [vmem:[#allocation7 + $0x358] sm:$0xff]   ;;  %v14336_v6 = vld [vmem:[#allocation7 + $0x3b0] sm:$0xff]   ;;  %v5553_v28 = vcombine.low %v15790_v4, %v15793_v36 }
 0x408   : > { %13440 = vmatprep.subr.bf16.mxu1 %v14308_v0  ;;  %13423 = vmatpush3.bf16.msra.mxu0 %v14309_v32  ;;  %v14338_v25 = vld [vmem:[#allocation7 + $0x318] sm:$0xff]   ;;  %v14340_v9 = vld [vmem:[#allocation7 + $0x350] sm:$0xff]   ;;  %v14339_v53 = vld [vmem:[#allocation7 + $0x3a8] sm:$0xff]  }
 0x409   : > { %13424 = vmatprep.subr.bf16.mxu0 %v14311_v62  ;;  %v14341_v13 = vld [vmem:[#allocation7 + $0x310] sm:$0xff]   ;;  %v14343_v52 = vld [vmem:[#allocation7 + $0x348] sm:$0xff]   ;;  %v14342_v7 = vld [vmem:[#allocation7 + $0x3a0] sm:$0xff]  }
 0x40a   : > { %v14344_v63 = vld [vmem:[#allocation7 + $0x308] sm:$0xff]   ;;  %v14346_v1 = vld [vmem:[#allocation7 + $0x340] sm:$0xff]   ;;  %v14345_v20 = vld [vmem:[#allocation7 + $0x398] sm:$0xff]  }
 0x40b   : > { %13441 = vmatpush3.bf16.msra.mxu1 %v14310_v14  ;;  %v14347_v49 = vld [vmem:[#allocation7 + $0x300] sm:$0xff]   ;;  %v14348_v54 = vld [vmem:[#allocation7 + $0x390] sm:$0xff]   ;;  %v14349_v58 = vld [vmem:[#allocation7 + $0x388] sm:$0xff]  }
 0x40c   : > { %13442 = vmatprep.subr.bf16.mxu1 %v14312_v11  ;;  %13425 = vmatpush3.bf16.msra.mxu0 %v14313_v46  ;;  %v12392_v50 = vld.sshfl [vmem:[#allocation4 + $0xb0] sm:$0x3 pattern:$0x76325410]  ;;  %v14353_v11 = vld [vmem:[%s16826_s7] sm:$0xff]  }
 0x40d   : > { %13426 = vmatprep.subr.bf16.mxu0 %v14315_v31  ;;  %v12384_v45 = vld.sshfl [vmem:[#allocation4 + $0x74] sm:$0x3 pattern:$0x76325410]  ;;  %v12417_v17 = vcombine.low %v12392_v50, %v15765_v5 }
 0x40e   : > { %v12376_v12 = vld.sshfl [vmem:[#allocation4 + $0x38] sm:$0x3 pattern:$0x76325410]  ;;  %v14350_v0 = vld [vmem:[#allocation7 + $0x380] sm:$0xff]  }
 0x40f   : > { %13443 = vmatpush3.bf16.msra.mxu1 %v14314_v30  ;;  %v12415_v39 = vcombine.low %v12376_v12, %v12384_v45  ;;  %v5552_v32 = vrot.slane %v12417_v17, %v15733_v38 }
 0x410   : > { %13444 = vmatprep.subr.bf16.mxu1 %v14316_v18  ;;  %13427 = vmatpush3.bf16.msra.mxu0 %v14317_v57 }
 0x411   : > { %13428 = vmatprep.subr.bf16.mxu0 %v14319_v47  ;;  %v5538_v62 = vrot.slane %v12415_v39, %v15733_v38 }
 0x413   : > { %13445 = vmatpush3.bf16.msra.mxu1 %v14318_v19  ;;  %v5555_v14 = vcombine.low %v5538_v62, %v5552_v32 }
 0x414   : > { %13446 = vmatprep.subr.bf16.mxu1 %v14320_v56  ;;  %13429 = vmatpush3.bf16.msra.mxu0 %v14321_v34 }
 0x415   : > { %13458 = vmatprep.subr.bf16.mxu0 %v14324_v24 }
 0x417   : > { %13447 = vmatpush3.bf16.msra.mxu1 %v14322_v16  ;;  %6488 = vmatmul.mubr.bf16.vlgmr.msra.gmra.mxu0 %v5517_v3 }
 0x418   : > { %13448 = vmatprep.subr.bf16.mxu1 %v14323_v48  ;;  %13459 = vmatpush3.bf16.msra.mxu0 %v14326_v21  ;;  %v12401_v21 = vld [vmem:[%s16825_s6] ss:$0 sm:$0xff] }
 0x419   : > { %6569 = vmatprep.mubr.bf16.mxu0 %v5554_v23  ;;  %13460 = vmatprep.subr.bf16.mxu0 %v14328_v27 }
 0x41b   : > { %13449 = vmatpush3.bf16.msra.mxu1 %v14325_v35 }
 0x41c   : > { %13450 = vmatprep.subr.bf16.mxu1 %v14327_v55  ;;  %13461 = vmatpush3.bf16.msra.mxu0 %v14330_v10 }
 0x41d   : > { %13462 = vmatprep.subr.bf16.mxu0 %v14331_v51 }
 0x41f   : > { %13451 = vmatpush3.bf16.msra.mxu1 %v14329_v29 }
 0x420   : > { %13935 = vmatprep.subr.bf16.mxu1 %v14816_v33  ;;  %13463 = vmatpush3.bf16.msra.mxu0 %v14332_v8 }
 0x421   : > { %13464 = vmatprep.subr.bf16.mxu0 %v14334_v60 }
 0x422   : > { %6529 = vmatmul.mubr.bf16.vlgmr.msra.gmra.mxu1 %v5519_v42 }
 0x423   : > { %13936 = vmatpush3.bf16.msra.mxu1 %v14333_v2  ;;  %13951 = vmatprep.mubr.msk.bf16.mxu1 %vm14817_vm9, %v14816_v33 }
 0x424   : > { %13937 = vmatprep.subr.bf16.mxu1 %v14816_v33  ;;  %13465 = vmatpush3.bf16.msra.mxu0 %v14335_v41 }
 0x425   : > { %13466 = vmatprep.subr.bf16.mxu0 %v14337_v26 }
 0x427   : > { %13938 = vmatpush3.bf16.msra.mxu1 %v14336_v6 }
 0x428   : > { %13939 = vmatprep.subr.bf16.mxu1 %v14816_v33  ;;  %13467 = vmatpush3.bf16.msra.mxu0 %v14338_v25 }
 0x429   : > { %13468 = vmatprep.subr.bf16.mxu0 %v14340_v9 }
 0x42b   : > { %13940 = vmatpush3.bf16.msra.mxu1 %v14339_v53 }
 0x42c   : > { %13941 = vmatprep.subr.bf16.mxu1 %v14816_v33  ;;  %13469 = vmatpush3.bf16.msra.mxu0 %v14341_v13 }
 0x42d   : > { %13470 = vmatprep.subr.bf16.mxu0 %v14343_v52 }
 0x42f   : > { %13942 = vmatpush3.bf16.msra.mxu1 %v14342_v7 }
 0x430   : > { %13943 = vmatprep.subr.bf16.mxu1 %v14816_v33  ;;  %13471 = vmatpush3.bf16.msra.mxu0 %v14344_v63 }
 0x431   : > { %13472 = vmatprep.subr.bf16.mxu0 %v14346_v1 }
 0x433   : > { %13944 = vmatpush3.bf16.msra.mxu1 %v14345_v20 }
 0x434   : > { %13945 = vmatprep.subr.bf16.mxu1 %v14816_v33  ;;  %13473 = vmatpush3.bf16.msra.mxu0 %v14347_v49 }
 0x437   : > { %13946 = vmatpush3.bf16.msra.mxu1 %v14348_v54  ;;  %6570 = vmatmul.mubr.bf16.vlgmr.msra.gmra.mxu0 %v5553_v28 }
 0x438   : > { %13947 = vmatprep.subr.bf16.mxu1 %v14816_v33  ;;  %13957 = vmatprep.mubr.msk.bf16.mxu0 %vm6696_vm10, %v14353_v11 }
 0x43b   : > { %13948 = vmatpush3.bf16.msra.mxu1 %v14349_v58 }
 0x43c   : > { %13949 = vmatprep.subr.bf16.mxu1 %v14816_v33 }
 0x43f   : > { %13950 = vmatpush3.bf16.msra.mxu1 %v14350_v0 }
 0x442   : > { %13952 = vmatmul.mubr.bf16.vlgmr.msra.gmra.mxu1 %v5555_v14 }
 0x493   : > { %v13342_v5 = vpop.f32.mrf.mxu0 }
 0x495   : > { %v13343_v46 = vpop.f32.mrf.mxu0 }
 0x496   : > { %v13344_v48 = vadd.f32 %v13343_v46, %v13342_v5 }
 0x497   : > { %v13345_v30 = vpop.f32.mrf.mxu0 }
 0x498   : > { %v6326_v35 = vadd.f32 %v13344_v48, %v12401_v21 }
 0x499   : > { %v13346_v43 = vpop.f32.mrf.mxu0 }
 0x49a   : > { %v13347_v23 = vadd.f32 %v13346_v43, %v13345_v30 }
 0x49c   : > { %v6329_v42 = vadd.f32 %v13347_v23, %v12401_v21 }
 0x4a1   : > { %v13364_v31 = vpop.f32.mrf.mxu1 }
 0x4a3   : > { %v13365_v18 = vpop.f32.mrf.mxu1 }
 0x4a4   : > { %v13366_v3 = vadd.f32 %v13365_v18, %v13364_v31 }
 0x4a5   : > { %v13367_v57 = vpop.f32.mrf.mxu1 }
 0x4a6   : > { %v6367_v51 = vadd.f32 %v13366_v3, %v6326_v35  ;;  %v6655_v3 = vld [vmem:[#allocation2 + $0x8] sm:$0x1] }
 0x4a7   : > { %v13368_v47 = vpop.f32.mrf.mxu1 }
 0x4a8   : > { %v13369_v29 = vadd.f32 %v13368_v47, %v13367_v57 }
 0x4aa   : > { %v6370_v9 = vadd.f32 %v13369_v29, %v6329_v42 }
 0x4b7   : > { %v13386_v61 = vpop.f32.mrf.mxu0 }
 0x4b9   : > { %v13387_v38 = vpop.f32.mrf.mxu0 }
 0x4ba   : > { %v13388_v55 = vadd.f32 %v13387_v38, %v13386_v61 }
 0x4bb   : > { %v13389_v19 = vpop.f32.mrf.mxu0 }
 0x4bc   : > { %v6408_v41 = vadd.f32 %v13388_v55, %v6367_v51 }
 0x4bd   : > { %v13390_v56 = vpop.f32.mrf.mxu0 }
 0x4be   : > { %v13391_v26 = vadd.f32 %v13390_v56, %v13389_v19 }
 0x4c0   : > { %v6411_v1 = vadd.f32 %v13391_v26, %v6370_v9  ;;  %v14356_v26 = vld [vmem:[#allocation9 + $0x38] sm:$0xff]   ;;  %v14359_v9 = vld [vmem:[#allocation9 + $0x70] sm:$0xff]  }
 0x4c2   : > { %v13408_v15 = vpop.f32.mrf.mxu1 }
 0x4c4   : > { %v13409_v40 = vpop.f32.mrf.mxu1 }
 0x4c5   : > { %v13410_v8 = vadd.f32 %v13409_v40, %v13408_v15 }
 0x4c6   : > { %v13411_v34 = vpop.f32.mrf.mxu1 }
 0x4c7   : > { %v6449_v53 = vadd.f32 %v13410_v8, %v6408_v41  ;;  %v14355_v41 = vld [vmem:[#allocation9 + $0x78] sm:$0xff]  }
 0x4c8   : > { %v13412_v24 = vpop.f32.mrf.mxu1  ;;  %13492 = vmatprep.subr.bf16.mxu1 %v14355_v41  ;;  %v9576_v41 = vld [vmem:[#allocation4 + $0xe0] sm:$0x1] }
 0x4c9   : > { %v13413_v13 = vadd.f32 %v13412_v24, %v13411_v34  ;;  %v6649_v34 = vld [vmem:[#allocation2] sm:$0xf]  ;;  %13493 = vmatpush3.bf16.msra.mxu1 %v14356_v26  ;;  %v15859_v26 = vld.sshfl [vmem:[#allocation4 + $0xec] sm:$0x1 pattern:$0x75316420] }
 0x4ca   : > { %13494 = vmatprep.subr.bf16.mxu1 %v14359_v9  ;;  %v9582_v9 = vld [vmem:[#allocation3 + $0x3c] sm:$0x1] }
 0x4cb   : > { %v6452_v28 = vadd.f32 %v13413_v13, %v6411_v1  ;;  %v14360_v13 = vld [vmem:[#allocation9 + $0x30] sm:$0xff]   ;;  %v14364_v1 = vld [vmem:[#allocation9 + $0x28] sm:$0xff]  }
 0x4cd   : > { %13495 = vmatpush3.bf16.msra.mxu1 %v14360_v13  ;;  %v9622_v13 = vld [vmem:[#allocation3 + $0x3c] sm:$0x4] }
 0x4d7   : > { %v13430_v59 = vpop.f32.mrf.mxu0 }
 0x4d9   : > { %v13431_v16 = vpop.f32.mrf.mxu0 }
 0x4da   : > { %v13432_v6 = vadd.f32 %v13431_v16, %v13430_v59 }
 0x4db   : > { %v13433_v36 = vpop.f32.mrf.mxu0 }
 0x4dc   : > { %v6490_v20 = vadd.f32 %v13432_v6, %v6449_v53  ;;  %v14357_v6 = vld [vmem:[#allocation9 + $0xf8] sm:$0xff]   ;;  %v14361_v53 = vld [vmem:[#allocation9 + $0xf0] sm:$0xff]  }
 0x4dd   : > { %v13434_v10 = vpop.f32.mrf.mxu0 }
 0x4de   : > { %v13435_v49 = vadd.f32 %v13434_v10, %v13433_v36 }
 0x4e0   : > { %v6493_v17 = vadd.f32 %v13435_v49, %v6452_v28  ;;  %v14367_v49 = vld [vmem:[#allocation9 + $0x60] sm:$0xff]  }
 0x4e1   : > { %v14370_v28 = vld [vmem:[#allocation9 + $0xa0] sm:$0xff]  }
 0x4e2   : > { %v13452_v4 = vpop.f32.mrf.mxu1 }
 0x4e4   : > { %v13453_v27 = vpop.f32.mrf.mxu1 }
 0x4e5   : > { %v13454_v52 = vadd.f32 %v13453_v27, %v13452_v4 }
 0x4e6   : > { %v13455_v60 = vpop.f32.mrf.mxu1 }
 0x4e7   : > { %v6531_v58 = vadd.f32 %v13454_v52, %v6490_v20  ;;  %v14362_v52 = vld [vmem:[#allocation9 + $0xb0] sm:$0xff]   ;;  %v14366_v20 = vld [vmem:[#allocation9 + $0xa8] sm:$0xff]  }
 0x4e8   : > { %v13456_v7 = vpop.f32.mrf.mxu1 }
 0x4e9   : > { %v13457_v45 = vadd.f32 %v13456_v7, %v13455_v60  ;;  %v14363_v7 = vld [vmem:[#allocation9 + $0x68] sm:$0xff]  }
 0x4ea   : > { %13496 = vmatprep.subr.bf16.mxu1 %v14363_v7  ;;  %v9639_v7 = vshrl.u32 %v9622_v13, 16 }
 0x4eb   : > { %v6534_v32 = vadd.f32 %v13457_v45, %v6493_v17  ;;  %13497 = vmatpush3.bf16.msra.mxu1 %v14364_v1  ;;  %v14373_v45 = vld [vmem:[#allocation9 + $0xd8] sm:$0xff]  }
 0x4ec   : > { %13498 = vmatprep.subr.bf16.mxu1 %v14367_v49  ;;  %v14372_v17 = vld [vmem:[#allocation9 + $0x18] sm:$0xff]  }
 0x4ed   : > { %v9656_v1 = vld [vmem:[#allocation4 + $0xe8] sm:$0x1]  ;;  %v9688_v49 = vld [vmem:[#allocation4 + $0xec] sm:$0x1] }
 0x4f7   : > { %v13474_v2 = vpop.f32.mrf.mxu0 }
 0x4f9   : > { %v13475_v25 = vpop.f32.mrf.mxu0 }
 0x4fa   : > { %v13476_v54 = vadd.f32 %v13475_v25, %v13474_v2  ;;  %v14358_v25 = vld [vmem:[#allocation9 + $0xb8] sm:$0xff]  }
 0x4fb   : > { %v13477_v63 = vpop.f32.mrf.mxu0 }
 0x4fc   : > { %v6572_v39 = vadd.f32 %v13476_v54, %v6531_v58  ;;  %v14369_v54 = vld [vmem:[#allocation9 + $0xe0] sm:$0xff]   ;;  %v14371_v58 = vld [vmem:[#allocation9 + $0x58] sm:$0xff]  }
 0x4fd   : > { %v13478_v50 = vpop.f32.mrf.mxu0 }
 0x4fe   : > { %v13479_v12 = vadd.f32 %v13478_v50, %v13477_v63  ;;  %v14365_v63 = vld [vmem:[#allocation9 + $0xe8] sm:$0xff]   ;;  %v14368_v50 = vld [vmem:[#allocation9 + $0x20] sm:$0xff]  }
 0x4ff   : > { %13499 = vmatpush3.bf16.msra.mxu1 %v14368_v50  ;;  %v12784_v50 = vrot.slane %v9639_v7, 10 }
 0x500   : > { %v6575_v5 = vadd.f32 %v13479_v12, %v6534_v32  ;;  %v14374_v12 = vld [vmem:[#allocation9 + $0x98] sm:$0xff]   ;;  %13500 = vmatprep.subr.bf16.mxu1 %v14371_v58  ;;  %v14376_v32 = vld [vmem:[#allocation9 + $0x10] sm:$0xff]  }
 0x501   : > { %v9657_v58 = vsel %vm15826_vm12, %v12784_v50, %v9656_v1 }
 0x502   : > { %v6612_v0 = vpop.f32.mrf.mxu1 }
 0x503   : > { %v6613_v62 = vadd.f32 %v6612_v0, %v6572_v39  ;;  %v14375_v39 = vld [vmem:[#allocation9 + $0x50] sm:$0xff]   ;;  %13501 = vmatpush3.bf16.msra.mxu1 %v14372_v17 }
 0x504   : > { %v13953_v14 = vpop.f32.mrf.mxu1  ;;  %v14377_v0 = vld [vmem:[#allocation9 + $0xd0] sm:$0xff]   ;;  %13502 = vmatprep.subr.bf16.mxu1 %v14375_v39 }
 0x505   : > { %v6619_v11 = vmul.f32 0.2, %v6613_v62  ;;  %v14379_v14 = vld [vmem:[#allocation9 + $0x48] sm:$0xff]  }
 0x506   : > { %v6615_v46 = vpop.f32.mrf.mxu1 }
 0x507   : > { %v6621_v31 = vmax.f32 %v6613_v62, %v6619_v11  ;;  %v6616_v30 = vadd.f32 %v6615_v46, %v6575_v5  ;;  %v14378_v62 = vld [vmem:[#allocation9 + $0x90] sm:$0xff]   ;;  %v14381_v11 = vld [vmem:[#allocation9 + $0xc8] sm:$0xff]   ;;  %13503 = vmatpush3.bf16.msra.mxu1 %v14376_v32 }
 0x508   : > { %v13954_v18 = vpop.f32.mrf.mxu1  ;;  %v14380_v5 = vld [vmem:[#allocation9 + $0x8] sm:$0xff]   ;;  %13504 = vmatprep.subr.bf16.mxu1 %v14379_v14 }
 0x509   : > { %v13057_v43 = vpack.c.bf16 %v6621_v31, %v6621_v31  ;;  %v6620_v57 = vmul.f32 0.2, %v6616_v30  ;;  %v14382_v46 = vld [vmem:[#allocation9 + $0x88] sm:$0xff]   ;;  %v14383_v31 = vld [vmem:[#allocation9 + $0x40] sm:$0xff]  }
 0x50a   : > { %v15839_v18 = vld.sshfl [vmem:[#allocation4] sm:$0x5 pattern:$0x75316420] }
 0x50b   : > { %v6630_v61 = vshrl.u32 %v13057_v43, 16  ;;  %v6622_v47 = vmax.f32 %v6616_v30, %v6620_v57  ;;  %v6633_v15 = vshll.u32 %v13057_v43, 16  ;;  %v14385_v30 = vld [vmem:[#allocation9 + $0xc0] sm:$0xff]   ;;  %13505 = vmatpush3.bf16.msra.mxu1 %v14380_v5 }
 0x50c   : > { %v14384_v43 = vld [vmem:[#allocation9] sm:$0xff]   ;;  %13506 = vmatprep.subr.bf16.mxu1 %v14383_v31 }
 0x50d   : > { %v6632_v38 = vrot.slane %v6630_v61, 7  ;;  %v13058_v19 = vpack.c.bf16 %v6622_v47, %v6622_v47  ;;  %v14386_v57 = vld [vmem:[#allocation9 + $0x80] sm:$0xff]   ;;  %v15841_v61 = vld.sshfl [vmem:[#allocation4 + $0x8] sm:$0x5 pattern:$0x75316420] }
 0x50e   : > { %v7316_v47 = vcombine.low %v15839_v18, %v15841_v61 }
 0x50f   : > { %v6635_v40 = vor.u32 %v6633_v15, %v6632_v38  ;;  %v6638_v56 = vshrl.u32 %v13058_v19, 16  ;;  %v6641_v16 = vshll.u32 %v13058_v19, 16  ;;  %v6636_v48 = vrot.slane %v6632_v38, 4  ;;  %13507 = vmatpush3.bf16.msra.mxu1 %v14384_v43  ;;  %v9211_v38 = vld [vmem:[#allocation3] sm:$0x1] }
 0x510   : > { %v9215_v15 = vld [vmem:[#allocation4] sm:$0x1]  ;;  %v9227_v19 = vld [vmem:[#allocation3] sm:$0x4] }
 0x511   : > { %v6650_v59 = vsel %vm15684_vm15, %v6635_v40, %v6649_v34  ;;  %v6640_v24 = vrot.slane %v6638_v56, 7  ;;  %v9216_v40 = vsel %vm15826_vm12, %v9211_v38, %v9215_v15  ;;  %v12741_v56 = vrot.slane %v9227_v19, 10  ;;  %v9247_v34 = vld [vmem:[#allocation4 + $0x4] sm:$0x1] }
 0x512   : > { %6651 = vst [vmem:[#allocation2] sm:$0xf] %v6650_v59  ;;  %v9259_v59 = vld [vmem:[#allocation3] sm:$0x1]  ;;  %9217 = vst [vmem:[#allocation4] sm:$0x1] %v9216_v40 }
 0x513   : > { %v6643_v21 = vor.u32 %v6641_v16, %v6640_v24  ;;  %v6645_v36 = vrot.slane %v6640_v24, 4  ;;  %v14387_v24 = vld [vmem:[#allocation9 + $0x178] sm:$0xff]   ;;  %v9264_v16 = vshrl.u32 %v9259_v59, 16 }
 0x514   : > { %13536 = vmatprep.subr.bf16.mxu1 %v14387_v24 }
 0x515   : > { %v6644_v27 = vsel %vm15691_vm4, %v6636_v48, %v6643_v21  ;;  %v6656_v35 = vsel %vm15826_vm12, %v6645_v36, %v6655_v3  ;;  %v9287_v48 = vld [vmem:[#allocation4 + $0x8] sm:$0x1]  ;;  %v9299_v21 = vld [vmem:[#allocation3] sm:$0x4]  ;;  %v9248_v36 = vsel %vm15826_vm12, %v12741_v56, %v9247_v34  ;;  %vm11368_vm4 = vsmask.f32 7946 }
 0x516   : > { %6652 = vst [vmem:[#allocation2 + $0x4] sm:$0xf] %v6644_v27  ;;  %6657 = vst [vmem:[#allocation2 + $0x8] sm:$0x1] %v6656_v35  ;;  %v9304_v3 = vshrl.u32 %v9299_v21, 16  ;;  %v9288_v27 = vsel %vm15826_vm12, %v9264_v16, %v9287_v48 }
 0x517   : > { %9249 = vst [vmem:[#allocation4 + $0x4] sm:$0x1] %v9248_v36  ;;  %v9327_v35 = vld [vmem:[#allocation4 + $0xc] sm:$0x1]  ;;  %9289 = vst [vmem:[#allocation4 + $0x8] sm:$0x1] %v9288_v27 }
 0x518   : > { %vm16706_vm5 = vmand %vm10186_vm14, %vm11368_vm4 }
 0x51d   : > { %v14351_v23 = vld [vmem:[#allocation2] sm:$0xff]   ;;  %v14352_v55 = vld [vmem:[#allocation2 + $0x8] ss:$0 sps:$4 sm:$0x11]  }
 0x51e   : > { %v6686_v10 = vshll.u32 %v14351_v23, 16  ;;  %v6691_v51 = vshll.u32 %v14352_v55, 16  ;;  %v6684_v29 = vshrl.u32 %v14351_v23, 16  ;;  %v12749_v23 = vrot.slane %v9304_v3, 10 }
 0x520   : > { %v6688_v8 = vrot.slane %v6686_v10, 1  ;;  %v6693_v2 = vrot.slane %v6691_v51, 1  ;;  %v9328_v55 = vsel %vm15826_vm12, %v12749_v23, %v9327_v35  ;;  %v14389_v10 = vld [vmem:[#allocation9 + $0x1f8] sm:$0xff]  }
 0x521   : > { %9329 = vst [vmem:[#allocation4 + $0xc] sm:$0x1] %v9328_v55  ;;  %v15853_v51 = vld.sshfl [vmem:[#allocation4 + $0xdc] sm:$0x5 pattern:$0x75316420] }
 0x522   : > { %v6689_v60 = vor.u32 %v6688_v8, %v6684_v29  ;;  %v15855_v29 = vld.sshfl [vmem:[#allocation4 + $0xe4] sm:$0x5 pattern:$0x75316420]  ;;  %v9534_v8 = vld [vmem:[#allocation3 + $0x3c] sm:$0x1] }
 0x523   : > { %9658 = vst [vmem:[#allocation4 + $0xe8] sm:$0x1] %v9657_v58 }
 0x524   : > { %v6694_v42 = vsel %vm4311_vm8, %v6689_v60, %v6693_v2  ;;  %v9544_v60 = vld [vmem:[#allocation4 + $0xdc] sm:$0x1]  ;;  %v9550_v2 = vld [vmem:[#allocation3 + $0x3c] sm:$0x4] }
 0x525   : > { %13955 = vmatprep.subr.bf16.mxu0 %v6694_v42 }
 0x526   : > { %13956 = vmatpush3.bf16.msra.mxu0 %v6694_v42  ;;  %v9545_v42 = vsel %vm15826_vm12, %v9534_v8, %v9544_v60 }
 0x527   : > { %13514 = vmatprep.subr.bf16.mxu0 %v14357_v6  ;;  %9546 = vst [vmem:[#allocation4 + $0xdc] sm:$0x1] %v9545_v42 }
 0x529   : > { %13958 = vmatmul.mubr.msk.bf16.vlgmr.msra.gmra.mxu0 %vm6696_vm10, %v14354_v37  ;;  %v12776_v37 = vrot.slane %v9550_v2, 10 }
 0x52a   : > { %13515 = vmatpush3.bf16.msra.mxu0 %v14358_v25  ;;  %v7632_v25 = vcombine.low %v15855_v29, %v15859_v26  ;;  %v14449_v29 = vld [vmem:[#allocation9 + $0x2c0] sm:$0xff]  }
 0x52b   : > { %13516 = vmatprep.subr.bf16.mxu0 %v14361_v53  ;;  %v9577_v6 = vsel %vm15826_vm12, %v12776_v37, %v9576_v41  ;;  %v9616_v53 = vld [vmem:[#allocation4 + $0xe4] sm:$0x1] }
 0x52c   : > { %9578 = vst [vmem:[#allocation4 + $0xe0] sm:$0x1] %v9577_v6 }
 0x52e   : > { %13517 = vmatpush3.bf16.msra.mxu0 %v14362_v52  ;;  %v9599_v52 = vshrl.u32 %v9582_v9, 16 }
 0x52f   : > { %13518 = vmatprep.subr.bf16.mxu0 %v14365_v63  ;;  %v9662_v63 = vld [vmem:[#allocation3 + $0x3c] sm:$0x2] }
 0x532   : > { %13519 = vmatpush3.bf16.msra.mxu0 %v14366_v20  ;;  %v12788_v20 = vrot.slane %v9662_v63, 9 }
 0x533   : > { %13520 = vmatprep.subr.bf16.mxu0 %v14369_v54  ;;  %v9617_v54 = vsel %vm15826_vm12, %v9599_v52, %v9616_v53 }
 0x534   : > { %9618 = vst [vmem:[#allocation4 + $0xe4] sm:$0x1] %v9617_v54 }
 0x536   : > { %13521 = vmatpush3.bf16.msra.mxu0 %v14370_v28  ;;  %v9689_v28 = vsel %vm15826_vm12, %v12788_v20, %v9688_v49 }
 0x537   : > { %13522 = vmatprep.subr.bf16.mxu0 %v14373_v45  ;;  %9690 = vst [vmem:[#allocation4 + $0xec] sm:$0x1] %v9689_v28 }
 0x53a   : > { %13523 = vmatpush3.bf16.msra.mxu0 %v14374_v12 }
 0x53b   : > { %13524 = vmatprep.subr.bf16.mxu0 %v14377_v0 }
 0x53e   : > { %13525 = vmatpush3.bf16.msra.mxu0 %v14378_v62 }
 0x53f   : > { %13526 = vmatprep.subr.bf16.mxu0 %v14381_v11 }
 0x542   : > { %13527 = vmatpush3.bf16.msra.mxu0 %v14382_v46 }
 0x543   : > { %13528 = vmatprep.subr.bf16.mxu0 %v14385_v30 }
 0x546   : > { %13529 = vmatpush3.bf16.msra.mxu0 %v14386_v57 }
 0x547   : > { %13558 = vmatprep.subr.bf16.mxu0 %v14389_v10 }
 0x5e9   : > { %v13959_v45 = vpop.f32.mrf.mxu0 }
 0x5eb   : > { %v6737_v17 = vpop.f32.mrf.mxu0 }
 0x5ed   : > { %v13960_v12 = vpop.f32.mrf.mxu0 }
 0x5ee   : > { %v6753_v39 = vpack.c.bf16 %v13960_v12, %v13959_v45  ;;  %v13060_v0 = vpack.c.bf16 %v13960_v12, %v13960_v12 }
 0x5ef   : > { %v6740_v32 = vpop.f32.mrf.mxu0 }
 0x5f0   : > { %6767 = vst [vmem:[#allocation3 + $0x30] sm:$0xf] %v13060_v0  ;;  %6762 = vst [vmem:[#allocation3 + $0x24] sm:$0xf] %v6753_v39  ;;  %v6752_v62 = vpack.c.bf16 %v6740_v32, %v6737_v17  ;;  %v13059_v14 = vpack.c.bf16 %v6740_v32, %v6740_v32 }
 0x5f2   : > { %6756 = vst [vmem:[#allocation3 + $0xc] sm:$0xf] %v6752_v62  ;;  %6761 = vst [vmem:[#allocation3 + $0x18] sm:$0xf] %v13059_v14 }
 0x5f7   : > { %v6771_v11 = vld [vmem:[#allocation3 + $0x24] sm:$0x1]  ;;  %v6779_v5 = vld [vmem:[#allocation3 + $0x24] sm:$0x4]  ;;  %v6899_v63 = vld [vmem:[#allocation3 + $0x24] sm:$0x2] }
 0x5f8   : > { %v6803_v46 = vld [vmem:[#allocation3 + $0x24] sm:$0x3]  ;;  %6775 = vst [vmem:[#allocation4 + $0xb4] sm:$0x1] %v6771_v11  ;;  %v12551_v31 = vrot.slane %v6779_v5, 10 }
 0x5f9   : > { %v6832_v30 = vshrl.u32 %v6803_v46, 16  ;;  %v6835_v43 = vshll.u32 %v6803_v46, 16  ;;  %v6769_v57 = vld [vmem:[#allocation3 + $0xc] sm:$0x1]  ;;  %v6770_v38 = vld [vmem:[#allocation3 + $0x18] sm:$0x1] }
 0x5fa   : > { %v6777_v15 = vld [vmem:[#allocation3 + $0xc] sm:$0x4]  ;;  %6773 = vst [vmem:[#allocation4 + $0x3c] sm:$0x1] %v6769_v57  ;;  %6774 = vst [vmem:[#allocation4 + $0x78] sm:$0x1] %v6770_v38 }
 0x5fb   : > { %v6778_v19 = vld [vmem:[#allocation3 + $0x18] sm:$0x4]  ;;  %v12549_v40 = vrot.slane %v6777_v15, 10  ;;  %6799 = vst [vmem:[#allocation4 + $0xb8] sm:$0x1] %v12551_v31  ;;  %v6834_v34 = vrot.slane %v6832_v30, 4 }
 0x5fc   : > { %v6801_v56 = vld [vmem:[#allocation3 + $0xc] sm:$0x3]  ;;  %v12550_v59 = vrot.slane %v6778_v19, 10  ;;  %v6802_v24 = vld [vmem:[#allocation3 + $0x18] sm:$0x3]  ;;  %v6837_v21 = vrot.slane %v6835_v43, 5 }
 0x5fd   : > { %v6814_v16 = vshrl.u32 %v6801_v56, 16  ;;  %v6817_v48 = vshll.u32 %v6801_v56, 16  ;;  %v6851_v36 = vld [vmem:[#allocation3 + $0x24] sm:$0xc]  ;;  %6797 = vst [vmem:[#allocation4 + $0x40] sm:$0x1] %v12549_v40 }
 0x5fe   : > { %v6823_v3 = vshrl.u32 %v6802_v24, 16  ;;  %v6826_v27 = vshll.u32 %v6802_v24, 16  ;;  %v6849_v35 = vld [vmem:[#allocation3 + $0xc] sm:$0xc]  ;;  %v6850_v23 = vld [vmem:[#allocation3 + $0x18] sm:$0xc]  ;;  %v6838_v8 = vor.u32 %v6837_v21, %v6834_v34 }
 0x5ff   : > { %6798 = vst [vmem:[#allocation4 + $0x7c] sm:$0x1] %v12550_v59  ;;  %v6816_v55 = vrot.slane %v6814_v16, 4  ;;  %v6819_v10 = vrot.slane %v6817_v48, 5  ;;  %v6862_v60 = vshrl.u32 %v6849_v35, 16  ;;  %v6865_v41 = vshll.u32 %v6849_v35, 16 }
 0x600   : > { %v6897_v2 = vld [vmem:[#allocation3 + $0xc] sm:$0x2]  ;;  %v6825_v42 = vrot.slane %v6823_v3, 4  ;;  %v6828_v37 = vrot.slane %v6826_v27, 5  ;;  %v6871_v6 = vshrl.u32 %v6850_v23, 16  ;;  %v6839_v13 = vrot.slane %v6838_v8, 4 }
 0x601   : > { %v6898_v9 = vld [vmem:[#allocation3 + $0x18] sm:$0x2]  ;;  %v6820_v53 = vor.u32 %v6819_v10, %v6816_v55  ;;  %v6864_v52 = vrot.slane %v6862_v60, 6  ;;  %v6874_v7 = vshll.u32 %v6850_v23, 16  ;;  %v6867_v20 = vrot.slane %v6865_v41, 7 }
 0x602   : > { %v6829_v1 = vor.u32 %v6828_v37, %v6825_v42  ;;  %v6873_v49 = vrot.slane %v6871_v6, 6  ;;  %v6880_v54 = vshrl.u32 %v6851_v36, 16  ;;  %v6920_v50 = vld [vmem:[#allocation3 + $0xc] sm:$0x1]  ;;  %6847 = vst [vmem:[#allocation4 + $0xbc] sm:$0x1] %v6839_v13 }
 0x603   : > { %v6821_v28 = vrot.slane %v6820_v53, 4  ;;  %v6876_v58 = vrot.slane %v6874_v7, 7  ;;  %v6883_v45 = vshll.u32 %v6851_v36, 16  ;;  %v12553_v17 = vrot.slane %v6897_v2, 9  ;;  %v6921_v12 = vld [vmem:[#allocation3 + $0x18] sm:$0x1] }
 0x604   : > { %6924 = vst [vmem:[#allocation4 + $0x14] sm:$0x1] %v6920_v50  ;;  %v6830_v39 = vrot.slane %v6829_v1, 4  ;;  %v6868_v0 = vor.u32 %v6867_v20, %v6864_v52  ;;  %v6882_v32 = vrot.slane %v6880_v54, 6  ;;  %6925 = vst [vmem:[#allocation4 + $0x50] sm:$0x1] %v6921_v12 }
 0x605   : > { %6845 = vst [vmem:[#allocation4 + $0x44] sm:$0x1] %v6821_v28  ;;  %v6877_v62 = vor.u32 %v6876_v58, %v6873_v49  ;;  %v6885_v14 = vrot.slane %v6883_v45, 7  ;;  %v12554_v11 = vrot.slane %v6898_v9, 9  ;;  %6917 = vst [vmem:[#allocation4 + $0x4c] sm:$0x1] %v12553_v17 }
 0x606   : > { %6846 = vst [vmem:[#allocation4 + $0x80] sm:$0x1] %v6830_v39  ;;  %v6869_v5 = vrot.slane %v6868_v0, 4  ;;  %v12555_v46 = vrot.slane %v6899_v63, 9  ;;  %v9339_v31 = vld [vmem:[#allocation3] sm:$0x2]  ;;  %v7324_v39 = vrot.slane %v7316_v47, %v15083_v44 }
 0x607   : > { %v6878_v30 = vrot.slane %v6877_v62, 4  ;;  %v6886_v43 = vor.u32 %v6885_v14, %v6882_v32  ;;  %6918 = vst [vmem:[#allocation4 + $0x88] sm:$0x1] %v12554_v11  ;;  %v6922_v57 = vld [vmem:[#allocation3 + $0x24] sm:$0x1]  ;;  %v12753_v3 = vrot.slane %v9339_v31, 9 }
 0x608   : > { %v6923_v38 = vld [vmem:[#allocation3 + $0x30] sm:$0x1]  ;;  %6893 = vst [vmem:[#allocation4 + $0x48] sm:$0x1] %v6869_v5  ;;  %6919 = vst [vmem:[#allocation4 + $0xc4] sm:$0x1] %v12555_v46 }
 0x609   : > { %6926 = vst [vmem:[#allocation4 + $0x8c] sm:$0x1] %v6922_v57  ;;  %6927 = vst [vmem:[#allocation4 + $0xc8] sm:$0x1] %v6923_v38  ;;  %v6928_v15 = vld [vmem:[#allocation3 + $0xc] sm:$0x4] }
 0x60a   : > { %v6929_v19 = vld [vmem:[#allocation3 + $0x18] sm:$0x4]  ;;  %v6930_v40 = vld [vmem:[#allocation3 + $0x24] sm:$0x4]  ;;  %v6887_v56 = vrot.slane %v6886_v43, 4  ;;  %v12556_v59 = vrot.slane %v6928_v15, 10 }
 0x60b   : > { %6894 = vst [vmem:[#allocation4 + $0x84] sm:$0x1] %v6878_v30  ;;  %v6931_v34 = vld [vmem:[#allocation3 + $0x30] sm:$0x4]  ;;  %v12557_v24 = vrot.slane %v6929_v19, 10  ;;  %v12558_v16 = vrot.slane %v6930_v40, 10 }
 0x60c   : > { %v12559_v48 = vrot.slane %v6931_v34, 10  ;;  %v6952_v21 = vld [vmem:[#allocation3 + $0xc] sm:$0x3]  ;;  %v6953_v36 = vld [vmem:[#allocation3 + $0x18] sm:$0x3] }
 0x60d   : > { %6895 = vst [vmem:[#allocation4 + $0xc0] sm:$0x1] %v6887_v56  ;;  %6948 = vst [vmem:[#allocation4 + $0x18] sm:$0x1] %v12556_v59  ;;  %v6954_v27 = vld [vmem:[#allocation3 + $0x24] sm:$0x3] }
 0x60e   : > { %6949 = vst [vmem:[#allocation4 + $0x54] sm:$0x1] %v12557_v24  ;;  %6950 = vst [vmem:[#allocation4 + $0x90] sm:$0x1] %v12558_v16  ;;  %v6955_v35 = vld [vmem:[#allocation3 + $0x30] sm:$0x3] }
 0x60f   : > { %v6957_v23 = vshrl.u32 %v6952_v21, 16  ;;  %v6960_v55 = vshll.u32 %v6952_v21, 16  ;;  %6951 = vst [vmem:[#allocation4 + $0xcc] sm:$0x1] %v12559_v48  ;;  %v6966_v10 = vshrl.u32 %v6953_v36, 16  ;;  %v6969_v8 = vshll.u32 %v6953_v36, 16 }
 0x610   : > { %v6975_v60 = vshrl.u32 %v6954_v27, 16  ;;  %v6978_v2 = vshll.u32 %v6954_v27, 16  ;;  %v9359_v42 = vld [vmem:[#allocation4 + $0x10] sm:$0x1]  ;;  %v6984_v9 = vshrl.u32 %v6955_v35, 16  ;;  %v6987_v53 = vshll.u32 %v6955_v35, 16 }
 0x611   : > { %v12580_v37 = vld.sshfl [vmem:[#allocation4 + $0x3c] sm:$0x5 pattern:$0x75316420]  ;;  %v6959_v41 = vrot.slane %v6957_v23, 4  ;;  %v6962_v6 = vrot.slane %v6960_v55, 5  ;;  %v9360_v58 = vsel %vm15826_vm12, %v12753_v3, %v9359_v42 }
 0x612   : > { %v12588_v13 = vld.sshfl [vmem:[#allocation4 + $0x78] sm:$0x5 pattern:$0x75316420]  ;;  %v6968_v52 = vrot.slane %v6966_v10, 4  ;;  %v6971_v7 = vrot.slane %v6969_v8, 5 }
 0x613   : > { %v6977_v63 = vrot.slane %v6975_v60, 4  ;;  %v6980_v1 = vrot.slane %v6978_v2, 5  ;;  %v7000_v20 = vld [vmem:[#allocation3 + $0xc] sm:$0xc]  ;;  %v6963_v54 = vor.u32 %v6962_v6, %v6959_v41  ;;  %v6986_v50 = vrot.slane %v6984_v9, 4 }
 0x614   : > { %v12581_v49 = vld.sshfl [vmem:[#allocation4 + $0x44] sm:$0x5 pattern:$0x75316420]  ;;  %v6989_v28 = vrot.slane %v6987_v53, 5  ;;  %v6972_v32 = vor.u32 %v6971_v7, %v6968_v52  ;;  %v7005_v30 = vshrl.u32 %v7000_v20, 16 }
 0x615   : > { %v7001_v45 = vld [vmem:[#allocation3 + $0x18] sm:$0xc]  ;;  %v12589_v17 = vld.sshfl [vmem:[#allocation4 + $0x80] sm:$0x5 pattern:$0x75316420]  ;;  %v7406_v0 = vcombine.low %v12580_v37, %v12581_v49  ;;  %v6981_v62 = vor.u32 %v6980_v1, %v6977_v63 }
 0x616   : > { %v12596_v12 = vld.sshfl [vmem:[#allocation4 + $0xb4] sm:$0x5 pattern:$0x75316420]  ;;  %v7002_v14 = vld [vmem:[#allocation3 + $0x24] sm:$0xc]  ;;  %v7496_v11 = vcombine.low %v12588_v13, %v12589_v17  ;;  %v6990_v46 = vor.u32 %v6989_v28, %v6986_v50 }
 0x617   : > { %v6964_v5 = vrot.slane %v6963_v54, 4  ;;  %v15877_v31 = vld.sshfl [vmem:[#allocation4 + $0x10] sm:$0x5 pattern:$0x75316420]  ;;  %v7414_v57 = vrot.slane %v7406_v0, %v15083_v44  ;;  %v6973_v38 = vrot.slane %v6972_v32, 4 }
 0x618   : > { %v12597_v43 = vld.sshfl [vmem:[#allocation4 + $0xbc] sm:$0x5 pattern:$0x75316420]  ;;  %v6982_v15 = vrot.slane %v6981_v62, 4  ;;  %v7504_v19 = vrot.slane %v7496_v11, %v15083_v44  ;;  %v6991_v61 = vrot.slane %v6990_v46, 4 }
 0x619   : > { %9361 = vst [vmem:[#allocation4 + $0x10] sm:$0x1] %v9360_v58  ;;  %v7586_v18 = vcombine.low %v12596_v12, %v12597_v43  ;;  %6996 = vst [vmem:[#allocation4 + $0x1c] sm:$0x1] %v6964_v5  ;;  %v12605_v47 = vcombine.low %v7324_v39, %v7414_v57  ;;  %v7003_v40 = vld [vmem:[#allocation3 + $0x30] sm:$0xc] }
 0x61a   : > { %6997 = vst [vmem:[#allocation4 + $0x58] sm:$0x1] %v6973_v38  ;;  %6998 = vst [vmem:[#allocation4 + $0x94] sm:$0x1] %v6982_v15  ;;  %v7007_v56 = vrot.slane %v7005_v30, 6  ;;  %v7008_v34 = vshll.u32 %v7000_v20, 16 }
 0x61b   : > { %v7014_v59 = vshrl.u32 %v7001_v45, 16  ;;  %v7594_v24 = vrot.slane %v7586_v18, %v15083_v44  ;;  %6999 = vst [vmem:[#allocation4 + $0xd0] sm:$0x1] %v6991_v61  ;;  %v7017_v16 = vshll.u32 %v7001_v45, 16  ;;  %v7023_v48 = vshrl.u32 %v7002_v14, 16  ;;  %v14388_v17 = vld [vmem:[#allocation9 + $0x138] sm:$0xff]  }
 0x61c   : > { %v7905_v21 = vrot.slane %v12605_v47, %v15083_v44  ;;  %v7010_v36 = vrot.slane %v7008_v34, 7  ;;  %v7026_v27 = vshll.u32 %v7002_v14, 16  ;;  %v7048_v35 = vld [vmem:[#allocation3 + $0xc] sm:$0x2]  ;;  %v7032_v8 = vshrl.u32 %v7003_v40, 16  ;;  %v14390_v18 = vld [vmem:[#allocation9 + $0x1b8] sm:$0xff]  }
 0x61d   : > { %v7016_v3 = vrot.slane %v7014_v59, 6  ;;  %v12607_v23 = vcombine.low %v7504_v19, %v7594_v24  ;;  %v7019_v55 = vrot.slane %v7017_v16, 7  ;;  %v7025_v10 = vrot.slane %v7023_v48, 6  ;;  %v7049_v37 = vld [vmem:[#allocation3 + $0x18] sm:$0x2]  ;;  %v14391_v11 = vld [vmem:[#allocation9 + $0x170] sm:$0xff]  }
 0x61e   : > { %v7011_v60 = vor.u32 %v7010_v36, %v7007_v56  ;;  %v7028_v2 = vrot.slane %v7026_v27, 7  ;;  %v7035_v42 = vshll.u32 %v7003_v40, 16  ;;  %v12582_v6 = vld.sshfl [vmem:[#allocation4 + $0x4c] sm:$0x5 pattern:$0x75316420] }
 0x61f   : > { %v7919_v41 = vrot.slane %v12607_v23, %v15083_v44  ;;  %v7020_v9 = vor.u32 %v7019_v55, %v7016_v3  ;;  %v7034_v53 = vrot.slane %v7032_v8, 6  ;;  %v7050_v13 = vld [vmem:[#allocation3 + $0x24] sm:$0x2]  ;;  %v12560_v52 = vrot.slane %v7048_v35, 9  ;;  %v7072_v7 = vld [vmem:[#allocation3 + $0x18] sm:$0x1] }
 0x620   : > { %v7073_v63 = vld [vmem:[#allocation3 + $0x24] sm:$0x1]  ;;  %v12590_v20 = vld.sshfl [vmem:[#allocation4 + $0x88] sm:$0x5 pattern:$0x75316420]  ;;  %v7029_v54 = vor.u32 %v7028_v2, %v7025_v10 }
 0x621   : > { %v12575_v1 = vld.sshfl [vmem:[#allocation4 + $0x18] sm:$0x5 pattern:$0x75316420]  ;;  %v7012_v49 = vrot.slane %v7011_v60, 4  ;;  %v7037_v50 = vrot.slane %v7035_v42, 7  ;;  %v7928_v58 = vcombine.high %v7905_v21, %v7919_v41  ;;  %v7927_v45 = vcombine.low %v7905_v21, %v7919_v41 }
 0x622   : > { %v7051_v28 = vld [vmem:[#allocation3 + $0x30] sm:$0x2]  ;;  %7076 = vst [vmem:[#allocation4 + $0x28] sm:$0x1] %v7072_v7  ;;  %7077 = vst [vmem:[#allocation4 + $0x64] sm:$0x1] %v7073_v63  ;;  %v7317_v0 = vcombine.low %v15877_v31, %v12575_v1 }
 0x623   : > { %v12583_v12 = vld.sshfl [vmem:[#allocation4 + $0x54] sm:$0x5 pattern:$0x75316420]  ;;  %v7021_v32 = vrot.slane %v7020_v9, 4  ;;  %v7030_v5 = vrot.slane %v7029_v54, 4  ;;  %v7038_v46 = vor.u32 %v7037_v50, %v7034_v53  ;;  %v7951_v43 = vrot.slane %v7928_v58, %v15083_v44 }
 0x624   : > { %v12598_v39 = vld.sshfl [vmem:[#allocation4 + $0xc4] sm:$0x5 pattern:$0x75316420]  ;;  %7068 = vst [vmem:[#allocation4 + $0x24] sm:$0x1] %v12560_v52  ;;  %v7407_v14 = vcombine.low %v12582_v6, %v12583_v12  ;;  %v7937_v57 = vrot.slane %v7927_v45, %v15083_v44  ;;  %v7331_v15 = vrot.slane %v7317_v0, %v15083_v44 }
 0x625   : > { %v12591_v62 = vld.sshfl [vmem:[#allocation4 + $0x90] sm:$0x5 pattern:$0x75316420]  ;;  %7044 = vst [vmem:[#allocation4 + $0x20] sm:$0x1] %v7012_v49  ;;  %8797 = vmatprep.mubr.bf16.mxu1 %v7951_v43  ;;  %v7961_v24 = vcombine.high %v7951_v43, %v7951_v43 }
 0x626   : > { %v12561_v30 = vrot.slane %v7049_v37, 9  ;;  %v12599_v38 = vld.sshfl [vmem:[#allocation4 + $0xcc] sm:$0x5 pattern:$0x75316420]  ;;  %v7497_v19 = vcombine.low %v12590_v20, %v12591_v62  ;;  %v7421_v61 = vrot.slane %v7407_v14, %v15083_v44  ;;  %v7039_v40 = vrot.slane %v7038_v46, 4  ;;  %8798 = vmatmul.mubr.bf16.vlgmr.msra.gmra.mxu1 %v7937_v57 }
 0x627   : > { %7045 = vst [vmem:[#allocation4 + $0x5c] sm:$0x1] %v7021_v32  ;;  %v7074_v31 = vld [vmem:[#allocation3 + $0x30] sm:$0x1]  ;;  %v7587_v47 = vcombine.low %v12598_v39, %v12599_v38  ;;  %7046 = vst [vmem:[#allocation4 + $0x98] sm:$0x1] %v7030_v5  ;;  %v7959_v48 = vcombine.high %v7937_v57, %v7937_v57  ;;  %13537 = vmatpush3.bf16.msra.mxu1 %v14388_v17  ;;  %8837 = vmatprep.mubr.bf16.mxu0 %v7961_v24 }
 0x628   : > { %v12562_v56 = vrot.slane %v7050_v13, 9  ;;  %7069 = vst [vmem:[#allocation4 + $0x60] sm:$0x1] %v12561_v30  ;;  %7078 = vst [vmem:[#allocation4 + $0xa0] sm:$0x1] %v7074_v31  ;;  %v7511_v16 = vrot.slane %v7497_v19, %v15083_v44  ;;  %v14393_v21 = vld [vmem:[#allocation9 + $0x1f0] sm:$0xff]   ;;  %v12606_v23 = vcombine.low %v7331_v15, %v7421_v61  ;;  %13538 = vmatprep.subr.bf16.mxu1 %v14391_v11 }
 0x629   : > { %v7080_v34 = vld [vmem:[#allocation3 + $0x18] sm:$0x4]  ;;  %v7081_v59 = vld [vmem:[#allocation3 + $0x24] sm:$0x4]  ;;  %v12563_v36 = vrot.slane %v7051_v28, 9  ;;  %v7601_v35 = vrot.slane %v7587_v47, %v15083_v44  ;;  %v14392_v2 = vld [vmem:[#allocation9 + $0x130] sm:$0xff]   ;;  %8838 = vmatmul.mubr.bf16.vlgmr.msra.gmra.mxu0 %v7959_v48 }
 0x62a   : > { %v7082_v3 = vld [vmem:[#allocation3 + $0x30] sm:$0x4]  ;;  %v7104_v27 = vld [vmem:[#allocation3 + $0x18] sm:$0x3]  ;;  %7047 = vst [vmem:[#allocation4 + $0xd4] sm:$0x1] %v7039_v40  ;;  %v15892_v53 = vrot.slane %v12606_v23, %v15083_v44  ;;  %13559 = vmatpush3.bf16.msra.mxu0 %v14390_v18 }
 0x62b   : > { %7070 = vst [vmem:[#allocation4 + $0x9c] sm:$0x1] %v12562_v56  ;;  %v12564_v55 = vrot.slane %v7080_v34, 10  ;;  %v12565_v10 = vrot.slane %v7081_v59, 10  ;;  %v7105_v8 = vld [vmem:[#allocation3 + $0x24] sm:$0x3]  ;;  %v12608_v9 = vcombine.low %v7511_v16, %v7601_v35  ;;  %13560 = vmatprep.subr.bf16.mxu0 %v14393_v21  ;;  %13539 = vmatpush3.bf16.msra.mxu1 %v14392_v2 }
 0x62c   : > { %v7106_v60 = vld [vmem:[#allocation3 + $0x30] sm:$0x3]  ;;  %7071 = vst [vmem:[#allocation4 + $0xd8] sm:$0x1] %v12563_v36  ;;  %v12566_v42 = vrot.slane %v7082_v3, 10  ;;  %v7109_v37 = vshrl.u32 %v7104_v27, 16 }
 0x62d   : > { %v7112_v41 = vshll.u32 %v7104_v27, 16  ;;  %v7118_v6 = vshrl.u32 %v7105_v8, 16  ;;  %v14395_v13 = vld [vmem:[#allocation9 + $0x168] sm:$0xff]   ;;  %7100 = vst [vmem:[#allocation4 + $0x2c] sm:$0x1] %v12564_v55  ;;  %v7121_v52 = vshll.u32 %v7105_v8, 16  ;;  %v15895_v54 = vrot.slane %v12608_v9, %v15083_v44 }
 0x62e   : > { %7101 = vst [vmem:[#allocation4 + $0x68] sm:$0x1] %v12565_v10  ;;  %v7127_v7 = vshrl.u32 %v7106_v60, 16  ;;  %v7152_v63 = vld [vmem:[#allocation3 + $0x18] sm:$0xc]  ;;  %v14394_v1 = vld [vmem:[#allocation9 + $0x1b0] sm:$0xff]   ;;  %13540 = vmatprep.subr.bf16.mxu1 %v14395_v13 }
 0x62f   : > { %7102 = vst [vmem:[#allocation4 + $0xa4] sm:$0x1] %v12566_v42  ;;  %v7111_v20 = vrot.slane %v7109_v37, 4  ;;  %v7114_v49 = vrot.slane %v7112_v41, 5  ;;  %v14396_v50 = vld [vmem:[#allocation9 + $0x128] sm:$0xff]   ;;  %v7120_v58 = vrot.slane %v7118_v6, 4  ;;  %v7930_v5 = vcombine.high %v15892_v53, %v15895_v54  ;;  %13561 = vmatpush3.bf16.msra.mxu0 %v14394_v1 }
 0x630   : > { %v14397_v28 = vld [vmem:[#allocation9 + $0x1e8] sm:$0xff]   ;;  %v7123_v45 = vrot.slane %v7121_v52, 5  ;;  %v14399_v12 = vld [vmem:[#allocation9 + $0x160] sm:$0xff]   ;;  %v7129_v32 = vrot.slane %v7127_v7, 4  ;;  %v7130_v62 = vshll.u32 %v7106_v60, 16  ;;  %v7157_v11 = vshrl.u32 %v7152_v63, 16  ;;  %13541 = vmatpush3.bf16.msra.mxu1 %v14396_v50 }
 0x631   : > { %v14398_v17 = vld [vmem:[#allocation9 + $0x1a8] sm:$0xff]   ;;  %v12576_v39 = vld.sshfl [vmem:[#allocation4 + $0x20] sm:$0x5 pattern:$0x75316420]  ;;  %v7115_v0 = vor.u32 %v7114_v49, %v7111_v20  ;;  %v14401_v46 = vld [vmem:[#allocation9 + $0x1e0] sm:$0xff]   ;;  %v7958_v31 = vrot.slane %v7930_v5, %v15083_v44  ;;  %13562 = vmatprep.subr.bf16.mxu0 %v14397_v28  ;;  %13542 = vmatprep.subr.bf16.mxu1 %v14399_v12 }
 0x632   : > { %v7153_v14 = vld [vmem:[#allocation3 + $0x24] sm:$0xc]  ;;  %v12584_v30 = vld.sshfl [vmem:[#allocation4 + $0x5c] sm:$0x5 pattern:$0x75316420]  ;;  %v7124_v43 = vor.u32 %v7123_v45, %v7120_v58 }
 0x633   : > { %v7160_v57 = vshll.u32 %v7152_v63, 16  ;;  %v14400_v38 = vld [vmem:[#allocation9 + $0x120] sm:$0xff]   ;;  %v12592_v15 = vld.sshfl [vmem:[#allocation4 + $0x98] sm:$0x5 pattern:$0x75316420]  ;;  %8877 = vmatprep.mubr.bf16.mxu1 %v7958_v31  ;;  %v7962_v36 = vcombine.high %v7958_v31, %v7958_v31  ;;  %13563 = vmatpush3.bf16.msra.mxu0 %v14398_v17 }
 0x634   : > { %v7116_v19 = vrot.slane %v7115_v0, 4  ;;  %v7132_v18 = vrot.slane %v7130_v62, 5  ;;  %v12600_v61 = vld.sshfl [vmem:[#allocation4 + $0xd4] sm:$0x5 pattern:$0x75316420]  ;;  %13564 = vmatprep.subr.bf16.mxu0 %v14401_v46  ;;  %13543 = vmatpush3.bf16.msra.mxu1 %v14400_v38 }
 0x635   : > { %v7125_v47 = vrot.slane %v7124_v43, 4  ;;  %v7154_v40 = vld [vmem:[#allocation3 + $0x30] sm:$0xc]  ;;  %v7159_v56 = vrot.slane %v7157_v11, 6  ;;  %v7162_v24 = vrot.slane %v7160_v57, 7  ;;  %v7166_v16 = vshrl.u32 %v7153_v14, 16  ;;  %8917 = vmatprep.mubr.bf16.mxu0 %v7962_v36 }
 0x636   : > { %v12577_v34 = vld.sshfl [vmem:[#allocation4 + $0x28] sm:$0x5 pattern:$0x75316420]  ;;  %v7133_v59 = vor.u32 %v7132_v18, %v7129_v32  ;;  %7148 = vst [vmem:[#allocation4 + $0x30] sm:$0x1] %v7116_v19  ;;  %v7631_v23 = vcombine.low %v12600_v61, %v15853_v51 }
 0x637   : > { %v7200_v48 = vld [vmem:[#allocation3 + $0x18] sm:$0x2]  ;;  %v7201_v21 = vld [vmem:[#allocation3 + $0x24] sm:$0x2]  ;;  %v14403_v3 = vld [vmem:[#allocation9 + $0x158] sm:$0xff]   ;;  %v7361_v35 = vcombine.low %v12576_v39, %v12577_v34  ;;  %v7169_v55 = vshll.u32 %v7153_v14, 16  ;;  %v7163_v42 = vor.u32 %v7162_v24, %v7159_v56  ;;  %v7929_v56 = vcombine.low %v15892_v53, %v15895_v54 }
 0x638   : > { %v12585_v27 = vld.sshfl [vmem:[#allocation4 + $0x64] sm:$0x5 pattern:$0x75316420]  ;;  %7149 = vst [vmem:[#allocation4 + $0x6c] sm:$0x1] %v7125_v47  ;;  %13544 = vmatprep.subr.bf16.mxu1 %v14403_v3  ;;  %v7639_v50 = vrot.slane %v7631_v23, %v15083_v44 }
 0x639   : > { %v14402_v10 = vld [vmem:[#allocation9 + $0x1a0] sm:$0xff]   ;;  %v12593_v8 = vld.sshfl [vmem:[#allocation4 + $0xa0] sm:$0x5 pattern:$0x75316420]  ;;  %v7451_v60 = vcombine.low %v12584_v30, %v12585_v27  ;;  %v7134_v2 = vrot.slane %v7133_v59, 4  ;;  %v7369_v41 = vrot.slane %v7361_v35, %v15083_v44 }
 0x63a   : > { %v14405_v37 = vld [vmem:[#allocation9 + $0x1d8] sm:$0xff]   ;;  %v7541_v6 = vcombine.low %v12592_v15, %v12593_v8  ;;  %v7168_v9 = vrot.slane %v7166_v16, 6  ;;  %v7171_v13 = vrot.slane %v7169_v55, 7  ;;  %v7164_v63 = vrot.slane %v7163_v42, 4  ;;  %v14407_v49 = vld [vmem:[#allocation9 + $0x150] sm:$0xff]   ;;  %13565 = vmatpush3.bf16.msra.mxu0 %v14402_v10  ;;  %v14411_v30 = vld [vmem:[#allocation9 + $0x148] sm:$0xff]  }
 0x63b   : > { %v7202_v52 = vld [vmem:[#allocation3 + $0x30] sm:$0x2]  ;;  %v7459_v51 = vrot.slane %v7451_v60, %v15083_v44  ;;  %7150 = vst [vmem:[#allocation4 + $0xa8] sm:$0x1] %v7134_v2  ;;  %v7175_v1 = vshrl.u32 %v7154_v40, 16  ;;  %v7178_v20 = vshll.u32 %v7154_v40, 16  ;;  %13566 = vmatprep.subr.bf16.mxu0 %v14405_v37 }
 0x63c   : > { %v14404_v7 = vld [vmem:[#allocation9 + $0x118] sm:$0xff]   ;;  %v7172_v28 = vor.u32 %v7171_v13, %v7168_v9  ;;  %v12568_v58 = vrot.slane %v7200_v48, 9  ;;  %v12569_v45 = vrot.slane %v7201_v21, 9  ;;  %v7549_v12 = vrot.slane %v7541_v6, %v15083_v44  ;;  %7196 = vst [vmem:[#allocation4 + $0x34] sm:$0x1] %v7164_v63  ;;  %v14409_v62 = vld [vmem:[#allocation9 + $0x1d0] sm:$0xff]  }
 0x63d   : > { %v14406_v17 = vld [vmem:[#allocation9 + $0x198] sm:$0xff]   ;;  %v7177_v39 = vrot.slane %v7175_v1, 6  ;;  %v7180_v0 = vrot.slane %v7178_v20, 7  ;;  %v12570_v32 = vrot.slane %v7202_v52, 9  ;;  %13545 = vmatpush3.bf16.msra.mxu1 %v14404_v7  ;;  %v14408_v11 = vld [vmem:[#allocation9 + $0x110] sm:$0xff]   ;;  %v12609_v5 = vcombine.low %v7369_v41, %v7459_v51  ;;  %v14413_v15 = vld [vmem:[#allocation9 + $0x1c8] sm:$0xff]  }
 0x63e   : > { %v7173_v14 = vrot.slane %v7172_v28, 4  ;;  %7220 = vst [vmem:[#allocation4 + $0x38] sm:$0x1] %v12568_v58  ;;  %7221 = vst [vmem:[#allocation4 + $0x74] sm:$0x1] %v12569_v45  ;;  %13546 = vmatprep.subr.bf16.mxu1 %v14407_v49  ;;  %13567 = vmatpush3.bf16.msra.mxu0 %v14406_v17  ;;  %v14410_v43 = vld [vmem:[#allocation9 + $0x190] sm:$0xff]   ;;  %v12611_v57 = vcombine.low %v7549_v12, %v7639_v50  ;;  %v7944_v48 = vrot.slane %v7929_v56, %v15083_v44 }
 0x63f   : > { %v7181_v46 = vor.u32 %v7180_v0, %v7177_v39  ;;  %7222 = vst [vmem:[#allocation4 + $0xb0] sm:$0x1] %v12570_v32  ;;  %13568 = vmatprep.subr.bf16.mxu0 %v14409_v62  ;;  %v14412_v19 = vld [vmem:[#allocation9 + $0x108] sm:$0xff]   ;;  %v15906_v18 = vrot.slane %v12609_v5, %v15083_v44  ;;  %v14415_v31 = vld [vmem:[#allocation9 + $0x140] sm:$0xff]   ;;  %v14419_v24 = vld [vmem:[#allocation9 + $0x278] sm:$0xff]  }
 0x640   : > { %7197 = vst [vmem:[#allocation4 + $0x70] sm:$0x1] %v7173_v14  ;;  %v14414_v61 = vld [vmem:[#allocation9 + $0x188] sm:$0xff]   ;;  %v15909_v47 = vrot.slane %v12611_v57, %v15083_v44  ;;  %v14417_v40 = vld [vmem:[#allocation9 + $0x1c0] sm:$0xff]   ;;  %v14421_v21 = vld [vmem:[#allocation9 + $0x2f8] sm:$0xff]   ;;  %v7960_v54 = vcombine.high %v7944_v48, %v7944_v48 }
 0x641   : > { %v7182_v38 = vrot.slane %v7181_v46, 4  ;;  %13547 = vmatpush3.bf16.msra.mxu1 %v14408_v11  ;;  %v14416_v34 = vld [vmem:[#allocation9 + $0x100] sm:$0xff]   ;;  %v14420_v36 = vld [vmem:[#allocation9 + $0x238] sm:$0xff]   ;;  %v14423_v27 = vld [vmem:[#allocation9 + $0x270] sm:$0xff]   ;;  %v7646_v11 = vrot.slane %v7632_v25, %v15083_v44 }
 0x642   : > { %13548 = vmatprep.subr.bf16.mxu1 %v14411_v30  ;;  %13569 = vmatpush3.bf16.msra.mxu0 %v14410_v43  ;;  %v7996_v59 = vcombine.high %v15906_v18, %v15909_v47  ;;  %v14418_v16 = vld [vmem:[#allocation9 + $0x180] sm:$0xff]   ;;  %v14422_v53 = vld [vmem:[#allocation9 + $0x2b8] sm:$0xff]   ;;  %v14425_v35 = vld [vmem:[#allocation9 + $0x2f0] sm:$0xff]   ;;  %v7995_v26 = vcombine.low %v15906_v18, %v15909_v47 }
 0x643   : > { %7198 = vst [vmem:[#allocation4 + $0xac] sm:$0x1] %v7182_v38  ;;  %13570 = vmatprep.subr.bf16.mxu0 %v14413_v15  ;;  %v14424_v55 = vld [vmem:[#allocation9 + $0x230] sm:$0xff]   ;;  %v14427_v10 = vld [vmem:[#allocation9 + $0x268] sm:$0xff]   ;;  %v14431_v42 = vld [vmem:[#allocation9 + $0x260] sm:$0xff]  }
 0x644   : > { %v8019_v3 = vrot.slane %v7996_v59, %v15083_v44  ;;  %v14426_v8 = vld [vmem:[#allocation9 + $0x2b0] sm:$0xff]   ;;  %v14429_v60 = vld [vmem:[#allocation9 + $0x2e8] sm:$0xff]   ;;  %v12578_v41 = vld.sshfl [vmem:[#allocation4 + $0x30] sm:$0x5 pattern:$0x75316420]  ;;  %v8005_v59 = vrot.slane %v7995_v26, %v15083_v44 }
 0x645   : > { %13549 = vmatpush3.bf16.msra.mxu1 %v14412_v19  ;;  %v14428_v2 = vld [vmem:[#allocation9 + $0x228] sm:$0xff]   ;;  %v14433_v6 = vld [vmem:[#allocation9 + $0x2e0] sm:$0xff]   ;;  %v14435_v7 = vld [vmem:[#allocation9 + $0x258] sm:$0xff]  }
 0x646   : > { %13550 = vmatprep.subr.bf16.mxu1 %v14415_v31  ;;  %13571 = vmatpush3.bf16.msra.mxu0 %v14414_v61  ;;  %v8029_v23 = vcombine.high %v8019_v3, %v8019_v3  ;;  %v14430_v37 = vld [vmem:[#allocation9 + $0x2a8] sm:$0xff]   ;;  %v14432_v13 = vld [vmem:[#allocation9 + $0x220] sm:$0xff]   ;;  %v14437_v49 = vld [vmem:[#allocation9 + $0x2d8] sm:$0xff]  }
 0x647   : > { %13572 = vmatprep.subr.bf16.mxu0 %v14417_v40  ;;  %v12579_v9 = vld.sshfl [vmem:[#allocation4 + $0x38] sm:$0x1 pattern:$0x75316420]  ;;  %v14434_v63 = vld [vmem:[#allocation9 + $0x2a0] sm:$0xff]   ;;  %v14436_v28 = vld [vmem:[#allocation9 + $0x218] sm:$0xff]  }
 0x648   : > { %v12586_v52 = vld.sshfl [vmem:[#allocation4 + $0x6c] sm:$0x5 pattern:$0x75316420]  ;;  %v7362_v20 = vcombine.low %v12578_v41, %v12579_v9  ;;  %v14439_v17 = vld [vmem:[#allocation9 + $0x250] sm:$0xff]   ;;  %v14443_v5 = vld [vmem:[#allocation9 + $0x248] sm:$0xff]  }
 0x649   : > { %13551 = vmatpush3.bf16.msra.mxu1 %v14416_v34  ;;  %v12587_v1 = vld.sshfl [vmem:[#allocation4 + $0x74] sm:$0x1 pattern:$0x75316420]  ;;  %v14438_v12 = vld [vmem:[#allocation9 + $0x298] sm:$0xff]   ;;  %v14441_v0 = vld [vmem:[#allocation9 + $0x2d0] sm:$0xff]  }
 0x64a   : > { %13580 = vmatprep.subr.bf16.mxu1 %v14419_v24  ;;  %13573 = vmatpush3.bf16.msra.mxu0 %v14418_v16  ;;  %v12594_v51 = vld.sshfl [vmem:[#allocation4 + $0xa8] sm:$0x5 pattern:$0x75316420]  ;;  %v7452_v58 = vcombine.low %v12586_v52, %v12587_v1  ;;  %v7376_v39 = vrot.slane %v7362_v20, %v15083_v44  ;;  %v14440_v32 = vld [vmem:[#allocation9 + $0x210] sm:$0xff]   ;;  %v14445_v43 = vld [vmem:[#allocation9 + $0x2c8] sm:$0xff]  }
 0x64b   : > { %13602 = vmatprep.subr.bf16.mxu0 %v14421_v21  ;;  %v12595_v50 = vld.sshfl [vmem:[#allocation4 + $0xb0] sm:$0x1 pattern:$0x75316420]  ;;  %v14442_v46 = vld [vmem:[#allocation9 + $0x290] sm:$0xff]   ;;  %v14444_v57 = vld [vmem:[#allocation9 + $0x208] sm:$0xff]  }
 0x64c   : > { %8878 = vmatmul.mubr.bf16.vlgmr.msra.gmra.mxu1 %v7944_v48  ;;  %v7542_v45 = vcombine.low %v12594_v51, %v12595_v50  ;;  %v7466_v62 = vrot.slane %v7452_v58, %v15083_v44  ;;  %v14447_v15 = vld [vmem:[#allocation9 + $0x240] sm:$0xff]   ;;  %v14446_v19 = vld [vmem:[#allocation9 + $0x288] sm:$0xff]   ;;  %v14451_v40 = vld [vmem:[#allocation9 + $0x378] sm:$0xff]   ;;  %v8027_v48 = vcombine.high %v8005_v59, %v8005_v59 }
 0x64d   : > { %13581 = vmatpush3.bf16.msra.mxu1 %v14420_v36  ;;  %8957 = vmatprep.mubr.bf16.mxu1 %v8019_v3  ;;  %v14448_v25 = vld [vmem:[#allocation9 + $0x200] sm:$0xff]   ;;  %v14452_v24 = vld [vmem:[#allocation9 + $0x338] sm:$0xff]   ;;  %v14454_v16 = vld [vmem:[#allocation9 + $0x370] sm:$0xff]  }
 0x64e   : > { %8918 = vmatmul.mubr.bf16.vlgmr.msra.gmra.mxu0 %v7960_v54  ;;  %13582 = vmatprep.subr.bf16.mxu1 %v14423_v27  ;;  %v7556_v14 = vrot.slane %v7542_v45, %v15083_v44  ;;  %v12610_v30 = vcombine.low %v7376_v39, %v7466_v62  ;;  %v14450_v56 = vld [vmem:[#allocation9 + $0x280] sm:$0xff]   ;;  %v14453_v47 = vld [vmem:[#allocation9 + $0x3b8] sm:$0xff]   ;;  %v14455_v21 = vld [vmem:[#allocation9 + $0x330] sm:$0xff]  }
 0x64f   : > { %13603 = vmatpush3.bf16.msra.mxu0 %v14422_v53  ;;  %8997 = vmatprep.mubr.bf16.mxu0 %v8029_v23  ;;  %v14457_v36 = vld [vmem:[#allocation9 + $0x368] sm:$0xff]   ;;  %v14456_v3 = vld [vmem:[#allocation9 + $0x3b0] sm:$0xff]   ;;  %v14460_v53 = vld [vmem:[#allocation9 + $0x360] sm:$0xff]  }
 0x650   : > { %13604 = vmatprep.subr.bf16.mxu0 %v14425_v35  ;;  %v12612_v38 = vcombine.low %v7556_v14, %v7646_v11  ;;  %v15925_v31 = vrot.slane %v12610_v30, %v15083_v44  ;;  %v14458_v27 = vld [vmem:[#allocation9 + $0x328] sm:$0xff]   ;;  %v14461_v35 = vld [vmem:[#allocation9 + $0x320] sm:$0xff]   ;;  %v14463_v23 = vld [vmem:[#allocation9 + $0x358] sm:$0xff]  }
 0x651   : > { %13583 = vmatpush3.bf16.msra.mxu1 %v14424_v55  ;;  %v14459_v54 = vld [vmem:[#allocation9 + $0x3a8] sm:$0xff]   ;;  %v14462_v55 = vld [vmem:[#allocation9 + $0x3a0] sm:$0xff]   ;;  %v12604_v20 = vld [vmem:[%s16828_s9] ss:$0 sm:$0xff] }
 0x652   : > { %13584 = vmatprep.subr.bf16.mxu1 %v14427_v10  ;;  %v15930_v61 = vrot.slane %v12612_v38, %v15083_v44  ;;  %v14464_v10 = vld [vmem:[#allocation9 + $0x318] sm:$0xff]   ;;  %v14470_v41 = vld [vmem:[#allocation9 + $0x308] sm:$0xff]   ;;  %v14473_v52 = vld [vmem:[#allocation9 + $0x300] sm:$0xff]  }
 0x653   : > { %13605 = vmatpush3.bf16.msra.mxu0 %v14426_v8  ;;  %v14466_v8 = vld [vmem:[#allocation9 + $0x350] sm:$0xff]   ;;  %v14471_v9 = vld [vmem:[#allocation9 + $0x388] sm:$0xff]  }
 0x654   : > { %13606 = vmatprep.subr.bf16.mxu0 %v14429_v60  ;;  %v7998_v34 = vcombine.high %v15925_v31, %v15930_v61  ;;  %v14465_v60 = vld [vmem:[#allocation9 + $0x398] sm:$0xff]  }
 0x655   : > { %13585 = vmatpush3.bf16.msra.mxu1 %v14428_v2  ;;  %v14467_v2 = vld [vmem:[#allocation9 + $0x310] sm:$0xff]  }
 0x656   : > { %13586 = vmatprep.subr.bf16.mxu1 %v14431_v42  ;;  %v8026_v18 = vrot.slane %v7998_v34, %v15083_v44  ;;  %v14469_v42 = vld [vmem:[#allocation9 + $0x348] sm:$0xff]  }
 0x657   : > { %13607 = vmatpush3.bf16.msra.mxu0 %v14430_v37  ;;  %v14468_v37 = vld [vmem:[#allocation9 + $0x390] sm:$0xff]  }
 0x658   : > { %13608 = vmatprep.subr.bf16.mxu0 %v14433_v6  ;;  %v14472_v6 = vld [vmem:[#allocation9 + $0x340] sm:$0xff]  }
 0x659   : > { %13587 = vmatpush3.bf16.msra.mxu1 %v14432_v13  ;;  %v7997_v13 = vcombine.low %v15925_v31, %v15930_v61 }
 0x65a   : > { %13588 = vmatprep.subr.bf16.mxu1 %v14435_v7  ;;  %v14474_v7 = vld [vmem:[#allocation9 + $0x380] sm:$0xff]  }
 0x65b   : > { %13609 = vmatpush3.bf16.msra.mxu0 %v14434_v63  ;;  %v8012_v51 = vrot.slane %v7997_v13, %v15083_v44  ;;  %v14476_v44 = vld [vmem:[%s16829_s10] sm:$0xff]  }
 0x65c   : > { %13610 = vmatprep.subr.bf16.mxu0 %v14437_v49 }
 0x65d   : > { %13589 = vmatpush3.bf16.msra.mxu1 %v14436_v28  ;;  %v8028_v63 = vcombine.high %v8012_v51, %v8012_v51 }
 0x65e   : > { %13590 = vmatprep.subr.bf16.mxu1 %v14439_v17 }
 0x65f   : > { %13611 = vmatpush3.bf16.msra.mxu0 %v14438_v12 }
 0x660   : > { %13612 = vmatprep.subr.bf16.mxu0 %v14441_v0 }
 0x661   : > { %13591 = vmatpush3.bf16.msra.mxu1 %v14440_v32 }
 0x662   : > { %13592 = vmatprep.subr.bf16.mxu1 %v14443_v5 }
 0x663   : > { %13613 = vmatpush3.bf16.msra.mxu0 %v14442_v46 }
 0x664   : > { %13614 = vmatprep.subr.bf16.mxu0 %v14445_v43 }
 0x665   : > { %13593 = vmatpush3.bf16.msra.mxu1 %v14444_v57 }
 0x666   : > { %13594 = vmatprep.subr.bf16.mxu1 %v14447_v15 }
 0x667   : > { %13615 = vmatpush3.bf16.msra.mxu0 %v14446_v19 }
 0x668   : > { %13616 = vmatprep.subr.bf16.mxu0 %v14449_v29 }
 0x669   : > { %13595 = vmatpush3.bf16.msra.mxu1 %v14448_v25 }
 0x66a   : > { %13624 = vmatprep.subr.bf16.mxu1 %v14451_v40 }
 0x66b   : > { %13617 = vmatpush3.bf16.msra.mxu0 %v14450_v56 }
 0x66c   : > { %8958 = vmatmul.mubr.bf16.vlgmr.msra.gmra.mxu1 %v8005_v59  ;;  %13961 = vmatprep.subr.bf16.mxu0 %v14816_v33 }
 0x66d   : > { %13625 = vmatpush3.bf16.msra.mxu1 %v14452_v24  ;;  %9037 = vmatprep.mubr.bf16.mxu1 %v8026_v18 }
 0x66e   : > { %8998 = vmatmul.mubr.bf16.vlgmr.msra.gmra.mxu0 %v8027_v48  ;;  %13626 = vmatprep.subr.bf16.mxu1 %v14454_v16 }
 0x66f   : > { %13962 = vmatpush3.bf16.msra.mxu0 %v14453_v47  ;;  %13977 = vmatprep.mubr.msk.bf16.mxu0 %vm14817_vm9, %v14816_v33 }
 0x670   : > { %13963 = vmatprep.subr.bf16.mxu0 %v14816_v33 }
 0x671   : > { %13627 = vmatpush3.bf16.msra.mxu1 %v14455_v21 }
 0x672   : > { %13628 = vmatprep.subr.bf16.mxu1 %v14457_v36 }
 0x673   : > { %13964 = vmatpush3.bf16.msra.mxu0 %v14456_v3 }
 0x674   : > { %13965 = vmatprep.subr.bf16.mxu0 %v14816_v33 }
 0x675   : > { %13629 = vmatpush3.bf16.msra.mxu1 %v14458_v27 }
 0x676   : > { %13630 = vmatprep.subr.bf16.mxu1 %v14460_v53 }
 0x677   : > { %13966 = vmatpush3.bf16.msra.mxu0 %v14459_v54 }
 0x678   : > { %13967 = vmatprep.subr.bf16.mxu0 %v14816_v33 }
 0x679   : > { %13631 = vmatpush3.bf16.msra.mxu1 %v14461_v35 }
 0x67a   : > { %13632 = vmatprep.subr.bf16.mxu1 %v14463_v23 }
 0x67b   : > { %13968 = vmatpush3.bf16.msra.mxu0 %v14462_v55 }
 0x67c   : > { %13969 = vmatprep.subr.bf16.mxu0 %v14816_v33 }
 0x67d   : > { %13633 = vmatpush3.bf16.msra.mxu1 %v14464_v10 }
 0x67e   : > { %13634 = vmatprep.subr.bf16.mxu1 %v14466_v8 }
 0x67f   : > { %13970 = vmatpush3.bf16.msra.mxu0 %v14465_v60 }
 0x680   : > { %13971 = vmatprep.subr.bf16.mxu0 %v14816_v33 }
 0x681   : > { %13635 = vmatpush3.bf16.msra.mxu1 %v14467_v2 }
 0x682   : > { %13636 = vmatprep.subr.bf16.mxu1 %v14469_v42 }
 0x683   : > { %13972 = vmatpush3.bf16.msra.mxu0 %v14468_v37 }
 0x684   : > { %13973 = vmatprep.subr.bf16.mxu0 %v14816_v33 }
 0x685   : > { %13637 = vmatpush3.bf16.msra.mxu1 %v14470_v41 }
 0x686   : > { %13638 = vmatprep.subr.bf16.mxu1 %v14472_v6 }
 0x687   : > { %13974 = vmatpush3.bf16.msra.mxu0 %v14471_v9 }
 0x688   : > { %13975 = vmatprep.subr.bf16.mxu0 %v14816_v33 }
 0x689   : > { %13639 = vmatpush3.bf16.msra.mxu1 %v14473_v52  ;;  %v9101_v52 = vld [vmem:[#allocation2] sm:$0xf] }
 0x68b   : > { %13976 = vmatpush3.bf16.msra.mxu0 %v14474_v7  ;;  %v9104_v7 = vld [vmem:[#allocation2 + $0x4] sm:$0x1] }
 0x68c   : > { %9038 = vmatmul.mubr.bf16.vlgmr.msra.gmra.mxu1 %v8012_v51  ;;  %13658 = vmatprep.subr.bf16.mxu0 %v14478_v22 }
 0x68d   : > { %13983 = vmatprep.mubr.msk.bf16.mxu1 %vm9135_vm13, %v14476_v44  ;;  %v14484_v44 = vld [vmem:[%s16830_s11 + $0xf0] sm:$0xff]  }
 0x68e   : > { %13978 = vmatmul.mubr.bf16.vlgmr.msra.gmra.mxu0 %v8028_v63 }
 0x6e6   : > { %v13508_v1 = vpop.f32.mrf.mxu1 }
 0x6e8   : > { %v13509_v49 = vpop.f32.mrf.mxu1 }
 0x6e9   : > { %v13530_v50 = vpop.f32.mrf.mxu0  ;;  %v13510_v28 = vadd.f32 %v13509_v49, %v13508_v1 }
 0x6ea   : > { %v13511_v58 = vpop.f32.mrf.mxu1 }
 0x6eb   : > { %v13531_v45 = vpop.f32.mrf.mxu0  ;;  %v8800_v17 = vadd.f32 %v13510_v28, %v12604_v20 }
 0x6ec   : > { %v13532_v12 = vadd.f32 %v13531_v45, %v13530_v50  ;;  %v13512_v39 = vpop.f32.mrf.mxu1  ;;  %v14477_v45 = vld [vmem:[%s16829_s10 + $0x8] sm:$0xff]  }
 0x6ed   : > { %v13533_v0 = vpop.f32.mrf.mxu0  ;;  %v14481_v39 = vld [vmem:[%s16830_s11 + $0xb8] sm:$0xff]  }
 0x6ee   : > { %v8840_v32 = vadd.f32 %v13532_v12, %v8800_v17  ;;  %v14479_v17 = vld [vmem:[%s16830_s11 + $0x38] sm:$0xff]   ;;  %v14482_v0 = vld [vmem:[%s16830_s11 + $0x70] sm:$0xff]  }
 0x6ef   : > { %v13534_v62 = vpop.f32.mrf.mxu0  ;;  %v14480_v12 = vld [vmem:[%s16830_s11 + $0xf8] sm:$0xff]   ;;  %13659 = vmatpush3.bf16.msra.mxu0 %v14479_v17 }
 0x6f0   : > { %v14485_v62 = vld [vmem:[%s16830_s11 + $0xb0] sm:$0xff]   ;;  %13660 = vmatprep.subr.bf16.mxu0 %v14482_v0  ;;  %v9250_v0 = vld [vmem:[#allocation4 + $0x40] sm:$0x1] }
 0x70c   : > { %v13552_v14 = vpop.f32.mrf.mxu1 }
 0x70e   : > { %v13553_v11 = vpop.f32.mrf.mxu1  ;;  %v13574_v5 = vpop.f32.mrf.mxu0 }
 0x70f   : > { %v13554_v56 = vadd.f32 %v13553_v11, %v13552_v14  ;;  %v14486_v14 = vld [vmem:[%s16830_s11 + $0x68] sm:$0xff]  }
 0x710   : > { %v13555_v46 = vpop.f32.mrf.mxu1  ;;  %v13575_v30 = vpop.f32.mrf.mxu0  ;;  %v14488_v11 = vld [vmem:[%s16830_s11 + $0xe8] sm:$0xff]  }
 0x711   : > { %v8880_v34 = vadd.f32 %v13554_v56, %v8840_v32  ;;  %v13576_v59 = vadd.f32 %v13575_v30, %v13574_v5  ;;  %v14483_v32 = vld [vmem:[%s16830_s11 + $0x30] sm:$0xff]   ;;  %v14487_v5 = vld [vmem:[%s16830_s11 + $0x28] sm:$0xff]   ;;  %v14490_v30 = vld [vmem:[%s16830_s11 + $0x60] sm:$0xff]  }
 0x712   : > { %v13556_v43 = vpop.f32.mrf.mxu1  ;;  %v13577_v57 = vpop.f32.mrf.mxu0  ;;  %13661 = vmatpush3.bf16.msra.mxu0 %v14483_v32  ;;  %v14489_v46 = vld [vmem:[%s16830_s11 + $0xa8] sm:$0xff]  }
 0x713   : > { %v8920_v16 = vadd.f32 %v13576_v59, %v8880_v34  ;;  %13662 = vmatprep.subr.bf16.mxu0 %v14486_v14  ;;  %v14492_v43 = vld [vmem:[%s16830_s11 + $0xe0] sm:$0xff]   ;;  %v14502_v56 = vld [vmem:[%s16830_s11 + $0x48] sm:$0xff]  }
 0x714   : > { %v13578_v38 = vpop.f32.mrf.mxu0  ;;  %v14491_v57 = vld [vmem:[%s16830_s11 + $0x20] sm:$0xff]   ;;  %v14504_v34 = vld [vmem:[%s16830_s11 + $0xc8] sm:$0xff]  }
 0x715   : > { %v14493_v38 = vld [vmem:[%s16830_s11 + $0xa0] sm:$0xff]   ;;  %v14503_v59 = vld [vmem:[%s16830_s11 + $0x8] sm:$0xff]  }
 0x716   : > { %13663 = vmatpush3.bf16.msra.mxu0 %v14487_v5 }
 0x717   : > { %13664 = vmatprep.subr.bf16.mxu0 %v14490_v30 }
 0x71a   : > { %13665 = vmatpush3.bf16.msra.mxu0 %v14491_v57 }
 0x72c   : > { %v13596_v15 = vpop.f32.mrf.mxu1 }
 0x72e   : > { %v13597_v19 = vpop.f32.mrf.mxu1  ;;  %v13618_v31 = vpop.f32.mrf.mxu0 }
 0x72f   : > { %v13598_v24 = vadd.f32 %v13597_v19, %v13596_v15  ;;  %v14494_v15 = vld [vmem:[%s16830_s11 + $0x58] sm:$0xff]  }
 0x730   : > { %v13599_v29 = vpop.f32.mrf.mxu1  ;;  %v13619_v26 = vpop.f32.mrf.mxu0  ;;  %v14496_v19 = vld [vmem:[%s16830_s11 + $0xd8] sm:$0xff]   ;;  %13666 = vmatprep.subr.bf16.mxu0 %v14494_v15 }
 0x731   : > { %v8960_v18 = vadd.f32 %v13598_v24, %v8920_v16  ;;  %v13620_v47 = vadd.f32 %v13619_v26, %v13618_v31  ;;  %v14495_v31 = vld [vmem:[%s16830_s11 + $0x18] sm:$0xff]   ;;  %v14498_v26 = vld [vmem:[%s16830_s11 + $0x50] sm:$0xff]   ;;  %v14505_v24 = vld [vmem:[%s16830_s11 + $0x88] sm:$0xff]  }
 0x732   : > { %v13600_v25 = vpop.f32.mrf.mxu1  ;;  %v13621_v61 = vpop.f32.mrf.mxu0  ;;  %v14497_v29 = vld [vmem:[%s16830_s11 + $0x98] sm:$0xff]   ;;  %13667 = vmatpush3.bf16.msra.mxu0 %v14495_v31  ;;  %v14506_v16 = vld [vmem:[%s16830_s11 + $0x40] sm:$0xff]  }
 0x733   : > { %v9000_v3 = vadd.f32 %v13620_v47, %v8960_v18  ;;  %v14500_v25 = vld [vmem:[%s16830_s11 + $0xd0] sm:$0xff]   ;;  %13668 = vmatprep.subr.bf16.mxu0 %v14498_v26  ;;  %v14508_v18 = vld [vmem:[%s16830_s11 + $0xc0] sm:$0xff]   ;;  %v9290_v15 = vld [vmem:[#allocation4 + $0x44] sm:$0x1] }
 0x734   : > { %v13622_v40 = vpop.f32.mrf.mxu0  ;;  %v14499_v61 = vld [vmem:[%s16830_s11 + $0x10] sm:$0xff]   ;;  %v14507_v47 = vld [vmem:[%s16830_s11] sm:$0xff]   ;;  %v9293_v26 = vld [vmem:[#allocation4 + $0x80] sm:$0x1] }
 0x735   : > { %v14501_v40 = vld [vmem:[%s16830_s11 + $0x90] sm:$0xff]  }
 0x736   : > { %13669 = vmatpush3.bf16.msra.mxu0 %v14499_v61 }
 0x737   : > { %13670 = vmatprep.subr.bf16.mxu0 %v14502_v56 }
 0x73a   : > { %13671 = vmatpush3.bf16.msra.mxu0 %v14503_v59 }
 0x73b   : > { %13672 = vmatprep.subr.bf16.mxu0 %v14506_v16 }
 0x73e   : > { %13673 = vmatpush3.bf16.msra.mxu0 %v14507_v47  ;;  %v9375_v47 = vld [vmem:[#allocation4 + $0x14] sm:$0x1] }
 0x74c   : > { %v13640_v48 = vpop.f32.mrf.mxu1 }
 0x74e   : > { %v13641_v21 = vpop.f32.mrf.mxu1  ;;  %v9079_v36 = vpop.f32.mrf.mxu0 }
 0x74f   : > { %v13642_v27 = vadd.f32 %v13641_v21, %v13640_v48  ;;  %v14509_v48 = vld [vmem:[%s16830_s11 + $0x80] sm:$0xff]   ;;  %v14518_v21 = vld [vmem:[%s16830_s11 + $0x178] sm:$0xff]  }
 0x750   : > { %v13643_v53 = vpop.f32.mrf.mxu1  ;;  %v13979_v54 = vpop.f32.mrf.mxu0  ;;  %13702 = vmatprep.subr.bf16.mxu0 %v14518_v21 }
 0x751   : > { %v9040_v35 = vadd.f32 %v13642_v27, %v9000_v3 }
 0x752   : > { %v13644_v23 = vpop.f32.mrf.mxu1  ;;  %v9082_v55 = vpop.f32.mrf.mxu0 }
 0x753   : > { %v9080_v10 = vadd.f32 %v9079_v36, %v9040_v35  ;;  %v14536_v36 = vld [vmem:[%s16830_s11 + $0x1f8] sm:$0xff]  }
 0x754   : > { %v13980_v8 = vpop.f32.mrf.mxu0 }
 0x755   : > { %v9085_v60 = vmul.f32 0.2, %v9080_v10  ;;  %v9691_v8 = vld [vmem:[#allocation4] sm:$0x11] }
 0x757   : > { %v9086_v2 = vmax.f32 %v9080_v10, %v9085_v60  ;;  %v9692_v60 = vld [vmem:[#allocation4 + $0x8] sm:$0x11] }
 0x759   : > { %v13061_v42 = vpack.c.bf16 %v9086_v2, %v9086_v2  ;;  %v12790_v2 = vcombine.low %v9691_v8, %v9691_v8 }
 0x75b   : > { %v9092_v37 = vshrl.u32 %v13061_v42, 16  ;;  %v9095_v6 = vshll.u32 %v13061_v42, 16  ;;  %v12791_v42 = vcombine.high %v9691_v8, %v9691_v8 }
 0x75d   : > { %v9094_v41 = vrot.slane %v9092_v37, 7  ;;  %v12792_v37 = vcombine.low %v9692_v60, %v9692_v60 }
 0x75f   : > { %v9097_v9 = vor.u32 %v9095_v6, %v9094_v41  ;;  %v9098_v13 = vrot.slane %v9094_v41, 4  ;;  %v12793_v41 = vcombine.high %v9692_v60, %v9692_v60  ;;  %v9224_v6 = vld [vmem:[#allocation4 + $0xb4] sm:$0x1]  ;;  %v16078_v32 = vunpack.c.l.b16 %v12792_v37  ;;  %v9365_v37 = vld [vmem:[#allocation4 + $0x88] sm:$0x1] }
 0x761   : > { %v9102_v51 = vsel %vm15684_vm15, %v9097_v9, %v9101_v52  ;;  %v9105_v63 = vsel %vm15826_vm12, %v9098_v13, %v9104_v7  ;;  %v16068_v9 = vld [vmem:[#allocation4 + $0xdc] sm:$0x11]  ;;  %v9221_v7 = vld [vmem:[#allocation4 + $0x78] sm:$0x1]  ;;  %vm10189_vm15 = vcmask 1043459  }
 0x762   : > { %9103 = vst [vmem:[#allocation2] sm:$0xf] %v9102_v51  ;;  %9106 = vst [vmem:[#allocation2 + $0x4] sm:$0x1] %v9105_v63  ;;  %v9218_v52 = vld [vmem:[#allocation4 + $0x3c] sm:$0x1]  ;;  %v12845_v14 = vcombine.low %v16068_v9, %v16068_v9 }
 0x763   : > { %v9256_v63 = vld [vmem:[#allocation4 + $0xb8] sm:$0x1] }
 0x769   : > { %v14475_v1 = vld [vmem:[#allocation2] sm:$0x1f]  }
 0x76a   : > { %v9131_v20 = vshll.u32 %v14475_v1, 16  ;;  %v9129_v49 = vshrl.u32 %v14475_v1, 16 }
 0x76c   : > { %v9133_v50 = vrot.slane %v9131_v20, 1 }
 0x76e   : > { %v9134_v28 = vor.u32 %v9133_v50, %v9129_v49  ;;  %v16072_v50 = vunpack.c.l.b16 %v12790_v2  ;;  %v9333_v2 = vld [vmem:[#allocation4 + $0x84] sm:$0x1] }
 0x770   : > { %14048 = vmatprep.subr.msk.bf16.mxu1 %vm841_vm3, %v9134_v28  ;;  %v9144_v58 = vsel %vm841_vm3, %v9134_v28, 0  ;;  %vm10183_vm3 = vcmask 1041409  }
 0x771   : > { %13982 = vmatpush3.bf16.msra.mxu1 %v9144_v58  ;;  %v9296_v58 = vld [vmem:[#allocation4 + $0xbc] sm:$0x1] }
 0x772   : > { %13680 = vmatprep.subr.bf16.mxu1 %v14480_v12 }
 0x774   : > { %13984 = vmatmul.mubr.msk.bf16.vlgmr.msra.gmra.mxu1 %vm9135_vm13, %v14477_v45 }
 0x775   : > { %13681 = vmatpush3.bf16.msra.mxu1 %v14481_v39 }
 0x776   : > { %13682 = vmatprep.subr.bf16.mxu1 %v14484_v44  ;;  %v16076_v44 = vunpack.c.l.b16 %v12791_v42 }
 0x779   : > { %13683 = vmatpush3.bf16.msra.mxu1 %v14485_v62  ;;  %v16080_v62 = vunpack.c.l.b16 %v12793_v41 }
 0x77a   : > { %13684 = vmatprep.subr.bf16.mxu1 %v14488_v11 }
 0x77d   : > { %13685 = vmatpush3.bf16.msra.mxu1 %v14489_v46 }
 0x77e   : > { %13686 = vmatprep.subr.bf16.mxu1 %v14492_v43  ;;  %v9253_v43 = vld [vmem:[#allocation4 + $0x7c] sm:$0x1] }
 0x781   : > { %13687 = vmatpush3.bf16.msra.mxu1 %v14493_v38 }
 0x782   : > { %13688 = vmatprep.subr.bf16.mxu1 %v14496_v19 }
 0x785   : > { %13689 = vmatpush3.bf16.msra.mxu1 %v14497_v29 }
 0x786   : > { %13690 = vmatprep.subr.bf16.mxu1 %v14500_v25 }
 0x789   : > { %13691 = vmatpush3.bf16.msra.mxu1 %v14501_v40  ;;  %v12846_v40 = vcombine.high %v16068_v9, %v16068_v9 }
 0x78a   : > { %13692 = vmatprep.subr.bf16.mxu1 %v14504_v34 }
 0x78d   : > { %13693 = vmatpush3.bf16.msra.mxu1 %v14505_v24 }
 0x78e   : > { %13694 = vmatprep.subr.bf16.mxu1 %v14508_v18  ;;  %v9368_v18 = vld [vmem:[#allocation4 + $0xc4] sm:$0x1] }
 0x791   : > { %13695 = vmatpush3.bf16.msra.mxu1 %v14509_v48 }
 0x792   : > { %13724 = vmatprep.subr.bf16.mxu1 %v14536_v36 }
 0x834   : > { %v13985_v3 = vpop.f32.mrf.mxu1 }
 0x836   : > { %v9180_v27 = vpop.f32.mrf.mxu1 }
 0x838   : > { %v13986_v53 = vpop.f32.mrf.mxu1 }
 0x839   : > { %v9196_v54 = vpack.c.bf16 %v13986_v53, %v13985_v3  ;;  %v13063_v35 = vpack.c.bf16 %v13986_v53, %v13986_v53  ;;  %v9330_v3 = vld [vmem:[#allocation4 + $0x48] sm:$0x1] }
 0x83a   : > { %v9183_v23 = vpop.f32.mrf.mxu1 }
 0x83b   : > { %9205 = vst [vmem:[#allocation3 + $0x24] sm:$0xf] %v9196_v54  ;;  %9210 = vst [vmem:[#allocation3 + $0x30] sm:$0xf] %v13063_v35  ;;  %v9195_v55 = vpack.c.bf16 %v9183_v23, %v9180_v27  ;;  %v13062_v10 = vpack.c.bf16 %v9183_v23, %v9183_v23  ;;  %v9336_v27 = vld [vmem:[#allocation4 + $0xc0] sm:$0x1] }
 0x83c   : > { %v9362_v23 = vld [vmem:[#allocation4 + $0x4c] sm:$0x1] }
 0x83d   : > { %9199 = vst [vmem:[#allocation3 + $0xc] sm:$0xf] %v9195_v55  ;;  %9204 = vst [vmem:[#allocation3 + $0x18] sm:$0xf] %v13062_v10  ;;  %v9378_v55 = vld [vmem:[#allocation4 + $0x50] sm:$0x1] }
 0x842   : > { %v9214_v13 = vld [vmem:[#allocation3 + $0x24] sm:$0x1]  ;;  %v9230_v51 = vld [vmem:[#allocation3 + $0x24] sm:$0x4]  ;;  %v16074_v22 = vld [vmem:[#allocation3 + $0x24] sm:$0x2] }
 0x843   : > { %v9262_v1 = vld [vmem:[#allocation3 + $0x24] sm:$0x1]  ;;  %v9225_v20 = vsel %vm15826_vm12, %v9214_v13, %v9224_v6  ;;  %v12744_v49 = vrot.slane %v9230_v51, 10  ;;  %v9302_v45 = vld [vmem:[#allocation3 + $0x24] sm:$0x4]  ;;  %v12756_v35 = vrot.slane %v16074_v22, 9 }
 0x844   : > { %v9279_v28 = vshrl.u32 %v9262_v1, 16  ;;  %v9212_v17 = vld [vmem:[#allocation3 + $0xc] sm:$0x1]  ;;  %v9213_v12 = vld [vmem:[#allocation3 + $0x18] sm:$0x1]  ;;  %v9319_v16 = vshrl.u32 %v9302_v45, 16 }
 0x845   : > { %9226 = vst [vmem:[#allocation4 + $0xb4] sm:$0x1] %v9225_v20  ;;  %v9228_v39 = vld [vmem:[#allocation3 + $0xc] sm:$0x4]  ;;  %v9219_v11 = vsel %vm15826_vm12, %v9212_v17, %v9218_v52  ;;  %v9222_v5 = vsel %vm15826_vm12, %v9213_v12, %v9221_v7  ;;  %v9229_v46 = vld [vmem:[#allocation3 + $0x18] sm:$0x4]  ;;  %v9257_v57 = vsel %vm15826_vm12, %v12744_v49, %v9256_v63  ;;  %v9369_v51 = vsel %vm15826_vm12, %v12756_v35, %v9368_v18 }
 0x846   : > { %v12742_v30 = vrot.slane %v9228_v39, 10  ;;  %v9260_v38 = vld [vmem:[#allocation3 + $0xc] sm:$0x1]  ;;  %9220 = vst [vmem:[#allocation4 + $0x3c] sm:$0x1] %v9219_v11  ;;  %v12743_v19 = vrot.slane %v9229_v46, 10  ;;  %v9297_v25 = vsel %vm15826_vm12, %v9279_v28, %v9296_v58 }
 0x847   : > { %9223 = vst [vmem:[#allocation4 + $0x78] sm:$0x1] %v9222_v5  ;;  %9258 = vst [vmem:[#allocation4 + $0xb8] sm:$0x1] %v9257_v57  ;;  %v9261_v31 = vld [vmem:[#allocation3 + $0x18] sm:$0x1] }
 0x848   : > { %v9269_v29 = vshrl.u32 %v9260_v38, 16  ;;  %v9300_v61 = vld [vmem:[#allocation3 + $0xc] sm:$0x4]  ;;  %v9251_v56 = vsel %vm15826_vm12, %v12742_v30, %v9250_v0  ;;  %v9274_v34 = vshrl.u32 %v9261_v31, 16  ;;  %9298 = vst [vmem:[#allocation4 + $0xbc] sm:$0x1] %v9297_v25  ;;  %v9254_v48 = vsel %vm15826_vm12, %v12743_v19, %v9253_v43 }
 0x849   : > { %v9301_v59 = vld [vmem:[#allocation3 + $0x18] sm:$0x4]  ;;  %v9309_v24 = vshrl.u32 %v9300_v61, 16  ;;  %9252 = vst [vmem:[#allocation4 + $0x40] sm:$0x1] %v9251_v56  ;;  %v12752_v60 = vrot.slane %v9319_v16, 10  ;;  %v16135_v16 = vunpack.c.l.b16 %v12846_v40 }
 0x84a   : > { %v9291_v21 = vsel %vm15826_vm12, %v9269_v29, %v9290_v15  ;;  %v9314_v36 = vshrl.u32 %v9301_v59, 16  ;;  %v9340_v53 = vld [vmem:[#allocation3 + $0xc] sm:$0x2]  ;;  %v9341_v54 = vld [vmem:[#allocation3 + $0x18] sm:$0x2]  ;;  %v9294_v10 = vsel %vm15826_vm12, %v9274_v34, %v9293_v26 }
 0x84b   : > { %9255 = vst [vmem:[#allocation4 + $0x7c] sm:$0x1] %v9254_v48  ;;  %9292 = vst [vmem:[#allocation4 + $0x44] sm:$0x1] %v9291_v21  ;;  %v12750_v8 = vrot.slane %v9309_v24, 10  ;;  %v12754_v42 = vrot.slane %v9340_v53, 9  ;;  %v9337_v28 = vsel %vm15826_vm12, %v12752_v60, %v9336_v27  ;;  %v16130_v24 = vunpack.c.l.b16 %v12845_v14 }
 0x84c   : > { %v9371_v41 = vld [vmem:[#allocation3 + $0xc] sm:$0x1]  ;;  %v9381_v6 = vld [vmem:[#allocation4 + $0x8c] sm:$0x1]  ;;  %v9384_v13 = vld [vmem:[#allocation4 + $0xc8] sm:$0x1] }
 0x84d   : > { %9295 = vst [vmem:[#allocation4 + $0x80] sm:$0x1] %v9294_v10  ;;  %v12751_v52 = vrot.slane %v9314_v36, 10  ;;  %v12755_v7 = vrot.slane %v9341_v54, 9  ;;  %v9372_v63 = vld [vmem:[#allocation3 + $0x18] sm:$0x1]  ;;  %v9376_v20 = vsel %vm15826_vm12, %v9371_v41, %v9375_v47  ;;  %v9331_v49 = vsel %vm15826_vm12, %v12750_v8, %v9330_v3 }
 0x84e   : > { %v9373_v1 = vld [vmem:[#allocation3 + $0x24] sm:$0x1]  ;;  %v9363_v58 = vsel %vm15826_vm12, %v12754_v42, %v9362_v23  ;;  %9370 = vst [vmem:[#allocation4 + $0xc4] sm:$0x1] %v9369_v51  ;;  %v9374_v45 = vld [vmem:[#allocation3 + $0x30] sm:$0x1]  ;;  %v9379_v22 = vsel %vm15826_vm12, %v9372_v63, %v9378_v55 }
 0x84f   : > { %9377 = vst [vmem:[#allocation4 + $0x14] sm:$0x1] %v9376_v20  ;;  %v9387_v17 = vld [vmem:[#allocation3 + $0xc] sm:$0x4]  ;;  %v9388_v12 = vld [vmem:[#allocation3 + $0x18] sm:$0x4]  ;;  %v9334_v39 = vsel %vm15826_vm12, %v12751_v52, %v9333_v2  ;;  %v9366_v0 = vsel %vm15826_vm12, %v12755_v7, %v9365_v37  ;;  %v9382_v11 = vsel %vm15826_vm12, %v9373_v1, %v9381_v6  ;;  %v9385_v5 = vsel %vm15826_vm12, %v9374_v45, %v9384_v13 }
 0x850   : > { %9332 = vst [vmem:[#allocation4 + $0x48] sm:$0x1] %v9331_v49  ;;  %9338 = vst [vmem:[#allocation4 + $0xc0] sm:$0x1] %v9337_v28  ;;  %v9389_v46 = vld [vmem:[#allocation3 + $0x24] sm:$0x4] }
 0x851   : > { %9364 = vst [vmem:[#allocation4 + $0x4c] sm:$0x1] %v9363_v58  ;;  %9380 = vst [vmem:[#allocation4 + $0x50] sm:$0x1] %v9379_v22  ;;  %v9390_v30 = vld [vmem:[#allocation3 + $0x30] sm:$0x4] }
 0x852   : > { %v9407_v43 = vld [vmem:[#allocation4 + $0x18] sm:$0x1]  ;;  %v9410_v57 = vld [vmem:[#allocation4 + $0x54] sm:$0x1]  ;;  %v9413_v38 = vld [vmem:[#allocation4 + $0x90] sm:$0x1] }
 0x853   : > { %v9715_v15 = vld [vmem:[#allocation4 + $0xb4] sm:$0x11]  ;;  %9335 = vst [vmem:[#allocation4 + $0x84] sm:$0x1] %v9334_v39  ;;  %9367 = vst [vmem:[#allocation4 + $0x88] sm:$0x1] %v9366_v0 }
 0x854   : > { %9383 = vst [vmem:[#allocation4 + $0x8c] sm:$0x1] %v9382_v11  ;;  %9386 = vst [vmem:[#allocation4 + $0xc8] sm:$0x1] %v9385_v5  ;;  %v12757_v19 = vrot.slane %v9387_v17, 10  ;;  %v12758_v31 = vrot.slane %v9388_v12, 10  ;;  %v12835_v25 = vcombine.low %v9715_v15, %v9715_v15  ;;  %v12836_v61 = vcombine.high %v9715_v15, %v9715_v15 }
 0x855   : > { %v12759_v29 = vrot.slane %v9389_v46, 10  ;;  %v12760_v26 = vrot.slane %v9390_v30, 10  ;;  %v9416_v56 = vld [vmem:[#allocation4 + $0xcc] sm:$0x1]  ;;  %v16123_v34 = vld [vmem:[#allocation3 + $0xc] sm:$0x1] }
 0x856   : > { %v16125_v59 = vld [vmem:[#allocation3 + $0x18] sm:$0x1]  ;;  %v9699_v18 = vld [vmem:[#allocation4 + $0x3c] sm:$0x11]  ;;  %v9408_v47 = vsel %vm15826_vm12, %v12757_v19, %v9407_v43  ;;  %v9411_v48 = vsel %vm15826_vm12, %v12758_v31, %v9410_v57  ;;  %v10167_v9 = vunpack.c.l.b16 %v12835_v25  ;;  %v10168_v40 = vunpack.c.l.b16 %v12836_v61 }
 0x857   : > { %v9414_v21 = vsel %vm15826_vm12, %v12759_v29, %v9413_v38  ;;  %v9417_v14 = vsel %vm15826_vm12, %v12760_v26, %v9416_v56  ;;  %v9707_v36 = vld [vmem:[#allocation4 + $0x78] sm:$0x11]  ;;  %v12805_v3 = vcombine.low %v9699_v18, %v9699_v18  ;;  %v12806_v27 = vcombine.high %v9699_v18, %v9699_v18  ;;  %9409 = vst [vmem:[#allocation4 + $0x18] sm:$0x1] %v9408_v47  ;;  %v9693_v2 = vld [vmem:[#allocation4 + $0x10] sm:$0x11] }
 0x858   : > { %9412 = vst [vmem:[#allocation4 + $0x54] sm:$0x1] %v9411_v48  ;;  %9415 = vst [vmem:[#allocation4 + $0x90] sm:$0x1] %v9414_v21  ;;  %v12820_v53 = vcombine.low %v9707_v36, %v9707_v36  ;;  %v12821_v54 = vcombine.high %v9707_v36, %v9707_v36  ;;  %v9424_v35 = vshrl.u32 %v16123_v34, 16  ;;  %v9429_v23 = vshrl.u32 %v16125_v59, 16 }
 0x859   : > { %9418 = vst [vmem:[#allocation4 + $0xcc] sm:$0x1] %v9417_v14  ;;  %v10137_v55 = vunpack.c.l.b16 %v12805_v3  ;;  %v10138_v10 = vunpack.c.l.b16 %v12806_v27  ;;  %v10195_v8 = vrot.slane %v10168_v40, 5  ;;  %v10188_v60 = vrot.slane %v10167_v9, 5  ;;  %v9700_v41 = vld [vmem:[#allocation4 + $0x44] sm:$0x11] }
 0x85a   : > { %v10152_v42 = vunpack.c.l.b16 %v12820_v53  ;;  %v10153_v37 = vunpack.c.l.b16 %v12821_v54  ;;  %v9716_v6 = vld [vmem:[#allocation4 + $0xbc] sm:$0x11]  ;;  %v12794_v13 = vcombine.low %v9693_v2, %v9693_v2  ;;  %v12795_v52 = vcombine.high %v9693_v2, %v9693_v2  ;;  %v9701_v30 = vld [vmem:[#allocation4 + $0x4c] sm:$0x11] }
 0x85b   : > { %v10191_v7 = vrot.slane %v10138_v10, 7  ;;  %v10182_v51 = vrot.slane %v10137_v55, 7  ;;  %v9708_v63 = vld [vmem:[#allocation4 + $0x80] sm:$0x11]  ;;  %v12807_v1 = vcombine.low %v9700_v41, %v9700_v41  ;;  %v12808_v20 = vcombine.high %v9700_v41, %v9700_v41  ;;  %v14538_v48 = vld [vmem:[%s16830_s11 + $0x170] sm:$0xff]   ;;  %v14554_v59 = vld [vmem:[%s16830_s11 + $0x160] sm:$0xff]  }
 0x85c   : > { %v10193_v49 = vrot.slane %v10153_v37, 6  ;;  %v10185_v28 = vrot.slane %v10152_v42, 6  ;;  %v12822_v58 = vcombine.low %v9708_v63, %v9708_v63  ;;  %v12823_v45 = vcombine.high %v9708_v63, %v9708_v63  ;;  %v9717_v19 = vld [vmem:[#allocation4 + $0xc4] sm:$0x11]  ;;  %v14547_v2 = vld [vmem:[%s16830_s11 + $0x130] sm:$0xff]  }
 0x85d   : > { %v10192_v22 = vsel %vm10183_vm3, %v10191_v7, %v16076_v44  ;;  %v10184_v17 = vsel %vm10183_vm3, %v10182_v51, %v16072_v50  ;;  %v12837_v12 = vcombine.low %v9716_v6, %v9716_v6  ;;  %v12838_v39 = vcombine.high %v9716_v6, %v9716_v6  ;;  %v9709_v44 = vld [vmem:[#allocation4 + $0x88] sm:$0x11]  ;;  %v14519_v29 = vld [vmem:[%s16830_s11 + $0x138] sm:$0xff]  }
 0x85e   : > { %v10194_v0 = vsel %vm10186_vm14, %v10193_v49, %v10192_v22  ;;  %v10187_v11 = vsel %vm10186_vm14, %v10185_v28, %v10184_v17  ;;  %v10139_v5 = vunpack.c.l.b16 %v12807_v1  ;;  %v10140_v46 = vunpack.c.l.b16 %v12808_v20  ;;  %v9422_v6 = vld [vmem:[#allocation3 + $0x30] sm:$0x1]  ;;  %v9450_v20 = vld [vmem:[#allocation4 + $0x58] sm:$0x1]  ;;  %v9453_v49 = vld [vmem:[#allocation4 + $0x94] sm:$0x1] }
 0x85f   : > { %v10196_v43 = vsel %vm10189_vm15, %v10195_v8, %v10194_v0  ;;  %v10190_v57 = vsel %vm10189_vm15, %v10188_v60, %v10187_v11  ;;  %v16155_v38 = vunpack.c.l.b16 %v12822_v58  ;;  %v10155_v15 = vunpack.c.l.b16 %v12823_v45  ;;  %v9421_v60 = vld [vmem:[#allocation3 + $0x24] sm:$0x1]  ;;  %v9456_v17 = vld [vmem:[#allocation4 + $0xd0] sm:$0x1]  ;;  %v14537_v0 = vld [vmem:[%s16830_s11 + $0x1b8] sm:$0xff]  }
 0x860   : > { %v10276_v31 = vpack.c.b16 %v10196_v43, %v10196_v43  ;;  %v10275_v50 = vpack.c.b16 %v10190_v57, %v10190_v57  ;;  %v16160_v26 = vunpack.c.l.b16 %v12837_v12  ;;  %v10170_v25 = vunpack.c.l.b16 %v12838_v39  ;;  %v16198_v43 = vld [vmem:[#allocation4 + $0xe4] sm:$0x11] }
 0x861   : > { %v10203_v61 = vrot.slane %v10140_v46, 7  ;;  %v10205_v56 = vrot.slane %v10155_v15, 6  ;;  %v12809_v18 = vcombine.low %v9701_v30, %v9701_v30  ;;  %v12810_v47 = vcombine.high %v9701_v30, %v9701_v30  ;;  %v14551_v46 = vld [vmem:[%s16830_s11 + $0x128] sm:$0xff]   ;;  %v9459_v30 = vld [vmem:[#allocation3 + $0xc] sm:$0x4] }
 0x862   : > { %11057 = vmatprep.mubr.bf16.mxu0 %v10276_v31  ;;  %v10207_v21 = vrot.slane %v10170_v25, 5  ;;  %v12824_v14 = vcombine.low %v9709_v44, %v9709_v44  ;;  %v12825_v36 = vcombine.high %v9709_v44, %v9709_v44  ;;  %v12839_v3 = vcombine.low %v9717_v19, %v9717_v19  ;;  %v9461_v15 = vld [vmem:[#allocation3 + $0x24] sm:$0x4]  ;;  %v9462_v44 = vld [vmem:[#allocation3 + $0x30] sm:$0x4] }
 0x863   : > { %11058 = vmatmul.mubr.bf16.vlgmr.msra.gmra.mxu0 %v10275_v50  ;;  %v10204_v27 = vsel %vm10183_vm3, %v10203_v61, %v16080_v62  ;;  %v12840_v9 = vcombine.high %v9717_v19, %v9717_v19  ;;  %v16167_v40 = vunpack.c.l.b16 %v12794_v13  ;;  %v10127_v53 = vunpack.c.l.b16 %v12795_v52  ;;  %v9447_v13 = vld [vmem:[#allocation4 + $0x1c] sm:$0x1]  ;;  %v14550_v52 = vld [vmem:[%s16830_s11 + $0x168] sm:$0xff]  }
 0x864   : > { %13703 = vmatpush3.bf16.msra.mxu0 %v14519_v29  ;;  %v10206_v54 = vsel %vm10186_vm14, %v10205_v56, %v10204_v27  ;;  %v16170_v55 = vunpack.c.l.b16 %v12809_v18  ;;  %v10142_v10 = vunpack.c.l.b16 %v12810_v47  ;;  %v16172_v8 = vunpack.c.l.b16 %v12824_v14  ;;  %v9499_v29 = vld [vmem:[#allocation3 + $0xc] sm:$0x2]  ;;  %v14548_v56 = vld [vmem:[%s16830_s11 + $0x1f0] sm:$0xff]  }
 0x865   : > { %v10208_v42 = vsel %vm10189_vm15, %v10207_v21, %v10206_v54  ;;  %v10157_v62 = vunpack.c.l.b16 %v12825_v36  ;;  %v16178_v37 = vunpack.c.l.b16 %v12839_v3  ;;  %v10172_v41 = vunpack.c.l.b16 %v12840_v9  ;;  %13704 = vmatprep.subr.bf16.mxu0 %v14538_v48  ;;  %v16220_v47 = vld [vmem:[#allocation3 + $0x24] sm:$0x2]  ;;  %v14555_v21 = vld [vmem:[%s16830_s11 + $0x120] sm:$0xff]  }
 0x866   : > { %v10278_v7 = vpack.c.b16 %v10208_v42, %v10208_v42  ;;  %v10215_v51 = vrot.slane %v10142_v10, 7  ;;  %v10197_v63 = vrot.slane %v10139_v5, 7  ;;  %v10199_v1 = vrot.slane %v16155_v38, 6  ;;  %v9460_v38 = vld [vmem:[#allocation3 + $0x18] sm:$0x4]  ;;  %v14549_v42 = vld [vmem:[%s16830_s11 + $0x1b0] sm:$0xff]  }
 0x867   : > { %v10217_v28 = vrot.slane %v10157_v62, 6  ;;  %v10219_v58 = vrot.slane %v10172_v41, 5  ;;  %v10201_v45 = vrot.slane %v16160_v26, 5  ;;  %v9434_v22 = vshrl.u32 %v9421_v60, 16  ;;  %v9500_v26 = vld [vmem:[#allocation3 + $0x18] sm:$0x2] }
 0x868   : > { %11097 = vmatprep.mubr.bf16.mxu1 %v10278_v7  ;;  %v10216_v12 = vsel %vm10183_vm3, %v10215_v51, %v10127_v53  ;;  %v10198_v39 = vsel %vm10183_vm3, %v10197_v63, %v16078_v32  ;;  %v9439_v11 = vshrl.u32 %v9422_v6, 16  ;;  %v9448_v5 = vsel %vm15826_vm12, %v9424_v35, %v9447_v13  ;;  %13705 = vmatpush3.bf16.msra.mxu0 %v14547_v2  ;;  %v16228_v9 = vld [vmem:[#allocation3 + $0x30] sm:$0x2]  ;;  %v14558_v53 = vld [vmem:[%s16830_s11 + $0x158] sm:$0xff]   ;;  %v9490_v10 = vld [vmem:[#allocation4 + $0x5c] sm:$0x1] }
 0x869   : > { %v10218_v32 = vsel %vm10186_vm14, %v10217_v28, %v10216_v12  ;;  %v10200_v57 = vsel %vm10186_vm14, %v10199_v1, %v10198_v39  ;;  %9449 = vst [vmem:[#allocation4 + $0x1c] sm:$0x1] %v9448_v5  ;;  %v9451_v34 = vsel %vm15826_vm12, %v9429_v23, %v9450_v20  ;;  %v9454_v35 = vsel %vm15826_vm12, %v9434_v22, %v9453_v49  ;;  %v14552_v7 = vld [vmem:[%s16830_s11 + $0x1e8] sm:$0xff]   ;;  %v9519_v49 = vld [vmem:[#allocation4 + $0x24] sm:$0x1] }
 0x86a   : > { %13706 = vmatprep.subr.bf16.mxu0 %v14550_v52  ;;  %v10220_v19 = vsel %vm10189_vm15, %v10219_v58, %v10218_v32  ;;  %v10202_v31 = vsel %vm10189_vm15, %v10201_v45, %v10200_v57  ;;  %9452 = vst [vmem:[#allocation4 + $0x58] sm:$0x1] %v9451_v34  ;;  %9455 = vst [vmem:[#allocation4 + $0x94] sm:$0x1] %v9454_v35  ;;  %v9457_v50 = vsel %vm15826_vm12, %v9439_v11, %v9456_v17  ;;  %v9496_v52 = vld [vmem:[#allocation4 + $0xd4] sm:$0x1] }
 0x86b   : > { %v10209_v23 = vrot.slane %v16170_v55, 7  ;;  %v10280_v25 = vpack.c.b16 %v10220_v19, %v10220_v19  ;;  %v10277_v61 = vpack.c.b16 %v10202_v31, %v10202_v31  ;;  %9458 = vst [vmem:[#allocation4 + $0xd0] sm:$0x1] %v9457_v50  ;;  %v10211_v18 = vrot.slane %v16172_v8, 6  ;;  %v9487_v55 = vld [vmem:[#allocation4 + $0x20] sm:$0x1] }
 0x86c   : > { %v10255_v48 = vrot.slane %v16135_v16, 5  ;;  %13707 = vmatpush3.bf16.msra.mxu0 %v14551_v46  ;;  %v9464_v36 = vshrl.u32 %v9459_v30, 16  ;;  %v9469_v3 = vshrl.u32 %v9460_v38, 16  ;;  %v9474_v27 = vshrl.u32 %v9461_v15, 16  ;;  %v9493_v8 = vld [vmem:[#allocation4 + $0x98] sm:$0x1] }
 0x86d   : > { %v10210_v14 = vsel %vm10183_vm3, %v10209_v23, %v16167_v40  ;;  %11137 = vmatprep.mubr.bf16.mxu0 %v10280_v25  ;;  %11098 = vmatmul.mubr.bf16.vlgmr.msra.gmra.mxu1 %v10277_v61  ;;  %v9479_v54 = vshrl.u32 %v9462_v44, 16  ;;  %v12769_v60 = vrot.slane %v9499_v29, 9  ;;  %v12770_v2 = vrot.slane %v9500_v26, 9  ;;  %v9522_v12 = vld [vmem:[#allocation4 + $0x60] sm:$0x1]  ;;  %v14562_v46 = vld [vmem:[%s16830_s11 + $0x150] sm:$0xff]  }
 0x86e   : > { %v12847_v40 = vcombine.low %v16198_v43, %v16198_v43  ;;  %13725 = vmatpush3.bf16.msra.mxu1 %v14537_v0  ;;  %13708 = vmatprep.subr.bf16.mxu0 %v14554_v59  ;;  %v10213_v62 = vrot.slane %v16178_v37, 5  ;;  %v12765_v41 = vrot.slane %v9464_v36, 10  ;;  %v12766_v6 = vrot.slane %v9469_v3, 10  ;;  %v14559_v37 = vld [vmem:[%s16830_s11 + $0x118] sm:$0xff]   ;;  %v14553_v44 = vld [vmem:[%s16830_s11 + $0x1a8] sm:$0xff]   ;;  %v14556_v50 = vld [vmem:[%s16830_s11 + $0x1e0] sm:$0xff]  }
 0x86f   : > { %v12767_v13 = vrot.slane %v9474_v27, 10  ;;  %13726 = vmatprep.subr.bf16.mxu1 %v14548_v56  ;;  %v10212_v51 = vsel %vm10186_vm14, %v10211_v18, %v10210_v14  ;;  %v12768_v63 = vrot.slane %v9479_v54, 10  ;;  %v12771_v1 = vrot.slane %v16220_v47, 9  ;;  %v9525_v23 = vld [vmem:[#allocation4 + $0x9c] sm:$0x1]  ;;  %v14601_v16 = vld [vmem:[%s16830_s11 + $0x2a8] sm:$0xff]  }
 0x870   : > { %v12772_v20 = vrot.slane %v16228_v9, 9  ;;  %v9694_v28 = vld [vmem:[#allocation4 + $0x18] sm:$0x11]  ;;  %13709 = vmatpush3.bf16.msra.mxu0 %v14555_v21  ;;  %v9488_v58 = vsel %vm15826_vm12, %v12765_v41, %v9487_v55  ;;  %v9491_v45 = vsel %vm15826_vm12, %v12766_v6, %v9490_v10  ;;  %v9520_v17 = vsel %vm15826_vm12, %v12769_v60, %v9519_v49  ;;  %v9531_v21 = vld [vmem:[#allocation3 + $0x18] sm:$0x1] }
 0x871   : > { %v9494_v22 = vsel %vm15826_vm12, %v12767_v13, %v9493_v8  ;;  %v9702_v39 = vld [vmem:[#allocation4 + $0x54] sm:$0x11]  ;;  %v12796_v11 = vcombine.low %v9694_v28, %v9694_v28  ;;  %v12797_v5 = vcombine.high %v9694_v28, %v9694_v28  ;;  %13710 = vmatprep.subr.bf16.mxu0 %v14558_v53  ;;  %9489 = vst [vmem:[#allocation4 + $0x20] sm:$0x1] %v9488_v58  ;;  %9492 = vst [vmem:[#allocation4 + $0x5c] sm:$0x1] %v9491_v45 }
 0x872   : > { %v9710_v0 = vld [vmem:[#allocation4 + $0x90] sm:$0x11]  ;;  %9495 = vst [vmem:[#allocation4 + $0x98] sm:$0x1] %v9494_v22  ;;  %v9497_v30 = vsel %vm15826_vm12, %v12768_v63, %v9496_v52  ;;  %9521 = vst [vmem:[#allocation4 + $0x24] sm:$0x1] %v9520_v17  ;;  %v9523_v32 = vsel %vm15826_vm12, %v12770_v2, %v9522_v12  ;;  %v12811_v34 = vcombine.low %v9702_v39, %v9702_v39  ;;  %13727 = vmatpush3.bf16.msra.mxu1 %v14549_v42 }
 0x873   : > { %v9718_v57 = vld [vmem:[#allocation4 + $0xcc] sm:$0x11]  ;;  %v12812_v35 = vcombine.high %v9702_v39, %v9702_v39  ;;  %v12826_v38 = vcombine.low %v9710_v0, %v9710_v0  ;;  %v12827_v15 = vcombine.high %v9710_v0, %v9710_v0  ;;  %9498 = vst [vmem:[#allocation4 + $0xd4] sm:$0x1] %v9497_v30  ;;  %9524 = vst [vmem:[#allocation4 + $0x60] sm:$0x1] %v9523_v32  ;;  %13728 = vmatprep.subr.bf16.mxu1 %v14552_v7 }
 0x874   : > { %v12841_v19 = vcombine.low %v9718_v57, %v9718_v57  ;;  %v12842_v31 = vcombine.high %v9718_v57, %v9718_v57  ;;  %v16270_v59 = vsel %vm10189_vm15, %v10213_v62, %v10212_v51  ;;  %v9528_v29 = vld [vmem:[#allocation4 + $0xd8] sm:$0x1]  ;;  %v12848_v26 = vcombine.high %v16198_v43, %v16198_v43  ;;  %13711 = vmatpush3.bf16.msra.mxu0 %v14559_v37  ;;  %v9532_v14 = vld [vmem:[#allocation3 + $0x24] sm:$0x1]  ;;  %v9535_v36 = vld [vmem:[#allocation4 + $0x28] sm:$0x1] }
 0x875   : > { %v10143_v25 = vunpack.c.l.b16 %v12811_v34  ;;  %v10144_v61 = vunpack.c.l.b16 %v12812_v35  ;;  %v16274_v56 = vunpack.c.l.b16 %v12826_v38  ;;  %v10159_v18 = vunpack.c.l.b16 %v12827_v15  ;;  %v14563_v47 = vld [vmem:[%s16830_s11 + $0x110] sm:$0xff]   ;;  %13712 = vmatprep.subr.bf16.mxu0 %v14562_v46  ;;  %v14566_v9 = vld [vmem:[%s16830_s11 + $0x148] sm:$0xff]   ;;  %v9533_v55 = vld [vmem:[#allocation3 + $0x30] sm:$0x1] }
 0x876   : > { %v10128_v3 = vunpack.c.l.b16 %v12796_v11  ;;  %v10174_v27 = vunpack.c.l.b16 %v12842_v31  ;;  %v9526_v53 = vsel %vm15826_vm12, %v12771_v1, %v9525_v23  ;;  %v9529_v54 = vsel %vm15826_vm12, %v12772_v20, %v9528_v29  ;;  %v9538_v10 = vld [vmem:[#allocation4 + $0x64] sm:$0x1]  ;;  %13729 = vmatpush3.bf16.msra.mxu1 %v14553_v44  ;;  %v14557_v42 = vld [vmem:[%s16830_s11 + $0x1a0] sm:$0xff]   ;;  %v9547_v41 = vld [vmem:[#allocation3 + $0x18] sm:$0x4] }
 0x877   : > { %v10129_v8 = vunpack.c.l.b16 %v12797_v5  ;;  %v16286_v60 = vunpack.c.l.b16 %v12841_v19  ;;  %v10227_v2 = vrot.slane %v10144_v61, 7  ;;  %9527 = vst [vmem:[#allocation4 + $0x9c] sm:$0x1] %v9526_v53  ;;  %9530 = vst [vmem:[#allocation4 + $0xd8] sm:$0x1] %v9529_v54  ;;  %v10221_v62 = vrot.slane %v10143_v25, 7  ;;  %13730 = vmatprep.subr.bf16.mxu1 %v14556_v50 }
 0x878   : > { %v10229_v6 = vrot.slane %v10159_v18, 6  ;;  %v14560_v13 = vld [vmem:[%s16830_s11 + $0x1d8] sm:$0xff]   ;;  %v10223_v52 = vrot.slane %v16274_v56, 6  ;;  %v9536_v7 = vsel %vm15826_vm12, %v9531_v21, %v9535_v36  ;;  %v9539_v51 = vsel %vm15826_vm12, %v9532_v14, %v9538_v10  ;;  %13713 = vmatpush3.bf16.msra.mxu0 %v14563_v47  ;;  %v14567_v49 = vld [vmem:[%s16830_s11 + $0x108] sm:$0xff]   ;;  %v9548_v45 = vld [vmem:[#allocation3 + $0x24] sm:$0x4] }
 0x879   : > { %v9541_v63 = vld [vmem:[#allocation4 + $0xa0] sm:$0x1]  ;;  %v10228_v1 = vsel %vm10183_vm3, %v10227_v2, %v10129_v8  ;;  %v10231_v20 = vrot.slane %v10174_v27, 5  ;;  %v10222_v37 = vsel %vm10183_vm3, %v10221_v62, %v10128_v3  ;;  %9537 = vst [vmem:[#allocation4 + $0x28] sm:$0x1] %v9536_v7  ;;  %13714 = vmatprep.subr.bf16.mxu0 %v14566_v9  ;;  %v14570_v17 = vld [vmem:[%s16830_s11 + $0x140] sm:$0xff]   ;;  %v10279_v32 = vpack.c.b16 %v16270_v59, %v16270_v59 }
 0x87a   : > { %v9695_v28 = vld [vmem:[#allocation4 + $0x20] sm:$0x11]  ;;  %9540 = vst [vmem:[#allocation4 + $0x64] sm:$0x1] %v9539_v51  ;;  %v9542_v58 = vsel %vm15826_vm12, %v9533_v55, %v9541_v63  ;;  %v10230_v22 = vsel %vm10186_vm14, %v10229_v6, %v10228_v1  ;;  %v9549_v11 = vld [vmem:[#allocation3 + $0x30] sm:$0x4]  ;;  %13731 = vmatpush3.bf16.msra.mxu1 %v14557_v42  ;;  %v16322_v31 = vsel %vm10186_vm14, %v10223_v52, %v10222_v37 }
 0x87b   : > { %v9703_v12 = vld [vmem:[#allocation4 + $0x5c] sm:$0x11]  ;;  %v12798_v39 = vcombine.low %v9695_v28, %v9695_v28  ;;  %v12799_v0 = vcombine.high %v9695_v28, %v9695_v28  ;;  %9543 = vst [vmem:[#allocation4 + $0xa0] sm:$0x1] %v9542_v58  ;;  %v12773_v5 = vrot.slane %v9547_v41, 10  ;;  %v10232_v46 = vsel %vm10189_vm15, %v10231_v20, %v10230_v22  ;;  %13732 = vmatprep.subr.bf16.mxu1 %v14560_v13  ;;  %v14571_v29 = vld [vmem:[%s16830_s11 + $0x100] sm:$0xff]  }
 0x87c   : > { %v14561_v30 = vld [vmem:[%s16830_s11 + $0x198] sm:$0xff]   ;;  %v12813_v57 = vcombine.low %v9703_v12, %v9703_v12  ;;  %v12814_v34 = vcombine.high %v9703_v12, %v9703_v12  ;;  %v9579_v35 = vld [vmem:[#allocation3 + $0x18] sm:$0x1]  ;;  %v16316_v38 = vld [vmem:[#allocation3 + $0x24] sm:$0x1]  ;;  %v10282_v15 = vpack.c.b16 %v10232_v46, %v10232_v46  ;;  %v10225_v50 = vrot.slane %v16286_v60, 5  ;;  %13715 = vmatpush3.bf16.msra.mxu0 %v14567_v49 }
 0x87d   : > { %v14564_v44 = vld [vmem:[%s16830_s11 + $0x1d0] sm:$0xff]   ;;  %v10130_v19 = vunpack.c.l.b16 %v12798_v39  ;;  %v9567_v23 = vld [vmem:[#allocation4 + $0x2c] sm:$0x1]  ;;  %v14574_v25 = vld [vmem:[%s16830_s11 + $0x278] sm:$0xff]   ;;  %v12774_v18 = vrot.slane %v9548_v45, 10  ;;  %v12775_v47 = vrot.slane %v9549_v11, 10  ;;  %13716 = vmatprep.subr.bf16.mxu0 %v14570_v17  ;;  %v10131_v3 = vunpack.c.l.b16 %v12799_v0 }
 0x87e   : > { %v10145_v61 = vunpack.c.l.b16 %v12813_v57  ;;  %v10146_v56 = vunpack.c.l.b16 %v12814_v34  ;;  %v9570_v21 = vld [vmem:[#allocation4 + $0x68] sm:$0x1]  ;;  %11177 = vmatprep.mubr.bf16.mxu1 %v10282_v15  ;;  %v9711_v14 = vld [vmem:[#allocation4 + $0x98] sm:$0x11]  ;;  %v9568_v27 = vsel %vm15826_vm12, %v12773_v5, %v9567_v23  ;;  %v9584_v9 = vshrl.u32 %v9579_v35, 16  ;;  %13733 = vmatpush3.bf16.msra.mxu1 %v14561_v30  ;;  %v14568_v41 = vld [vmem:[%s16830_s11 + $0x1c8] sm:$0xff]  }
 0x87f   : > { %v9719_v36 = vld [vmem:[#allocation4 + $0xd4] sm:$0x11]  ;;  %v9589_v53 = vshrl.u32 %v16316_v38, 16  ;;  %v12828_v55 = vcombine.low %v9711_v14, %v9711_v14  ;;  %v12829_v10 = vcombine.high %v9711_v14, %v9711_v14  ;;  %9569 = vst [vmem:[#allocation4 + $0x2c] sm:$0x1] %v9568_v27  ;;  %13734 = vmatprep.subr.bf16.mxu1 %v14564_v44  ;;  %v9571_v13 = vsel %vm15826_vm12, %v12774_v18, %v9570_v21  ;;  %v14575_v63 = vld [vmem:[%s16830_s11 + $0x238] sm:$0xff]  }
 0x880   : > { %v14565_v54 = vld [vmem:[%s16830_s11 + $0x190] sm:$0xff]   ;;  %v12843_v8 = vcombine.low %v9719_v36, %v9719_v36  ;;  %v12844_v2 = vcombine.high %v9719_v36, %v9719_v36  ;;  %v9573_v42 = vld [vmem:[#allocation4 + $0xa4] sm:$0x1]  ;;  %v9581_v62 = vld [vmem:[#allocation3 + $0x30] sm:$0x1]  ;;  %v10239_v6 = vrot.slane %v10146_v56, 7  ;;  %13717 = vmatpush3.bf16.msra.mxu0 %v14571_v29 }
 0x881   : > { %v9574_v52 = vsel %vm15826_vm12, %v12775_v47, %v9573_v42  ;;  %v10233_v7 = vrot.slane %v10145_v61, 7  ;;  %v9607_v51 = vld [vmem:[#allocation4 + $0x30] sm:$0x1]  ;;  %v10160_v1 = vunpack.c.l.b16 %v12828_v55  ;;  %v10161_v20 = vunpack.c.l.b16 %v12829_v10  ;;  %9572 = vst [vmem:[#allocation4 + $0x68] sm:$0x1] %v9571_v13  ;;  %13746 = vmatprep.subr.bf16.mxu0 %v14574_v25  ;;  %v14594_v17 = vld [vmem:[%s16830_s11 + $0x270] sm:$0xff]  }
 0x882   : > { %v10175_v49 = vunpack.c.l.b16 %v12843_v8  ;;  %v10176_v28 = vunpack.c.l.b16 %v12844_v2  ;;  %9575 = vst [vmem:[#allocation4 + $0xa4] sm:$0x1] %v9574_v52  ;;  %v9610_v37 = vld [vmem:[#allocation4 + $0x6c] sm:$0x1]  ;;  %v9619_v58 = vld [vmem:[#allocation3 + $0x18] sm:$0x4]  ;;  %v10240_v22 = vsel %vm10183_vm3, %v10239_v6, %v10131_v3  ;;  %v9608_v0 = vsel %vm15826_vm12, %v9584_v9, %v9607_v51  ;;  %13735 = vmatpush3.bf16.msra.mxu1 %v14565_v54 }
 0x883   : > { %v9620_v45 = vld [vmem:[#allocation3 + $0x24] sm:$0x4]  ;;  %v10234_v12 = vsel %vm10183_vm3, %v10233_v7, %v10130_v19  ;;  %v9594_v39 = vshrl.u32 %v9581_v62, 16  ;;  %v9613_v11 = vld [vmem:[#allocation4 + $0xa8] sm:$0x1]  ;;  %v14569_v46 = vld [vmem:[%s16830_s11 + $0x188] sm:$0xff]   ;;  %13736 = vmatprep.subr.bf16.mxu1 %v14568_v41  ;;  %11138 = vmatmul.mubr.bf16.vlgmr.msra.gmra.mxu0 %v10279_v32  ;;  %v9611_v15 = vsel %vm15826_vm12, %v9589_v53, %v9610_v37  ;;  %v16374_v61 = vsel %vm10189_vm15, %v10225_v50, %v16322_v31 }
 0x884   : > { %v9621_v5 = vld [vmem:[#allocation3 + $0x30] sm:$0x4]  ;;  %v10241_v30 = vrot.slane %v10161_v20, 6  ;;  %v10243_v57 = vrot.slane %v10176_v28, 5  ;;  %v10235_v34 = vrot.slane %v10160_v1, 6  ;;  %v10237_v35 = vrot.slane %v10175_v49, 5  ;;  %13747 = vmatpush3.bf16.msra.mxu0 %v14575_v63 }
 0x885   : > { %9609 = vst [vmem:[#allocation4 + $0x30] sm:$0x1] %v9608_v0  ;;  %v14572_v38 = vld [vmem:[%s16830_s11 + $0x1c0] sm:$0xff]   ;;  %v9614_v44 = vsel %vm15826_vm12, %v9594_v39, %v9613_v11  ;;  %v9624_v19 = vshrl.u32 %v9619_v58, 16  ;;  %v9629_v23 = vshrl.u32 %v9620_v45, 16  ;;  %v9634_v32 = vshrl.u32 %v9621_v5, 16  ;;  %13748 = vmatprep.subr.bf16.mxu0 %v14594_v17 }
 0x886   : > { %v16367_v29 = vld [vmem:[#allocation3 + $0x18] sm:$0x2]  ;;  %v10242_v25 = vsel %vm10186_vm14, %v10241_v30, %v10240_v22  ;;  %v10236_v59 = vsel %vm10186_vm14, %v10235_v34, %v10234_v12  ;;  %9612 = vst [vmem:[#allocation4 + $0x6c] sm:$0x1] %v9611_v15  ;;  %9615 = vst [vmem:[#allocation4 + $0xa8] sm:$0x1] %v9614_v44  ;;  %13737 = vmatpush3.bf16.msra.mxu1 %v14569_v46  ;;  %v10281_v30 = vpack.c.b16 %v16374_v61, %v16374_v61 }
 0x887   : > { %v9647_v56 = vld [vmem:[#allocation4 + $0x34] sm:$0x1]  ;;  %v9650_v18 = vld [vmem:[#allocation4 + $0x70] sm:$0x1]  ;;  %v9660_v47 = vld [vmem:[#allocation3 + $0x24] sm:$0x2]  ;;  %v10244_v14 = vsel %vm10189_vm15, %v10243_v57, %v10242_v25  ;;  %v16385_v31 = vsel %vm10189_vm15, %v10237_v35, %v10236_v59  ;;  %13738 = vmatprep.subr.bf16.mxu1 %v14572_v38 }
 0x888   : > { %v14573_v21 = vld [vmem:[%s16830_s11 + $0x180] sm:$0xff]   ;;  %v14595_v60 = vld [vmem:[%s16830_s11 + $0x230] sm:$0xff]   ;;  %v12781_v50 = vrot.slane %v9624_v19, 10  ;;  %v12782_v3 = vrot.slane %v9629_v23, 10  ;;  %v10284_v27 = vpack.c.b16 %v10244_v14, %v10244_v14  ;;  %v14584_v9 = vld [vmem:[%s16830_s11 + $0x2f8] sm:$0xff]   ;;  %v12785_v8 = vrot.slane %v16367_v29, 9 }
 0x889   : > { %v9696_v36 = vld [vmem:[#allocation4 + $0x28] sm:$0x11]  ;;  %v14598_v55 = vld [vmem:[%s16830_s11 + $0x268] sm:$0xff]   ;;  %v9661_v10 = vld [vmem:[#allocation3 + $0x30] sm:$0x2]  ;;  %v12783_v62 = vrot.slane %v9634_v32, 10  ;;  %13749 = vmatpush3.bf16.msra.mxu0 %v14595_v60 }
 0x88a   : > { %v12800_v53 = vcombine.low %v9696_v36, %v9696_v36  ;;  %v12801_v54 = vcombine.high %v9696_v36, %v9696_v36  ;;  %v9704_v2 = vld [vmem:[#allocation4 + $0x64] sm:$0x11]  ;;  %v9648_v41 = vsel %vm15826_vm12, %v12781_v50, %v9647_v56  ;;  %v9651_v6 = vsel %vm15826_vm12, %v12782_v3, %v9650_v18  ;;  %11217 = vmatprep.mubr.bf16.mxu0 %v10284_v27  ;;  %v9653_v1 = vld [vmem:[#allocation4 + $0xac] sm:$0x1]  ;;  %v14599_v28 = vld [vmem:[%s16830_s11 + $0x228] sm:$0xff]  }
 0x88b   : > { %v9712_v42 = vld [vmem:[#allocation4 + $0xa0] sm:$0x11]  ;;  %v12786_v13 = vrot.slane %v9660_v47, 9  ;;  %v12815_v52 = vcombine.low %v9704_v2, %v9704_v2  ;;  %v12816_v7 = vcombine.high %v9704_v2, %v9704_v2  ;;  %9649 = vst [vmem:[#allocation4 + $0x34] sm:$0x1] %v9648_v41  ;;  %v9654_v37 = vsel %vm15826_vm12, %v12783_v62, %v9653_v1  ;;  %13739 = vmatpush3.bf16.msra.mxu1 %v14573_v21  ;;  %v14602_v5 = vld [vmem:[%s16830_s11 + $0x260] sm:$0xff]  }
 0x88c   : > { %v12830_v51 = vcombine.low %v9712_v42, %v9712_v42  ;;  %v12831_v63 = vcombine.high %v9712_v42, %v9712_v42  ;;  %9652 = vst [vmem:[#allocation4 + $0x70] sm:$0x1] %v9651_v6  ;;  %v10132_v20 = vunpack.c.l.b16 %v12800_v53  ;;  %v10133_v49 = vunpack.c.l.b16 %v12801_v54  ;;  %v9679_v45 = vld [vmem:[#allocation4 + $0x38] sm:$0x1]  ;;  %v9682_v22 = vld [vmem:[#allocation4 + $0x74] sm:$0x1]  ;;  %13750 = vmatprep.subr.bf16.mxu0 %v14598_v55  ;;  %13768 = vmatprep.subr.bf16.mxu1 %v14584_v9 }
 0x88d   : > { %v12787_v58 = vrot.slane %v9661_v10, 9  ;;  %v14585_v17 = vld [vmem:[%s16830_s11 + $0x2b8] sm:$0xff]   ;;  %v10147_v12 = vunpack.c.l.b16 %v12815_v52  ;;  %v10148_v39 = vunpack.c.l.b16 %v12816_v7  ;;  %9655 = vst [vmem:[#allocation4 + $0xac] sm:$0x1] %v9654_v37  ;;  %v9685_v46 = vld [vmem:[#allocation4 + $0xb0] sm:$0x1]  ;;  %v9680_v34 = vsel %vm15826_vm12, %v12785_v8, %v9679_v45  ;;  %13751 = vmatpush3.bf16.msra.mxu0 %v14599_v28 }
 0x88e   : > { %v10162_v0 = vunpack.c.l.b16 %v12830_v51  ;;  %v10163_v11 = vunpack.c.l.b16 %v12831_v63  ;;  %v14596_v57 = vld [vmem:[%s16830_s11 + $0x2f0] sm:$0xff]   ;;  %v9683_v35 = vsel %vm15826_vm12, %v12786_v13, %v9682_v22  ;;  %9681 = vst [vmem:[#allocation4 + $0x38] sm:$0x1] %v9680_v34  ;;  %11178 = vmatmul.mubr.bf16.vlgmr.msra.gmra.mxu1 %v10281_v30  ;;  %v14603_v29 = vld [vmem:[%s16830_s11 + $0x220] sm:$0xff]   ;;  %v10249_v25 = vrot.slane %v16130_v24, 5  ;;  %13752 = vmatprep.subr.bf16.mxu0 %v14602_v5  ;;  %v14606_v32 = vld [vmem:[%s16830_s11 + $0x258] sm:$0xff]  }
 0x88f   : > { %v9686_v38 = vsel %vm15826_vm12, %v12787_v58, %v9685_v46  ;;  %v10251_v15 = vrot.slane %v10148_v39, 7  ;;  %v10245_v19 = vrot.slane %v10147_v12, 7  ;;  %9684 = vst [vmem:[#allocation4 + $0x74] sm:$0x1] %v9683_v35  ;;  %13769 = vmatpush3.bf16.msra.mxu1 %v14585_v17  ;;  %v14597_v59 = vld [vmem:[%s16830_s11 + $0x2b0] sm:$0xff]   ;;  %v16434_v56 = vunpack.c.l.b16 %v12847_v40  ;;  %v14600_v21 = vld [vmem:[%s16830_s11 + $0x2e8] sm:$0xff]  }
 0x890   : > { %v10253_v44 = vrot.slane %v10163_v11, 6  ;;  %v10247_v23 = vrot.slane %v10162_v0, 6  ;;  %9687 = vst [vmem:[#allocation4 + $0xb0] sm:$0x1] %v9686_v38  ;;  %v16439_v24 = vunpack.c.l.b16 %v12848_v26  ;;  %13770 = vmatprep.subr.bf16.mxu1 %v14596_v57  ;;  %v14607_v9 = vld [vmem:[%s16830_s11 + $0x218] sm:$0xff]   ;;  %v14610_v10 = vld [vmem:[%s16830_s11 + $0x250] sm:$0xff]  }
 0x891   : > { %v10252_v61 = vsel %vm10183_vm3, %v10251_v15, %v10133_v49  ;;  %v10246_v18 = vsel %vm10183_vm3, %v10245_v19, %v10132_v20  ;;  %v14657_v3 = vld [vmem:[#allocation4 + $0xec] ss:$0 sps:$4 sm:$0x11]   ;;  %13753 = vmatpush3.bf16.msra.mxu0 %v14603_v29  ;;  %v10261_v62 = vrot.slane %v16434_v56, 5  ;;  %v14611_v49 = vld [vmem:[%s16830_s11 + $0x210] sm:$0xff]   ;;  %v14614_v22 = vld [vmem:[%s16830_s11 + $0x248] sm:$0xff]  }
 0x892   : > { %v10254_v47 = vsel %vm10186_vm14, %v10253_v44, %v10252_v61  ;;  %v9697_v14 = vld [vmem:[#allocation4 + $0x30] sm:$0x11]  ;;  %v10248_v60 = vsel %vm10186_vm14, %v10247_v23, %v10246_v18  ;;  %13754 = vmatprep.subr.bf16.mxu0 %v14606_v32  ;;  %v10267_v42 = vrot.slane %v16439_v24, 5  ;;  %v10181_v20 = vunpack.c.l.b16 %v14657_v3  ;;  %v14605_v45 = vld [vmem:[%s16830_s11 + $0x2a0] sm:$0xff]   ;;  %v14608_v11 = vld [vmem:[%s16830_s11 + $0x2d8] sm:$0xff]  }
 0x893   : > { %v9705_v36 = vld [vmem:[#allocation4 + $0x6c] sm:$0x11]  ;;  %v10256_v40 = vsel %vm10189_vm15, %v10255_v48, %v10254_v47  ;;  %v12802_v43 = vcombine.low %v9697_v14, %v9697_v14  ;;  %v12803_v26 = vcombine.high %v9697_v14, %v9697_v14  ;;  %v16454_v55 = vsel %vm10189_vm15, %v10249_v25, %v10248_v60  ;;  %13771 = vmatpush3.bf16.msra.mxu1 %v14597_v59  ;;  %v14609_v29 = vld [vmem:[%s16830_s11 + $0x298] sm:$0xff]   ;;  %v14612_v59 = vld [vmem:[%s16830_s11 + $0x2d0] sm:$0xff]  }
 0x894   : > { %v12817_v50 = vcombine.low %v9705_v36, %v9705_v36  ;;  %v10286_v27 = vpack.c.b16 %v10256_v40, %v10256_v40  ;;  %v9713_v53 = vld [vmem:[#allocation4 + $0xa8] sm:$0x11]  ;;  %v12818_v54 = vcombine.high %v9705_v36, %v9705_v36  ;;  %13772 = vmatprep.subr.bf16.mxu1 %v14600_v21  ;;  %v10273_v38 = vrot.slane %v10181_v20, 5  ;;  %v14615_v15 = vld [vmem:[%s16830_s11 + $0x208] sm:$0xff]   ;;  %v14613_v18 = vld [vmem:[%s16830_s11 + $0x290] sm:$0xff]  }
 0x895   : > { %v14604_v48 = vld [vmem:[%s16830_s11 + $0x2e0] sm:$0xff]   ;;  %v12832_v8 = vcombine.low %v9713_v53, %v9713_v53  ;;  %v12833_v2 = vcombine.high %v9713_v53, %v9713_v53  ;;  %v10134_v41 = vunpack.c.l.b16 %v12802_v43  ;;  %v10135_v6 = vunpack.c.l.b16 %v12803_v26  ;;  %v14654_v63 = vld [vmem:[#allocation4 + $0x38] ss:$0 sps:$4 sm:$0x11]   ;;  %13755 = vmatpush3.bf16.msra.mxu0 %v14607_v9  ;;  %v14622_v47 = vld [vmem:[%s16830_s11 + $0x378] sm:$0xff]  }
 0x896   : > { %11257 = vmatprep.mubr.bf16.mxu1 %v10286_v27  ;;  %v10149_v13 = vunpack.c.l.b16 %v12817_v50  ;;  %v10150_v52 = vunpack.c.l.b16 %v12818_v54  ;;  %v14655_v1 = vld [vmem:[#allocation4 + $0x74] ss:$0 sps:$4 sm:$0x11]   ;;  %13756 = vmatprep.subr.bf16.mxu0 %v14610_v10  ;;  %v10136_v39 = vunpack.c.l.b16 %v14654_v63  ;;  %v14618_v25 = vld [vmem:[%s16830_s11 + $0x240] sm:$0xff]   ;;  %v14623_v14 = vld [vmem:[%s16830_s11 + $0x338] sm:$0xff]   ;;  %v10283_v60 = vpack.c.b16 %v16385_v31, %v16385_v31 }
 0x897   : > { %v10164_v7 = vunpack.c.l.b16 %v12832_v8  ;;  %v10165_v51 = vunpack.c.l.b16 %v12833_v2  ;;  %v14656_v58 = vld [vmem:[#allocation4 + $0xb0] ss:$0 sps:$4 sm:$0x11]   ;;  %13773 = vmatpush3.bf16.msra.mxu1 %v14601_v16  ;;  %v10151_v0 = vunpack.c.l.b16 %v14655_v1  ;;  %v14619_v24 = vld [vmem:[%s16830_s11 + $0x200] sm:$0xff]   ;;  %v14633_v40 = vld [vmem:[%s16830_s11 + $0x370] sm:$0xff]   ;;  %v10285_v54 = vpack.c.b16 %v16454_v55, %v16454_v55 }
 0x898   : > { %v10263_v28 = vrot.slane %v10150_v52, 7  ;;  %v10257_v37 = vrot.slane %v10149_v13, 7  ;;  %13774 = vmatprep.subr.bf16.mxu1 %v14604_v48  ;;  %v10166_v30 = vunpack.c.l.b16 %v14656_v58  ;;  %v14616_v21 = vld [vmem:[%s16830_s11 + $0x2c8] sm:$0xff]   ;;  %v14620_v43 = vld [vmem:[%s16830_s11 + $0x2c0] sm:$0xff]   ;;  %v14634_v50 = vld [vmem:[%s16830_s11 + $0x330] sm:$0xff]  }
 0x899   : > { %v10265_v17 = vrot.slane %v10165_v51, 6  ;;  %v10259_v12 = vrot.slane %v10164_v7, 6  ;;  %v10269_v35 = vrot.slane %v10151_v0, 7  ;;  %13757 = vmatpush3.bf16.msra.mxu0 %v14611_v49  ;;  %v14617_v36 = vld [vmem:[%s16830_s11 + $0x288] sm:$0xff]   ;;  %v14621_v31 = vld [vmem:[%s16830_s11 + $0x280] sm:$0xff]   ;;  %v14632_v9 = vld [vmem:[%s16830_s11 + $0x3b8] sm:$0xff]  }
 0x89a   : > { %v10264_v5 = vsel %vm10183_vm3, %v10263_v28, %v10135_v6  ;;  %v10258_v46 = vsel %vm10183_vm3, %v10257_v37, %v10134_v41  ;;  %v10271_v23 = vrot.slane %v10166_v30, 6  ;;  %13758 = vmatprep.subr.bf16.mxu0 %v14614_v22  ;;  %v14636_v3 = vld [vmem:[%s16830_s11 + $0x368] sm:$0xff]   ;;  %v14639_v53 = vld [vmem:[%s16830_s11 + $0x360] sm:$0xff]   ;;  %v14635_v48 = vld [vmem:[%s16830_s11 + $0x3b0] sm:$0xff]  }
 0x89b   : > { %v10266_v57 = vsel %vm10186_vm14, %v10265_v17, %v10264_v5  ;;  %v10260_v34 = vsel %vm10186_vm14, %v10259_v12, %v10258_v46  ;;  %13775 = vmatpush3.bf16.msra.mxu1 %v14605_v45  ;;  %v10270_v61 = vsel %vm10183_vm3, %v10269_v35, %v10136_v39  ;;  %v14637_v27 = vld [vmem:[%s16830_s11 + $0x328] sm:$0xff]   ;;  %v14640_v16 = vld [vmem:[%s16830_s11 + $0x320] sm:$0xff]   ;;  %v14642_v10 = vld [vmem:[%s16830_s11 + $0x358] sm:$0xff]  }
 0x89c   : > { %v10268_v44 = vsel %vm10189_vm15, %v10267_v42, %v10266_v57  ;;  %v16488_v19 = vsel %vm10189_vm15, %v10261_v62, %v10260_v34  ;;  %13776 = vmatprep.subr.bf16.mxu1 %v14608_v11  ;;  %v10272_v32 = vsel %vm10186_vm14, %v10271_v23, %v10270_v61  ;;  %v14643_v55 = vld [vmem:[%s16830_s11 + $0x318] sm:$0xff]   ;;  %v14638_v8 = vld [vmem:[%s16830_s11 + $0x3a8] sm:$0xff]   ;;  %v14645_v2 = vld [vmem:[%s16830_s11 + $0x350] sm:$0xff]  }
 0x89d   : > { %v16502_v56 = vsel %vm10189_vm15, %v10273_v38, %v10272_v32  ;;  %13759 = vmatpush3.bf16.msra.mxu0 %v14615_v15  ;;  %v10288_v26 = vpack.c.b16 %v10268_v44, %v10268_v44  ;;  %v14646_v42 = vld [vmem:[%s16830_s11 + $0x310] sm:$0xff]   ;;  %v14641_v62 = vld [vmem:[%s16830_s11 + $0x3a0] sm:$0xff]   ;;  %v14648_v41 = vld [vmem:[%s16830_s11 + $0x348] sm:$0xff]   ;;  %v10287_v1 = vpack.c.b16 %v16488_v19, %v16488_v19 }
 0x89e   : > { %13760 = vmatprep.subr.bf16.mxu0 %v14618_v25  ;;  %v14649_v6 = vld [vmem:[%s16830_s11 + $0x308] sm:$0xff]   ;;  %v14644_v13 = vld [vmem:[%s16830_s11 + $0x398] sm:$0xff]   ;;  %v14651_v52 = vld [vmem:[%s16830_s11 + $0x340] sm:$0xff]   ;;  %v10289_v49 = vpack.c.b16 %v16502_v56, %v16502_v56 }
 0x89f   : > { %13777 = vmatpush3.bf16.msra.mxu1 %v14609_v29  ;;  %v14652_v7 = vld [vmem:[%s16830_s11 + $0x300] sm:$0xff]   ;;  %v14647_v51 = vld [vmem:[%s16830_s11 + $0x390] sm:$0xff]   ;;  %v14650_v63 = vld [vmem:[%s16830_s11 + $0x388] sm:$0xff]  }
 0x8a0   : > { %13778 = vmatprep.subr.bf16.mxu1 %v14612_v59  ;;  %v14653_v20 = vld [vmem:[%s16830_s11 + $0x380] sm:$0xff]   ;;  %v14658_v45 = vld [vmem:[%s16832_s13 + $0xb8] sm:$0xff]   ;;  %v14662_v39 = vld [vmem:[%s16832_s13 + $0x70] sm:$0xff]  }
 0x8a1   : > { %13761 = vmatpush3.bf16.msra.mxu0 %v14619_v24  ;;  %v14659_v22 = vld [vmem:[%s16832_s13 + $0x78] sm:$0xff]   ;;  %v14660_v0 = vld [vmem:[%s16832_s13 + $0xb0] sm:$0xff]   ;;  %v14665_v46 = vld [vmem:[%s16832_s13 + $0x68] sm:$0xff]  }
 0x8a2   : > { %13790 = vmatprep.subr.bf16.mxu0 %v14622_v47  ;;  %v14661_v12 = vld [vmem:[%s16832_s13 + $0x38] sm:$0xff]   ;;  %v14664_v5 = vld [vmem:[%s16832_s13 + $0x30] sm:$0xff]   ;;  %v12789_v30 = vld [vmem:[%s16831_s12] ss:$0 sm:$0xff] }
 0x8a3   : > { %13779 = vmatpush3.bf16.msra.mxu1 %v14613_v18  ;;  %v14663_v57 = vld [vmem:[%s16832_s13 + $0xa8] sm:$0xff]   ;;  %v14668_v15 = vld [vmem:[%s16832_s13 + $0x60] sm:$0xff]   ;;  %v14671_v59 = vld [vmem:[%s16832_s13 + $0x58] sm:$0xff]  }
 0x8a4   : > { %13780 = vmatprep.subr.bf16.mxu1 %v14616_v21  ;;  %11218 = vmatmul.mubr.bf16.vlgmr.msra.gmra.mxu0 %v10283_v60  ;;  %v14667_v35 = vld [vmem:[%s16832_s13 + $0x28] sm:$0xff]   ;;  %v14666_v23 = vld [vmem:[%s16832_s13 + $0xa0] sm:$0xff]   ;;  %v14669_v56 = vld [vmem:[%s16832_s13 + $0x98] sm:$0xff]  }
 0x8a5   : > { %13791 = vmatpush3.bf16.msra.mxu0 %v14623_v14  ;;  %11297 = vmatprep.mubr.bf16.mxu0 %v10288_v26  ;;  %v14670_v25 = vld [vmem:[%s16832_s13 + $0x20] sm:$0xff]   ;;  %v14673_v24 = vld [vmem:[%s16832_s13 + $0x18] sm:$0xff]   ;;  %v14674_v18 = vld [vmem:[%s16832_s13 + $0x50] sm:$0xff]  }
 0x8a6   : > { %13792 = vmatprep.subr.bf16.mxu0 %v14633_v40  ;;  %v14672_v47 = vld [vmem:[%s16832_s13 + $0x90] sm:$0xff]   ;;  %v14677_v14 = vld [vmem:[%s16832_s13 + $0x48] sm:$0xff]   ;;  %v14681_v40 = vld [vmem:[%s16832_s13 + $0x40] sm:$0xff]  }
 0x8a7   : > { %13781 = vmatpush3.bf16.msra.mxu1 %v14617_v36  ;;  %v14676_v21 = vld [vmem:[%s16832_s13 + $0x10] sm:$0xff]   ;;  %v14675_v36 = vld [vmem:[%s16832_s13 + $0x88] sm:$0xff]   ;;  %v14682_v26 = vld [vmem:[%s16832_s13] sm:$0xff]  }
 0x8a8   : > { %13782 = vmatprep.subr.bf16.mxu1 %v14620_v43  ;;  %v14679_v60 = vld [vmem:[%s16832_s13 + $0x8] sm:$0xff]   ;;  %v14678_v43 = vld [vmem:[%s16832_s13 + $0x80] sm:$0xff]  }
 0x8a9   : > { %13793 = vmatpush3.bf16.msra.mxu0 %v14634_v50 }
 0x8aa   : > { %13794 = vmatprep.subr.bf16.mxu0 %v14636_v3 }
 0x8ab   : > { %13783 = vmatpush3.bf16.msra.mxu1 %v14621_v31 }
 0x8ac   : > { %13987 = vmatprep.subr.bf16.mxu1 %v14816_v33 }
 0x8ad   : > { %13795 = vmatpush3.bf16.msra.mxu0 %v14637_v27 }
 0x8ae   : > { %11258 = vmatmul.mubr.bf16.vlgmr.msra.gmra.mxu1 %v10285_v54  ;;  %13796 = vmatprep.subr.bf16.mxu0 %v14639_v53 }
 0x8af   : > { %13988 = vmatpush3.bf16.msra.mxu1 %v14632_v9  ;;  %14003 = vmatprep.mubr.msk.bf16.mxu1 %vm14817_vm9, %v14816_v33 }
 0x8b0   : > { %13989 = vmatprep.subr.bf16.mxu1 %v14816_v33 }
 0x8b1   : > { %13797 = vmatpush3.bf16.msra.mxu0 %v14640_v16 }
 0x8b2   : > { %13798 = vmatprep.subr.bf16.mxu0 %v14642_v10 }
 0x8b3   : > { %13990 = vmatpush3.bf16.msra.mxu1 %v14635_v48 }
 0x8b4   : > { %13991 = vmatprep.subr.bf16.mxu1 %v14816_v33 }
 0x8b5   : > { %13799 = vmatpush3.bf16.msra.mxu0 %v14643_v55 }
 0x8b6   : > { %13800 = vmatprep.subr.bf16.mxu0 %v14645_v2 }
 0x8b7   : > { %13992 = vmatpush3.bf16.msra.mxu1 %v14638_v8 }
 0x8b8   : > { %13993 = vmatprep.subr.bf16.mxu1 %v14816_v33 }
 0x8b9   : > { %13801 = vmatpush3.bf16.msra.mxu0 %v14646_v42 }
 0x8ba   : > { %13802 = vmatprep.subr.bf16.mxu0 %v14648_v41 }
 0x8bb   : > { %13994 = vmatpush3.bf16.msra.mxu1 %v14641_v62 }
 0x8bc   : > { %13995 = vmatprep.subr.bf16.mxu1 %v14816_v33 }
 0x8bd   : > { %13803 = vmatpush3.bf16.msra.mxu0 %v14649_v6 }
 0x8be   : > { %13804 = vmatprep.subr.bf16.mxu0 %v14651_v52 }
 0x8bf   : > { %13996 = vmatpush3.bf16.msra.mxu1 %v14644_v13 }
 0x8c0   : > { %13997 = vmatprep.subr.bf16.mxu1 %v14816_v33 }
 0x8c1   : > { %13805 = vmatpush3.bf16.msra.mxu0 %v14652_v7 }
 0x8c2   : > { %13821 = vmatprep.subr.bf16.mxu0 %v14659_v22 }
 0x8c3   : > { %13998 = vmatpush3.bf16.msra.mxu1 %v14647_v51 }
 0x8c4   : > { %13999 = vmatprep.subr.bf16.mxu1 %v14816_v33  ;;  %11298 = vmatmul.mubr.bf16.vlgmr.msra.gmra.mxu0 %v10287_v1 }
 0x8c5   : > { %13822 = vmatpush3.bf16.msra.mxu0 %v14661_v12 }
 0x8c6   : > { %13823 = vmatprep.subr.bf16.mxu0 %v14662_v39 }
 0x8c7   : > { %14000 = vmatpush3.bf16.msra.mxu1 %v14650_v63 }
 0x8c8   : > { %14001 = vmatprep.subr.bf16.mxu1 %v14816_v33 }
 0x8c9   : > { %13824 = vmatpush3.bf16.msra.mxu0 %v14664_v5 }
 0x8ca   : > { %13825 = vmatprep.subr.bf16.mxu0 %v14665_v46 }
 0x8cb   : > { %14002 = vmatpush3.bf16.msra.mxu1 %v14653_v20 }
 0x8cc   : > { %14007 = vmatprep.subr.bf16.mxu1 %v14816_v33 }
 0x8cd   : > { %13826 = vmatpush3.bf16.msra.mxu0 %v14667_v35 }
 0x8ce   : > { %14004 = vmatmul.mubr.bf16.vlgmr.msra.gmra.mxu1 %v10289_v49  ;;  %13827 = vmatprep.subr.bf16.mxu0 %v14668_v15 }
 0x8cf   : > { %14023 = vmatprep.mubr.msk.bf16.mxu1 %vm14817_vm9, %v14816_v33  ;;  %14008 = vmatpush3.bf16.msra.mxu1 %v14658_v45 }
 0x8d0   : > { %14009 = vmatprep.subr.bf16.mxu1 %v14816_v33 }
 0x8d1   : > { %13828 = vmatpush3.bf16.msra.mxu0 %v14670_v25 }
 0x8d2   : > { %13829 = vmatprep.subr.bf16.mxu0 %v14671_v59 }
 0x8d3   : > { %14010 = vmatpush3.bf16.msra.mxu1 %v14660_v0 }
 0x8d4   : > { %14011 = vmatprep.subr.bf16.mxu1 %v14816_v33 }
 0x8d5   : > { %13830 = vmatpush3.bf16.msra.mxu0 %v14673_v24 }
 0x8d6   : > { %13831 = vmatprep.subr.bf16.mxu0 %v14674_v18 }
 0x8d7   : > { %14012 = vmatpush3.bf16.msra.mxu1 %v14663_v57 }
 0x8d8   : > { %14013 = vmatprep.subr.bf16.mxu1 %v14816_v33 }
 0x8d9   : > { %13832 = vmatpush3.bf16.msra.mxu0 %v14676_v21 }
 0x8da   : > { %13833 = vmatprep.subr.bf16.mxu0 %v14677_v14 }
 0x8db   : > { %14014 = vmatpush3.bf16.msra.mxu1 %v14666_v23 }
 0x8dc   : > { %14015 = vmatprep.subr.bf16.mxu1 %v14816_v33 }
 0x8dd   : > { %13834 = vmatpush3.bf16.msra.mxu0 %v14679_v60 }
 0x8de   : > { %13835 = vmatprep.subr.bf16.mxu0 %v14681_v40  ;;  %v14684_v40 = vld [vmem:[%s16834_s15 + $0xb8] sm:$0xff]  }
 0x8df   : > { %14016 = vmatpush3.bf16.msra.mxu1 %v14669_v56 }
 0x8e0   : > { %14017 = vmatprep.subr.bf16.mxu1 %v14816_v33 }
 0x8e1   : > { %13836 = vmatpush3.bf16.msra.mxu0 %v14682_v26  ;;  %v14687_v26 = vld [vmem:[%s16834_s15 + $0x38] sm:$0xff]  }
 0x8e3   : > { %14018 = vmatpush3.bf16.msra.mxu1 %v14672_v47 }
 0x8e4   : > { %14019 = vmatprep.subr.bf16.mxu1 %v14816_v33 }
 0x8e7   : > { %14020 = vmatpush3.bf16.msra.mxu1 %v14675_v36 }
 0x8e8   : > { %14021 = vmatprep.subr.bf16.mxu1 %v14816_v33 }
 0x8eb   : > { %14022 = vmatpush3.bf16.msra.mxu1 %v14678_v43  ;;  %v14685_v43 = vld [vmem:[%s16834_s15 + $0x78] sm:$0xff]  }
 0x8ec   : > { %14027 = vmatprep.subr.bf16.mxu1 %v14816_v33  ;;  %13852 = vmatprep.subr.bf16.mxu0 %v14685_v43 }
 0x923   : > { %v13674_v28 = vpop.f32.mrf.mxu0 }
 0x925   : > { %v13675_v37 = vpop.f32.mrf.mxu0 }
 0x926   : > { %v13676_v58 = vadd.f32 %v13675_v37, %v13674_v28 }
 0x927   : > { %v13677_v17 = vpop.f32.mrf.mxu0 }
 0x928   : > { %v11060_v38 = vadd.f32 %v13676_v58, %v12789_v30 }
 0x929   : > { %v13678_v11 = vpop.f32.mrf.mxu0 }
 0x92d   : > { %v13696_v34 = vpop.f32.mrf.mxu1 }
 0x92f   : > { %v13697_v44 = vpop.f32.mrf.mxu1 }
 0x930   : > { %v13698_v19 = vadd.f32 %v13697_v44, %v13696_v34  ;;  %v11361_v44 = vld [vmem:[#allocation2] sm:$0x7] }
 0x931   : > { %v13699_v29 = vpop.f32.mrf.mxu1 }
 0x932   : > { %v11100_v61 = vadd.f32 %v13698_v19, %v11060_v38 }
 0x933   : > { %v13700_v32 = vpop.f32.mrf.mxu1 }
 0x943   : > { %v13718_v50 = vpop.f32.mrf.mxu0 }
 0x945   : > { %v13719_v31 = vpop.f32.mrf.mxu0 }
 0x946   : > { %v13720_v6 = vadd.f32 %v13719_v31, %v13718_v50  ;;  %v14688_v50 = vld [vmem:[%s16834_s15 + $0x70] sm:$0xff]  }
 0x947   : > { %v13721_v3 = vpop.f32.mrf.mxu0  ;;  %v14686_v31 = vld [vmem:[%s16834_s15 + $0xb0] sm:$0xff]  }
 0x948   : > { %v11140_v13 = vadd.f32 %v13720_v6, %v11100_v61  ;;  %v14690_v3 = vld [vmem:[%s16834_s15 + $0x30] sm:$0xff]   ;;  %v14701_v6 = vld [vmem:[%s16834_s15 + $0x88] sm:$0xff]  }
 0x949   : > { %v13722_v27 = vpop.f32.mrf.mxu0 }
 0x94a   : > { %v14691_v27 = vld [vmem:[%s16834_s15 + $0x68] sm:$0xff]  }
 0x94e   : > { %v13740_v9 = vpop.f32.mrf.mxu1 }
 0x950   : > { %v13741_v53 = vpop.f32.mrf.mxu1 }
 0x951   : > { %v13742_v52 = vadd.f32 %v13741_v53, %v13740_v9  ;;  %v14689_v9 = vld [vmem:[%s16834_s15 + $0xa8] sm:$0xff]  }
 0x952   : > { %v13743_v54 = vpop.f32.mrf.mxu1  ;;  %v14693_v53 = vld [vmem:[%s16834_s15 + $0x28] sm:$0xff]  }
 0x953   : > { %v11180_v51 = vadd.f32 %v13742_v52, %v11140_v13  ;;  %v14694_v54 = vld [vmem:[%s16834_s15 + $0x60] sm:$0xff]   ;;  %v14705_v13 = vld [vmem:[%s16834_s15 + $0x8] sm:$0xff]  }
 0x954   : > { %v13744_v16 = vpop.f32.mrf.mxu1  ;;  %v14707_v52 = vld [vmem:[%s16834_s15 + $0x40] sm:$0xff]  }
 0x955   : > { %v14692_v16 = vld [vmem:[%s16834_s15 + $0xa0] sm:$0xff]  }
 0x964   : > { %v13762_v48 = vpop.f32.mrf.mxu0 }
 0x966   : > { %v13763_v10 = vpop.f32.mrf.mxu0 }
 0x967   : > { %v13764_v7 = vadd.f32 %v13763_v10, %v13762_v48  ;;  %v14696_v48 = vld [vmem:[%s16834_s15 + $0x20] sm:$0xff]   ;;  %v14697_v10 = vld [vmem:[%s16834_s15 + $0x58] sm:$0xff]  }
 0x968   : > { %v13765_v55 = vpop.f32.mrf.mxu0 }
 0x969   : > { %v11220_v63 = vadd.f32 %v13764_v7, %v11180_v51  ;;  %v14695_v55 = vld [vmem:[%s16834_s15 + $0x98] sm:$0xff]   ;;  %v14704_v7 = vld [vmem:[%s16834_s15 + $0x80] sm:$0xff]  }
 0x96a   : > { %v13766_v8 = vpop.f32.mrf.mxu0  ;;  %v14708_v51 = vld [vmem:[%s16834_s15] sm:$0xff]  }
 0x96b   : > { %v14699_v8 = vld [vmem:[%s16834_s15 + $0x18] sm:$0xff]  }
 0x96e   : > { %v13784_v2 = vpop.f32.mrf.mxu1 }
 0x970   : > { %v13785_v42 = vpop.f32.mrf.mxu1 }
 0x971   : > { %v13786_v1 = vadd.f32 %v13785_v42, %v13784_v2  ;;  %v14700_v2 = vld [vmem:[%s16834_s15 + $0x50] sm:$0xff]  }
 0x972   : > { %v13787_v62 = vpop.f32.mrf.mxu1  ;;  %v14698_v42 = vld [vmem:[%s16834_s15 + $0x90] sm:$0xff]  }
 0x973   : > { %v11260_v37 = vadd.f32 %v13786_v1, %v11220_v63  ;;  %v14702_v62 = vld [vmem:[%s16834_s15 + $0x10] sm:$0xff]  }
 0x974   : > { %v13788_v41 = vpop.f32.mrf.mxu1 }
 0x975   : > { %v14703_v41 = vld [vmem:[%s16834_s15 + $0x48] sm:$0xff]  }
 0x984   : > { %v13806_v20 = vpop.f32.mrf.mxu0 }
 0x986   : > { %v13807_v49 = vpop.f32.mrf.mxu0 }
 0x987   : > { %v13808_v28 = vadd.f32 %v13807_v49, %v13806_v20 }
 0x988   : > { %v13809_v58 = vpop.f32.mrf.mxu0 }
 0x989   : > { %v11300_v45 = vadd.f32 %v13808_v28, %v11260_v37  ;;  %v12973_v37 = vld [vmem:[%s16833_s14] ss:$0 sm:$0xff] }
 0x98a   : > { %v13810_v22 = vpop.f32.mrf.mxu0 }
 0x98e   : > { %v11339_v17 = vpop.f32.mrf.mxu1 }
 0x98f   : > { %v11340_v12 = vadd.f32 %v11339_v17, %v11300_v45 }
 0x990   : > { %v14005_v39 = vpop.f32.mrf.mxu1 }
 0x991   : > { %v11345_v0 = vmul.f32 0.2, %v11340_v12 }
 0x992   : > { %v11342_v11 = vpop.f32.mrf.mxu1 }
 0x993   : > { %v11346_v5 = vmax.f32 %v11340_v12, %v11345_v0 }
 0x994   : > { %v14006_v46 = vpop.f32.mrf.mxu1 }
 0x995   : > { %v13064_v30 = vpack.c.bf16 %v11346_v5, %v11346_v5 }
 0x997   : > { %v11352_v57 = vshrl.u32 %v13064_v30, 16  ;;  %v11355_v35 = vshll.u32 %v13064_v30, 16 }
 0x999   : > { %v11354_v34 = vrot.slane %v11352_v57, 7 }
 0x99b   : > { %v11357_v15 = vor.u32 %v11355_v35, %v11354_v34 }
 0x99d   : > { %v11362_v19 = vsel %vm16699_vm2, %v11357_v15, %v11361_v44 }
 0x99e   : > { %11363 = vst [vmem:[#allocation2] sm:$0x7] %v11362_v19 }
 0x9a5   : > { %v11364_v29 = vld [vmem:[#allocation2] sm:$0x1]  ;;  %v11370_v25 = vld [vmem:[#allocation2] sm:$0x4] }
 0x9a6   : > { %v11365_v61 = vsel %vm15826_vm12, 0, %v11364_v29  ;;  %v11371_v59 = vsel %vm16706_vm5, 0, %v11370_v25  ;;  %v14680_v32 = vld [vmem:[#allocation2] ss:$0 sps:$4 sm:$0x66]  }
 0x9a7   : > { %11366 = vst [vmem:[#allocation2] sm:$0x1] %v11365_v61  ;;  %11372 = vst [vmem:[#allocation2] sm:$0x4] %v11371_v59  ;;  %v11390_v24 = vrot.slane %v14680_v32, 1 }
 0x9a9   : > { %14024 = vmatmul.mubr.bf16.vlgmr.msra.gmra.mxu1 %v11390_v24 }
 0x9aa   : > { %14043 = vmatprep.mubr.msk.bf16.mxu1 %vm14817_vm9, %v14816_v33  ;;  %14028 = vmatpush3.bf16.msra.mxu1 %v14684_v40 }
 0x9ab   : > { %14029 = vmatprep.subr.bf16.mxu1 %v14816_v33 }
 0x9ae   : > { %v16714_v56 = vld [vmem:[#allocation2] sm:$0x7]  ;;  %14030 = vmatpush3.bf16.msra.mxu1 %v14686_v31 }
 0x9af   : > { %v12971_v18 = vcombine.low %v16714_v56, %v16714_v56  ;;  %v11373_v60 = vld [vmem:[#allocation2] sm:$0x3]  ;;  %14031 = vmatprep.subr.bf16.mxu1 %v14816_v33 }
 0x9b1   : > { %v11382_v47 = vshll.u32 %v12971_v18, 16  ;;  %v11380_v21 = vshrl.u32 %v12971_v18, 16 }
 0x9b2   : > { %14032 = vmatpush3.bf16.msra.mxu1 %v14689_v9 }
 0x9b3   : > { %v11384_v14 = vrot.slane %v11382_v47, 1  ;;  %14033 = vmatprep.subr.bf16.mxu1 %v14816_v33 }
 0x9b5   : > { %v11385_v36 = vor.u32 %v11384_v14, %v11380_v21  ;;  %v13001_v14 = vld [vmem:[%s16835_s16] ss:$0 sm:$0xff] }
 0x9b6   : > { %14034 = vmatpush3.bf16.msra.mxu1 %v14692_v16 }
 0x9b7   : > { %11623 = vmatprep.mubr.bf16.mxu0 %v11385_v36  ;;  %14035 = vmatprep.subr.bf16.mxu1 %v14816_v33 }
 0x9b8   : > { %11624 = vmatmul.mubr.bf16.vlgmr.msra.gmra.mxu0 %v11373_v60 }
 0x9b9   : > { %13853 = vmatpush3.bf16.msra.mxu0 %v14687_v26 }
 0x9ba   : > { %13854 = vmatprep.subr.bf16.mxu0 %v14688_v50  ;;  %14036 = vmatpush3.bf16.msra.mxu1 %v14695_v55 }
 0x9bb   : > { %14037 = vmatprep.subr.bf16.mxu1 %v14816_v33 }
 0x9bd   : > { %13855 = vmatpush3.bf16.msra.mxu0 %v14690_v3 }
 0x9be   : > { %13856 = vmatprep.subr.bf16.mxu0 %v14691_v27  ;;  %14038 = vmatpush3.bf16.msra.mxu1 %v14698_v42 }
 0x9bf   : > { %14039 = vmatprep.subr.bf16.mxu1 %v14816_v33 }
 0x9c1   : > { %13857 = vmatpush3.bf16.msra.mxu0 %v14693_v53 }
 0x9c2   : > { %13858 = vmatprep.subr.bf16.mxu0 %v14694_v54  ;;  %14040 = vmatpush3.bf16.msra.mxu1 %v14701_v6 }
 0x9c3   : > { %14041 = vmatprep.subr.bf16.mxu1 %v14816_v33 }
 0x9c5   : > { %13859 = vmatpush3.bf16.msra.mxu0 %v14696_v48 }
 0x9c6   : > { %13860 = vmatprep.subr.bf16.mxu0 %v14697_v10  ;;  %14042 = vmatpush3.bf16.msra.mxu1 %v14704_v7 }
 0x9c9   : > { %13861 = vmatpush3.bf16.msra.mxu0 %v14699_v8 }
 0x9ca   : > { %13862 = vmatprep.subr.bf16.mxu0 %v14700_v2 }
 0x9cd   : > { %13863 = vmatpush3.bf16.msra.mxu0 %v14702_v62 }
 0x9ce   : > { %13864 = vmatprep.subr.bf16.mxu0 %v14703_v41 }
 0x9d1   : > { %13865 = vmatpush3.bf16.msra.mxu0 %v14705_v13 }
 0x9d2   : > { %13866 = vmatprep.subr.bf16.mxu0 %v14707_v52 }
 0x9d5   : > { %13867 = vmatpush3.bf16.msra.mxu0 %v14708_v51 }
 0xa69   : > { %v11665_v63 = vpop.f32.mrf.mxu1 }
 0xa6b   : > { %v14025_v1 = vpop.f32.mrf.mxu1 }
 0xa6d   : > { %v11668_v20 = vpop.f32.mrf.mxu1 }
 0xa6f   : > { %v14026_v49 = vpop.f32.mrf.mxu1 }
 0xa78   : > { %v13837_v28 = vpop.f32.mrf.mxu0 }
 0xa7a   : > { %v13838_v58 = vpop.f32.mrf.mxu0 }
 0xa7b   : > { %v13839_v45 = vadd.f32 %v13838_v58, %v13837_v28 }
 0xa7c   : > { %v13840_v33 = vpop.f32.mrf.mxu0 }
 0xa7d   : > { %v11626_v22 = vadd.f32 %v13839_v45, %v12973_v37 }
 0xa7e   : > { %v13841_v17 = vpop.f32.mrf.mxu0 }
 0xa7f   : > { %v11666_v12 = vadd.f32 %v11665_v63, %v11626_v22 }
 0xa81   : > { %v11671_v39 = vmul.f32 0.2, %v11666_v12 }
 0xa83   : > { %v11672_v0 = vmax.f32 %v11666_v12, %v11671_v39 }
 0xa85   : > { %v13065_v11 = vpack.c.bf16 %v11672_v0, %v11672_v0 }
 0xa87   : > { %v11678_v5 = vshrl.u32 %v13065_v11, 16  ;;  %v11681_v30 = vshll.u32 %v13065_v11, 16 }
 0xa89   : > { %v11680_v46 = vrot.slane %v11678_v5, 7 }
 0xa8b   : > { %v11683_v57 = vor.u32 %v11681_v30, %v11680_v46 }
 0xa8d   : > { %v11685_v34 = vsel %vm16699_vm2, %v11683_v57, %v16714_v56 }
 0xa8e   : > { %11686 = vst [vmem:[#allocation2] sm:$0x7] %v11685_v34 }
 0xa95   : > { %v11690_v35 = vld [vmem:[#allocation2] sm:$0x4]  ;;  %v11687_v15 = vld [vmem:[#allocation2] sm:$0x1] }
 0xa96   : > { %v11691_v44 = vsel %vm16706_vm5, 0, %v11690_v35  ;;  %v11688_v19 = vsel %vm15826_vm12, 0, %v11687_v15  ;;  %v14706_v29 = vld [vmem:[#allocation2] ss:$0 sps:$4 sm:$0x66]  }
 0xa97   : > { %11692 = vst [vmem:[#allocation2] sm:$0x4] %v11691_v44  ;;  %11689 = vst [vmem:[#allocation2] sm:$0x1] %v11688_v19  ;;  %v11710_v61 = vrot.slane %v14706_v29, 1 }
 0xa99   : > { %14044 = vmatmul.mubr.bf16.vlgmr.msra.gmra.mxu1 %v11710_v61 }
 0xa9e   : > { %v14709_v25 = vld [vmem:[#allocation2] ss:$0 sps:$4 sm:$0x77]  }
 0xa9f   : > { %v11702_v59 = vshll.u32 %v14709_v25, 16  ;;  %v11700_v32 = vshrl.u32 %v14709_v25, 16  ;;  %v11693_v56 = vld [vmem:[#allocation2] sm:$0x3] }
 0xaa1   : > { %v11704_v24 = vrot.slane %v11702_v59, 1 }
 0xaa3   : > { %v11705_v38 = vor.u32 %v11704_v24, %v11700_v32 }
 0xaa5   : > { %11943 = vmatprep.mubr.bf16.mxu0 %v11705_v38 }
 0xaa6   : > { %11944 = vmatmul.mubr.bf16.vlgmr.msra.gmra.mxu0 %v11693_v56 }
 0xb59   : > { %v11985_v18 = vpop.f32.mrf.mxu1 }
 0xb5b   : > { %v14045_v47 = vpop.f32.mrf.mxu1 }
 0xb5d   : > { %v11988_v23 = vpop.f32.mrf.mxu1 }
 0xb5f   : > { %v14046_v4 = vpop.f32.mrf.mxu1 }
 0xb66   : > { %v13868_v21 = vpop.f32.mrf.mxu0 }
 0xb68   : > { %v13869_v36 = vpop.f32.mrf.mxu0 }
 0xb69   : > { %v13870_v60 = vadd.f32 %v13869_v36, %v13868_v21 }
 0xb6a   : > { %v13871_v40 = vpop.f32.mrf.mxu0 }
 0xb6b   : > { %v11946_v43 = vadd.f32 %v13870_v60, %v13001_v14 }
 0xb6c   : > { %v13872_v26 = vpop.f32.mrf.mxu0 }
 0xb6d   : > { %v11986_v50 = vadd.f32 %v11985_v18, %v11946_v43 }
 0xb6f   : > { %v13026_v31 = vmul.f32 -1.442695, %v11986_v50 }
 0xb71   : > { %14710 = vpow2.f32 %v13026_v31 }
 0xb7e   : > { %v14711_v3 = vpop.eup %14710 }
 0xb7f   : > { %v11994_v27 = vadd.f32 1.0, %v14711_v3 }
 0xb81   : > { %14712 = vrcp.f32 %v11994_v27 }
 0xb8e   : > { %v14713_v9 = vpop.eup %14712 }
 0xb8f   : > { %11997 = vst [vmem:[%s590_s26] sm:$0x3] %v14713_v9   ;;  %13028 = vst [vmem:[%s590_s26] sm:$0xc] %v14713_v9  }
 0xb90 PF: > { %s29_s24 = sadd.s32 1, %s14806_s24  }
 0xb91   : > { %p26_p2 = scmp.ge.s32.totalorder %s29_s24, 4  }
 0xb93   :  { %28 = sbr.rel (!%p26_p2) target bundleno = 5 (0x5), region = 139 }
 0xb98   :  { %12023 = vsyncpa [#allocation6], 1 }
 0xb99   :  { %12025 = vsyncpa [#allocation6 + $0x1], 1 }
 0xb9a   :  { %12026 = vsyncpa [#allocation8], 1 }

</bundles_post_ra>
